<compile_context>
chip_gen: v7x
topology: tpu7x:2x2x1
jax: 0.10.0
libtpu: 0.0.40
codegen_flags: <defaults>
</compile_context>

<pallas_src>
import numpy as np

import jax
import jax.numpy as jnp
from jax import lax
from jax.experimental import pallas as pl
from jax.experimental.pallas import tpu as pltpu


# --------------------------------------------------------------------------
# Model / layout constants
# --------------------------------------------------------------------------

CLASSES = 2
BASE_C = 8                      # per-branch base channel width
H = W = 16
H2 = W2 = 8
M = H * W                       # 256 dense pixels per image

HP1, WP1 = H + 2, W + 2         # 18 x 18 padded level-1 image
HP2, WP2 = H2 + 2, W2 + 2       # 10 x 10 padded level-2 image
SEG1 = 384                      # per-image padded segment, level 1 (>= 324)
SEG2 = 128                      # per-image padded segment, level 2 (>= 100)

B_FOLD = 2                      # images folded onto the lane axis per step
N1 = B_FOLD * SEG1              # 768 lanes, level-1 activations
N2 = B_FOLD * SEG2              # 256 lanes, level-2 activations
ND = B_FOLD * M                 # 512 lanes, dense output

PADG = 128                      # aligned left margin of the im2col scratch
COLW = PADG + N1 + PADG         # 1024-lane im2col scratch width
CIN_MAX = 6 * BASE_C            # 48 merged decoder input channels
ROWS_COL = 9 * CIN_MAX          # 432 im2col rows (tap-major)

ROWS_W = 136                    # weight/bias slab rows (130 used, padded)
KMAX = 512                      # weight slab lane width (max K = 432)

# conv name -> (row offset in the weight/bias slabs, Cout, Cin, K)
W_LAYOUT = {
    "c1":   (0,   16, 8,  72),    # enc-1 conv a (input channel padded 1 -> 8)
    "c2":   (16,  16, 16, 144),   # enc-1 conv b
    "c3":   (32,  32, 16, 144),   # enc-2 conv a
    "c4":   (64,  32, 32, 288),   # enc-2 conv b
    "c5":   (96,  16, 48, 432),   # dec conv a (input = [up(32) | skip(16)])
    "c6":   (112, 16, 16, 144),   # dec conv b
    "head": (128, 2,  16, 16),    # fused per-branch 1x1 heads + final 1x1
}


# --------------------------------------------------------------------------
# The fused kernel: whole DoubleUNet forward for B_FOLD images per grid step
# --------------------------------------------------------------------------

def _double_unet_kernel(x_ref, w_ref, b_ref, m1_ref, m2_ref,
                        sel_ref, rep_ref, cmp_ref, o_ref, col_ref):
    """Channels on sublanes; B_FOLD padded image segments on lanes."""

    # Zero the three narrow lane strips of the im2col scratch that can be read
    # by a tap window before any store of this step has covered them (left of
    # the read window and right of the level-2 / level-1 / pool windows).  All
    # other read lanes are rewritten every step, so stale VMEM (incl. NaNs)
    # can never leak into the valid outputs.
    for lo in (PADG - 32, PADG + N2 - 32, PADG + N1 - 32):
        col_ref[0:ROWS_COL, lo:lo + 64] = jnp.zeros((ROWS_COL, 64),
                                                    jnp.bfloat16)

    mask1 = m1_ref[...]                    # (1, N1) f32 0/1 valid-lane mask
    mask2 = m2_ref[...]                    # (1, N2)

    def conv3x3(parts, name, wp, n, mask):
        """Fused-K im2col conv: store the bf16 input 9 times at 9 static lane
        offsets (tap-major row blocks implement channel concat for free), one
        (Cout, 9*Cin) x (9*Cin, n) bf16 matmul, f32 bias + ReLU + valid-mask
        epilogue, bf16 result."""
        r0, co, ci, k = W_LAYOUT[name]
        cin = sum(p.shape[0] for p in parts)
        assert cin == ci and k == 9 * ci
        for t in range(9):
            d = (t // 3 - 1) * wp + (t % 3 - 1)      # tap shift in lanes
            rr = t * cin
            for p in parts:
                cc = p.shape[0]
                col_ref[rr:rr + cc, PADG - d:PADG - d + n] = p
                rr += cc
        acc = jnp.dot(w_ref[r0:r0 + co, 0:k],
                      col_ref[0:9 * cin, PADG:PADG + n],
                      preferred_element_type=jnp.float32)
        acc = jnp.maximum(acc + b_ref[r0:r0 + co, 0:1], 0.0) * mask
        return acc.astype(jnp.bfloat16)

    x = x_ref[0]                                     # (8, N1) bf16, padded

    # Encoder level 1 (16x16).
    e1 = conv3x3([x], "c1", WP1, N1, mask1)          # (16, N1)
    e1 = conv3x3([e1], "c2", WP1, N1, mask1)         # (16, N1)

    # 2x2 / stride-2 max pool: stage e1 once, take the 3 shifted window taps
    # (offsets +1, +WP1, +WP1+1 never leave an image's own padded segment for
    # valid anchors), VPU max, then a constant 0/1 down-select matmul maps the
    # even anchors into the level-2 padded layout.
    col_ref[0:16, PADG:PADG + N1] = e1
    win = e1
    for k_off in (1, WP1, WP1 + 1):
        win = jnp.maximum(win, col_ref[0:16, PADG + k_off:PADG + k_off + N1])
    q1 = jnp.dot(win, sel_ref[...],
                 preferred_element_type=jnp.float32).astype(jnp.bfloat16)

    # Encoder level 2 (8x8).
    e2 = conv3x3([q1], "c3", WP2, N2, mask2)         # (32, N2)
    e2 = conv3x3([e2], "c4", WP2, N2, mask2)         # (32, N2)

    # Nearest-neighbour 2x upsample via constant 0/1 replication matmul.
    u1 = jnp.dot(e2, rep_ref[...],
                 preferred_element_type=jnp.float32).astype(jnp.bfloat16)

    # Decoder: skip-concat happens for free via adjacent im2col row blocks.
    d1 = conv3x3([u1, e1], "c5", WP1, N1, mask1)     # (16, N1)
    d1 = conv3x3([d1], "c6", WP1, N1, mask1)         # (16, N1)

    # Fused heads: cat(head_a(d1_a), head_b(d1_b)) followed by the final 1x1
    # conv, pre-composed into one (classes, 16) matmul.
    r0, co, _, k = W_LAYOUT["head"]
    out = jnp.dot(w_ref[r0:r0 + co, 0:k], d1,
                  preferred_element_type=jnp.float32) + b_ref[r0:r0 + co, 0:1]

    # Compact the padded layout to the dense (classes, B*H*W) output block
    # with a constant 0/1 selection matmul (lane-dense 512-wide store).
    o_ref[0] = jnp.dot(out.astype(jnp.bfloat16), cmp_ref[...],
                       preferred_element_type=jnp.float32)


# --------------------------------------------------------------------------
# Host-side constants: masks, pool/upsample/compaction 0/1 matrices
# --------------------------------------------------------------------------

def _layout_constants():
    def p1(y, x):
        return (y + 1) * WP1 + (x + 1)

    def p2(y, x):
        return (y + 1) * WP2 + (x + 1)

    mask1 = np.zeros((1, N1), np.float32)
    mask2 = np.zeros((1, N2), np.float32)
    sel = np.zeros((N1, N2), np.float32)      # pool anchor down-select
    rep = np.zeros((N2, N1), np.float32)      # nearest-2x replication
    cmp_mat = np.zeros((N1, ND), np.float32)  # padded -> dense compaction
    for b in range(B_FOLD):
        o1, o2, od = b * SEG1, b * SEG2, b * M
        for y in range(H):
            for x in range(W):
                mask1[0, o1 + p1(y, x)] = 1.0
                rep[o2 + p2(y // 2, x // 2), o1 + p1(y, x)] = 1.0
                cmp_mat[o1 + p1(y, x), od + y * W + x] = 1.0
        for y in range(H2):
            for x in range(W2):
                mask2[0, o2 + p2(y, x)] = 1.0
                sel[o1 + p1(2 * y, 2 * x), o2 + p2(y, x)] = 1.0
    return (jnp.asarray(mask1), jnp.asarray(mask2),
            jnp.asarray(sel, jnp.bfloat16), jnp.asarray(rep, jnp.bfloat16),
            jnp.asarray(cmp_mat, jnp.bfloat16))


# --------------------------------------------------------------------------
# Parameters (canonical per-branch layout) + merged slab packing
# --------------------------------------------------------------------------

def _conv_init(key, kh, kw, cin, cout):
    wkey, _ = jax.random.split(key)
    fan_in = kh * kw * cin
    w = jax.random.normal(wkey, (kh, kw, cin, cout), jnp.float32) * jnp.sqrt(
        2.0 / fan_in)
    b = jnp.zeros((cout,), jnp.float32)
    return w, b


def make_branch_params(key, in_ch=1, base_c=BASE_C, classes=CLASSES):
    keys = jax.random.split(key, 7)
    c, c2 = base_c, 2 * base_c
    return {
        "e1a": _conv_init(keys[0], 3, 3, in_ch, c),
        "e1b": _conv_init(keys[1], 3, 3, c, c),
        "e2a": _conv_init(keys[2], 3, 3, c, c2),
        "e2b": _conv_init(keys[3], 3, 3, c2, c2),
        "d1a": _conv_init(keys[4], 3, 3, c2 + c, c),
        "d1b": _conv_init(keys[5], 3, 3, c, c),
        "head": _conv_init(keys[6], 1, 1, c, classes),
    }


def make_params(key):
    k1, k2, k3 = jax.random.split(key, 3)
    return {
        "unet_plus": make_branch_params(k1),
        "unet": make_branch_params(k2),
        "final": _conv_init(k3, 1, 1, 2 * CLASSES, CLASSES),
    }


def _tapsT(w):
    """(3, 3, Cin, Cout) HWIO -> (9, Cout, Cin)."""
    kh, kw, ci, co = w.shape
    return jnp.transpose(w.reshape(kh * kw, ci, co), (0, 2, 1))


def _flat_k(w9):
    """(9, Cout, Cin) -> (Cout, 9*Cin) with K ordered tap-major, matching the
    im2col row layout row = tap * Cin + channel."""
    t, co, ci = w9.shape
    return jnp.transpose(w9, (1, 0, 2)).reshape(co, t * ci)


def _merge_diag(wa, wb):
    ta, tb = _tapsT(wa), _tapsT(wb)
    _, co, ci = ta.shape
    m = jnp.zeros((9, 2 * co, 2 * ci), jnp.float32)
    m = m.at[:, 0:co, 0:ci].set(ta)
    m = m.at[:, co:2 * co, ci:2 * ci].set(tb)
    return m


def _pack_params(params):
    """Merge the two branches block-diagonally, repack every conv to a
    (Cout, 9*Cin) fused-K matrix, fold the two 1x1 heads + final 1x1 conv into
    one (classes, 16) matmul, and pack everything into one bf16 weight slab
    and one f32 bias slab."""
    pa, pb = params["unet_plus"], params["unet"]
    c, c2 = BASE_C, 2 * BASE_C
    f32 = jnp.float32

    def bias(ba, bb):
        return jnp.concatenate([ba, bb])

    # First conv: both branches read the same single input channel; input is
    # padded to 8 channels (zeros) so the im2col K rows stay sublane friendly.
    ta, tb = _tapsT(pa["e1a"][0]), _tapsT(pb["e1a"][0])      # (9, 8, 1)
    m1 = jnp.zeros((9, 2 * c, 8), f32)
    m1 = m1.at[:, 0:c, 0:1].set(ta)
    m1 = m1.at[:, c:2 * c, 0:1].set(tb)

    m2 = _merge_diag(pa["e1b"][0], pb["e1b"][0])
    m3 = _merge_diag(pa["e2a"][0], pb["e2a"][0])
    m4 = _merge_diag(pa["e2b"][0], pb["e2b"][0])

    # Decoder conv a: per-branch input = [up (c2) | skip (c)]; merged im2col
    # channel order is [up_a | up_b | skip_a | skip_b].
    ta, tb = _tapsT(pa["d1a"][0]), _tapsT(pb["d1a"][0])      # (9, c, c2 + c)
    m5 = jnp.zeros((9, 2 * c, 2 * c2 + 2 * c), f32)
    m5 = m5.at[:, 0:c, 0:c2].set(ta[:, :, 0:c2])
    m5 = m5.at[:, 0:c, 2 * c2:2 * c2 + c].set(ta[:, :, c2:c2 + c])
    m5 = m5.at[:, c:2 * c, c2:2 * c2].set(tb[:, :, 0:c2])
    m5 = m5.at[:, c:2 * c, 2 * c2 + c:2 * c2 + 2 * c].set(tb[:, :, c2:c2 + c])

    m6 = _merge_diag(pa["d1b"][0], pb["d1b"][0])

    # Per-branch 1x1 heads (c -> classes) merged block-diagonally, folded into
    # the final 1x1 conv (2*classes -> classes): both are linear.
    wh = jnp.zeros((2 * CLASSES, 2 * c), f32)
    wh = wh.at[0:CLASSES, 0:c].set(pa["head"][0].reshape(c, CLASSES).T)
    wh = wh.at[CLASSES:2 * CLASSES, c:2 * c].set(
        pb["head"][0].reshape(c, CLASSES).T)
    bh = jnp.concatenate([pa["head"][1], pb["head"][1]])
    wf = params["final"][0].reshape(2 * CLASSES, CLASSES).T
    bf_ = params["final"][1]
    wc = wf @ wh                                   # (classes, 16)
    bc = wf @ bh + bf_                             # (classes,)

    entries = [
        ("c1", _flat_k(m1), bias(pa["e1a"][1], pb["e1a"][1])),
        ("c2", _flat_k(m2), bias(pa["e1b"][1], pb["e1b"][1])),
        ("c3", _flat_k(m3), bias(pa["e2a"][1], pb["e2a"][1])),
        ("c4", _flat_k(m4), bias(pa["e2b"][1], pb["e2b"][1])),
        ("c5", _flat_k(m5), bias(pa["d1a"][1], pb["d1a"][1])),
        ("c6", _flat_k(m6), bias(pa["d1b"][1], pb["d1b"][1])),
        ("head", wc, bc),
    ]
    w_slab = jnp.zeros((ROWS_W, KMAX), f32)
    b_slab = jnp.zeros((ROWS_W, 1), f32)
    for name, wmat, bvec in entries:
        r0, co, _, k = W_LAYOUT[name]
        assert wmat.shape == (co, k), (name, wmat.shape)
        w_slab = w_slab.at[r0:r0 + co, 0:k].set(wmat)
        b_slab = b_slab.at[r0:r0 + co, 0].set(bvec)
    return w_slab.astype(jnp.bfloat16), b_slab


# --------------------------------------------------------------------------
# Public forward (NCHW in / NCHW out, matching the PyTorch module)
# --------------------------------------------------------------------------

def double_unet_forward(x_nchw, params):
    """Matches DoubleUNet.forward: final_conv(cat(unet_plus(x), unet(x)))."""
    n, cin, h, w = x_nchw.shape
    assert (cin, h, w) == (1, H, W), (cin, h, w)

    steps = -(-n // B_FOLD)
    n_pad = steps * B_FOLD
    if n_pad != n:
        x_nchw = jnp.pad(x_nchw, ((0, n_pad - n), (0, 0), (0, 0), (0, 0)))

    # NCHW -> per-image (H+2)x(W+2) zero-padded flat layout (SEG1 lanes per
    # image), channels padded 1 -> 8, B_FOLD images folded onto lanes.
    xp = jnp.pad(x_nchw, ((0, 0), (0, 0), (1, 1), (1, 1)))     # (n,1,18,18)
    xp = xp.reshape(n_pad, 1, HP1 * WP1)
    xp = jnp.pad(xp, ((0, 0), (0, 7), (0, SEG1 - HP1 * WP1)))  # (n,8,SEG1)
    xp = xp.reshape(steps, B_FOLD, 8, SEG1).transpose(0, 2, 1, 3)
    xp = xp.reshape(steps, 8, N1).astype(jnp.bfloat16)

    w_slab, b_slab = _pack_params(params)
    mask1, mask2, sel, rep, cmp_mat = _layout_constants()
    consts = [w_slab, b_slab, mask1, mask2, sel, rep, cmp_mat]

    in_specs = [pl.BlockSpec((1, 8, N1), lambda i: (i, 0, 0))]
    for arr in consts:
        zeros = (0,) * arr.ndim
        in_specs.append(pl.BlockSpec(arr.shape, lambda i, _z=zeros: _z))

    out = pl.pallas_call(
        _double_unet_kernel,
        out_shape=jax.ShapeDtypeStruct((steps, CLASSES, ND), jnp.float32),
        grid_spec=pltpu.PrefetchScalarGridSpec(
            num_scalar_prefetch=0,
            grid=(steps,),                      # B_FOLD images per grid step
            in_specs=in_specs,
            out_specs=pl.BlockSpec((1, CLASSES, ND), lambda i: (i, 0, 0)),
            scratch_shapes=[pltpu.VMEM((ROWS_COL, COLW), jnp.bfloat16)],
        ),
        compiler_params=pltpu.CompilerParams(
            dimension_semantics=("parallel",)),
    )(xp, *consts)

    # (steps, classes, B*M) -> NCHW (n, classes, 16, 16): layout plumbing only.
    out = out.reshape(steps, CLASSES, B_FOLD, M).transpose(0, 2, 1, 3)
    out = out.reshape(n_pad, CLASSES, H, W)
    return out[:n]


# --------------------------------------------------------------------------
# Pure-JAX reference (mirrors the original per-branch module semantics)
# --------------------------------------------------------------------------

def _ref_conv(x, w, b, relu):
    n, h, ww, cin = x.shape
    kh, _, _, cout = w.shape
    if kh == 1:
        out = jnp.dot(x.reshape(-1, cin), w.reshape(cin, cout),
                      precision=lax.Precision.HIGHEST) + b
    else:
        xp = jnp.pad(x, ((0, 0), (1, 1), (1, 1), (0, 0)))
        cols = jnp.stack([xp[:, dy:dy + h, dx:dx + ww, :]
                          for dy in range(3) for dx in range(3)], axis=3)
        out = jnp.dot(cols.reshape(-1, 9 * cin), w.reshape(9 * cin, cout),
                      precision=lax.Precision.HIGHEST) + b
    out = out.reshape(n, h, ww, cout)
    return jnp.maximum(out, 0.0) if relu else out


def _ref_branch(x, p):
    e1 = _ref_conv(x, *p["e1a"], relu=True)
    e1 = _ref_conv(e1, *p["e1b"], relu=True)
    n_, hh, www, cc = e1.shape
    q1 = jnp.max(e1.reshape(n_, hh // 2, 2, www // 2, 2, cc), axis=(2, 4))
    e2 = _ref_conv(q1, *p["e2a"], relu=True)
    e2 = _ref_conv(e2, *p["e2b"], relu=True)
    u1 = jnp.repeat(jnp.repeat(e2, 2, axis=1), 2, axis=2)
    d1 = jnp.concatenate([u1, e1], axis=-1)
    d1 = _ref_conv(d1, *p["d1a"], relu=True)
    d1 = _ref_conv(d1, *p["d1b"], relu=True)
    return _ref_conv(d1, *p["head"], relu=False)


def _reference_forward(x_nchw, params):
    x = jnp.transpose(x_nchw, (0, 2, 3, 1))
    out1 = _ref_branch(x, params["unet_plus"])
    out2 = _ref_branch(x, params["unet"])
    cat = jnp.concatenate([out1, out2], axis=-1)
    out = _ref_conv(cat, *params["final"], relu=False)
    return jnp.transpose(out, (0, 3, 1, 2))


# --------------------------------------------------------------------------
# Main
# --------------------------------------------------------------------------

if __name__ == "__main__":
    key = jax.random.PRNGKey(0)
    k_x, k_p = jax.random.split(key)

    # PyTorch module has in_channels=1: x is NCHW (batch=2, C=1, H=W=16).
    x = jax.random.normal(k_x, (2, 1, H, W), jnp.float32)
    params = make_params(k_p)

    fwd = jax.jit(double_unet_forward)
    out = fwd(x, params)
    jax.block_until_ready(out)

    assert out.shape == (2, CLASSES, H, W), out.shape
    assert out.dtype == jnp.float32

    # Sanity check against a pure-JAX f32 reference (tolerance sized for the
    # intentional bf16 matmul operands inside the kernel).
    ref = jax.jit(_reference_forward)(x, params)
    err = float(jnp.max(jnp.abs(out - ref)))
    assert err < 0.25, f"kernel/reference mismatch: max abs err = {err}"

    print("KERNEL_OK")
</pallas_src>

<mosaic_0001>
module attributes {stable_mosaic.version = 11 : i64} {
  func.func @_double_unet_kernel(%arg0: i32, %arg1: memref<1x8x768xbf16, #tpu.memory_space<vmem>>, %arg2: memref<136x512xbf16, #tpu.memory_space<vmem>>, %arg3: memref<136x1xf32, #tpu.memory_space<vmem>>, %arg4: memref<1x768xf32, #tpu.memory_space<vmem>>, %arg5: memref<1x256xf32, #tpu.memory_space<vmem>>, %arg6: memref<768x256xbf16, #tpu.memory_space<vmem>>, %arg7: memref<256x768xbf16, #tpu.memory_space<vmem>>, %arg8: memref<768x512xbf16, #tpu.memory_space<vmem>>, %arg9: memref<1x2x512xf32, #tpu.memory_space<vmem>>, %arg10: memref<432x1024xbf16, #tpu.memory_space<vmem>>) attributes {dimension_semantics = [#tpu.dimension_semantics<parallel>], iteration_bounds = array<i64: 1>, scalar_prefetch = 0 : i64, scratch_operands = 1 : i64, tpu.core_type = #tpu.core_type<tc>, window_params = [{transform_indices = @transform_0, window_bounds = array<i64: 1, 8, 768>}, {pipeline_mode = #tpu.pipeline_mode<synchronous>, transform_indices = @transform_1, window_bounds = array<i64: 136, 512>}, {pipeline_mode = #tpu.pipeline_mode<synchronous>, transform_indices = @transform_2, window_bounds = array<i64: 136, 1>}, {pipeline_mode = #tpu.pipeline_mode<synchronous>, transform_indices = @transform_3, window_bounds = array<i64: 1, 768>}, {pipeline_mode = #tpu.pipeline_mode<synchronous>, transform_indices = @transform_4, window_bounds = array<i64: 1, 256>}, {pipeline_mode = #tpu.pipeline_mode<synchronous>, transform_indices = @transform_5, window_bounds = array<i64: 768, 256>}, {pipeline_mode = #tpu.pipeline_mode<synchronous>, transform_indices = @transform_6, window_bounds = array<i64: 256, 768>}, {pipeline_mode = #tpu.pipeline_mode<synchronous>, transform_indices = @transform_7, window_bounds = array<i64: 768, 512>}, {transform_indices = @transform_8, window_bounds = array<i64: 1, 2, 512>}]} {
    %cst = arith.constant 0.000000e+00 : bf16
    %0 = vector.broadcast %cst : bf16 to vector<432x64xbf16>
    %c0 = arith.constant 0 : index
    %c96 = arith.constant 96 : index
    %1 = vector.load %arg10[%c0, %c96] : memref<432x1024xbf16, #tpu.memory_space<vmem>>, vector<432x64xbf16>
    tpu.vector_store %arg10[%c0, %c96], %0 {strides = array<i32>} : memref<432x1024xbf16, #tpu.memory_space<vmem>>, vector<432x64xbf16>,
    %cst_0 = arith.constant 0.000000e+00 : bf16
    %2 = vector.broadcast %cst_0 : bf16 to vector<432x64xbf16>
    %c0_1 = arith.constant 0 : index
    %c352 = arith.constant 352 : index
    %3 = vector.load %arg10[%c0_1, %c352] : memref<432x1024xbf16, #tpu.memory_space<vmem>>, vector<432x64xbf16>
    tpu.vector_store %arg10[%c0_1, %c352], %2 {strides = array<i32>} : memref<432x1024xbf16, #tpu.memory_space<vmem>>, vector<432x64xbf16>,
    %cst_2 = arith.constant 0.000000e+00 : bf16
    %4 = vector.broadcast %cst_2 : bf16 to vector<432x64xbf16>
    %c0_3 = arith.constant 0 : index
    %c864 = arith.constant 864 : index
    %5 = vector.load %arg10[%c0_3, %c864] : memref<432x1024xbf16, #tpu.memory_space<vmem>>, vector<432x64xbf16>
    tpu.vector_store %arg10[%c0_3, %c864], %4 {strides = array<i32>} : memref<432x1024xbf16, #tpu.memory_space<vmem>>, vector<432x64xbf16>,
    %c0_4 = arith.constant 0 : index
    %c0_5 = arith.constant 0 : index
    %6 = vector.load %arg4[%c0_4, %c0_5] : memref<1x768xf32, #tpu.memory_space<vmem>>, vector<1x768xf32>
    %c0_6 = arith.constant 0 : index
    %c0_7 = arith.constant 0 : index
    %7 = vector.load %arg5[%c0_6, %c0_7] : memref<1x256xf32, #tpu.memory_space<vmem>>, vector<1x256xf32>
    %c0_8 = arith.constant 0 : index
    %c0_9 = arith.constant 0 : index
    %c0_10 = arith.constant 0 : index
    %8 = vector.load %arg1[%c0_8, %c0_9, %c0_10] : memref<1x8x768xbf16, #tpu.memory_space<vmem>>, vector<1x8x768xbf16>
    %9 = vector.shape_cast %8 : vector<1x8x768xbf16> to vector<8x768xbf16>
    %c0_11 = arith.constant 0 : index
    %c147 = arith.constant 147 : index
    %10 = vector.load %arg10[%c0_11, %c147] : memref<432x1024xbf16, #tpu.memory_space<vmem>>, vector<8x768xbf16>
    tpu.vector_store %arg10[%c0_11, %c147], %9 {strides = array<i32>} : memref<432x1024xbf16, #tpu.memory_space<vmem>>, vector<8x768xbf16>,
    %c8 = arith.constant 8 : index
    %c146 = arith.constant 146 : index
    %11 = vector.load %arg10[%c8, %c146] : memref<432x1024xbf16, #tpu.memory_space<vmem>>, vector<8x768xbf16>
    tpu.vector_store %arg10[%c8, %c146], %9 {strides = array<i32>} : memref<432x1024xbf16, #tpu.memory_space<vmem>>, vector<8x768xbf16>,
    %c16 = arith.constant 16 : index
    %c145 = arith.constant 145 : index
    %12 = vector.load %arg10[%c16, %c145] : memref<432x1024xbf16, #tpu.memory_space<vmem>>, vector<8x768xbf16>
    tpu.vector_store %arg10[%c16, %c145], %9 {strides = array<i32>} : memref<432x1024xbf16, #tpu.memory_space<vmem>>, vector<8x768xbf16>,
    %c24 = arith.constant 24 : index
    %c129 = arith.constant 129 : index
    %13 = vector.load %arg10[%c24, %c129] : memref<432x1024xbf16, #tpu.memory_space<vmem>>, vector<8x768xbf16>
    tpu.vector_store %arg10[%c24, %c129], %9 {strides = array<i32>} : memref<432x1024xbf16, #tpu.memory_space<vmem>>, vector<8x768xbf16>,
    %c32 = arith.constant 32 : index
    %c128 = arith.constant 128 : index
    %14 = vector.load %arg10[%c32, %c128] : memref<432x1024xbf16, #tpu.memory_space<vmem>>, vector<8x768xbf16>
    tpu.vector_store %arg10[%c32, %c128], %9 {strides = array<i32>} : memref<432x1024xbf16, #tpu.memory_space<vmem>>, vector<8x768xbf16>,
    %c40 = arith.constant 40 : index
    %c127 = arith.constant 127 : index
    %15 = vector.load %arg10[%c40, %c127] : memref<432x1024xbf16, #tpu.memory_space<vmem>>, vector<8x768xbf16>
    tpu.vector_store %arg10[%c40, %c127], %9 {strides = array<i32>} : memref<432x1024xbf16, #tpu.memory_space<vmem>>, vector<8x768xbf16>,
    %c48 = arith.constant 48 : index
    %c111 = arith.constant 111 : index
    %16 = vector.load %arg10[%c48, %c111] : memref<432x1024xbf16, #tpu.memory_space<vmem>>, vector<8x768xbf16>
    tpu.vector_store %arg10[%c48, %c111], %9 {strides = array<i32>} : memref<432x1024xbf16, #tpu.memory_space<vmem>>, vector<8x768xbf16>,
    %c56 = arith.constant 56 : index
    %c110 = arith.constant 110 : index
    %17 = vector.load %arg10[%c56, %c110] : memref<432x1024xbf16, #tpu.memory_space<vmem>>, vector<8x768xbf16>
    tpu.vector_store %arg10[%c56, %c110], %9 {strides = array<i32>} : memref<432x1024xbf16, #tpu.memory_space<vmem>>, vector<8x768xbf16>,
    %c64 = arith.constant 64 : index
    %c109 = arith.constant 109 : index
    %18 = vector.load %arg10[%c64, %c109] : memref<432x1024xbf16, #tpu.memory_space<vmem>>, vector<8x768xbf16>
    tpu.vector_store %arg10[%c64, %c109], %9 {strides = array<i32>} : memref<432x1024xbf16, #tpu.memory_space<vmem>>, vector<8x768xbf16>,
    %c0_12 = arith.constant 0 : index
    %c0_13 = arith.constant 0 : index
    %19 = vector.load %arg2[%c0_12, %c0_13] : memref<136x512xbf16, #tpu.memory_space<vmem>>, vector<16x72xbf16>
    %c0_14 = arith.constant 0 : index
    %c128_15 = arith.constant 128 : index
    %20 = vector.load %arg10[%c0_14, %c128_15] : memref<432x1024xbf16, #tpu.memory_space<vmem>>, vector<72x768xbf16>
    %cst_16 = arith.constant dense<0.000000e+00> : vector<16x768xf32>
    %21 = tpu.matmul %19, %20, %cst_16 {dimension_numbers = #tpu.dot_dimension_numbers<[1], [0], [0], [1], [0, 0, 1, 1], [], []>} : vector<16x72xbf16>, vector<72x768xbf16>, vector<16x768xf32> -> vector<16x768xf32>
    %c0_17 = arith.constant 0 : index
    %c0_18 = arith.constant 0 : index
    %22 = vector.load %arg3[%c0_17, %c0_18] : memref<136x1xf32, #tpu.memory_space<vmem>>, vector<16x1xf32>
    %23 = vector.broadcast %22 : vector<16x1xf32> to vector<16x768xf32>
    %24 = arith.addf %21, %23 : vector<16x768xf32>
    %cst_19 = arith.constant 0.000000e+00 : f32
    %25 = vector.broadcast %cst_19 : f32 to vector<16x768xf32>
    %26 = arith.maximumf %24, %25 : vector<16x768xf32>
    %27 = vector.broadcast %6 : vector<1x768xf32> to vector<16x768xf32>
    %28 = arith.mulf %26, %27 : vector<16x768xf32>
    %29 = arith.truncf %28 : vector<16x768xf32> to vector<16x768xbf16>
    %c0_20 = arith.constant 0 : index
    %c147_21 = arith.constant 147 : index
    %30 = vector.load %arg10[%c0_20, %c147_21] : memref<432x1024xbf16, #tpu.memory_space<vmem>>, vector<16x768xbf16>
    tpu.vector_store %arg10[%c0_20, %c147_21], %29 {strides = array<i32>} : memref<432x1024xbf16, #tpu.memory_space<vmem>>, vector<16x768xbf16>,
    %c16_22 = arith.constant 16 : index
    %c146_23 = arith.constant 146 : index
    %31 = vector.load %arg10[%c16_22, %c146_23] : memref<432x1024xbf16, #tpu.memory_space<vmem>>, vector<16x768xbf16>
    tpu.vector_store %arg10[%c16_22, %c146_23], %29 {strides = array<i32>} : memref<432x1024xbf16, #tpu.memory_space<vmem>>, vector<16x768xbf16>,
    %c32_24 = arith.constant 32 : index
    %c145_25 = arith.constant 145 : index
    %32 = vector.load %arg10[%c32_24, %c145_25] : memref<432x1024xbf16, #tpu.memory_space<vmem>>, vector<16x768xbf16>
    tpu.vector_store %arg10[%c32_24, %c145_25], %29 {strides = array<i32>} : memref<432x1024xbf16, #tpu.memory_space<vmem>>, vector<16x768xbf16>,
    %c48_26 = arith.constant 48 : index
    %c129_27 = arith.constant 129 : index
    %33 = vector.load %arg10[%c48_26, %c129_27] : memref<432x1024xbf16, #tpu.memory_space<vmem>>, vector<16x768xbf16>
    tpu.vector_store %arg10[%c48_26, %c129_27], %29 {strides = array<i32>} : memref<432x1024xbf16, #tpu.memory_space<vmem>>, vector<16x768xbf16>,
    %c64_28 = arith.constant 64 : index
    %c128_29 = arith.constant 128 : index
    %34 = vector.load %arg10[%c64_28, %c128_29] : memref<432x1024xbf16, #tpu.memory_space<vmem>>, vector<16x768xbf16>
    tpu.vector_store %arg10[%c64_28, %c128_29], %29 {strides = array<i32>} : memref<432x1024xbf16, #tpu.memory_space<vmem>>, vector<16x768xbf16>,
    %c80 = arith.constant 80 : index
    %c127_30 = arith.constant 127 : index
    %35 = vector.load %arg10[%c80, %c127_30] : memref<432x1024xbf16, #tpu.memory_space<vmem>>, vector<16x768xbf16>
    tpu.vector_store %arg10[%c80, %c127_30], %29 {strides = array<i32>} : memref<432x1024xbf16, #tpu.memory_space<vmem>>, vector<16x768xbf16>,
    %c96_31 = arith.constant 96 : index
    %c111_32 = arith.constant 111 : index
    %36 = vector.load %arg10[%c96_31, %c111_32] : memref<432x1024xbf16, #tpu.memory_space<vmem>>, vector<16x768xbf16>
    tpu.vector_store %arg10[%c96_31, %c111_32], %29 {strides = array<i32>} : memref<432x1024xbf16, #tpu.memory_space<vmem>>, vector<16x768xbf16>,
    %c112 = arith.constant 112 : index
    %c110_33 = arith.constant 110 : index
    %37 = vector.load %arg10[%c112, %c110_33] : memref<432x1024xbf16, #tpu.memory_space<vmem>>, vector<16x768xbf16>
    tpu.vector_store %arg10[%c112, %c110_33], %29 {strides = array<i32>} : memref<432x1024xbf16, #tpu.memory_space<vmem>>, vector<16x768xbf16>,
    %c128_34 = arith.constant 128 : index
    %c109_35 = arith.constant 109 : index
    %38 = vector.load %arg10[%c128_34, %c109_35] : memref<432x1024xbf16, #tpu.memory_space<vmem>>, vector<16x768xbf16>
    tpu.vector_store %arg10[%c128_34, %c109_35], %29 {strides = array<i32>} : memref<432x1024xbf16, #tpu.memory_space<vmem>>, vector<16x768xbf16>,
    %c16_36 = arith.constant 16 : index
    %c0_37 = arith.constant 0 : index
    %39 = vector.load %arg2[%c16_36, %c0_37] : memref<136x512xbf16, #tpu.memory_space<vmem>>, vector<16x144xbf16>
    %c0_38 = arith.constant 0 : index
    %c128_39 = arith.constant 128 : index
    %40 = vector.load %arg10[%c0_38, %c128_39] : memref<432x1024xbf16, #tpu.memory_space<vmem>>, vector<144x768xbf16>
    %cst_40 = arith.constant dense<0.000000e+00> : vector<16x768xf32>
    %41 = tpu.matmul %39, %40, %cst_40 {dimension_numbers = #tpu.dot_dimension_numbers<[1], [0], [0], [1], [0, 0, 1, 1], [], []>} : vector<16x144xbf16>, vector<144x768xbf16>, vector<16x768xf32> -> vector<16x768xf32>
    %c16_41 = arith.constant 16 : index
    %c0_42 = arith.constant 0 : index
    %42 = vector.load %arg3[%c16_41, %c0_42] : memref<136x1xf32, #tpu.memory_space<vmem>>, vector<16x1xf32>
    %43 = vector.broadcast %42 : vector<16x1xf32> to vector<16x768xf32>
    %44 = arith.addf %41, %43 : vector<16x768xf32>
    %cst_43 = arith.constant 0.000000e+00 : f32
    %45 = vector.broadcast %cst_43 : f32 to vector<16x768xf32>
    %46 = arith.maximumf %44, %45 : vector<16x768xf32>
    %47 = vector.broadcast %6 : vector<1x768xf32> to vector<16x768xf32>
    %48 = arith.mulf %46, %47 : vector<16x768xf32>
    %49 = arith.truncf %48 : vector<16x768xf32> to vector<16x768xbf16>
    %c0_44 = arith.constant 0 : index
    %c128_45 = arith.constant 128 : index
    %50 = vector.load %arg10[%c0_44, %c128_45] : memref<432x1024xbf16, #tpu.memory_space<vmem>>, vector<16x768xbf16>
    tpu.vector_store %arg10[%c0_44, %c128_45], %49 {strides = array<i32>} : memref<432x1024xbf16, #tpu.memory_space<vmem>>, vector<16x768xbf16>,
    %c0_46 = arith.constant 0 : index
    %c129_47 = arith.constant 129 : index
    %51 = vector.load %arg10[%c0_46, %c129_47] : memref<432x1024xbf16, #tpu.memory_space<vmem>>, vector<16x768xbf16>
    %52 = arith.maximumf %49, %51 : vector<16x768xbf16>
    %c0_48 = arith.constant 0 : index
    %c146_49 = arith.constant 146 : index
    %53 = vector.load %arg10[%c0_48, %c146_49] : memref<432x1024xbf16, #tpu.memory_space<vmem>>, vector<16x768xbf16>
    %54 = arith.maximumf %52, %53 : vector<16x768xbf16>
    %c0_50 = arith.constant 0 : index
    %c147_51 = arith.constant 147 : index
    %55 = vector.load %arg10[%c0_50, %c147_51] : memref<432x1024xbf16, #tpu.memory_space<vmem>>, vector<16x768xbf16>
    %56 = arith.maximumf %54, %55 : vector<16x768xbf16>
    %c0_52 = arith.constant 0 : index
    %c0_53 = arith.constant 0 : index
    %57 = vector.load %arg6[%c0_52, %c0_53] : memref<768x256xbf16, #tpu.memory_space<vmem>>, vector<768x256xbf16>
    %cst_54 = arith.constant dense<0.000000e+00> : vector<16x256xf32>
    %58 = tpu.matmul %56, %57, %cst_54 {dimension_numbers = #tpu.dot_dimension_numbers<[1], [0], [0], [1], [0, 0, 1, 1], [], []>} : vector<16x768xbf16>, vector<768x256xbf16>, vector<16x256xf32> -> vector<16x256xf32>
    %59 = arith.truncf %58 : vector<16x256xf32> to vector<16x256xbf16>
    %c0_55 = arith.constant 0 : index
    %c139 = arith.constant 139 : index
    %60 = vector.load %arg10[%c0_55, %c139] : memref<432x1024xbf16, #tpu.memory_space<vmem>>, vector<16x256xbf16>
    tpu.vector_store %arg10[%c0_55, %c139], %59 {strides = array<i32>} : memref<432x1024xbf16, #tpu.memory_space<vmem>>, vector<16x256xbf16>,
    %c16_56 = arith.constant 16 : index
    %c138 = arith.constant 138 : index
    %61 = vector.load %arg10[%c16_56, %c138] : memref<432x1024xbf16, #tpu.memory_space<vmem>>, vector<16x256xbf16>
    tpu.vector_store %arg10[%c16_56, %c138], %59 {strides = array<i32>} : memref<432x1024xbf16, #tpu.memory_space<vmem>>, vector<16x256xbf16>,
    %c32_57 = arith.constant 32 : index
    %c137 = arith.constant 137 : index
    %62 = vector.load %arg10[%c32_57, %c137] : memref<432x1024xbf16, #tpu.memory_space<vmem>>, vector<16x256xbf16>
    tpu.vector_store %arg10[%c32_57, %c137], %59 {strides = array<i32>} : memref<432x1024xbf16, #tpu.memory_space<vmem>>, vector<16x256xbf16>,
    %c48_58 = arith.constant 48 : index
    %c129_59 = arith.constant 129 : index
    %63 = vector.load %arg10[%c48_58, %c129_59] : memref<432x1024xbf16, #tpu.memory_space<vmem>>, vector<16x256xbf16>
    tpu.vector_store %arg10[%c48_58, %c129_59], %59 {strides = array<i32>} : memref<432x1024xbf16, #tpu.memory_space<vmem>>, vector<16x256xbf16>,
    %c64_60 = arith.constant 64 : index
    %c128_61 = arith.constant 128 : index
    %64 = vector.load %arg10[%c64_60, %c128_61] : memref<432x1024xbf16, #tpu.memory_space<vmem>>, vector<16x256xbf16>
    tpu.vector_store %arg10[%c64_60, %c128_61], %59 {strides = array<i32>} : memref<432x1024xbf16, #tpu.memory_space<vmem>>, vector<16x256xbf16>,
    %c80_62 = arith.constant 80 : index
    %c127_63 = arith.constant 127 : index
    %65 = vector.load %arg10[%c80_62, %c127_63] : memref<432x1024xbf16, #tpu.memory_space<vmem>>, vector<16x256xbf16>
    tpu.vector_store %arg10[%c80_62, %c127_63], %59 {strides = array<i32>} : memref<432x1024xbf16, #tpu.memory_space<vmem>>, vector<16x256xbf16>,
    %c96_64 = arith.constant 96 : index
    %c119 = arith.constant 119 : index
    %66 = vector.load %arg10[%c96_64, %c119] : memref<432x1024xbf16, #tpu.memory_space<vmem>>, vector<16x256xbf16>
    tpu.vector_store %arg10[%c96_64, %c119], %59 {strides = array<i32>} : memref<432x1024xbf16, #tpu.memory_space<vmem>>, vector<16x256xbf16>,
    %c112_65 = arith.constant 112 : index
    %c118 = arith.constant 118 : index
    %67 = vector.load %arg10[%c112_65, %c118] : memref<432x1024xbf16, #tpu.memory_space<vmem>>, vector<16x256xbf16>
    tpu.vector_store %arg10[%c112_65, %c118], %59 {strides = array<i32>} : memref<432x1024xbf16, #tpu.memory_space<vmem>>, vector<16x256xbf16>,
    %c128_66 = arith.constant 128 : index
    %c117 = arith.constant 117 : index
    %68 = vector.load %arg10[%c128_66, %c117] : memref<432x1024xbf16, #tpu.memory_space<vmem>>, vector<16x256xbf16>
    tpu.vector_store %arg10[%c128_66, %c117], %59 {strides = array<i32>} : memref<432x1024xbf16, #tpu.memory_space<vmem>>, vector<16x256xbf16>,
    %c32_67 = arith.constant 32 : index
    %c0_68 = arith.constant 0 : index
    %69 = vector.load %arg2[%c32_67, %c0_68] : memref<136x512xbf16, #tpu.memory_space<vmem>>, vector<32x144xbf16>
    %c0_69 = arith.constant 0 : index
    %c128_70 = arith.constant 128 : index
    %70 = vector.load %arg10[%c0_69, %c128_70] : memref<432x1024xbf16, #tpu.memory_space<vmem>>, vector<144x256xbf16>
    %cst_71 = arith.constant dense<0.000000e+00> : vector<32x256xf32>
    %71 = tpu.matmul %69, %70, %cst_71 {dimension_numbers = #tpu.dot_dimension_numbers<[1], [0], [0], [1], [0, 0, 1, 1], [], []>} : vector<32x144xbf16>, vector<144x256xbf16>, vector<32x256xf32> -> vector<32x256xf32>
    %c32_72 = arith.constant 32 : index
    %c0_73 = arith.constant 0 : index
    %72 = vector.load %arg3[%c32_72, %c0_73] : memref<136x1xf32, #tpu.memory_space<vmem>>, vector<32x1xf32>
    %73 = vector.broadcast %72 : vector<32x1xf32> to vector<32x256xf32>
    %74 = arith.addf %71, %73 : vector<32x256xf32>
    %cst_74 = arith.constant 0.000000e+00 : f32
    %75 = vector.broadcast %cst_74 : f32 to vector<32x256xf32>
    %76 = arith.maximumf %74, %75 : vector<32x256xf32>
    %77 = vector.broadcast %7 : vector<1x256xf32> to vector<32x256xf32>
    %78 = arith.mulf %76, %77 : vector<32x256xf32>
    %79 = arith.truncf %78 : vector<32x256xf32> to vector<32x256xbf16>
    %c0_75 = arith.constant 0 : index
    %c139_76 = arith.constant 139 : index
    %80 = vector.load %arg10[%c0_75, %c139_76] : memref<432x1024xbf16, #tpu.memory_space<vmem>>, vector<32x256xbf16>
    tpu.vector_store %arg10[%c0_75, %c139_76], %79 {strides = array<i32>} : memref<432x1024xbf16, #tpu.memory_space<vmem>>, vector<32x256xbf16>,
    %c32_77 = arith.constant 32 : index
    %c138_78 = arith.constant 138 : index
    %81 = vector.load %arg10[%c32_77, %c138_78] : memref<432x1024xbf16, #tpu.memory_space<vmem>>, vector<32x256xbf16>
    tpu.vector_store %arg10[%c32_77, %c138_78], %79 {strides = array<i32>} : memref<432x1024xbf16, #tpu.memory_space<vmem>>, vector<32x256xbf16>,
    %c64_79 = arith.constant 64 : index
    %c137_80 = arith.constant 137 : index
    %82 = vector.load %arg10[%c64_79, %c137_80] : memref<432x1024xbf16, #tpu.memory_space<vmem>>, vector<32x256xbf16>
    tpu.vector_store %arg10[%c64_79, %c137_80], %79 {strides = array<i32>} : memref<432x1024xbf16, #tpu.memory_space<vmem>>, vector<32x256xbf16>,
    %c96_81 = arith.constant 96 : index
    %c129_82 = arith.constant 129 : index
    %83 = vector.load %arg10[%c96_81, %c129_82] : memref<432x1024xbf16, #tpu.memory_space<vmem>>, vector<32x256xbf16>
    tpu.vector_store %arg10[%c96_81, %c129_82], %79 {strides = array<i32>} : memref<432x1024xbf16, #tpu.memory_space<vmem>>, vector<32x256xbf16>,
    %c128_83 = arith.constant 128 : index
    %c128_84 = arith.constant 128 : index
    %84 = vector.load %arg10[%c128_83, %c128_84] : memref<432x1024xbf16, #tpu.memory_space<vmem>>, vector<32x256xbf16>
    tpu.vector_store %arg10[%c128_83, %c128_84], %79 {strides = array<i32>} : memref<432x1024xbf16, #tpu.memory_space<vmem>>, vector<32x256xbf16>,
    %c160 = arith.constant 160 : index
    %c127_85 = arith.constant 127 : index
    %85 = vector.load %arg10[%c160, %c127_85] : memref<432x1024xbf16, #tpu.memory_space<vmem>>, vector<32x256xbf16>
    tpu.vector_store %arg10[%c160, %c127_85], %79 {strides = array<i32>} : memref<432x1024xbf16, #tpu.memory_space<vmem>>, vector<32x256xbf16>,
    %c192 = arith.constant 192 : index
    %c119_86 = arith.constant 119 : index
    %86 = vector.load %arg10[%c192, %c119_86] : memref<432x1024xbf16, #tpu.memory_space<vmem>>, vector<32x256xbf16>
    tpu.vector_store %arg10[%c192, %c119_86], %79 {strides = array<i32>} : memref<432x1024xbf16, #tpu.memory_space<vmem>>, vector<32x256xbf16>,
    %c224 = arith.constant 224 : index
    %c118_87 = arith.constant 118 : index
    %87 = vector.load %arg10[%c224, %c118_87] : memref<432x1024xbf16, #tpu.memory_space<vmem>>, vector<32x256xbf16>
    tpu.vector_store %arg10[%c224, %c118_87], %79 {strides = array<i32>} : memref<432x1024xbf16, #tpu.memory_space<vmem>>, vector<32x256xbf16>,
    %c256 = arith.constant 256 : index
    %c117_88 = arith.constant 117 : index
    %88 = vector.load %arg10[%c256, %c117_88] : memref<432x1024xbf16, #tpu.memory_space<vmem>>, vector<32x256xbf16>
    tpu.vector_store %arg10[%c256, %c117_88], %79 {strides = array<i32>} : memref<432x1024xbf16, #tpu.memory_space<vmem>>, vector<32x256xbf16>,
    %c64_89 = arith.constant 64 : index
    %c0_90 = arith.constant 0 : index
    %89 = vector.load %arg2[%c64_89, %c0_90] : memref<136x512xbf16, #tpu.memory_space<vmem>>, vector<32x288xbf16>
    %c0_91 = arith.constant 0 : index
    %c128_92 = arith.constant 128 : index
    %90 = vector.load %arg10[%c0_91, %c128_92] : memref<432x1024xbf16, #tpu.memory_space<vmem>>, vector<288x256xbf16>
    %cst_93 = arith.constant dense<0.000000e+00> : vector<32x256xf32>
    %91 = tpu.matmul %89, %90, %cst_93 {dimension_numbers = #tpu.dot_dimension_numbers<[1], [0], [0], [1], [0, 0, 1, 1], [], []>} : vector<32x288xbf16>, vector<288x256xbf16>, vector<32x256xf32> -> vector<32x256xf32>
    %c64_94 = arith.constant 64 : index
    %c0_95 = arith.constant 0 : index
    %92 = vector.load %arg3[%c64_94, %c0_95] : memref<136x1xf32, #tpu.memory_space<vmem>>, vector<32x1xf32>
    %93 = vector.broadcast %92 : vector<32x1xf32> to vector<32x256xf32>
    %94 = arith.addf %91, %93 : vector<32x256xf32>
    %cst_96 = arith.constant 0.000000e+00 : f32
    %95 = vector.broadcast %cst_96 : f32 to vector<32x256xf32>
    %96 = arith.maximumf %94, %95 : vector<32x256xf32>
    %97 = vector.broadcast %7 : vector<1x256xf32> to vector<32x256xf32>
    %98 = arith.mulf %96, %97 : vector<32x256xf32>
    %99 = arith.truncf %98 : vector<32x256xf32> to vector<32x256xbf16>
    %c0_97 = arith.constant 0 : index
    %c0_98 = arith.constant 0 : index
    %100 = vector.load %arg7[%c0_97, %c0_98] : memref<256x768xbf16, #tpu.memory_space<vmem>>, vector<256x768xbf16>
    %cst_99 = arith.constant dense<0.000000e+00> : vector<32x768xf32>
    %101 = tpu.matmul %99, %100, %cst_99 {dimension_numbers = #tpu.dot_dimension_numbers<[1], [0], [0], [1], [0, 0, 1, 1], [], []>} : vector<32x256xbf16>, vector<256x768xbf16>, vector<32x768xf32> -> vector<32x768xf32>
    %102 = arith.truncf %101 : vector<32x768xf32> to vector<32x768xbf16>
    %c0_100 = arith.constant 0 : index
    %c147_101 = arith.constant 147 : index
    %103 = vector.load %arg10[%c0_100, %c147_101] : memref<432x1024xbf16, #tpu.memory_space<vmem>>, vector<32x768xbf16>
    tpu.vector_store %arg10[%c0_100, %c147_101], %102 {strides = array<i32>} : memref<432x1024xbf16, #tpu.memory_space<vmem>>, vector<32x768xbf16>,
    %c32_102 = arith.constant 32 : index
    %c147_103 = arith.constant 147 : index
    %104 = vector.load %arg10[%c32_102, %c147_103] : memref<432x1024xbf16, #tpu.memory_space<vmem>>, vector<16x768xbf16>
    tpu.vector_store %arg10[%c32_102, %c147_103], %49 {strides = array<i32>} : memref<432x1024xbf16, #tpu.memory_space<vmem>>, vector<16x768xbf16>,
    %c48_104 = arith.constant 48 : index
    %c146_105 = arith.constant 146 : index
    %105 = vector.load %arg10[%c48_104, %c146_105] : memref<432x1024xbf16, #tpu.memory_space<vmem>>, vector<32x768xbf16>
    tpu.vector_store %arg10[%c48_104, %c146_105], %102 {strides = array<i32>} : memref<432x1024xbf16, #tpu.memory_space<vmem>>, vector<32x768xbf16>,
    %c80_106 = arith.constant 80 : index
    %c146_107 = arith.constant 146 : index
    %106 = vector.load %arg10[%c80_106, %c146_107] : memref<432x1024xbf16, #tpu.memory_space<vmem>>, vector<16x768xbf16>
    tpu.vector_store %arg10[%c80_106, %c146_107], %49 {strides = array<i32>} : memref<432x1024xbf16, #tpu.memory_space<vmem>>, vector<16x768xbf16>,
    %c96_108 = arith.constant 96 : index
    %c145_109 = arith.constant 145 : index
    %107 = vector.load %arg10[%c96_108, %c145_109] : memref<432x1024xbf16, #tpu.memory_space<vmem>>, vector<32x768xbf16>
    tpu.vector_store %arg10[%c96_108, %c145_109], %102 {strides = array<i32>} : memref<432x1024xbf16, #tpu.memory_space<vmem>>, vector<32x768xbf16>,
    %c128_110 = arith.constant 128 : index
    %c145_111 = arith.constant 145 : index
    %108 = vector.load %arg10[%c128_110, %c145_111] : memref<432x1024xbf16, #tpu.memory_space<vmem>>, vector<16x768xbf16>
    tpu.vector_store %arg10[%c128_110, %c145_111], %49 {strides = array<i32>} : memref<432x1024xbf16, #tpu.memory_space<vmem>>, vector<16x768xbf16>,
    %c144 = arith.constant 144 : index
    %c129_112 = arith.constant 129 : index
    %109 = vector.load %arg10[%c144, %c129_112] : memref<432x1024xbf16, #tpu.memory_space<vmem>>, vector<32x768xbf16>
    tpu.vector_store %arg10[%c144, %c129_112], %102 {strides = array<i32>} : memref<432x1024xbf16, #tpu.memory_space<vmem>>, vector<32x768xbf16>,
    %c176 = arith.constant 176 : index
    %c129_113 = arith.constant 129 : index
    %110 = vector.load %arg10[%c176, %c129_113] : memref<432x1024xbf16, #tpu.memory_space<vmem>>, vector<16x768xbf16>
    tpu.vector_store %arg10[%c176, %c129_113], %49 {strides = array<i32>} : memref<432x1024xbf16, #tpu.memory_space<vmem>>, vector<16x768xbf16>,
    %c192_114 = arith.constant 192 : index
    %c128_115 = arith.constant 128 : index
    %111 = vector.load %arg10[%c192_114, %c128_115] : memref<432x1024xbf16, #tpu.memory_space<vmem>>, vector<32x768xbf16>
    tpu.vector_store %arg10[%c192_114, %c128_115], %102 {strides = array<i32>} : memref<432x1024xbf16, #tpu.memory_space<vmem>>, vector<32x768xbf16>,
    %c224_116 = arith.constant 224 : index
    %c128_117 = arith.constant 128 : index
    %112 = vector.load %arg10[%c224_116, %c128_117] : memref<432x1024xbf16, #tpu.memory_space<vmem>>, vector<16x768xbf16>
    tpu.vector_store %arg10[%c224_116, %c128_117], %49 {strides = array<i32>} : memref<432x1024xbf16, #tpu.memory_space<vmem>>, vector<16x768xbf16>,
    %c240 = arith.constant 240 : index
    %c127_118 = arith.constant 127 : index
    %113 = vector.load %arg10[%c240, %c127_118] : memref<432x1024xbf16, #tpu.memory_space<vmem>>, vector<32x768xbf16>
    tpu.vector_store %arg10[%c240, %c127_118], %102 {strides = array<i32>} : memref<432x1024xbf16, #tpu.memory_space<vmem>>, vector<32x768xbf16>,
    %c272 = arith.constant 272 : index
    %c127_119 = arith.constant 127 : index
    %114 = vector.load %arg10[%c272, %c127_119] : memref<432x1024xbf16, #tpu.memory_space<vmem>>, vector<16x768xbf16>
    tpu.vector_store %arg10[%c272, %c127_119], %49 {strides = array<i32>} : memref<432x1024xbf16, #tpu.memory_space<vmem>>, vector<16x768xbf16>,
    %c288 = arith.constant 288 : index
    %c111_120 = arith.constant 111 : index
    %115 = vector.load %arg10[%c288, %c111_120] : memref<432x1024xbf16, #tpu.memory_space<vmem>>, vector<32x768xbf16>
    tpu.vector_store %arg10[%c288, %c111_120], %102 {strides = array<i32>} : memref<432x1024xbf16, #tpu.memory_space<vmem>>, vector<32x768xbf16>,
    %c320 = arith.constant 320 : index
    %c111_121 = arith.constant 111 : index
    %116 = vector.load %arg10[%c320, %c111_121] : memref<432x1024xbf16, #tpu.memory_space<vmem>>, vector<16x768xbf16>
    tpu.vector_store %arg10[%c320, %c111_121], %49 {strides = array<i32>} : memref<432x1024xbf16, #tpu.memory_space<vmem>>, vector<16x768xbf16>,
    %c336 = arith.constant 336 : index
    %c110_122 = arith.constant 110 : index
    %117 = vector.load %arg10[%c336, %c110_122] : memref<432x1024xbf16, #tpu.memory_space<vmem>>, vector<32x768xbf16>
    tpu.vector_store %arg10[%c336, %c110_122], %102 {strides = array<i32>} : memref<432x1024xbf16, #tpu.memory_space<vmem>>, vector<32x768xbf16>,
    %c368 = arith.constant 368 : index
    %c110_123 = arith.constant 110 : index
    %118 = vector.load %arg10[%c368, %c110_123] : memref<432x1024xbf16, #tpu.memory_space<vmem>>, vector<16x768xbf16>
    tpu.vector_store %arg10[%c368, %c110_123], %49 {strides = array<i32>} : memref<432x1024xbf16, #tpu.memory_space<vmem>>, vector<16x768xbf16>,
    %c384 = arith.constant 384 : index
    %c109_124 = arith.constant 109 : index
    %119 = vector.load %arg10[%c384, %c109_124] : memref<432x1024xbf16, #tpu.memory_space<vmem>>, vector<32x768xbf16>
    tpu.vector_store %arg10[%c384, %c109_124], %102 {strides = array<i32>} : memref<432x1024xbf16, #tpu.memory_space<vmem>>, vector<32x768xbf16>,
    %c416 = arith.constant 416 : index
    %c109_125 = arith.constant 109 : index
    %120 = vector.load %arg10[%c416, %c109_125] : memref<432x1024xbf16, #tpu.memory_space<vmem>>, vector<16x768xbf16>
    tpu.vector_store %arg10[%c416, %c109_125], %49 {strides = array<i32>} : memref<432x1024xbf16, #tpu.memory_space<vmem>>, vector<16x768xbf16>,
    %c96_126 = arith.constant 96 : index
    %c0_127 = arith.constant 0 : index
    %121 = vector.load %arg2[%c96_126, %c0_127] : memref<136x512xbf16, #tpu.memory_space<vmem>>, vector<16x432xbf16>
    %c0_128 = arith.constant 0 : index
    %c128_129 = arith.constant 128 : index
    %122 = vector.load %arg10[%c0_128, %c128_129] : memref<432x1024xbf16, #tpu.memory_space<vmem>>, vector<432x768xbf16>
    %cst_130 = arith.constant dense<0.000000e+00> : vector<16x768xf32>
    %123 = tpu.matmul %121, %122, %cst_130 {dimension_numbers = #tpu.dot_dimension_numbers<[1], [0], [0], [1], [0, 0, 1, 1], [], []>} : vector<16x432xbf16>, vector<432x768xbf16>, vector<16x768xf32> -> vector<16x768xf32>
    %c96_131 = arith.constant 96 : index
    %c0_132 = arith.constant 0 : index
    %124 = vector.load %arg3[%c96_131, %c0_132] : memref<136x1xf32, #tpu.memory_space<vmem>>, vector<16x1xf32>
    %125 = vector.broadcast %124 : vector<16x1xf32> to vector<16x768xf32>
    %126 = arith.addf %123, %125 : vector<16x768xf32>
    %cst_133 = arith.constant 0.000000e+00 : f32
    %127 = vector.broadcast %cst_133 : f32 to vector<16x768xf32>
    %128 = arith.maximumf %126, %127 : vector<16x768xf32>
    %129 = vector.broadcast %6 : vector<1x768xf32> to vector<16x768xf32>
    %130 = arith.mulf %128, %129 : vector<16x768xf32>
    %131 = arith.truncf %130 : vector<16x768xf32> to vector<16x768xbf16>
    %c0_134 = arith.constant 0 : index
    %c147_135 = arith.constant 147 : index
    %132 = vector.load %arg10[%c0_134, %c147_135] : memref<432x1024xbf16, #tpu.memory_space<vmem>>, vector<16x768xbf16>
    tpu.vector_store %arg10[%c0_134, %c147_135], %131 {strides = array<i32>} : memref<432x1024xbf16, #tpu.memory_space<vmem>>, vector<16x768xbf16>,
    %c16_136 = arith.constant 16 : index
    %c146_137 = arith.constant 146 : index
    %133 = vector.load %arg10[%c16_136, %c146_137] : memref<432x1024xbf16, #tpu.memory_space<vmem>>, vector<16x768xbf16>
    tpu.vector_store %arg10[%c16_136, %c146_137], %131 {strides = array<i32>} : memref<432x1024xbf16, #tpu.memory_space<vmem>>, vector<16x768xbf16>,
    %c32_138 = arith.constant 32 : index
    %c145_139 = arith.constant 145 : index
    %134 = vector.load %arg10[%c32_138, %c145_139] : memref<432x1024xbf16, #tpu.memory_space<vmem>>, vector<16x768xbf16>
    tpu.vector_store %arg10[%c32_138, %c145_139], %131 {strides = array<i32>} : memref<432x1024xbf16, #tpu.memory_space<vmem>>, vector<16x768xbf16>,
    %c48_140 = arith.constant 48 : index
    %c129_141 = arith.constant 129 : index
    %135 = vector.load %arg10[%c48_140, %c129_141] : memref<432x1024xbf16, #tpu.memory_space<vmem>>, vector<16x768xbf16>
    tpu.vector_store %arg10[%c48_140, %c129_141], %131 {strides = array<i32>} : memref<432x1024xbf16, #tpu.memory_space<vmem>>, vector<16x768xbf16>,
    %c64_142 = arith.constant 64 : index
    %c128_143 = arith.constant 128 : index
    %136 = vector.load %arg10[%c64_142, %c128_143] : memref<432x1024xbf16, #tpu.memory_space<vmem>>, vector<16x768xbf16>
    tpu.vector_store %arg10[%c64_142, %c128_143], %131 {strides = array<i32>} : memref<432x1024xbf16, #tpu.memory_space<vmem>>, vector<16x768xbf16>,
    %c80_144 = arith.constant 80 : index
    %c127_145 = arith.constant 127 : index
    %137 = vector.load %arg10[%c80_144, %c127_145] : memref<432x1024xbf16, #tpu.memory_space<vmem>>, vector<16x768xbf16>
    tpu.vector_store %arg10[%c80_144, %c127_145], %131 {strides = array<i32>} : memref<432x1024xbf16, #tpu.memory_space<vmem>>, vector<16x768xbf16>,
    %c96_146 = arith.constant 96 : index
    %c111_147 = arith.constant 111 : index
    %138 = vector.load %arg10[%c96_146, %c111_147] : memref<432x1024xbf16, #tpu.memory_space<vmem>>, vector<16x768xbf16>
    tpu.vector_store %arg10[%c96_146, %c111_147], %131 {strides = array<i32>} : memref<432x1024xbf16, #tpu.memory_space<vmem>>, vector<16x768xbf16>,
    %c112_148 = arith.constant 112 : index
    %c110_149 = arith.constant 110 : index
    %139 = vector.load %arg10[%c112_148, %c110_149] : memref<432x1024xbf16, #tpu.memory_space<vmem>>, vector<16x768xbf16>
    tpu.vector_store %arg10[%c112_148, %c110_149], %131 {strides = array<i32>} : memref<432x1024xbf16, #tpu.memory_space<vmem>>, vector<16x768xbf16>,
    %c128_150 = arith.constant 128 : index
    %c109_151 = arith.constant 109 : index
    %140 = vector.load %arg10[%c128_150, %c109_151] : memref<432x1024xbf16, #tpu.memory_space<vmem>>, vector<16x768xbf16>
    tpu.vector_store %arg10[%c128_150, %c109_151], %131 {strides = array<i32>} : memref<432x1024xbf16, #tpu.memory_space<vmem>>, vector<16x768xbf16>,
    %c112_152 = arith.constant 112 : index
    %c0_153 = arith.constant 0 : index
    %141 = vector.load %arg2[%c112_152, %c0_153] : memref<136x512xbf16, #tpu.memory_space<vmem>>, vector<16x144xbf16>
    %c0_154 = arith.constant 0 : index
    %c128_155 = arith.constant 128 : index
    %142 = vector.load %arg10[%c0_154, %c128_155] : memref<432x1024xbf16, #tpu.memory_space<vmem>>, vector<144x768xbf16>
    %cst_156 = arith.constant dense<0.000000e+00> : vector<16x768xf32>
    %143 = tpu.matmul %141, %142, %cst_156 {dimension_numbers = #tpu.dot_dimension_numbers<[1], [0], [0], [1], [0, 0, 1, 1], [], []>} : vector<16x144xbf16>, vector<144x768xbf16>, vector<16x768xf32> -> vector<16x768xf32>
    %c112_157 = arith.constant 112 : index
    %c0_158 = arith.constant 0 : index
    %144 = vector.load %arg3[%c112_157, %c0_158] : memref<136x1xf32, #tpu.memory_space<vmem>>, vector<16x1xf32>
    %145 = vector.broadcast %144 : vector<16x1xf32> to vector<16x768xf32>
    %146 = arith.addf %143, %145 : vector<16x768xf32>
    %cst_159 = arith.constant 0.000000e+00 : f32
    %147 = vector.broadcast %cst_159 : f32 to vector<16x768xf32>
    %148 = arith.maximumf %146, %147 : vector<16x768xf32>
    %149 = vector.broadcast %6 : vector<1x768xf32> to vector<16x768xf32>
    %150 = arith.mulf %148, %149 : vector<16x768xf32>
    %151 = arith.truncf %150 : vector<16x768xf32> to vector<16x768xbf16>
    %c128_160 = arith.constant 128 : index
    %c0_161 = arith.constant 0 : index
    %152 = vector.load %arg2[%c128_160, %c0_161] : memref<136x512xbf16, #tpu.memory_space<vmem>>, vector<2x16xbf16>
    %cst_162 = arith.constant dense<0.000000e+00> : vector<2x768xf32>
    %153 = tpu.matmul %152, %151, %cst_162 {dimension_numbers = #tpu.dot_dimension_numbers<[1], [0], [0], [1], [0, 0, 1, 1], [], []>} : vector<2x16xbf16>, vector<16x768xbf16>, vector<2x768xf32> -> vector<2x768xf32>
    %c128_163 = arith.constant 128 : index
    %c0_164 = arith.constant 0 : index
    %154 = vector.load %arg3[%c128_163, %c0_164] : memref<136x1xf32, #tpu.memory_space<vmem>>, vector<2x1xf32>
    %155 = vector.broadcast %154 : vector<2x1xf32> to vector<2x768xf32>
    %156 = arith.addf %153, %155 : vector<2x768xf32>
    %157 = arith.truncf %156 : vector<2x768xf32> to vector<2x768xbf16>
    %c0_165 = arith.constant 0 : index
    %c0_166 = arith.constant 0 : index
    %158 = vector.load %arg8[%c0_165, %c0_166] : memref<768x512xbf16, #tpu.memory_space<vmem>>, vector<768x512xbf16>
    %cst_167 = arith.constant dense<0.000000e+00> : vector<2x512xf32>
    %159 = tpu.matmul %157, %158, %cst_167 {dimension_numbers = #tpu.dot_dimension_numbers<[1], [0], [0], [1], [0, 0, 1, 1], [], []>} : vector<2x768xbf16>, vector<768x512xbf16>, vector<2x512xf32> -> vector<2x512xf32>
    %c0_168 = arith.constant 0 : index
    %c0_169 = arith.constant 0 : index
    %c0_170 = arith.constant 0 : index
    %160 = vector.load %arg9[%c0_168, %c0_169, %c0_170] : memref<1x2x512xf32, #tpu.memory_space<vmem>>, vector<1x2x512xf32>
    %161 = vector.shape_cast %160 : vector<1x2x512xf32> to vector<2x512xf32>
    %162 = vector.shape_cast %159 : vector<2x512xf32> to vector<1x2x512xf32>
    tpu.vector_store %arg9[%c0_168, %c0_169, %c0_170], %162 {strides = array<i32>} : memref<1x2x512xf32, #tpu.memory_space<vmem>>, vector<1x2x512xf32>,
    return
  }
  func.func @transform_0(%arg0: i32) -> (i32, i32, i32) {
    %c0_i32 = arith.constant 0 : i32
    %c0_i32_0 = arith.constant 0 : i32
    %c0_i32_1 = arith.constant 0 : i32
    return %arg0, %c0_i32, %c0_i32_0 : i32, i32, i32
  }
  func.func @transform_1(%arg0: i32) -> (i32, i32) {
    %c0_i32 = arith.constant 0 : i32
    %c0_i32_0 = arith.constant 0 : i32
    %c0_i32_1 = arith.constant 0 : i32
    return %c0_i32, %c0_i32_0 : i32, i32
  }
  func.func @transform_2(%arg0: i32) -> (i32, i32) {
    %c0_i32 = arith.constant 0 : i32
    %c0_i32_0 = arith.constant 0 : i32
    %c0_i32_1 = arith.constant 0 : i32
    return %c0_i32, %c0_i32_0 : i32, i32
  }
  func.func @transform_3(%arg0: i32) -> (i32, i32) {
    %c0_i32 = arith.constant 0 : i32
    %c0_i32_0 = arith.constant 0 : i32
    %c0_i32_1 = arith.constant 0 : i32
    return %c0_i32, %c0_i32_0 : i32, i32
  }
  func.func @transform_4(%arg0: i32) -> (i32, i32) {
    %c0_i32 = arith.constant 0 : i32
    %c0_i32_0 = arith.constant 0 : i32
    %c0_i32_1 = arith.constant 0 : i32
    return %c0_i32, %c0_i32_0 : i32, i32
  }
  func.func @transform_5(%arg0: i32) -> (i32, i32) {
    %c0_i32 = arith.constant 0 : i32
    %c0_i32_0 = arith.constant 0 : i32
    %c0_i32_1 = arith.constant 0 : i32
    return %c0_i32, %c0_i32_0 : i32, i32
  }
  func.func @transform_6(%arg0: i32) -> (i32, i32) {
    %c0_i32 = arith.constant 0 : i32
    %c0_i32_0 = arith.constant 0 : i32
    %c0_i32_1 = arith.constant 0 : i32
    return %c0_i32, %c0_i32_0 : i32, i32
  }
  func.func @transform_7(%arg0: i32) -> (i32, i32) {
    %c0_i32 = arith.constant 0 : i32
    %c0_i32_0 = arith.constant 0 : i32
    %c0_i32_1 = arith.constant 0 : i32
    return %c0_i32, %c0_i32_0 : i32, i32
  }
  func.func @transform_8(%arg0: i32) -> (i32, i32, i32) {
    %c0_i32 = arith.constant 0 : i32
    %c0_i32_0 = arith.constant 0 : i32
    %c0_i32_1 = arith.constant 0 : i32
    return %arg0, %c0_i32, %c0_i32_0 : i32, i32, i32
  }
}

</mosaic_0001>

<bundles_post_ra>
// kernel: double_unet_forward.1
= control target key start
LH: loop header
LB: loop body
LE: loop exit
PB: predicated region body
PF: predicated region fallthrough
CT: control target
= control target key end

     0   :  { %vm32_vm0 = vcmask 261120   ;;  %v11452_v3 = vmov 0   ;;  %vm30_vm1 = vcmask 1048320   ;;  %s7984_s11 = smov 19   ;;  %s7985_s12 = smov 17   ;;  %vm273_vm2 = vcmask 1047700   ;;  %s11436_s0 = inlined_call_operand.vmem [shape: bf16[1,8,768], index: 0, kind: input, shape index: {}]   ;;  %s11437_s1 = inlined_call_operand.vmem [shape: bf16[136,512], index: 1, kind: input, shape index: {}]   ;;  %s11438_s2 = inlined_call_operand.vmem [shape: f32[136,1], index: 2, kind: input, shape index: {}]   ;;  %s11439_s3 = inlined_call_operand.vmem [shape: f32[1,768], index: 3, kind: input, shape index: {}]   ;;  %s11440_s5 = inlined_call_operand.vmem [shape: bf16[768,256], index: 5, kind: input, shape index: {}]   ;;  %s11441_s4 = inlined_call_operand.vmem [shape: f32[1,256], index: 4, kind: input, shape index: {}]   ;;  %s11442_s6 = inlined_call_operand.vmem [shape: bf16[256,768], index: 6, kind: input, shape index: {}]   ;;  %s11443_s7 = inlined_call_operand.vmem [shape: bf16[768,512], index: 7, kind: input, shape index: {}]   ;;  %s11444_s8 = inlined_call_operand.vmem [shape: f32[1,2,512], index: 8, kind: output, shape index: {}]  }
   0x1   :  { %v196_v0 = vld [vmem:[%s11436_s0] sm:$0xff]  ;;  %v197_v1 = vld [vmem:[%s11436_s0 + $0x8] sm:$0xff]  ;;  %v8052_v2 = vld [vmem:[%s11436_s0 + $0x10] sm:$0xff]  ;;  %33 = vst.msk [vmem:[#allocation2 + $0x8] sm:$0xff] %vm32_vm0, %v11452_v3  ;;  %602 = vmatprep.mubr.bf16.mxu0 %v11452_v3  ;;  %645 = vmatprep.mubr.bf16.mxu1 %v11452_v3  ;;  %s7983_s0 = smov 18   ;;  %s7986_s13 = smov 1  }
   0x2   :  { %35 = vst.msk [vmem:[#allocation2 + $0x48] sm:$0xff] %vm32_vm0, %v11452_v3  ;;  %37 = vst.msk [vmem:[#allocation2 + $0x88] sm:$0xff] %vm32_vm0, %v11452_v3  ;;  %v8112_v4 = vcombine.low %v196_v0, %v196_v0  ;;  %v8114_v5 = vcombine.high %v196_v0, %v196_v0  ;;  %v8116_v6 = vcombine.high %v197_v1, %v197_v1  ;;  %7368 = vset.pattern.permute.xlu1 %v11452_v3  ;;  %s7987_s14 = smov 127   ;;  %s7988_s15 = smov 111   ;;  %v531_v10 = vld [vmem:[%s11438_s2 + $0x8] sm:$0xff]  ;;  %v530_v11 = vld [vmem:[%s11438_s2] sm:$0xff] }
   0x3   :  { %39 = vst.msk [vmem:[#allocation2 + $0xc8] sm:$0xff] %vm32_vm0, %v11452_v3  ;;  %41 = vst.msk [vmem:[#allocation2 + $0x108] sm:$0xff] %vm32_vm0, %v11452_v3  ;;  %v8118_v7 = vcombine.low %v197_v1, %v197_v1  ;;  %v6860_v8 = vcombine.low %v8052_v2, %v8052_v2  ;;  %v8211_v9 = vcombine.high %v8052_v2, %v8052_v2  ;;  %7367 = vset.pattern.permute.xlu0 %v11452_v3  ;;  %s7989_s16 = smov 110   ;;  %s7990_s17 = smov 109   ;;  %vm239_vm3 = vcmask 1043608  }
   0x4   :  { %43 = vst.msk [vmem:[#allocation2 + $0x148] sm:$0xff] %vm32_vm0, %v11452_v3  ;;  %45 = vst.msk [vmem:[#allocation2 + $0x188] sm:$0xff] %vm32_vm0, %v11452_v3  ;;  %248 = vrot.lane.b32.xlu1 %v8112_v4, %s7983_s0  ;;  %214 = vrot.lane.b32.xlu0 %v8112_v4, %s7984_s11  ;;  %vm11450_vm4 = vcmask 146432   ;;  %vm226_vm5 = vcmask 154624   ;;  %vm11448_vm6 = vcmask 138240   ;;  %vm307_vm7 = vcmask 1043592  }
   0x5   :  { %47 = vst.msk [vmem:[#allocation2 + $0x1c8] sm:$0xff] %vm32_vm0, %v11452_v3  ;;  %49 = vst.msk [vmem:[#allocation2 + $0x208] sm:$0xff] %vm32_vm0, %v11452_v3  ;;  %vm328_vm8 = vcmask 7168   ;;  %vm341_vm9 = vcmask 1047564   ;;  %vm374_vm10 = vcmask 1039360   ;;  %vm11447_vm11 = vcmask 908288  }
   0x6   :  { %51 = vst.msk [vmem:[#allocation2 + $0x248] sm:$0xff] %vm32_vm0, %v11452_v3  ;;  %53 = vst.msk [vmem:[#allocation2 + $0x288] sm:$0xff] %vm32_vm0, %v11452_v3  ;;  %vm11446_vm12 = vcmask 900096   ;;  %vm11445_vm13 = vcmask 891904   ;;  %vm246_vm14 = vcmask 150528   ;;  %vm551_vm15 = vcmask 1043456  }
   0x7   :  { %55 = vst.msk [vmem:[#allocation2 + $0x2c8] sm:$0xff] %vm32_vm0, %v11452_v3  ;;  %61 = vst.msk [vmem:[#allocation2 + $0x388] sm:$0xff] %vm32_vm0, %v11452_v3  ;;  %s7992_s20 = smov 10   ;;  %s7993_s21 = smov 9  }
   0x8   :  { %67 = vst.msk [vmem:[#allocation2 + $0x448] sm:$0xff] %vm32_vm0, %v11452_v3  ;;  %73 = vst.msk [vmem:[#allocation2 + $0x508] sm:$0xff] %vm32_vm0, %v11452_v3  ;;  %250 = vrot.lane.b32.xlu1 %v8114_v5, %s7983_s0  ;;  %216 = vrot.lane.b32.xlu0 %v8114_v5, %s7984_s11  ;;  %s7994_s22 = smov 119   ;;  %s7995_s23 = smov 118  }
   0x9   :  { %79 = vst.msk [vmem:[#allocation2 + $0x5c8] sm:$0xff] %vm32_vm0, %v11452_v3  ;;  %87 = vst.msk [vmem:[#allocation2 + $0x18] sm:$0xff] %vm32_vm0, %v11452_v3 }
   0xa   :  { %89 = vst.msk [vmem:[#allocation2 + $0x58] sm:$0xff] %vm32_vm0, %v11452_v3  ;;  %91 = vst.msk [vmem:[#allocation2 + $0x98] sm:$0xff] %vm32_vm0, %v11452_v3 }
   0xb   :  { %93 = vst.msk [vmem:[#allocation2 + $0xd8] sm:$0xff] %vm32_vm0, %v11452_v3  ;;  %95 = vst.msk [vmem:[#allocation2 + $0x118] sm:$0xff] %vm32_vm0, %v11452_v3 }
   0xc   :  { %97 = vst.msk [vmem:[#allocation2 + $0x158] sm:$0xff] %vm32_vm0, %v11452_v3  ;;  %103 = vst.msk [vmem:[#allocation2 + $0x218] sm:$0xff] %vm32_vm0, %v11452_v3  ;;  %220 = vrot.lane.b32.xlu1 %v8116_v6, %s7984_s11  ;;  %218 = vrot.lane.b32.xlu0 %v8118_v7, %s7984_s11 }
   0xd   :  { %109 = vst.msk [vmem:[#allocation2 + $0x2d8] sm:$0xff] %vm32_vm0, %v11452_v3  ;;  %111 = vst.msk [vmem:[#allocation2 + $0x318] sm:$0xff] %vm32_vm0, %v11452_v3 }
   0xe   :  { %113 = vst.msk [vmem:[#allocation2 + $0x358] sm:$0xff] %vm32_vm0, %v11452_v3  ;;  %115 = vst.msk [vmem:[#allocation2 + $0x398] sm:$0xff] %vm32_vm0, %v11452_v3 }
   0xf   :  { %141 = vst.msk [vmem:[#allocation2 + $0x38] sm:$0xff] %vm32_vm0, %v11452_v3  ;;  %359 = vst [vmem:[#allocation2 + $0xa0] sm:$0xf] %v8116_v6 }
  0x10   :  { %86 = vst.msk [vmem:[#allocation2 + $0x10] sm:$0xff] %vm30_vm1, %v11452_v3  ;;  %88 = vst.msk [vmem:[#allocation2 + $0x50] sm:$0xff] %vm30_vm1, %v11452_v3  ;;  %254 = vrot.lane.b32.xlu1 %v8116_v6, %s7983_s0  ;;  %252 = vrot.lane.b32.xlu0 %v8118_v7, %s7983_s0 }
  0x11   :  { %90 = vst.msk [vmem:[#allocation2 + $0x90] sm:$0xff] %vm30_vm1, %v11452_v3  ;;  %92 = vst.msk [vmem:[#allocation2 + $0xd0] sm:$0xff] %vm30_vm1, %v11452_v3 }
  0x12   :  { %94 = vst.msk [vmem:[#allocation2 + $0x110] sm:$0xff] %vm30_vm1, %v11452_v3  ;;  %96 = vst.msk [vmem:[#allocation2 + $0x150] sm:$0xff] %vm30_vm1, %v11452_v3 }
  0x13   :  { %98 = vst.msk [vmem:[#allocation2 + $0x190] sm:$0xff] %vm30_vm1, %v11452_v3  ;;  %100 = vst.msk [vmem:[#allocation2 + $0x1d0] sm:$0xff] %vm30_vm1, %v11452_v3 }
  0x14   :  { %102 = vst.msk [vmem:[#allocation2 + $0x210] sm:$0xff] %vm30_vm1, %v11452_v3  ;;  %106 = vst.msk [vmem:[#allocation2 + $0x290] sm:$0xff] %vm30_vm1, %v11452_v3  ;;  %284 = vrot.lane.b32.xlu1 %v8114_v5, %s7985_s12  ;;  %282 = vrot.lane.b32.xlu0 %v8112_v4, %s7985_s12 }
  0x15   :  { %108 = vst.msk [vmem:[#allocation2 + $0x2d0] sm:$0xff] %vm30_vm1, %v11452_v3  ;;  %110 = vst.msk [vmem:[#allocation2 + $0x310] sm:$0xff] %vm30_vm1, %v11452_v3 }
  0x16   :  { %112 = vst.msk [vmem:[#allocation2 + $0x350] sm:$0xff] %vm30_vm1, %v11452_v3  ;;  %114 = vst.msk [vmem:[#allocation2 + $0x390] sm:$0xff] %vm30_vm1, %v11452_v3 }
  0x17   :  { %116 = vst.msk [vmem:[#allocation2 + $0x3d0] sm:$0xff] %vm30_vm1, %v11452_v3  ;;  %118 = vst.msk [vmem:[#allocation2 + $0x410] sm:$0xff] %vm30_vm1, %v11452_v3 }
  0x18   :  { %120 = vst.msk [vmem:[#allocation2 + $0x450] sm:$0xff] %vm30_vm1, %v11452_v3  ;;  %126 = vst.msk [vmem:[#allocation2 + $0x510] sm:$0xff] %vm30_vm1, %v11452_v3  ;;  %318 = vrot.lane.b32.xlu1 %v8114_v5, %s7986_s13  ;;  %316 = vrot.lane.b32.xlu0 %v8112_v4, %s7986_s13 }
  0x19   :  { %132 = vst.msk [vmem:[#allocation2 + $0x5d0] sm:$0xff] %vm30_vm1, %v11452_v3  ;;  %140 = vst.msk [vmem:[#allocation2 + $0x30] sm:$0xff] %vm30_vm1, %v11452_v3 }
  0x1a   :  { %142 = vst.msk [vmem:[#allocation2 + $0x70] sm:$0xff] %vm30_vm1, %v11452_v3  ;;  %144 = vst.msk [vmem:[#allocation2 + $0xb0] sm:$0xff] %vm30_vm1, %v11452_v3 }
  0x1b   :  { %146 = vst.msk [vmem:[#allocation2 + $0xf0] sm:$0xff] %vm30_vm1, %v11452_v3  ;;  %148 = vst.msk [vmem:[#allocation2 + $0x130] sm:$0xff] %vm30_vm1, %v11452_v3 }
  0x1c   :  { %150 = vst.msk [vmem:[#allocation2 + $0x170] sm:$0xff] %vm30_vm1, %v11452_v3  ;;  %152 = vst.msk [vmem:[#allocation2 + $0x1b0] sm:$0xff] %vm30_vm1, %v11452_v3  ;;  %288 = vrot.lane.b32.xlu1 %v8116_v6, %s7985_s12  ;;  %286 = vrot.lane.b32.xlu0 %v8118_v7, %s7985_s12 }
  0x1d   :  { %154 = vst.msk [vmem:[#allocation2 + $0x1f0] sm:$0xff] %vm30_vm1, %v11452_v3  ;;  %156 = vst.msk [vmem:[#allocation2 + $0x230] sm:$0xff] %vm30_vm1, %v11452_v3 }
  0x1e   :  { %164 = vst.msk [vmem:[#allocation2 + $0x330] sm:$0xff] %vm30_vm1, %v11452_v3  ;;  %166 = vst.msk [vmem:[#allocation2 + $0x370] sm:$0xff] %vm30_vm1, %v11452_v3 }
  0x1f   :  { %168 = vst.msk [vmem:[#allocation2 + $0x3b0] sm:$0xff] %vm30_vm1, %v11452_v3  ;;  %170 = vst.msk [vmem:[#allocation2 + $0x3f0] sm:$0xff] %vm30_vm1, %v11452_v3 }
  0x20   :  { %172 = vst.msk [vmem:[#allocation2 + $0x430] sm:$0xff] %vm30_vm1, %v11452_v3  ;;  %174 = vst.msk [vmem:[#allocation2 + $0x470] sm:$0xff] %vm30_vm1, %v11452_v3  ;;  %322 = vrot.lane.b32.xlu1 %v8116_v6, %s7986_s13  ;;  %320 = vrot.lane.b32.xlu0 %v8118_v7, %s7986_s13 }
  0x21   :  { %176 = vst.msk [vmem:[#allocation2 + $0x4b0] sm:$0xff] %vm30_vm1, %v11452_v3  ;;  %178 = vst.msk [vmem:[#allocation2 + $0x4f0] sm:$0xff] %vm30_vm1, %v11452_v3 }
  0x22   :  { %180 = vst.msk [vmem:[#allocation2 + $0x530] sm:$0xff] %vm30_vm1, %v11452_v3  ;;  %182 = vst.msk [vmem:[#allocation2 + $0x570] sm:$0xff] %vm30_vm1, %v11452_v3 }
  0x23   :  { %184 = vst.msk [vmem:[#allocation2 + $0x5b0] sm:$0xff] %vm30_vm1, %v11452_v3  ;;  %186 = vst.msk [vmem:[#allocation2 + $0x5f0] sm:$0xff] %vm30_vm1, %v11452_v3 }
  0x24   :  { %188 = vst.msk [vmem:[#allocation2 + $0x630] sm:$0xff] %vm30_vm1, %v11452_v3  ;;  %190 = vst.msk [vmem:[#allocation2 + $0x670] sm:$0xff] %vm30_vm1, %v11452_v3  ;;  %366 = vrot.lane.b32.xlu1 %v8118_v7, %s7987_s14  ;;  %364 = vrot.lane.b32.xlu0 %v8114_v5, %s7987_s14 }
  0x25   :  { %192 = vst.msk [vmem:[#allocation2 + $0x6b0] sm:$0xff] %vm30_vm1, %v11452_v3  ;;  %356 = vst [vmem:[#allocation2 + $0x88] sm:$0xf] %v8112_v4  ;;  %vm280_vm1 = vcmask 146436  }
  0x26   :  { %358 = vst [vmem:[#allocation2 + $0x98] sm:$0xf] %v8118_v7  ;;  %357 = vst [vmem:[#allocation2 + $0x90] sm:$0xf] %v8114_v5 }
  0x27   :  { %360 = vst [vmem:[#allocation2 + $0xa8] sm:$0xf] %v6860_v8  ;;  %361 = vst [vmem:[#allocation2 + $0xb0] sm:$0xf] %v8211_v9 }
  0x28   :  { %368 = vrot.lane.b32.xlu1 %v8116_v6, %s7987_s14  ;;  %362 = vrot.lane.b32.xlu0 %v8112_v4, %s7987_s14 }
  0x2c   :  { %398 = vrot.lane.b32.xlu1 %v8114_v5, %s7988_s15  ;;  %370 = vrot.lane.b32.xlu0 %v6860_v8, %s7987_s14 }
  0x30   :  { %432 = vrot.lane.b32.xlu1 %v8114_v5, %s7989_s16  ;;  %400 = vrot.lane.b32.xlu0 %v8118_v7, %s7988_s15 }
  0x34   :  { %396 = vrot.lane.b32.xlu1 %v8112_v4, %s7988_s15  ;;  %434 = vrot.lane.b32.xlu0 %v8118_v7, %s7989_s16 }
  0x38   :  { %404 = vrot.lane.b32.xlu1 %v6860_v8, %s7988_s15  ;;  %402 = vrot.lane.b32.xlu0 %v8116_v6, %s7988_s15 }
  0x3c   :  { %436 = vrot.lane.b32.xlu1 %v8116_v6, %s7989_s16  ;;  %430 = vrot.lane.b32.xlu0 %v8112_v4, %s7989_s16 }
  0x40   :  { %464 = vrot.lane.b32.xlu1 %v8112_v4, %s7990_s17  ;;  %438 = vrot.lane.b32.xlu0 %v6860_v8, %s7989_s16 }
  0x44   :  { %468 = vrot.lane.b32.xlu1 %v8118_v7, %s7990_s17  ;;  %466 = vrot.lane.b32.xlu0 %v8114_v5, %s7990_s17 }
  0x48   :  { %472 = vrot.lane.b32.xlu1 %v6860_v8, %s7990_s17  ;;  %470 = vrot.lane.b32.xlu0 %v8116_v6, %s7990_s17 }
  0x4c   :  { %224 = vrot.lane.b32.xlu1 %v8211_v9, %s7984_s11  ;;  %222 = vrot.lane.b32.xlu0 %v6860_v8, %s7984_s11 }
  0x50   :  { %258 = vrot.lane.b32.xlu1 %v8211_v9, %s7983_s0  ;;  %256 = vrot.lane.b32.xlu0 %v6860_v8, %s7983_s0 }
  0x54   :  { %292 = vrot.lane.b32.xlu1 %v8211_v9, %s7985_s12  ;;  %290 = vrot.lane.b32.xlu0 %v6860_v8, %s7985_s12 }
  0x58   :  { %326 = vrot.lane.b32.xlu1 %v8211_v9, %s7986_s13  ;;  %324 = vrot.lane.b32.xlu0 %v6860_v8, %s7986_s13 }
  0x5c   :  { %406 = vrot.lane.b32.xlu1 %v8211_v9, %s7988_s15  ;;  %372 = vrot.lane.b32.xlu0 %v8211_v9, %s7987_s14 }
  0x60   :  { %474 = vrot.lane.b32.xlu1 %v8211_v9, %s7990_s17  ;;  %440 = vrot.lane.b32.xlu0 %v8211_v9, %s7989_s16 }
  0x64   :  { %539 = vperm.xlu1 %7368, %v531_v10   ;;  %534 = vperm.xlu0 %7367, %v530_v11  }
  0x76   :  { %v249_v12 = vpop.permute.xlu1 %248  ;;  %v215_v13 = vpop.permute.xlu0 %214 }
  0x77   :  { %274 = vst.msk [vmem:[#allocation2 + $0x8] sm:$0xf0] %vm273_vm2, %v249_v12  ;;  %vm547_vm2 = vcmask 588800  }
  0x78   :  { %240 = vst.msk [vmem:[#allocation2 + $0x8] sm:$0xf] %vm239_vm3, %v215_v13  ;;  %vm428_vm3 = vcmask 904192  }
  0x7a   :  { %v251_v14 = vpop.permute.xlu1 %250  ;;  %v217_v15 = vpop.permute.xlu0 %216 }
  0x7b   :  { %v261_v16 = vsel %vm11450_vm4, %v249_v12, %v251_v14  ;;  %v227_v17 = vsel %vm226_vm5, %v215_v13, %v217_v15 }
  0x7c   :  { %275 = vst [vmem:[#allocation2 + $0x10] sm:$0xf0] %v261_v16  ;;  %241 = vst [vmem:[#allocation2 + $0x10] sm:$0xf] %v227_v17 }
  0x7e   :  { %v8315_v18 = vpop.permute.xlu1 %220  ;;  %v219_v19 = vpop.permute.xlu0 %218 }
  0x7f   :  { %v228_v20 = vsel %vm226_vm5, %v217_v15, %v219_v19  ;;  %v229_v21 = vsel %vm226_vm5, %v219_v19, %v8315_v18  ;;  %v500_v27 = vld [vmem:[#allocation2 + $0x8] sm:$0xff] }
  0x80   :  { %242 = vst [vmem:[#allocation2 + $0x18] sm:$0xf] %v228_v20  ;;  %243 = vst [vmem:[#allocation2 + $0x20] sm:$0xf] %v229_v21 }
  0x82   :  { %v8320_v22 = vpop.permute.xlu1 %254  ;;  %v253_v23 = vpop.permute.xlu0 %252 }
  0x83   :  { %v262_v24 = vsel %vm11450_vm4, %v251_v14, %v253_v23  ;;  %v263_v25 = vsel %vm11450_vm4, %v253_v23, %v8320_v22  ;;  %v501_v26 = vld [vmem:[#allocation2 + $0x10] sm:$0xff] }
  0x84   :  { %276 = vst [vmem:[#allocation2 + $0x18] sm:$0xf0] %v262_v24  ;;  %277 = vst [vmem:[#allocation2 + $0x20] sm:$0xf0] %v263_v25  ;;  %570 = vmatprep.subr.bf16.mxu0 %v501_v26 }
  0x85   :  { %571 = vmatpush1.bf16.msra.mxu0 %v500_v27 }
  0x86   :  { %v285_v28 = vpop.permute.xlu1 %284  ;;  %v283_v29 = vpop.permute.xlu0 %282 }
  0x87   :  { %v295_v30 = vsel %vm11448_vm6, %v283_v29, %v285_v28  ;;  %308 = vst.msk [vmem:[#allocation2 + $0x48] sm:$0xf] %vm307_vm7, %v283_v29  ;;  %vm394_vm7 = vcmask 1039364  }
  0x88   :  { %309 = vst [vmem:[#allocation2 + $0x50] sm:$0xf] %v295_v30 }
  0x8a   :  { %v319_v31 = vpop.permute.xlu1 %318  ;;  %v317_v32 = vpop.permute.xlu0 %316 }
  0x8b   :  { %v329_v33 = vsel %vm328_vm8, %v317_v32, %v319_v31  ;;  %342 = vst.msk [vmem:[#allocation2 + $0x48] sm:$0xf0] %vm341_vm9, %v317_v32  ;;  %v503_v34 = vld [vmem:[#allocation2 + $0x20] sm:$0xff]  ;;  %v502_v35 = vld [vmem:[#allocation2 + $0x18] sm:$0xff]  ;;  %vm496_vm9 = vcmask 887808  }
  0x8c   :  { %343 = vst [vmem:[#allocation2 + $0x50] sm:$0xf0] %v329_v33  ;;  %613 = vmatprep.subr.bf16.mxu1 %v503_v34 }
  0x8d   :  { %614 = vmatpush1.bf16.msra.mxu1 %v502_v35 }
  0x8e   :  { %v8327_v36 = vpop.permute.xlu1 %288  ;;  %v287_v37 = vpop.permute.xlu0 %286 }
  0x8f   :  { %v296_v38 = vsel %vm11448_vm6, %v285_v28, %v287_v37  ;;  %v297_v39 = vsel %vm11448_vm6, %v287_v37, %v8327_v36 }
  0x90   :  { %310 = vst [vmem:[#allocation2 + $0x58] sm:$0xf] %v296_v38  ;;  %311 = vst [vmem:[#allocation2 + $0x60] sm:$0xf] %v297_v39  ;;  %v8373_v39 = vld [vmem:[%s11437_s1] ss:$16 sps:$4 sm:$0xff]  }
  0x92   :  { %v8332_v40 = vpop.permute.xlu1 %322  ;;  %v321_v41 = vpop.permute.xlu0 %320  ;;  %v506_v45 = vld [vmem:[#allocation2 + $0x48] sm:$0xff] }
  0x93   :  { %v330_v42 = vsel %vm328_vm8, %v319_v31, %v321_v41  ;;  %v331_v43 = vsel %vm328_vm8, %v321_v41, %v8332_v40  ;;  %v507_v44 = vld [vmem:[#allocation2 + $0x50] sm:$0xff] }
  0x94   :  { %344 = vst [vmem:[#allocation2 + $0x58] sm:$0xf0] %v330_v42  ;;  %345 = vst [vmem:[#allocation2 + $0x60] sm:$0xf0] %v331_v43  ;;  %572 = vmatprep.subr.bf16.mxu0 %v507_v44 }
  0x95   :  { %573 = vmatpush1.bf16.msra.mxu0 %v506_v45 }
  0x96   :  { %v367_v46 = vpop.permute.xlu1 %366  ;;  %v365_v47 = vpop.permute.xlu0 %364 }
  0x97   :  { %v376_v48 = vsel %vm374_vm10, %v365_v47, %v367_v46 }
  0x98   :  { %390 = vst [vmem:[#allocation2 + $0x90] sm:$0xf0] %v376_v48 }
  0x9a   :  { %v369_v49 = vpop.permute.xlu1 %368  ;;  %v363_v50 = vpop.permute.xlu0 %362 }
  0x9b   :  { %v377_v51 = vsel %vm374_vm10, %v367_v46, %v369_v49  ;;  %v375_v52 = vsel %vm374_vm10, %v363_v50, %v365_v47  ;;  %v509_v53 = vld [vmem:[#allocation2 + $0x60] sm:$0xff]  ;;  %v508_v54 = vld [vmem:[#allocation2 + $0x58] sm:$0xff] }
  0x9c   :  { %391 = vst [vmem:[#allocation2 + $0x98] sm:$0xf0] %v377_v51  ;;  %389 = vst [vmem:[#allocation2 + $0x88] sm:$0xf0] %v375_v52  ;;  %615 = vmatprep.subr.bf16.mxu1 %v509_v53 }
  0x9d   :  { %616 = vmatpush1.bf16.msra.mxu1 %v508_v54 }
  0x9e   :  { %v399_v55 = vpop.permute.xlu1 %398  ;;  %v8340_v56 = vpop.permute.xlu0 %370 }
  0x9f   :  { %v378_v57 = vsel %vm374_vm10, %v369_v49, %v8340_v56  ;;  %v513_v58 = vld [vmem:[#allocation2 + $0x90] sm:$0xff] }
  0xa0   :  { %392 = vst [vmem:[#allocation2 + $0xa0] sm:$0xf0] %v378_v57  ;;  %574 = vmatprep.subr.bf16.mxu0 %v513_v58 }
  0xa2   :  { %v433_v59 = vpop.permute.xlu1 %432  ;;  %v401_v60 = vpop.permute.xlu0 %400 }
  0xa3   :  { %v410_v61 = vsel %vm11447_vm11, %v399_v55, %v401_v60  ;;  %v512_v62 = vld [vmem:[#allocation2 + $0x88] sm:$0xff]  ;;  %v514_v5 = vld [vmem:[#allocation2 + $0x98] sm:$0xff] }
  0xa4   :  { %424 = vst [vmem:[#allocation2 + $0xd0] sm:$0xf] %v410_v61  ;;  %575 = vmatpush1.bf16.msra.mxu0 %v512_v62 }
  0xa6   :  { %v397_v63 = vpop.permute.xlu1 %396  ;;  %v435_v0 = vpop.permute.xlu0 %434 }
  0xa7   :  { %v409_v1 = vsel %vm11447_vm11, %v397_v63, %v399_v55  ;;  %v444_v2 = vsel %vm11446_vm12, %v433_v59, %v435_v0  ;;  %v515_v4 = vld [vmem:[#allocation2 + $0xa0] sm:$0xff] }
  0xa8   :  { %423 = vst [vmem:[#allocation2 + $0xc8] sm:$0xf] %v409_v1  ;;  %458 = vst [vmem:[#allocation2 + $0xd0] sm:$0xf0] %v444_v2  ;;  %617 = vmatprep.subr.bf16.mxu1 %v515_v4 }
  0xa9   :  { %618 = vmatpush1.bf16.msra.mxu1 %v514_v5 }
  0xaa   :  { %v8347_v6 = vpop.permute.xlu1 %404  ;;  %v403_v7 = vpop.permute.xlu0 %402 }
  0xab   :  { %v411_v8 = vsel %vm11447_vm11, %v401_v60, %v403_v7  ;;  %v412_v9 = vsel %vm11447_vm11, %v403_v7, %v8347_v6 }
  0xac   :  { %425 = vst [vmem:[#allocation2 + $0xd8] sm:$0xf] %v411_v8  ;;  %426 = vst [vmem:[#allocation2 + $0xe0] sm:$0xf] %v412_v9  ;;  %v712_v8 = vlaneseq }
  0xae   :  { %v437_v10 = vpop.permute.xlu1 %436  ;;  %v431_v11 = vpop.permute.xlu0 %430  ;;  %v8403_v9 = vshrl.u32 %v712_v8, 7 }
  0xaf   :  { %v445_v12 = vsel %vm11446_vm12, %v435_v0, %v437_v10  ;;  %v443_v13 = vsel %vm11446_vm12, %v431_v11, %v433_v59  ;;  %v519_v14 = vld [vmem:[#allocation2 + $0xd0] sm:$0xff] }
  0xb0   :  { %459 = vst [vmem:[#allocation2 + $0xd8] sm:$0xf0] %v445_v12  ;;  %457 = vst [vmem:[#allocation2 + $0xc8] sm:$0xf0] %v443_v13  ;;  %576 = vmatprep.subr.bf16.mxu0 %v519_v14  ;;  %v8411_v12 = vld [vmem:[%s11439_s3] sm:$0x3f] }
  0xb1   :  { %11469 = vst [vmem:[#allocation3_spill] sm:$0xff] %v8403_v9  ;;  %v718_v13 = vsub.s32 1, %v8403_v9  ;;  %s7996_s3 = smov 117  }
  0xb2   :  { %v465_v15 = vpop.permute.xlu1 %464  ;;  %v8354_v16 = vpop.permute.xlu0 %438 }
  0xb3   :  { %v446_v17 = vsel %vm11446_vm12, %v437_v10, %v8354_v16  ;;  %v714_v10 = vsub.s32 0, %v8403_v9 }
  0xb4   :  { %460 = vst [vmem:[#allocation2 + $0xe0] sm:$0xf0] %v446_v17 }
  0xb6   :  { %v469_v19 = vpop.permute.xlu1 %468  ;;  %v467_v20 = vpop.permute.xlu0 %466 }
  0xb7   :  { %v477_v21 = vsel %vm11445_vm13, %v465_v15, %v467_v20  ;;  %v478_v23 = vsel %vm11445_vm13, %v467_v20, %v469_v19  ;;  %v518_v24 = vld [vmem:[#allocation2 + $0xc8] sm:$0xff]  ;;  %v520_v30 = vld [vmem:[#allocation2 + $0xd8] sm:$0xff] }
  0xb8   :  { %491 = vst [vmem:[#allocation2 + $0x108] sm:$0xf] %v477_v21  ;;  %492 = vst [vmem:[#allocation2 + $0x110] sm:$0xf] %v478_v23  ;;  %577 = vmatpush1.bf16.msra.mxu0 %v518_v24  ;;  %v8426_v23 = vrot.slane %v8411_v12, %v718_v13 }
  0xba   :  { %v8360_v25 = vpop.permute.xlu1 %472  ;;  %v471_v26 = vpop.permute.xlu0 %470  ;;  %11471 = vst [vmem:[#allocation5_spill] sm:$0xff] %v8426_v23 }
  0xbb   :  { %v479_v27 = vsel %vm11445_vm13, %v469_v19, %v471_v26  ;;  %v480_v28 = vsel %vm11445_vm13, %v471_v26, %v8360_v25  ;;  %v521_v29 = vld [vmem:[#allocation2 + $0xe0] sm:$0xff]  ;;  %v8420_v19 = vrot.slane %v8411_v12, %v714_v10 }
  0xbc   :  { %493 = vst [vmem:[#allocation2 + $0x118] sm:$0xf] %v479_v27  ;;  %494 = vst [vmem:[#allocation2 + $0x120] sm:$0xf] %v480_v28  ;;  %619 = vmatprep.subr.bf16.mxu1 %v521_v29  ;;  %v722_v27 = vsub.s32 2, %v8403_v9 }
  0xbd   :  { %620 = vmatpush1.bf16.msra.mxu1 %v520_v30  ;;  %11470 = vst [vmem:[#allocation4_spill] sm:$0xff] %v8420_v19 }
  0xbe   :  { %v225_v31 = vpop.permute.xlu1 %224  ;;  %v223_v32 = vpop.permute.xlu0 %222 }
  0xbf   :  { %247 = vst.msk [vmem:[#allocation2 + $0x38] sm:$0xf] %vm246_vm14, %v225_v31  ;;  %v230_v33 = vsel %vm226_vm5, %v8315_v18, %v223_v32  ;;  %v231_v34 = vsel %vm226_vm5, %v223_v32, %v225_v31  ;;  %v525_v35 = vld [vmem:[#allocation2 + $0x110] sm:$0xf]  ;;  %v524_v37 = vld [vmem:[#allocation2 + $0x108] sm:$0xf] }
  0xc0   :  { %244 = vst [vmem:[#allocation2 + $0x28] sm:$0xf] %v230_v33  ;;  %245 = vst [vmem:[#allocation2 + $0x30] sm:$0xf] %v231_v34  ;;  %6863 = vmatprep.subr.msk.bf16.mxu0 %vm551_vm15, %v525_v35  ;;  %v553_v38 = vsel %vm551_vm15, %v524_v37, 0  ;;  %vm462_vm14 = vcmask 900100  }
  0xc1   :  { %579 = vmatpush1.bf16.msra.mxu0 %v553_v38  ;;  %v726_v31 = vsub.s32 3, %v8403_v9 }
  0xc2   :  { %v259_v41 = vpop.permute.xlu1 %258  ;;  %v257_v18 = vpop.permute.xlu0 %256 }
  0xc3   :  { %281 = vst.msk [vmem:[#allocation2 + $0x38] sm:$0xf0] %vm280_vm1, %v259_v41  ;;  %v264_v42 = vsel %vm11450_vm4, %v8320_v22, %v257_v18  ;;  %v265_v43 = vsel %vm11450_vm4, %v257_v18, %v259_v41  ;;  %v527_v44 = vld [vmem:[#allocation2 + $0x120] sm:$0xf]  ;;  %v526_v45 = vld [vmem:[#allocation2 + $0x118] sm:$0xf] }
  0xc4   :  { %278 = vst [vmem:[#allocation2 + $0x28] sm:$0xf0] %v264_v42  ;;  %279 = vst [vmem:[#allocation2 + $0x30] sm:$0xf0] %v265_v43  ;;  %6864 = vmatmul.mubr.msk.bf16.vlgmr.msra.gmra.mrb[0].mxu0 %vm547_vm2, %v8373_v39  ;;  %6865 = vmatprep.subr.msk.bf16.mxu1 %vm551_vm15, %v527_v44  ;;  %v559_v46 = vsel %vm551_vm15, %v526_v45, 0  ;;  %v8438_v43 = vrot.slane %v8411_v12, %v722_v27  ;;  %vm790_vm1 = vcmask 1047704  }
  0xc5   :  { %622 = vmatpush1.bf16.msra.mxu1 %v559_v46  ;;  %688 = vmatprep.mubr.bf16.mxu0 %v11452_v3 }
  0xc6   :  { %v293_v47 = vpop.permute.xlu1 %292  ;;  %v291_v48 = vpop.permute.xlu0 %290  ;;  %11472 = vst [vmem:[#allocation6_spill] sm:$0xff] %v8438_v43 }
  0xc7   :  { %v298_v22 = vsel %vm11448_vm6, %v8327_v36, %v291_v48  ;;  %v299_v49 = vsel %vm11448_vm6, %v291_v48, %v293_v47  ;;  %v8443_v48 = vrot.slane %v8411_v12, %v726_v31 }
  0xc8   :  { %312 = vst [vmem:[#allocation2 + $0x68] sm:$0xf] %v298_v22  ;;  %313 = vst [vmem:[#allocation2 + $0x70] sm:$0xf] %v299_v49  ;;  %6866 = vmatmul.mubr.msk.bf16.vlgmr.msra.gmra.mrb[0].mxu1 %vm547_vm2, %v8373_v39 }
  0xc9   :  { %11473 = vst [vmem:[#allocation7_spill] sm:$0xff] %v8443_v48 }
  0xca   :  { %v327_v50 = vpop.permute.xlu1 %326  ;;  %v325_v51 = vpop.permute.xlu0 %324 }
  0xcb   :  { %v332_v52 = vsel %vm328_vm8, %v8332_v40, %v325_v51  ;;  %v333_v53 = vsel %vm328_vm8, %v325_v51, %v327_v50  ;;  %v505_v54 = vld [vmem:[#allocation2 + $0x30] sm:$0xff]  ;;  %v504_v55 = vld [vmem:[#allocation2 + $0x28] sm:$0xff] }
  0xcc   :  { %346 = vst [vmem:[#allocation2 + $0x68] sm:$0xf0] %v332_v52  ;;  %347 = vst [vmem:[#allocation2 + $0x70] sm:$0xf0] %v333_v53  ;;  %656 = vmatprep.subr.bf16.mxu0 %v505_v54 }
  0xcd   :  { %657 = vmatpush1.bf16.msra.mxu0 %v504_v55 }
  0xce   :  { %v407_v36 = vpop.permute.xlu1 %406  ;;  %v373_v57 = vpop.permute.xlu0 %372 }
  0xcf   :  { %v413_v58 = vsel %vm11447_vm11, %v8347_v6, %v407_v36  ;;  %429 = vst.msk [vmem:[#allocation2 + $0xf0] sm:$0xf] %vm428_vm3, %v407_v36  ;;  %v379_v59 = vsel %vm374_vm10, %v8340_v56, %v373_v57  ;;  %vm11449_vm3 = vcmask 1047688  }
  0xd0   :  { %395 = vst.msk [vmem:[#allocation2 + $0xb0] sm:$0xf0] %vm394_vm7, %v373_v57  ;;  %427 = vst [vmem:[#allocation2 + $0xe8] sm:$0xf] %v413_v58  ;;  %vm889_vm7 = vcmask 1047560  }
  0xd1   :  { %393 = vst [vmem:[#allocation2 + $0xa8] sm:$0xf0] %v379_v59  ;;  %v730_v59 = vsub.s32 4, %v8403_v9 }
  0xd2   :  { %v475_v40 = vpop.permute.xlu1 %474  ;;  %v441_v60 = vpop.permute.xlu0 %440 }
  0xd3   :  { %v481_v61 = vsel %vm11445_vm13, %v8360_v25, %v475_v40  ;;  %497 = vst.msk [vmem:[#allocation2 + $0x130] sm:$0xf] %vm496_vm9, %v475_v40  ;;  %v447_v62 = vsel %vm11446_vm12, %v8354_v16, %v441_v60  ;;  %v511_v63 = vld [vmem:[#allocation2 + $0x70] sm:$0xff]  ;;  %v510_v0 = vld [vmem:[#allocation2 + $0x68] sm:$0xff]  ;;  %vm2110_vm9 = vcmask 1047640  }
  0xd4   :  { %463 = vst.msk [vmem:[#allocation2 + $0xf0] sm:$0xf0] %vm462_vm14, %v441_v60  ;;  %495 = vst [vmem:[#allocation2 + $0x128] sm:$0xf] %v481_v61  ;;  %658 = vmatprep.subr.bf16.mxu0 %v511_v63  ;;  %v734_v60 = vsub.s32 5, %v8403_v9  ;;  %vm2105_vm14 = vcmask 89088  }
  0xd5   :  { %461 = vst [vmem:[#allocation2 + $0xe8] sm:$0xf0] %v447_v62  ;;  %659 = vmatpush1.bf16.msra.mxu0 %v510_v0 }
  0xd7   :  { %v517_v56 = vld [vmem:[#allocation2 + $0xb0] sm:$0xff] }
  0xd8   :  { %660 = vmatprep.subr.bf16.mxu0 %v517_v56  ;;  %v516_v1 = vld [vmem:[#allocation2 + $0xa8] sm:$0xff] }
  0xd9   :  { %661 = vmatpush1.bf16.msra.mxu0 %v516_v1  ;;  %v8486_v1 = vrot.slane %v8411_v12, %v730_v59 }
  0xda   :  { %v529_v5 = vld [vmem:[#allocation2 + $0x130] sm:$0xf] }
  0xdb   :  { %v523_v2 = vld [vmem:[#allocation2 + $0xf0] sm:$0xff]  ;;  %v528_v6 = vld [vmem:[#allocation2 + $0x128] sm:$0xf]  ;;  %11474 = vst [vmem:[#allocation8_spill] sm:$0xff] %v8486_v1 }
  0xdc   :  { %662 = vmatprep.subr.bf16.mxu0 %v523_v2  ;;  %v522_v4 = vld [vmem:[#allocation2 + $0xe8] sm:$0xff]  ;;  %v565_v7 = vsel %vm551_vm15, %v528_v6, 0  ;;  %v8494_v6 = vrot.slane %v8411_v12, %v734_v60 }
  0xdd   :  { %663 = vmatpush1.bf16.msra.mxu0 %v522_v4 }
  0xde   :  { %6867 = vmatprep.subr.msk.bf16.mxu0 %vm551_vm15, %v529_v5  ;;  %11475 = vst [vmem:[#allocation9_spill] sm:$0xff] %v8494_v6  ;;  %vm1113_vm15 = vcmask 130048  }
  0xe1   :  { %665 = vmatpush1.bf16.msra.mxu0 %v565_v7 }
  0xe3   :  { %v8406_v11 = vpop.permute.xlu0 %534  ;;  %v8414_v15 = vpop.permute.xlu1 %539 }
  0xe4   :  { %6868 = vmatmul.mubr.msk.bf16.vlgmr.msra.gmra.mrb[4].mxu0 %vm547_vm2, %v8373_v39  ;;  %vm11451_vm2 = vcmask 1047696  }
 0x197   :  { %v604_v14 = vpop.f32.mrb[0].mxu0 }
 0x198   :  { %v606_v16 = vpop.f32.mrb[1].mxu0  ;;  %v605_v17 = vadd.f32 %v604_v14, %v8406_v11 }
 0x199   :  { %v608_v20 = vpop.f32.mrb[2].mxu0  ;;  %v607_v21 = vadd.f32 %v606_v16, %v8406_v11 }
 0x19a   :  { %v609_v24 = vadd.f32 %v608_v20, %v8414_v15  ;;  %v699_v25 = vmax.f32 %v605_v17, 0.0  ;;  %v610_v26 = vpop.f32.mrb[3].mxu0 }
 0x19b   :  { %v611_v28 = vadd.f32 %v610_v26, %v8414_v15  ;;  %v700_v29 = vmax.f32 %v607_v21, 0.0  ;;  %v647_v30 = vpop.f32.mrb[0].mxu1 }
 0x19c   :  { %v705_v32 = vmax.f32 %v609_v24, 0.0  ;;  %v742_v33 = vmul.f32 %v8420_v19, %v699_v25  ;;  %v648_v34 = vadd.f32 %v647_v30, %v8406_v11  ;;  %v649_v35 = vpop.f32.mrb[1].mxu1  ;;  %v1092_v24 = vld [vmem:[%s11438_s2 + $0x10] sm:$0xff]  ;;  %v1093_v25 = vld [vmem:[%s11438_s2 + $0x18] sm:$0xff] }
 0x19d   :  { %v706_v37 = vmax.f32 %v611_v28, 0.0  ;;  %v743_v38 = vmul.f32 %v8426_v23, %v700_v29  ;;  %v650_v39 = vadd.f32 %v649_v35, %v8406_v11  ;;  %v651_v41 = vpop.f32.mrb[2].mxu1 }
 0x19e   :  { %v748_v18 = vmul.f32 %v8420_v19, %v705_v32  ;;  %v701_v42 = vmax.f32 %v648_v34, 0.0  ;;  %v652_v44 = vadd.f32 %v651_v41, %v8414_v15  ;;  %v653_v45 = vpop.f32.mrb[3].mxu1 }
 0x19f   :  { %v749_v46 = vmul.f32 %v8426_v23, %v706_v37  ;;  %v702_v47 = vmax.f32 %v650_v39, 0.0  ;;  %v654_v22 = vadd.f32 %v653_v45, %v8414_v15 }
 0x1a0   :  { %v8446_v49 = vpack.c.bf16 %v748_v18, %v742_v33  ;;  %v707_v50 = vmax.f32 %v652_v44, 0.0  ;;  %v744_v53 = vmul.f32 %v8438_v43, %v701_v42 }
 0x1a1   :  { %v8448_v51 = vpack.c.bf16 %v749_v46, %v743_v38  ;;  %v708_v52 = vmax.f32 %v654_v22, 0.0  ;;  %v745_v55 = vmul.f32 %v8443_v48, %v702_v47 }
 0x1a2   :  { %v750_v54 = vmul.f32 %v8438_v43, %v707_v50  ;;  %766 = vrot.lane.b32.xlu1 %v8446_v49, %s7984_s11 }
 0x1a3   :  { %v751_v36 = vmul.f32 %v8443_v48, %v708_v52 }
 0x1a4   :  { %v8456_v57 = vpack.c.bf16 %v750_v54, %v744_v53 }
 0x1a5   :  { %v8458_v58 = vpack.c.bf16 %v751_v36, %v745_v55 }
 0x1a6   :  { %900 = vst [vmem:[#allocation2 + $0x118] sm:$0xff] %v8456_v57  ;;  %908 = vrot.lane.b32.xlu0 %v8456_v57, %s7987_s14  ;;  %770 = vrot.lane.b32.xlu1 %v8456_v57, %s7984_s11 }
 0x1aa   :  { %937 = vrot.lane.b32.xlu0 %v8446_v49, %s7988_s15  ;;  %799 = vrot.lane.b32.xlu1 %v8446_v49, %s7983_s0 }
 0x1ae   :  { %974 = vrot.lane.b32.xlu0 %v8456_v57, %s7989_s16  ;;  %803 = vrot.lane.b32.xlu1 %v8456_v57, %s7983_s0 }
 0x1b2   :  { %768 = vrot.lane.b32.xlu0 %v8448_v51, %s7984_s11  ;;  %832 = vrot.lane.b32.xlu1 %v8446_v49, %s7985_s12 }
 0x1b6   :  { %772 = vrot.lane.b32.xlu0 %v8458_v58, %s7984_s11  ;;  %836 = vrot.lane.b32.xlu1 %v8456_v57, %s7985_s12 }
 0x1b7   :  { %v690_v40 = vpop.f32.mrb[4].mxu0 }
 0x1b8   :  { %v691_v61 = vadd.f32 %v690_v40, %v8406_v11  ;;  %v692_v62 = vpop.f32.mrb[5].mxu0 }
 0x1b9   :  { %v693_v63 = vadd.f32 %v692_v62, %v8406_v11  ;;  %v694_v0 = vpop.f32.mrb[6].mxu0 }
 0x1ba   :  { %v703_v56 = vmax.f32 %v691_v61, 0.0  ;;  %v695_v2 = vadd.f32 %v694_v0, %v8414_v15  ;;  %v696_v4 = vpop.f32.mrb[7].mxu0  ;;  %801 = vrot.lane.b32.xlu0 %v8448_v51, %s7983_s0  ;;  %865 = vrot.lane.b32.xlu1 %v8446_v49, %s7986_s13 }
 0x1bb   :  { %v704_v5 = vmax.f32 %v693_v63, 0.0  ;;  %v697_v7 = vadd.f32 %v696_v4, %v8414_v15  ;;  %v8540_v15 = vld [vmem:[%s11437_s1 + $0x24] ss:$16 sps:$4 sm:$0xff]  }
 0x1bc   :  { %v709_v8 = vmax.f32 %v695_v2, 0.0  ;;  %v746_v14 = vmul.f32 %v8486_v1, %v703_v56  ;;  %6871 = vmatprep.mubr.msk.bf16.mxu1 %vm1113_vm15, %v8540_v15  ;;  %6872 = vmatprep.mubr.msk.bf16.mxu0 %vm1113_vm15, %v8540_v15 }
 0x1bd   :  { %v710_v11 = vmax.f32 %v697_v7, 0.0  ;;  %v747_v17 = vmul.f32 %v8494_v6, %v704_v5 }
 0x1be   :  { %v752_v16 = vmul.f32 %v8486_v1, %v709_v8  ;;  %805 = vrot.lane.b32.xlu0 %v8458_v58, %s7983_s0  ;;  %869 = vrot.lane.b32.xlu1 %v8456_v57, %s7986_s13 }
 0x1bf   :  { %v753_v20 = vmul.f32 %v8494_v6, %v710_v11 }
 0x1c0   :  { %v8505_v12 = vpack.c.bf16 %v752_v16, %v746_v14 }
 0x1c1   :  { %v8507_v21 = vpack.c.bf16 %v753_v20, %v747_v17 }
 0x1c2   :  { %834 = vrot.lane.b32.xlu0 %v8448_v51, %s7985_s12  ;;  %904 = vrot.lane.b32.xlu1 %v8446_v49, %s7987_s14 }
 0x1c6   :  { %838 = vrot.lane.b32.xlu0 %v8458_v58, %s7985_s12  ;;  %941 = vrot.lane.b32.xlu1 %v8456_v57, %s7988_s15 }
 0x1ca   :  { %867 = vrot.lane.b32.xlu0 %v8448_v51, %s7986_s13  ;;  %970 = vrot.lane.b32.xlu1 %v8446_v49, %s7989_s16 }
 0x1ce   :  { %871 = vrot.lane.b32.xlu0 %v8458_v58, %s7986_s13  ;;  %906 = vrot.lane.b32.xlu1 %v8448_v51, %s7987_s14 }
 0x1d2   :  { %910 = vrot.lane.b32.xlu0 %v8458_v58, %s7987_s14  ;;  %943 = vrot.lane.b32.xlu1 %v8458_v58, %s7988_s15 }
 0x1d6   :  { %939 = vrot.lane.b32.xlu0 %v8448_v51, %s7988_s15  ;;  %972 = vrot.lane.b32.xlu1 %v8448_v51, %s7989_s16 }
 0x1da   :  { %976 = vrot.lane.b32.xlu0 %v8458_v58, %s7989_s16  ;;  %912 = vrot.lane.b32.xlu1 %v8505_v12, %s7987_s14 }
 0x1de   :  { %1005 = vrot.lane.b32.xlu0 %v8448_v51, %s7990_s17  ;;  %1007 = vrot.lane.b32.xlu1 %v8456_v57, %s7990_s17 }
 0x1e2   :  { %945 = vrot.lane.b32.xlu0 %v8505_v12, %s7988_s15  ;;  %978 = vrot.lane.b32.xlu1 %v8505_v12, %s7989_s16 }
 0x1e6   :  { %1003 = vrot.lane.b32.xlu0 %v8446_v49, %s7990_s17  ;;  %1009 = vrot.lane.b32.xlu1 %v8458_v58, %s7990_s17 }
 0x1ea   :  { %1011 = vrot.lane.b32.xlu0 %v8505_v12, %s7990_s17  ;;  %774 = vrot.lane.b32.xlu1 %v8505_v12, %s7984_s11 }
 0x1ee   :  { %776 = vrot.lane.b32.xlu0 %v8507_v21, %s7984_s11  ;;  %807 = vrot.lane.b32.xlu1 %v8505_v12, %s7983_s0 }
 0x1f2   :  { %809 = vrot.lane.b32.xlu0 %v8507_v21, %s7983_s0  ;;  %840 = vrot.lane.b32.xlu1 %v8505_v12, %s7985_s12 }
 0x1f6   :  { %842 = vrot.lane.b32.xlu0 %v8507_v21, %s7985_s12  ;;  %873 = vrot.lane.b32.xlu1 %v8505_v12, %s7986_s13 }
 0x1fa   :  { %875 = vrot.lane.b32.xlu0 %v8507_v21, %s7986_s13  ;;  %914 = vrot.lane.b32.xlu1 %v8507_v21, %s7987_s14 }
 0x1fe   :  { %947 = vrot.lane.b32.xlu0 %v8507_v21, %s7988_s15  ;;  %980 = vrot.lane.b32.xlu1 %v8507_v21, %s7989_s16 }
 0x202   :  { %1013 = vrot.lane.b32.xlu0 %v8507_v21, %s7990_s17  ;;  %1096 = vperm.xlu1 %7368, %v1092_v24  }
 0x206   :  { %1101 = vperm.xlu0 %7367, %v1093_v25  }
 0x214   :  { %v767_v26 = vpop.permute.xlu1 %766 }
 0x215   :  { %791 = vst.msk [vmem:[#allocation2 + $0x8] sm:$0xff] %vm790_vm1, %v767_v26 }
 0x218   :  { %v8591_v27 = vpop.permute.xlu0 %908  ;;  %v771_v28 = vpop.permute.xlu1 %770 }
 0x21c   :  { %v8593_v29 = vpop.permute.xlu0 %937  ;;  %v800_v30 = vpop.permute.xlu1 %799  ;;  %v1038_v37 = vld [vmem:[#allocation2 + $0x8] sm:$0xff] }
 0x21d   :  { %824 = vst.msk [vmem:[#allocation2 + $0x48] sm:$0xff] %vm11451_vm2, %v800_v30  ;;  %vm2199_vm2 = vcmask 957440  }
 0x220   :  { %v8596_v31 = vpop.permute.xlu0 %974  ;;  %v804_v32 = vpop.permute.xlu1 %803 }
 0x224   :  { %v769_v33 = vpop.permute.xlu0 %768  ;;  %v833_v34 = vpop.permute.xlu1 %832  ;;  %v1044_v47 = vld [vmem:[#allocation2 + $0x48] sm:$0xff] }
 0x225   :  { %v778_v35 = vsel %vm226_vm5, %v767_v26, %v769_v33  ;;  %857 = vst.msk [vmem:[#allocation2 + $0x88] sm:$0xff] %vm11449_vm3, %v833_v34  ;;  %v779_v18 = vsel %vm226_vm5, %v769_v33, %v771_v28  ;;  %vm2171_vm3 = vcmask 973824  }
 0x226   :  { %1117 = vmatprep.subr.bf16.mxu1 %v778_v35 }
 0x227   :  { %1118 = vmatpush1.bf16.msra.mxu1 %v1038_v37  ;;  %v1036_v37 = vld [vmem:[%s11437_s1 + $0x20] sm:$0xff] }
 0x228   :  { %v8600_v38 = vpop.permute.xlu0 %772  ;;  %v837_v39 = vpop.permute.xlu1 %836 }
 0x229   :  { %v780_v41 = vsel %vm226_vm5, %v771_v28, %v8600_v38 }
 0x22a   :  { %1160 = vmatprep.subr.bf16.mxu0 %v780_v41 }
 0x22b   :  { %1161 = vmatpush1.bf16.msra.mxu0 %v779_v18 }
 0x22c   :  { %v802_v42 = vpop.permute.xlu0 %801  ;;  %v866_v44 = vpop.permute.xlu1 %865  ;;  %v1050_v59 = vld [vmem:[#allocation2 + $0x88] sm:$0xff] }
 0x22d   :  { %v811_v45 = vsel %vm11450_vm4, %v800_v30, %v802_v42  ;;  %v812_v46 = vsel %vm11450_vm4, %v802_v42, %v804_v32  ;;  %890 = vst.msk [vmem:[#allocation2 + $0xc8] sm:$0xff] %vm889_vm7, %v866_v44 }
 0x22e   :  { %826 = vst [vmem:[#allocation2 + $0x58] sm:$0xff] %v812_v46  ;;  %1119 = vmatprep.subr.bf16.mxu1 %v811_v45 }
 0x22f   :  { %1120 = vmatpush1.bf16.msra.mxu1 %v1044_v47 }
 0x230   :  { %v8608_v22 = vpop.permute.xlu0 %805  ;;  %v870_v50 = vpop.permute.xlu1 %869 }
 0x231   :  { %v813_v52 = vsel %vm11450_vm4, %v804_v32, %v8608_v22 }
 0x232   :  { %1162 = vmatprep.subr.bf16.mxu0 %v813_v52 }
 0x233   :  { %1163 = vmatpush1.bf16.msra.mxu0 %v812_v46 }
 0x234   :  { %v835_v53 = vpop.permute.xlu0 %834  ;;  %v905_v54 = vpop.permute.xlu1 %904  ;;  %v1056_v2 = vld [vmem:[#allocation2 + $0xc8] sm:$0xff] }
 0x235   :  { %v844_v55 = vsel %vm11448_vm6, %v833_v34, %v835_v53  ;;  %v845_v36 = vsel %vm11448_vm6, %v835_v53, %v837_v39 }
 0x236   :  { %859 = vst [vmem:[#allocation2 + $0x98] sm:$0xff] %v845_v36  ;;  %1121 = vmatprep.subr.bf16.mxu1 %v844_v55 }
 0x237   :  { %1122 = vmatpush1.bf16.msra.mxu1 %v1050_v59 }
 0x238   :  { %v8614_v40 = vpop.permute.xlu0 %838  ;;  %v942_v60 = vpop.permute.xlu1 %941 }
 0x239   :  { %v846_v61 = vsel %vm11448_vm6, %v837_v39, %v8614_v40  ;;  %v1037_v39 = vld [vmem:[%s11437_s1 + $0x30] sm:$0xff] }
 0x23a   :  { %1164 = vmatprep.subr.bf16.mxu0 %v846_v61  ;;  %v6869_v45 = vcombine.low %v1036_v37, %v1037_v39  ;;  %v7404_v37 = vld [vmem:[%s11440_s5 + $0x84] ss:$8 sps:$4 sm:$0xff]   ;;  %v7402_v39 = vld [vmem:[%s11440_s5 + $0x80] ss:$8 sps:$4 sm:$0xff]  }
 0x23b   :  { %1165 = vmatpush1.bf16.msra.mxu0 %v845_v36 }
 0x23c   :  { %v868_v62 = vpop.permute.xlu0 %867  ;;  %v971_v63 = vpop.permute.xlu1 %970 }
 0x23d   :  { %v877_v0 = vsel %vm328_vm8, %v866_v44, %v868_v62  ;;  %v878_v56 = vsel %vm328_vm8, %v868_v62, %v870_v50 }
 0x23e   :  { %892 = vst [vmem:[#allocation2 + $0xd8] sm:$0xff] %v878_v56  ;;  %1123 = vmatprep.subr.bf16.mxu1 %v877_v0 }
 0x23f   :  { %1124 = vmatpush1.bf16.msra.mxu1 %v1056_v2 }
 0x240   :  { %v8620_v4 = vpop.permute.xlu0 %871  ;;  %v907_v5 = vpop.permute.xlu1 %906  ;;  %1125 = vmatprep.subr.bf16.mxu1 %v8448_v51 }
 0x241   :  { %v879_v7 = vsel %vm328_vm8, %v870_v50, %v8620_v4  ;;  %v917_v8 = vsel %vm374_vm10, %v907_v5, %v8591_v27  ;;  %v916_v17 = vsel %vm374_vm10, %v905_v54, %v907_v5 }
 0x242   :  { %931 = vst [vmem:[#allocation2 + $0x150] sm:$0xff] %v917_v8  ;;  %1166 = vmatprep.subr.bf16.mxu0 %v879_v7 }
 0x243   :  { %1126 = vmatpush1.bf16.msra.mxu1 %v8446_v49  ;;  %1167 = vmatpush1.bf16.msra.mxu0 %v878_v56 }
 0x244   :  { %v911_v11 = vpop.permute.xlu0 %910  ;;  %v944_v14 = vpop.permute.xlu1 %943  ;;  %1168 = vmatprep.subr.bf16.mxu0 %v8458_v58  ;;  %1127 = vmatprep.subr.bf16.mxu1 %v917_v8 }
 0x245   :  { %v918_v16 = vsel %vm374_vm10, %v8591_v27, %v911_v11  ;;  %v951_v51 = vsel %vm11447_vm11, %v942_v60, %v944_v14 }
 0x246   :  { %932 = vst [vmem:[#allocation2 + $0x158] sm:$0xff] %v918_v16 }
 0x247   :  { %1128 = vmatpush1.bf16.msra.mxu1 %v916_v17  ;;  %1169 = vmatpush1.bf16.msra.mxu0 %v8456_v57 }
 0x248   :  { %v940_v20 = vpop.permute.xlu0 %939  ;;  %v973_v24 = vpop.permute.xlu1 %972 }
 0x249   :  { %v949_v49 = vsel %vm11447_vm11, %v8593_v29, %v940_v20  ;;  %v950_v25 = vsel %vm11447_vm11, %v940_v20, %v942_v60  ;;  %v983_v58 = vsel %vm11446_vm12, %v973_v24, %v8596_v31  ;;  %v982_v29 = vsel %vm11446_vm12, %v971_v63, %v973_v24  ;;  %v7378_v20 = vld [vmem:[%s11440_s5] ss:$8 sps:$4 sm:$0xff]   ;;  %v7380_v24 = vld [vmem:[%s11440_s5 + $0x4] ss:$8 sps:$4 sm:$0xff]  }
 0x24a   :  { %964 = vst [vmem:[#allocation2 + $0x190] sm:$0xff] %v950_v25  ;;  %997 = vst [vmem:[#allocation2 + $0x1d0] sm:$0xff] %v983_v58  ;;  %1129 = vmatprep.subr.bf16.mxu1 %v950_v25  ;;  %v7381_v25 = vld [vmem:[%s11440_s5 + $0x10] ss:$8 sps:$4 sm:$0xff]  }
 0x24b   :  { %1130 = vmatpush1.bf16.msra.mxu1 %v949_v49  ;;  %v7383_v49 = vld [vmem:[%s11440_s5 + $0x14] ss:$8 sps:$4 sm:$0xff]  }
 0x24c   :  { %v977_v26 = vpop.permute.xlu0 %976  ;;  %v8639_v27 = vpop.permute.xlu1 %912  ;;  %1131 = vmatprep.subr.bf16.mxu1 %v983_v58  ;;  %v7386_v58 = vld [vmem:[%s11440_s5 + $0x24] ss:$8 sps:$4 sm:$0xff]  }
 0x24d   :  { %v984_v57 = vsel %vm11446_vm12, %v8596_v31, %v977_v26  ;;  %v919_v28 = vsel %vm374_vm10, %v911_v11, %v8639_v27 }
 0x24e   :  { %1170 = vmatprep.subr.bf16.mxu0 %v919_v28  ;;  %v7392_v28 = vld [vmem:[%s11440_s5 + $0x44] ss:$8 sps:$4 sm:$0xff]  }
 0x24f   :  { %1132 = vmatpush1.bf16.msra.mxu1 %v982_v29  ;;  %1171 = vmatpush1.bf16.msra.mxu0 %v918_v16  ;;  %v7390_v29 = vld [vmem:[%s11440_s5 + $0x40] ss:$8 sps:$4 sm:$0xff]  }
 0x250   :  { %v1006_v30 = vpop.permute.xlu0 %1005  ;;  %v1008_v32 = vpop.permute.xlu1 %1007 }
 0x251   :  { %v1016_v33 = vsel %vm11445_vm13, %v1006_v30, %v1008_v32 }
 0x252   :  { %1030 = vst [vmem:[#allocation2 + $0x210] sm:$0xff] %v1016_v33  ;;  %1133 = vmatprep.subr.bf16.mxu1 %v1016_v33  ;;  %v7398_v33 = vld [vmem:[%s11440_s5 + $0x64] ss:$8 sps:$4 sm:$0xff]  }
 0x254   :  { %v8647_v34 = vpop.permute.xlu0 %945  ;;  %v8649_v35 = vpop.permute.xlu1 %978 }
 0x255   :  { %v952_v31 = vsel %vm11447_vm11, %v944_v14, %v8647_v34  ;;  %v985_v41 = vsel %vm11446_vm12, %v977_v26, %v8649_v35  ;;  %v7384_v26 = vld [vmem:[%s11440_s5 + $0x20] ss:$8 sps:$4 sm:$0xff]  }
 0x256   :  { %1172 = vmatprep.subr.bf16.mxu0 %v952_v31  ;;  %v7399_v31 = vld [vmem:[%s11440_s5 + $0x70] ss:$8 sps:$4 sm:$0xff]  }
 0x257   :  { %1173 = vmatpush1.bf16.msra.mxu0 %v951_v51 }
 0x258   :  { %v1004_v18 = vpop.permute.xlu0 %1003  ;;  %v1010_v42 = vpop.permute.xlu1 %1009  ;;  %1174 = vmatprep.subr.bf16.mxu0 %v985_v41  ;;  %v7407_v41 = vld [vmem:[%s11440_s5 + $0x94] ss:$8 sps:$4 sm:$0xff]  }
 0x259   :  { %v1015_v44 = vsel %vm11445_vm13, %v1004_v18, %v1006_v30  ;;  %v1017_v52 = vsel %vm11445_vm13, %v1008_v32, %v1010_v42  ;;  %v7395_v30 = vld [vmem:[%s11440_s5 + $0x54] ss:$8 sps:$4 sm:$0xff]   ;;  %v7393_v32 = vld [vmem:[%s11440_s5 + $0x50] ss:$8 sps:$4 sm:$0xff]  }
 0x25a   :  { %1134 = vmatpush1.bf16.msra.mxu1 %v1015_v44  ;;  %v7405_v18 = vld [vmem:[%s11440_s5 + $0x90] ss:$8 sps:$4 sm:$0xff]   ;;  %v7408_v44 = vld [vmem:[%s11440_s5 + $0xa0] ss:$8 sps:$4 sm:$0xff]  }
 0x25b   :  { %1175 = vmatpush1.bf16.msra.mxu0 %v984_v57  ;;  %v7387_v57 = vld [vmem:[%s11440_s5 + $0x30] ss:$8 sps:$4 sm:$0xff]  }
 0x25c   :  { %v1012_v46 = vpop.permute.xlu0 %1011  ;;  %v775_v47 = vpop.permute.xlu1 %774 }
 0x25d   :  { %v1018_v50 = vsel %vm11445_vm13, %v1010_v42, %v1012_v46  ;;  %1150 = vmatmul.mubr.bf16.vlgmr.msra.gmra.mrb[4].mxu1 %v6869_v45  ;;  %v781_v36 = vsel %vm226_vm5, %v8600_v38, %v775_v47  ;;  %v7410_v42 = vld [vmem:[%s11440_s5 + $0xa4] ss:$8 sps:$4 sm:$0xff]  }
 0x25e   :  { %1176 = vmatprep.subr.bf16.mxu0 %v1018_v50  ;;  %6873 = vmatprep.mubr.msk.bf16.mxu1 %vm1113_vm15, %v8540_v15  ;;  %v7414_v50 = vld [vmem:[%s11440_s5 + $0xc0] ss:$8 sps:$4 sm:$0xff]  }
 0x25f   :  { %1177 = vmatpush1.bf16.msra.mxu0 %v1017_v52 }
 0x260   :  { %v777_v53 = vpop.permute.xlu0 %776  ;;  %v808_v54 = vpop.permute.xlu1 %807  ;;  %1968 = vmatprep.subr.bf16.mxu0 %v7380_v24  ;;  %v7422_v24 = vld [vmem:[%s11440_s5 + $0xe4] ss:$8 sps:$4 sm:$0xff]  }
 0x261   :  { %v782_v55 = vsel %vm226_vm5, %v775_v47, %v777_v53  ;;  %798 = vst.msk [vmem:[#allocation2 + $0x38] sm:$0xff] %vm226_vm5, %v777_v53  ;;  %v814_v15 = vsel %vm11450_vm4, %v8608_v22, %v808_v54  ;;  %v7416_v47 = vld [vmem:[%s11440_s5 + $0xc4] ss:$8 sps:$4 sm:$0xff]  }
 0x262   :  { %1193 = vmatmul.mubr.bf16.vlgmr.msra.gmra.mrb[8].mxu0 %v6869_v45  ;;  %1203 = vmatprep.subr.bf16.mxu1 %v782_v55 }
 0x263   :  { %1204 = vmatpush1.bf16.msra.mxu1 %v781_v36  ;;  %1969 = vmatpush1.bf16.msra.mxu0 %v7378_v20  ;;  %v7420_v20 = vld [vmem:[%s11440_s5 + $0xe0] ss:$8 sps:$4 sm:$0xff]  }
 0x264   :  { %v810_v59 = vpop.permute.xlu0 %809  ;;  %v841_v60 = vpop.permute.xlu1 %840  ;;  %1970 = vmatprep.subr.bf16.mxu0 %v7383_v49 }
 0x265   :  { %v815_v61 = vsel %vm11450_vm4, %v808_v54, %v810_v59  ;;  %v847_v56 = vsel %vm11448_vm6, %v8614_v40, %v841_v60  ;;  %vm2185_vm4 = vcmask 965632  }
 0x266   :  { %1205 = vmatprep.subr.bf16.mxu1 %v815_v61  ;;  %v7419_v61 = vld [vmem:[%s11440_s5 + $0xd4] ss:$8 sps:$4 sm:$0xff]  }
 0x267   :  { %1206 = vmatpush1.bf16.msra.mxu1 %v814_v15  ;;  %1971 = vmatpush1.bf16.msra.mxu0 %v7381_v25 }
 0x268   :  { %v843_v62 = vpop.permute.xlu0 %842  ;;  %v874_v63 = vpop.permute.xlu1 %873  ;;  %1972 = vmatprep.subr.bf16.mxu0 %v7386_v58 }
 0x269   :  { %v848_v0 = vsel %vm11448_vm6, %v841_v60, %v843_v62  ;;  %v880_v22 = vsel %vm328_vm8, %v8620_v4, %v874_v63  ;;  %vm2133_vm6 = vcmask 72704  }
 0x26a   :  { %1207 = vmatprep.subr.bf16.mxu1 %v848_v0  ;;  %v7417_v0 = vld [vmem:[%s11440_s5 + $0xd0] ss:$8 sps:$4 sm:$0xff]  }
 0x26b   :  { %1208 = vmatpush1.bf16.msra.mxu1 %v847_v56  ;;  %1973 = vmatpush1.bf16.msra.mxu0 %v7384_v26 }
 0x26c   :  { %v876_v38 = vpop.permute.xlu0 %875  ;;  %v915_v2 = vpop.permute.xlu1 %914 }
 0x26d   :  { %v881_v5 = vsel %vm328_vm8, %v874_v63, %v876_v38  ;;  %936 = vst.msk [vmem:[#allocation2 + $0x170] sm:$0xff] %vm374_vm10, %v915_v2  ;;  %v920_v4 = vsel %vm374_vm10, %v8639_v27, %v915_v2  ;;  %v7389_v27 = vld [vmem:[%s11440_s5 + $0x34] ss:$8 sps:$4 sm:$0xff]  }
 0x26e   :  { %1209 = vmatprep.subr.bf16.mxu1 %v881_v5  ;;  %1974 = vmatprep.subr.bf16.mxu0 %v7389_v27 }
 0x26f   :  { %1210 = vmatpush1.bf16.msra.mxu1 %v880_v22  ;;  %1975 = vmatpush1.bf16.msra.mxu0 %v7387_v57 }
 0x270   :  { %v948_v7 = vpop.permute.xlu0 %947  ;;  %v981_v8 = vpop.permute.xlu1 %980  ;;  %1211 = vmatprep.subr.bf16.mxu1 %v8507_v21  ;;  %1976 = vmatprep.subr.bf16.mxu0 %v7392_v28 }
 0x271   :  { %969 = vst.msk [vmem:[#allocation2 + $0x1b0] sm:$0xff] %vm11447_vm11, %v948_v7  ;;  %v953_v21 = vsel %vm11447_vm11, %v8647_v34, %v948_v7  ;;  %v7396_v34 = vld [vmem:[%s11440_s5 + $0x60] ss:$8 sps:$4 sm:$0xff]   ;;  %vm2138_vm11 = vcmask 1047624  }
 0x272   :  { %1002 = vst.msk [vmem:[#allocation2 + $0x1f0] sm:$0xff] %vm11446_vm12, %v981_v8 }
 0x273   :  { %1212 = vmatpush1.bf16.msra.mxu1 %v8505_v12  ;;  %v986_v12 = vsel %vm11446_vm12, %v8649_v35, %v981_v8  ;;  %1977 = vmatpush1.bf16.msra.mxu0 %v7390_v29  ;;  %v7401_v35 = vld [vmem:[%s11440_s5 + $0x74] ss:$8 sps:$4 sm:$0xff]  }
 0x274   :  { %v1014_v40 = vpop.permute.xlu0 %1013  ;;  %v1073_v11 = vld [vmem:[#allocation2 + $0x170] sm:$0xff]  ;;  %1978 = vmatprep.subr.bf16.mxu0 %v7395_v30 }
 0x275   :  { %1035 = vst.msk [vmem:[#allocation2 + $0x230] sm:$0xff] %vm11445_vm13, %v1014_v40  ;;  %1213 = vmatprep.subr.bf16.mxu1 %v1073_v11  ;;  %v1019_v17 = vsel %vm11445_vm13, %v1012_v46, %v1014_v40  ;;  %v7411_v46 = vld [vmem:[%s11440_s5 + $0xb0] ss:$8 sps:$4 sm:$0xff]  }
 0x276   :  { %v7423_v30 = vld [vmem:[%s11440_s5 + $0xf0] ss:$8 sps:$4 sm:$0xff]  }
 0x277   :  { %1214 = vmatpush1.bf16.msra.mxu1 %v920_v4  ;;  %1979 = vmatpush1.bf16.msra.mxu0 %v7393_v32  ;;  %v7425_v32 = vld [vmem:[%s11440_s5 + $0xf4] ss:$8 sps:$4 sm:$0xff]  }
 0x278   :  { %v1079_v14 = vld [vmem:[#allocation2 + $0x1b0] sm:$0xff]  ;;  %1980 = vmatprep.subr.bf16.mxu0 %v7398_v33 }
 0x279   :  { %1215 = vmatprep.subr.bf16.mxu1 %v1079_v14  ;;  %v1085_v16 = vld [vmem:[#allocation2 + $0x1f0] sm:$0xff] }
 0x27b   :  { %1216 = vmatpush1.bf16.msra.mxu1 %v953_v21  ;;  %1981 = vmatpush1.bf16.msra.mxu0 %v7396_v34 }
 0x27c   :  { %1217 = vmatprep.subr.bf16.mxu1 %v1085_v16  ;;  %v1091_v51 = vld [vmem:[#allocation2 + $0x230] sm:$0xff]  ;;  %1982 = vmatprep.subr.bf16.mxu0 %v7401_v35 }
 0x27f   :  { %1218 = vmatpush1.bf16.msra.mxu1 %v986_v12  ;;  %1983 = vmatpush1.bf16.msra.mxu0 %v7399_v31 }
 0x280   :  { %1219 = vmatprep.subr.bf16.mxu1 %v1091_v51  ;;  %1984 = vmatprep.subr.bf16.mxu0 %v7404_v37  ;;  %v7428_v37 = vld [vmem:[%s11440_s5 + $0x104] ss:$8 sps:$4 sm:$0xff]  }
 0x281   :  { %v8770_v52 = vpop.permute.xlu1 %1096 }
 0x283   :  { %1220 = vmatpush1.bf16.msra.mxu1 %v1019_v17  ;;  %1985 = vmatpush1.bf16.msra.mxu0 %v7402_v39 }
 0x284   :  { %1986 = vmatprep.subr.bf16.mxu0 %v7407_v41 }
 0x285   :  { %v8773_v36 = vpop.permute.xlu0 %1101 }
 0x286   :  { %1236 = vmatmul.mubr.bf16.vlgmr.msra.gmra.mrb[8].mxu1 %v6869_v45  ;;  %v7413_v45 = vld [vmem:[%s11440_s5 + $0xb4] ss:$8 sps:$4 sm:$0xff]  }
 0x287   :  { %1987 = vmatpush1.bf16.msra.mxu0 %v7405_v18 }
 0x288   :  { %1988 = vmatprep.subr.bf16.mxu0 %v7410_v42 }
 0x28b   :  { %1989 = vmatpush1.bf16.msra.mxu0 %v7408_v44 }
 0x28c   :  { %1990 = vmatprep.subr.bf16.mxu0 %v7413_v45 }
 0x28f   :  { %1991 = vmatpush1.bf16.msra.mxu0 %v7411_v46 }
 0x290   :  { %1992 = vmatprep.subr.bf16.mxu0 %v7416_v47 }
 0x293   :  { %1993 = vmatpush1.bf16.msra.mxu0 %v7414_v50 }
 0x294   :  { %1994 = vmatprep.subr.bf16.mxu0 %v7419_v61 }
 0x297   :  { %1995 = vmatpush1.bf16.msra.mxu0 %v7417_v0 }
 0x298   :  { %1996 = vmatprep.subr.bf16.mxu0 %v7422_v24 }
 0x29b   :  { %1997 = vmatpush1.bf16.msra.mxu0 %v7420_v20 }
 0x29c   :  { %1998 = vmatprep.subr.bf16.mxu0 %v7425_v32  ;;  %v7435_v32 = vld [vmem:[%s11440_s5 + $0x130] ss:$8 sps:$4 sm:$0xff]  }
 0x29f   :  { %1999 = vmatpush1.bf16.msra.mxu0 %v7423_v30  ;;  %v7437_v30 = vld [vmem:[%s11440_s5 + $0x134] ss:$8 sps:$4 sm:$0xff]  }
 0x2a0   :  { %2011 = vmatprep.subr.bf16.mxu0 %v7428_v37  ;;  %v7443_v37 = vld [vmem:[%s11440_s5 + $0x154] ss:$8 sps:$4 sm:$0xff]  }
 0x330   :  { %v1151_v53 = vpop.f32.mrb[4].mxu1 }
 0x331   :  { %v1152_v54 = vadd.f32 %v1151_v53, %v8770_v52  ;;  %v1153_v55 = vpop.f32.mrb[5].mxu1 }
 0x332   :  { %v1154_v59 = vadd.f32 %v1153_v55, %v8770_v52  ;;  %v1155_v60 = vpop.f32.mrb[6].mxu1 }
 0x333   :  { %v1246_v15 = vmax.f32 %v1152_v54, 0.0  ;;  %v1156_v62 = vadd.f32 %v1155_v60, %v8773_v36  ;;  %v1157_v63 = vpop.f32.mrb[7].mxu1 }
 0x334   :  { %v1247_v56 = vmax.f32 %v1154_v59, 0.0  ;;  %v1158_v38 = vadd.f32 %v1157_v63, %v8773_v36 }
 0x335   :  { %v1252_v2 = vmax.f32 %v1156_v62, 0.0  ;;  %v1194_v5 = vpop.f32.mrb[8].mxu0  ;;  %v1258_v40 = vmul.f32 %v1246_v15, %v8420_v19 }
 0x336   :  { %v1253_v22 = vmax.f32 %v1158_v38, 0.0  ;;  %v1195_v7 = vadd.f32 %v1194_v5, %v8770_v52  ;;  %v1196_v8 = vpop.f32.mrb[9].mxu0  ;;  %v1259_v21 = vmul.f32 %v1247_v56, %v8426_v23 }
 0x337   :  { %v1264_v11 = vmul.f32 %v1252_v2, %v8420_v19  ;;  %v1197_v4 = vadd.f32 %v1196_v8, %v8770_v52  ;;  %v1198_v14 = vpop.f32.mrb[10].mxu0 }
 0x338   :  { %v1265_v16 = vmul.f32 %v1253_v22, %v8426_v23  ;;  %v1248_v12 = vmax.f32 %v1195_v7, 0.0  ;;  %v1199_v51 = vadd.f32 %v1198_v14, %v8773_v36  ;;  %v1200_v17 = vpop.f32.mrb[11].mxu0 }
 0x339   :  { %v8797_v49 = vpack.c.bf16 %v1264_v11, %v1258_v40  ;;  %v1249_v25 = vmax.f32 %v1197_v4, 0.0  ;;  %v1201_v58 = vadd.f32 %v1200_v17, %v8773_v36 }
 0x33a   :  { %v8800_v26 = vpack.c.bf16 %v1265_v16, %v1259_v21  ;;  %v1254_v27 = vmax.f32 %v1199_v51, 0.0  ;;  %v1260_v28 = vmul.f32 %v1248_v12, %v8438_v43 }
 0x33b   :  { %1276 = vst [vmem:[#allocation2 + $0x8] sm:$0xff] %v8797_v49  ;;  %v1255_v57 = vmax.f32 %v1201_v58, 0.0  ;;  %1296 = vrot.lane.b32.xlu1 %v8797_v49, %s7987_s14  ;;  %3926 = vst [vmem:[#allocation2 + $0x388] sm:$0xff] %v8797_v49  ;;  %v1261_v33 = vmul.f32 %v1249_v25, %v8443_v48  ;;  %v7426_v25 = vld [vmem:[%s11440_s5 + $0x100] ss:$8 sps:$4 sm:$0xff]  }
 0x33c   :  { %v1266_v29 = vmul.f32 %v1254_v27, %v8438_v43  ;;  %v7431_v27 = vld [vmem:[%s11440_s5 + $0x114] ss:$8 sps:$4 sm:$0xff]  }
 0x33d   :  { %v1267_v34 = vmul.f32 %v1255_v57, %v8443_v48  ;;  %v7429_v57 = vld [vmem:[%s11440_s5 + $0x110] ss:$8 sps:$4 sm:$0xff]  }
 0x33e   :  { %v8816_v35 = vpack.c.bf16 %v1266_v29, %v1260_v28  ;;  %v7434_v28 = vld [vmem:[%s11440_s5 + $0x124] ss:$8 sps:$4 sm:$0xff]   ;;  %v7432_v29 = vld [vmem:[%s11440_s5 + $0x120] ss:$8 sps:$4 sm:$0xff]  }
 0x33f   :  { %v8818_v31 = vpack.c.bf16 %v1267_v34, %v1261_v33  ;;  %v7440_v33 = vld [vmem:[%s11440_s5 + $0x144] ss:$8 sps:$4 sm:$0xff]   ;;  %v7438_v34 = vld [vmem:[%s11440_s5 + $0x140] ss:$8 sps:$4 sm:$0xff]  }
 0x340   :  { %1278 = vst [vmem:[#allocation2 + $0x18] sm:$0xff] %v8816_v35  ;;  %3928 = vst [vmem:[#allocation2 + $0x398] sm:$0xff] %v8816_v35  ;;  %1300 = vrot.lane.b32.xlu0 %v8816_v35, %s7987_s14  ;;  %1332 = vrot.lane.b32.xlu1 %v8816_v35, %s7989_s16 }
 0x341   :  { %3929 = vst [vmem:[#allocation2 + $0x3a0] sm:$0xff] %v8818_v31 }
 0x344   :  { %1328 = vrot.lane.b32.xlu0 %v8797_v49, %s7989_s16  ;;  %1298 = vrot.lane.b32.xlu1 %v8800_v26, %s7987_s14 }
 0x348   :  { %1330 = vrot.lane.b32.xlu0 %v8800_v26, %s7989_s16  ;;  %1362 = vrot.lane.b32.xlu1 %v8800_v26, %s7990_s17 }
 0x34c   :  { %1364 = vrot.lane.b32.xlu0 %v8816_v35, %s7990_s17  ;;  %1360 = vrot.lane.b32.xlu1 %v8797_v49, %s7990_s17 }
 0x350   :  { %1302 = vrot.lane.b32.xlu0 %v8818_v31, %s7987_s14 }
 0x354   :  { %1334 = vrot.lane.b32.xlu0 %v8818_v31, %s7989_s16 }
 0x358   :  { %1366 = vrot.lane.b32.xlu0 %v8818_v31, %s7990_s17 }
 0x359   :  { %v1237_v39 = vpop.f32.mrb[8].mxu1 }
 0x35a   :  { %v1238_v41 = vadd.f32 %v1237_v39, %v8770_v52  ;;  %v1239_v18 = vpop.f32.mrb[9].mxu1 }
 0x35b   :  { %v1240_v42 = vadd.f32 %v1239_v18, %v8770_v52  ;;  %v1241_v44 = vpop.f32.mrb[10].mxu1  ;;  %v7446_v18 = vld [vmem:[%s11440_s5 + $0x164] ss:$8 sps:$4 sm:$0xff]  }
 0x35c   :  { %v1250_v45 = vmax.f32 %v1238_v41, 0.0  ;;  %v1242_v46 = vadd.f32 %v1241_v44, %v8773_v36  ;;  %v1243_v47 = vpop.f32.mrb[11].mxu1  ;;  %v7441_v41 = vld [vmem:[%s11440_s5 + $0x150] ss:$8 sps:$4 sm:$0xff]  }
 0x35d   :  { %v1251_v50 = vmax.f32 %v1240_v42, 0.0  ;;  %v1244_v53 = vadd.f32 %v1243_v47, %v8773_v36  ;;  %v1288_v36 = vld [vmem:[#allocation2 + $0x38] sm:$0xff] }
 0x35e   :  { %v1256_v54 = vmax.f32 %v1242_v46, 0.0  ;;  %v1262_v59 = vmul.f32 %v1250_v45, %v8486_v1  ;;  %v7444_v45 = vld [vmem:[%s11440_s5 + $0x160] ss:$8 sps:$4 sm:$0xff]   ;;  %v7449_v47 = vld [vmem:[%s11440_s5 + $0x174] ss:$8 sps:$4 sm:$0xff]  }
 0x35f   :  { %v1257_v55 = vmax.f32 %v1244_v53, 0.0  ;;  %v1263_v61 = vmul.f32 %v1251_v50, %v8494_v6 }
 0x360   :  { %v1268_v60 = vmul.f32 %v1256_v54, %v8486_v1 }
 0x361   :  { %v1269_v15 = vmul.f32 %v1257_v55, %v8494_v6  ;;  %v7447_v55 = vld [vmem:[%s11440_s5 + $0x170] ss:$8 sps:$4 sm:$0xff]  }
 0x362   :  { %v8856_v62 = vpack.c.bf16 %v1268_v60, %v1262_v59  ;;  %v7452_v59 = vld [vmem:[%s11440_s5 + $0x184] ss:$8 sps:$4 sm:$0xff]  }
 0x363   :  { %v8858_v52 = vpack.c.bf16 %v1269_v15, %v1263_v61 }
 0x364   :  { %3930 = vst [vmem:[#allocation2 + $0x3a8] sm:$0xff] %v8856_v62  ;;  %1304 = vrot.lane.b32.xlu1 %v8856_v62, %s7987_s14 }
 0x365   :  { %3931 = vst [vmem:[#allocation2 + $0x3b0] sm:$0xff] %v8858_v52  ;;  %1306 = vrot.lane.b32.xlu0 %v8858_v52, %s7987_s14 }
 0x368   :  { %1336 = vrot.lane.b32.xlu1 %v8856_v62, %s7989_s16 }
 0x369   :  { %1338 = vrot.lane.b32.xlu0 %v8858_v52, %s7989_s16 }
 0x36c   :  { %1368 = vrot.lane.b32.xlu1 %v8856_v62, %s7990_s17 }
 0x36d   :  { %1370 = vrot.lane.b32.xlu0 %v8858_v52, %s7990_s17 }
 0x370   :  { %1308 = vrot.lane.b32.xlu1 %v1288_v36, %s7987_s14 }
 0x374   :  { %1340 = vrot.lane.b32.xlu1 %v1288_v36, %s7989_s16 }
 0x378   :  { %1372 = vrot.lane.b32.xlu1 %v1288_v36, %s7990_s17 }
 0x3ad   :  { %v1297_v63 = vpop.permute.xlu1 %1296 }
 0x3b2   :  { %v8877_v0 = vpop.permute.xlu0 %1300  ;;  %v8879_v56 = vpop.permute.xlu1 %1332 }
 0x3b6   :  { %v1329_v38 = vpop.permute.xlu0 %1328  ;;  %v1299_v2 = vpop.permute.xlu1 %1298 }
 0x3b7   :  { %v1310_v5 = vsel %vm374_vm10, %v1297_v63, %v1299_v2  ;;  %v1311_v22 = vsel %vm374_vm10, %v1299_v2, %v8877_v0  ;;  %v7450_v63 = vld [vmem:[%s11440_s5 + $0x180] ss:$8 sps:$4 sm:$0xff]   ;;  %v7455_v2 = vld [vmem:[%s11440_s5 + $0x194] ss:$8 sps:$4 sm:$0xff]  }
 0x3b8   :  { %v1322_v4 = vmax.bf16 %v1310_v5, %v8797_v49  ;;  %v1323_v14 = vmax.bf16 %v1311_v22, %v8800_v26  ;;  %v7453_v5 = vld [vmem:[%s11440_s5 + $0x190] ss:$8 sps:$4 sm:$0xff]   ;;  %v7458_v22 = vld [vmem:[%s11440_s5 + $0x1a4] ss:$8 sps:$4 sm:$0xff]  }
 0x3ba   :  { %v1331_v7 = vpop.permute.xlu0 %1330  ;;  %v1363_v8 = vpop.permute.xlu1 %1362 }
 0x3bb   :  { %v1342_v40 = vsel %vm11446_vm12, %v1329_v38, %v1331_v7  ;;  %v1343_v11 = vsel %vm11446_vm12, %v1331_v7, %v8879_v56  ;;  %v7456_v7 = vld [vmem:[%s11440_s5 + $0x1a0] ss:$8 sps:$4 sm:$0xff]  }
 0x3bc   :  { %v1354_v21 = vmax.bf16 %v1342_v40, %v1322_v4  ;;  %v1355_v16 = vmax.bf16 %v1343_v11, %v1323_v14  ;;  %v7459_v40 = vld [vmem:[%s11440_s5 + $0x1b0] ss:$8 sps:$4 sm:$0xff]   ;;  %v7464_v11 = vld [vmem:[%s11440_s5 + $0x1c4] ss:$8 sps:$4 sm:$0xff]   ;;  %v7462_v14 = vld [vmem:[%s11440_s5 + $0x1c0] ss:$8 sps:$4 sm:$0xff]  }
 0x3be   :  { %v8889_v12 = vpop.permute.xlu0 %1364  ;;  %v1361_v51 = vpop.permute.xlu1 %1360 }
 0x3bf   :  { %v1375_v17 = vsel %vm11445_vm13, %v1363_v8, %v8889_v12  ;;  %v1374_v20 = vsel %vm11445_vm13, %v1361_v51, %v1363_v8  ;;  %v7461_v8 = vld [vmem:[%s11440_s5 + $0x1b4] ss:$8 sps:$4 sm:$0xff]   ;;  %v7465_v51 = vld [vmem:[%s11440_s5 + $0x1d0] ss:$8 sps:$4 sm:$0xff]  }
 0x3c0   :  { %v1386_v24 = vmax.bf16 %v1374_v20, %v1354_v21  ;;  %v1387_v58 = vmax.bf16 %v1375_v17, %v1355_v16  ;;  %v7467_v21 = vld [vmem:[%s11440_s5 + $0x1d4] ss:$8 sps:$4 sm:$0xff]   ;;  %v7470_v17 = vld [vmem:[%s11440_s5 + $0x1e4] ss:$8 sps:$4 sm:$0xff]  }
 0x3c2   :  { %2000 = vmatprep.mubr.bf16.mxu0 %v1387_v58  ;;  %v1303_v39 = vpop.permute.xlu0 %1302  ;;  %v7473_v58 = vld [vmem:[%s11440_s5 + $0x1f4] ss:$8 sps:$4 sm:$0xff]  }
 0x3c3   :  { %2001 = vmatmul.mubr.bf16.vlgmr.msra.gmra.mrb[12].mxu0 %v1386_v24 }
 0x3c4   :  { %2012 = vmatpush1.bf16.msra.mxu0 %v7426_v25  ;;  %v7468_v25 = vld [vmem:[%s11440_s5 + $0x1e0] ss:$8 sps:$4 sm:$0xff]  }
 0x3c5   :  { %2013 = vmatprep.subr.bf16.mxu0 %v7431_v27  ;;  %v1312_v27 = vsel %vm374_vm10, %v8877_v0, %v1303_v39  ;;  %v7476_v0 = vld [vmem:[%s11440_s5 + $0x204] ss:$8 sps:$4 sm:$0xff]  }
 0x3c6   :  { %v1335_v44 = vpop.permute.xlu0 %1334 }
 0x3c8   :  { %2014 = vmatpush1.bf16.msra.mxu0 %v7429_v57 }
 0x3c9   :  { %2015 = vmatprep.subr.bf16.mxu0 %v7434_v28  ;;  %v1344_v28 = vsel %vm11446_vm12, %v8879_v56, %v1335_v44 }
 0x3ca   :  { %v1367_v60 = vpop.permute.xlu0 %1366 }
 0x3cc   :  { %2016 = vmatpush1.bf16.msra.mxu0 %v7432_v29 }
 0x3cd   :  { %2017 = vmatprep.subr.bf16.mxu0 %v7437_v30  ;;  %v7471_v30 = vld [vmem:[%s11440_s5 + $0x1f0] ss:$8 sps:$4 sm:$0xff]  }
 0x3d0   :  { %2018 = vmatpush1.bf16.msra.mxu0 %v7435_v32  ;;  %v1324_v32 = vmax.bf16 %v1312_v27, %v8816_v35  ;;  %v7516_v27 = vld [vmem:[%s11440_s5 + $0x2e0] ss:$8 sps:$4 sm:$0xff]  }
 0x3d1   :  { %2019 = vmatprep.subr.bf16.mxu0 %v7440_v33 }
 0x3d4   :  { %2020 = vmatpush1.bf16.msra.mxu0 %v7438_v34  ;;  %v1376_v34 = vsel %vm11445_vm13, %v8889_v12, %v1367_v60  ;;  %v7479_v12 = vld [vmem:[%s11440_s5 + $0x214] ss:$8 sps:$4 sm:$0xff]  }
 0x3d5   :  { %2021 = vmatprep.subr.bf16.mxu0 %v7443_v37 }
 0x3d6   :  { %v8930_v42 = vpop.permute.xlu1 %1304 }
 0x3d7   :  { %v1313_v46 = vsel %vm374_vm10, %v1303_v39, %v8930_v42  ;;  %v8985_v16 = vpop.permute.xlu0 %1306  ;;  %v1356_v39 = vmax.bf16 %v1344_v28, %v1324_v32 }
 0x3d8   :  { %2022 = vmatpush1.bf16.msra.mxu0 %v7441_v41  ;;  %v1325_v54 = vmax.bf16 %v1313_v46, %v8818_v31  ;;  %v1314_v28 = vsel %vm374_vm10, %v8930_v42, %v8985_v16 }
 0x3d9   :  { %2023 = vmatprep.subr.bf16.mxu0 %v7446_v18  ;;  %v1326_v32 = vmax.bf16 %v1314_v28, %v8856_v62  ;;  %v7522_v62 = vld [vmem:[%s11437_s1 + $0x44] ss:$16 sps:$4 sm:$0xff]   ;;  %v7524_v28 = vld [vmem:[%s11437_s1 + $0x40] ss:$16 sps:$4 sm:$0xff]  }
 0x3da   :  { %v8940_v50 = vpop.permute.xlu1 %1336  ;;  %6974 = vmatprep.mubr.msk.bf16.mxu1 %vm1113_vm15, %v7522_v62 }
 0x3db   :  { %v1345_v53 = vsel %vm11446_vm12, %v1335_v44, %v8940_v50  ;;  %v8993_v24 = vpop.permute.xlu0 %1338  ;;  %v7474_v44 = vld [vmem:[%s11440_s5 + $0x200] ss:$8 sps:$4 sm:$0xff]  }
 0x3dc   :  { %2024 = vmatpush1.bf16.msra.mxu0 %v7444_v45  ;;  %v1357_v61 = vmax.bf16 %v1345_v53, %v1325_v54  ;;  %v1388_v45 = vmax.bf16 %v1376_v34, %v1356_v39  ;;  %v7480_v53 = vld [vmem:[%s11440_s5 + $0x220] ss:$8 sps:$4 sm:$0xff]   ;;  %v7485_v54 = vld [vmem:[%s11440_s5 + $0x234] ss:$8 sps:$4 sm:$0xff]  }
 0x3dd   :  { %2025 = vmatprep.subr.bf16.mxu0 %v7449_v47  ;;  %v7482_v47 = vld [vmem:[%s11440_s5 + $0x224] ss:$8 sps:$4 sm:$0xff]  }
 0x3de   :  { %v8951_v15 = vpop.permute.xlu1 %1368 }
 0x3df   :  { %v1377_v36 = vsel %vm11445_vm13, %v1367_v60, %v8951_v15  ;;  %v9018_v56 = vpop.permute.xlu0 %1370  ;;  %v7486_v60 = vld [vmem:[%s11440_s5 + $0x240] ss:$8 sps:$4 sm:$0xff]  }
 0x3e0   :  { %2026 = vmatpush1.bf16.msra.mxu0 %v7447_v55  ;;  %v1389_v38 = vmax.bf16 %v1377_v36, %v1357_v61  ;;  %v7483_v55 = vld [vmem:[%s11440_s5 + $0x230] ss:$8 sps:$4 sm:$0xff]   ;;  %v7491_v61 = vld [vmem:[%s11440_s5 + $0x254] ss:$8 sps:$4 sm:$0xff]  }
 0x3e1   :  { %2027 = vmatprep.subr.bf16.mxu0 %v7452_v59  ;;  %v7488_v59 = vld [vmem:[%s11440_s5 + $0x244] ss:$8 sps:$4 sm:$0xff]   ;;  %v7489_v36 = vld [vmem:[%s11440_s5 + $0x250] ss:$8 sps:$4 sm:$0xff]  }
 0x3e2   :  { %2043 = vmatprep.mubr.bf16.mxu0 %v1389_v38  ;;  %v1309_v4 = vpop.permute.xlu1 %1308  ;;  %v7492_v38 = vld [vmem:[%s11440_s5 + $0x260] ss:$8 sps:$4 sm:$0xff]  }
 0x3e3   :  { %v1315_v57 = vsel %vm374_vm10, %v8985_v16, %v1309_v4  ;;  %v7504_v4 = vld [vmem:[%s11440_s5 + $0x2a0] ss:$8 sps:$4 sm:$0xff]  }
 0x3e4   :  { %2028 = vmatpush1.bf16.msra.mxu0 %v7450_v63  ;;  %v1327_v37 = vmax.bf16 %v1315_v57, %v8858_v52  ;;  %v7477_v52 = vld [vmem:[%s11440_s5 + $0x210] ss:$8 sps:$4 sm:$0xff]   ;;  %v7494_v63 = vld [vmem:[%s11440_s5 + $0x264] ss:$8 sps:$4 sm:$0xff]   ;;  %v7521_v57 = vld [vmem:[%s11440_s5 + $0x2f4] ss:$8 sps:$4 sm:$0xff]  }
 0x3e5   :  { %2029 = vmatprep.subr.bf16.mxu0 %v7455_v2  ;;  %v7497_v2 = vld [vmem:[%s11440_s5 + $0x274] ss:$8 sps:$4 sm:$0xff]  }
 0x3e6   :  { %v1341_v20 = vpop.permute.xlu1 %1340 }
 0x3e7   :  { %v1347_v33 = vsel %vm11446_vm12, %v8993_v24, %v1341_v20  ;;  %v7515_v20 = vld [vmem:[%s11440_s5 + $0x2d4] ss:$8 sps:$4 sm:$0xff]  }
 0x3e8   :  { %2030 = vmatpush1.bf16.msra.mxu0 %v7453_v5  ;;  %v1359_v18 = vmax.bf16 %v1347_v33, %v1327_v37  ;;  %v7495_v5 = vld [vmem:[%s11440_s5 + $0x270] ss:$8 sps:$4 sm:$0xff]   ;;  %v1378_v33 = vsel %vm11445_vm13, %v8951_v15, %v9018_v56  ;;  %v2231_v15 = vld [vmem:[%s11438_s2 + $0x20] sm:$0xff] }
 0x3e9   :  { %2031 = vmatprep.subr.bf16.mxu0 %v7458_v22  ;;  %v7500_v22 = vld [vmem:[%s11440_s5 + $0x284] ss:$8 sps:$4 sm:$0xff]  }
 0x3ea   :  { %v1373_v29 = vpop.permute.xlu1 %1372 }
 0x3eb   :  { %v1379_v41 = vsel %vm11445_vm13, %v9018_v56, %v1373_v29  ;;  %v1346_v29 = vsel %vm11446_vm12, %v8940_v50, %v8993_v24  ;;  %v2232_v56 = vld [vmem:[%s11438_s2 + $0x28] sm:$0xff]  ;;  %vm2124_vm13 = vcmask 1047632   ;;  %vm2119_vm12 = vcmask 80896  }
 0x3ec   :  { %2032 = vmatpush1.bf16.msra.mxu0 %v7456_v7  ;;  %v1391_v46 = vmax.bf16 %v1379_v41, %v1359_v18  ;;  %v7498_v7 = vld [vmem:[%s11440_s5 + $0x280] ss:$8 sps:$4 sm:$0xff]   ;;  %v2233_v41 = vld [vmem:[%s11438_s2 + $0x30] sm:$0xff]  ;;  %v2234_v18 = vld [vmem:[%s11438_s2 + $0x38] sm:$0xff] }
 0x3ed   :  { %2033 = vmatprep.subr.bf16.mxu0 %v7461_v8  ;;  %v7503_v8 = vld [vmem:[%s11440_s5 + $0x294] ss:$8 sps:$4 sm:$0xff]  }
 0x3f0   :  { %2034 = vmatpush1.bf16.msra.mxu0 %v7459_v40  ;;  %v7501_v40 = vld [vmem:[%s11440_s5 + $0x290] ss:$8 sps:$4 sm:$0xff]  }
 0x3f1   :  { %2035 = vmatprep.subr.bf16.mxu0 %v7464_v11  ;;  %v7506_v11 = vld [vmem:[%s11440_s5 + $0x2a4] ss:$8 sps:$4 sm:$0xff]  }
 0x3f4   :  { %2036 = vmatpush1.bf16.msra.mxu0 %v7462_v14  ;;  %v7509_v14 = vld [vmem:[%s11440_s5 + $0x2b4] ss:$8 sps:$4 sm:$0xff]  }
 0x3f5   :  { %2037 = vmatprep.subr.bf16.mxu0 %v7467_v21  ;;  %v7507_v21 = vld [vmem:[%s11440_s5 + $0x2b0] ss:$8 sps:$4 sm:$0xff]  }
 0x3f8   :  { %2038 = vmatpush1.bf16.msra.mxu0 %v7465_v51  ;;  %v7512_v51 = vld [vmem:[%s11440_s5 + $0x2c4] ss:$8 sps:$4 sm:$0xff]  }
 0x3f9   :  { %2039 = vmatprep.subr.bf16.mxu0 %v7470_v17  ;;  %v7510_v17 = vld [vmem:[%s11440_s5 + $0x2c0] ss:$8 sps:$4 sm:$0xff]  }
 0x3fc   :  { %2040 = vmatpush1.bf16.msra.mxu0 %v7468_v25  ;;  %v7513_v25 = vld [vmem:[%s11440_s5 + $0x2d0] ss:$8 sps:$4 sm:$0xff]  }
 0x3fd   :  { %2041 = vmatprep.subr.bf16.mxu0 %v7473_v58  ;;  %v7518_v58 = vld [vmem:[%s11440_s5 + $0x2e4] ss:$8 sps:$4 sm:$0xff]  }
 0x400   :  { %2042 = vmatpush1.bf16.msra.mxu0 %v7471_v30  ;;  %v7519_v30 = vld [vmem:[%s11440_s5 + $0x2f0] ss:$8 sps:$4 sm:$0xff]   ;;  %s7991_s5 = smov 11  }
 0x401   :  { %2054 = vmatprep.subr.bf16.mxu0 %v7476_v0  ;;  %v1358_v0 = vmax.bf16 %v1346_v29, %v1326_v32  ;;  %v7525_v29 = vld [vmem:[%s11437_s1 + $0x64] ss:$16 sps:$4 sm:$0xff]  }
 0x403   :  { %2044 = vmatmul.mubr.bf16.vlgmr.msra.gmra.mrb[12].mxu0 %v1388_v45  ;;  %v1390_v34 = vmax.bf16 %v1378_v33, %v1358_v0  ;;  %v195_v33 = vld [vmem:[%s11441_s4] sm:$0x3] }
 0x404   :  { %2055 = vmatpush1.bf16.msra.mxu0 %v7474_v44  ;;  %2086 = vmatprep.mubr.bf16.mxu0 %v1391_v46 }
 0x405   :  { %2056 = vmatprep.subr.bf16.mxu0 %v7479_v12 }
 0x408   :  { %2057 = vmatpush1.bf16.msra.mxu0 %v7477_v52 }
 0x409   :  { %2058 = vmatprep.subr.bf16.mxu0 %v7482_v47 }
 0x40c   :  { %2059 = vmatpush1.bf16.msra.mxu0 %v7480_v53 }
 0x40d   :  { %2060 = vmatprep.subr.bf16.mxu0 %v7485_v54 }
 0x410   :  { %2061 = vmatpush1.bf16.msra.mxu0 %v7483_v55 }
 0x411   :  { %2062 = vmatprep.subr.bf16.mxu0 %v7488_v59 }
 0x414   :  { %2063 = vmatpush1.bf16.msra.mxu0 %v7486_v60 }
 0x415   :  { %2064 = vmatprep.subr.bf16.mxu0 %v7491_v61 }
 0x418   :  { %2065 = vmatpush1.bf16.msra.mxu0 %v7489_v36 }
 0x419   :  { %2066 = vmatprep.subr.bf16.mxu0 %v7494_v63 }
 0x41c   :  { %2067 = vmatpush1.bf16.msra.mxu0 %v7492_v38 }
 0x41d   :  { %2068 = vmatprep.subr.bf16.mxu0 %v7497_v2 }
 0x420   :  { %2069 = vmatpush1.bf16.msra.mxu0 %v7495_v5 }
 0x421   :  { %2070 = vmatprep.subr.bf16.mxu0 %v7500_v22 }
 0x424   :  { %2071 = vmatpush1.bf16.msra.mxu0 %v7498_v7 }
 0x425   :  { %2072 = vmatprep.subr.bf16.mxu0 %v7503_v8 }
 0x428   :  { %2073 = vmatpush1.bf16.msra.mxu0 %v7501_v40 }
 0x429   :  { %2074 = vmatprep.subr.bf16.mxu0 %v7506_v11 }
 0x42c   :  { %2075 = vmatpush1.bf16.msra.mxu0 %v7504_v4 }
 0x42d   :  { %2076 = vmatprep.subr.bf16.mxu0 %v7509_v14 }
 0x430   :  { %2077 = vmatpush1.bf16.msra.mxu0 %v7507_v21 }
 0x431   :  { %2078 = vmatprep.subr.bf16.mxu0 %v7512_v51 }
 0x434   :  { %2079 = vmatpush1.bf16.msra.mxu0 %v7510_v17 }
 0x435   :  { %2080 = vmatprep.subr.bf16.mxu0 %v7515_v20 }
 0x438   :  { %2081 = vmatpush1.bf16.msra.mxu0 %v7513_v25 }
 0x439   :  { %2082 = vmatprep.subr.bf16.mxu0 %v7518_v58 }
 0x43c   :  { %2083 = vmatpush1.bf16.msra.mxu0 %v7516_v27 }
 0x43d   :  { %2084 = vmatprep.subr.bf16.mxu0 %v7521_v57 }
 0x440   :  { %2085 = vmatpush1.bf16.msra.mxu0 %v7519_v30  ;;  %v7527_v30 = vld [vmem:[%s11437_s1 + $0x60] ss:$16 sps:$4 sm:$0xff]  }
 0x443   :  { %2087 = vmatmul.mubr.bf16.vlgmr.msra.gmra.mrb[12].mxu0 %v1390_v34 }
 0x516   :  { %v2088_v42 = vpop.f32.mrb[12].mxu0 }
 0x517   :  { %v2090_v16 = vpop.f32.mrb[13].mxu0 }
 0x518   :  { %v2092_v37 = vpop.f32.mrb[14].mxu0 }
 0x519   :  { %v9126_v50 = vpack.c.bf16 %v2092_v37, %v2088_v42  ;;  %v2094_v24 = vpop.f32.mrb[15].mxu0 }
 0x51a   :  { %v9128_v39 = vpack.c.bf16 %v2094_v24, %v2090_v16 }
 0x51b   :  { %2154 = vst [vmem:[#allocation2 + $0x108] sm:$0xff] %v9126_v50  ;;  %2101 = vrot.lane.b32.xlu0 %v9126_v50, %s7991_s5 }
 0x51c   :  { %2103 = vrot.lane.b32.xlu1 %v9128_v39, %s7991_s5 }
 0x51f   :  { %2115 = vrot.lane.b32.xlu0 %v9126_v50, %s7992_s20 }
 0x520   :  { %2117 = vrot.lane.b32.xlu1 %v9128_v39, %s7992_s20 }
 0x523   :  { %2129 = vrot.lane.b32.xlu0 %v9126_v50, %s7993_s21 }
 0x524   :  { %2131 = vrot.lane.b32.xlu1 %v9128_v39, %s7993_s21 }
 0x527   :  { %2143 = vrot.lane.b32.xlu0 %v9126_v50, %s7986_s13 }
 0x528   :  { %2145 = vrot.lane.b32.xlu1 %v9128_v39, %s7986_s13 }
 0x52b   :  { %2156 = vrot.lane.b32.xlu0 %v9126_v50, %s7987_s14 }
 0x52c   :  { %2158 = vrot.lane.b32.xlu1 %v9128_v39, %s7987_s14 }
 0x52f   :  { %2167 = vrot.lane.b32.xlu0 %v9126_v50, %s7994_s22 }
 0x530   :  { %2169 = vrot.lane.b32.xlu1 %v9128_v39, %s7994_s22 }
 0x533   :  { %2181 = vrot.lane.b32.xlu0 %v9126_v50, %s7995_s23 }
 0x534   :  { %2183 = vrot.lane.b32.xlu1 %v9128_v39, %s7995_s23 }
 0x537   :  { %2195 = vrot.lane.b32.xlu0 %v9126_v50, %s7996_s3 }
 0x538   :  { %2197 = vrot.lane.b32.xlu1 %v9128_v39, %s7996_s3 }
 0x53b   :  { %2237 = vperm.xlu0 %7367, %v2231_v15  }
 0x53c   :  { %2242 = vperm.xlu1 %7368, %v2232_v56  }
 0x53f   :  { %2247 = vperm.xlu0 %7367, %v2233_v41   ;;  %v9220_v41 = vrot.slane %v195_v33, %v718_v13 }
 0x540   :  { %2252 = vperm.xlu1 %7368, %v2234_v18  }
 0x58d   :  { %v2102_v44 = vpop.permute.xlu0 %2101 }
 0x58e   :  { %2111 = vst.msk [vmem:[#allocation2 + $0x8] sm:$0xff] %vm2110_vm9, %v2102_v44  ;;  %v2104_v45 = vpop.permute.xlu1 %2103 }
 0x58f   :  { %v2106_v12 = vsel %vm2105_vm14, %v2102_v44, %v2104_v45  ;;  %2114 = vst.msk [vmem:[#allocation2 + $0x18] sm:$0xff] %vm2105_vm14, %v2104_v45 }
 0x590   :  { %2279 = vmatprep.subr.bf16.mxu1 %v2106_v12 }
 0x591   :  { %v2116_v46 = vpop.permute.xlu0 %2115 }
 0x592   :  { %2125 = vst.msk [vmem:[#allocation2 + $0x48] sm:$0xff] %vm2124_vm13, %v2116_v46  ;;  %v2118_v52 = vpop.permute.xlu1 %2117 }
 0x593   :  { %2128 = vst.msk [vmem:[#allocation2 + $0x58] sm:$0xff] %vm2119_vm12, %v2118_v52  ;;  %v2120_v54 = vsel %vm2119_vm12, %v2116_v46, %v2118_v52 }
 0x595   :  { %v2130_v47 = vpop.permute.xlu0 %2129  ;;  %v2213_v53 = vld [vmem:[#allocation2 + $0x8] sm:$0xff] }
 0x596   :  { %2139 = vst.msk [vmem:[#allocation2 + $0x88] sm:$0xff] %vm2138_vm11, %v2130_v47  ;;  %v2132_v55 = vpop.permute.xlu1 %2131  ;;  %2280 = vmatpush1.bf16.msra.mxu1 %v2213_v53 }
 0x597   :  { %2142 = vst.msk [vmem:[#allocation2 + $0x98] sm:$0xff] %vm2133_vm6, %v2132_v55  ;;  %2281 = vmatprep.subr.bf16.mxu1 %v2120_v54  ;;  %v2134_v61 = vsel %vm2133_vm6, %v2130_v47, %v2132_v55 }
 0x599   :  { %v2144_v59 = vpop.permute.xlu0 %2143  ;;  %v2215_v60 = vld [vmem:[#allocation2 + $0x48] sm:$0xff] }
 0x59a   :  { %2151 = vst.msk [vmem:[#allocation2 + $0xc8] sm:$0xff] %vm889_vm7, %v2144_v59  ;;  %v2146_v36 = vpop.permute.xlu1 %2145  ;;  %2282 = vmatpush1.bf16.msra.mxu1 %v2215_v60 }
 0x59b   :  { %2153 = vst.msk [vmem:[#allocation2 + $0xd8] sm:$0xff] %vm328_vm8, %v2146_v36  ;;  %2283 = vmatprep.subr.bf16.mxu1 %v2134_v61  ;;  %v2147_v2 = vsel %vm328_vm8, %v2144_v59, %v2146_v36 }
 0x59d   :  { %v2157_v63 = vpop.permute.xlu0 %2156  ;;  %v2217_v38 = vld [vmem:[#allocation2 + $0x88] sm:$0xff] }
 0x59e   :  { %v2159_v5 = vpop.permute.xlu1 %2158  ;;  %2284 = vmatpush1.bf16.msra.mxu1 %v2217_v38 }
 0x59f   :  { %v2160_v22 = vsel %vm374_vm10, %v2157_v63, %v2159_v5  ;;  %2166 = vst.msk [vmem:[#allocation2 + $0x150] sm:$0xff] %vm374_vm10, %v2159_v5  ;;  %2285 = vmatprep.subr.bf16.mxu1 %v2147_v2 }
 0x5a0   :  { %2165 = vst [vmem:[#allocation2 + $0x148] sm:$0xff] %v2160_v22 }
 0x5a1   :  { %v2168_v7 = vpop.permute.xlu0 %2167  ;;  %v2219_v8 = vld [vmem:[#allocation2 + $0xc8] sm:$0xff] }
 0x5a2   :  { %v2170_v40 = vpop.permute.xlu1 %2169  ;;  %2286 = vmatpush1.bf16.msra.mxu1 %v2219_v8 }
 0x5a3   :  { %v2172_v11 = vsel %vm2171_vm3, %v2168_v7, %v2170_v40  ;;  %2180 = vst.msk [vmem:[#allocation2 + $0x190] sm:$0xff] %vm2171_vm3, %v2170_v40  ;;  %2287 = vmatprep.subr.bf16.mxu1 %v9128_v39  ;;  %v9216_v39 = vrot.slane %v195_v33, %v714_v10 }
 0x5a4   :  { %2178 = vst [vmem:[#allocation2 + $0x188] sm:$0xff] %v2172_v11 }
 0x5a5   :  { %v2182_v4 = vpop.permute.xlu0 %2181 }
 0x5a6   :  { %v2184_v14 = vpop.permute.xlu1 %2183  ;;  %2288 = vmatpush1.bf16.msra.mxu1 %v9126_v50  ;;  %v2224_v21 = vld [vmem:[#allocation2 + $0x150] sm:$0xff] }
 0x5a7   :  { %v2186_v51 = vsel %vm2185_vm4, %v2182_v4, %v2184_v14  ;;  %2194 = vst.msk [vmem:[#allocation2 + $0x1d0] sm:$0xff] %vm2185_vm4, %v2184_v14  ;;  %2289 = vmatprep.subr.bf16.mxu1 %v2224_v21 }
 0x5a8   :  { %2192 = vst [vmem:[#allocation2 + $0x1c8] sm:$0xff] %v2186_v51 }
 0x5a9   :  { %v2196_v17 = vpop.permute.xlu0 %2195 }
 0x5aa   :  { %v2198_v20 = vpop.permute.xlu1 %2197  ;;  %2290 = vmatpush1.bf16.msra.mxu1 %v2160_v22  ;;  %v2226_v25 = vld [vmem:[#allocation2 + $0x190] sm:$0xff] }
 0x5ab   :  { %2208 = vst.msk [vmem:[#allocation2 + $0x210] sm:$0xff] %vm2199_vm2, %v2198_v20  ;;  %2291 = vmatprep.subr.bf16.mxu1 %v2226_v25  ;;  %v2200_v57 = vsel %vm2199_vm2, %v2196_v17, %v2198_v20  ;;  %v7530_v17 = vld [vmem:[%s11437_s1 + $0x84] ss:$16 sps:$4 sm:$0xff]   ;;  %v2592_v25 = vld [vmem:[%s11438_s2 + $0x48] sm:$0xff] }
 0x5ac   :  { %v2591_v20 = vld [vmem:[%s11438_s2 + $0x40] sm:$0xff] }
 0x5ae   :  { %2292 = vmatpush1.bf16.msra.mxu1 %v2172_v11  ;;  %v2228_v58 = vld [vmem:[#allocation2 + $0x1d0] sm:$0xff] }
 0x5af   :  { %2293 = vmatprep.subr.bf16.mxu1 %v2228_v58  ;;  %v2593_v58 = vld [vmem:[%s11438_s2 + $0x50] sm:$0xff] }
 0x5b2   :  { %2294 = vmatpush1.bf16.msra.mxu1 %v2186_v51  ;;  %v2230_v27 = vld [vmem:[#allocation2 + $0x210] sm:$0xff] }
 0x5b3   :  { %2295 = vmatprep.subr.bf16.mxu1 %v2230_v27  ;;  %v2594_v27 = vld [vmem:[%s11438_s2 + $0x58] sm:$0xff] }
 0x5b6   :  { %2296 = vmatpush1.bf16.msra.mxu1 %v2200_v57 }
 0x5b9   :  { %2312 = vmatmul.mubr.bf16.vlgmr.msra.gmra.mrb[12].mxu1 %v7524_v28 }
 0x5ba   :  { %6975 = vmatprep.mubr.msk.bf16.mxu1 %vm1113_vm15, %v7525_v29  ;;  %v2238_v32 = vpop.permute.xlu0 %2237 }
 0x5bb   :  { %v2243_v16 = vpop.permute.xlu1 %2242 }
 0x5be   :  { %v2248_v52 = vpop.permute.xlu0 %2247 }
 0x5bf   :  { %v2253_v60 = vpop.permute.xlu1 %2252 }
 0x5c1   :  { %2322 = vmatmul.mubr.bf16.gmra.mrb[16].mxu1 %v7527_v30 }
 0x5c2   :  { %2683 = vmatprep.mubr.bf16.mxu1 %v7530_v17 }
 0x68c   :  { %v2313_v0 = vpop.f32.mrb[12].mxu1 }
 0x68d   :  { %v2314_v34 = vadd.f32 %v2313_v0, %v2238_v32  ;;  %v2315_v42 = vpop.f32.mrb[13].mxu1 }
 0x68e   :  { %v2316_v37 = vadd.f32 %v2315_v42, %v2238_v32  ;;  %v2317_v50 = vpop.f32.mrb[14].mxu1  ;;  %v7541_v42 = vld [vmem:[%s11442_s6 + $0xc] ss:$24 sps:$4 sm:$0xff]  }
 0x68f   :  { %v2332_v24 = vmax.f32 %v2314_v34, 0.0  ;;  %v2318_v62 = vadd.f32 %v2317_v50, %v2243_v16  ;;  %v2319_v15 = vpop.f32.mrb[15].mxu1  ;;  %3406 = vmatprep.subr.bf16.mxu0 %v7541_v42  ;;  %v7593_v42 = vld [vmem:[%s11442_s6 + $0x1b8] ss:$24 sps:$4 sm:$0xff]  }
 0x690   :  { %v2333_v56 = vmax.f32 %v2316_v37, 0.0  ;;  %v2320_v18 = vadd.f32 %v2319_v15, %v2243_v16 }
 0x691   :  { %v2334_v44 = vmax.f32 %v2318_v62, 0.0  ;;  %v2351_v12 = vmul.f32 %v9216_v39, %v2332_v24  ;;  %v7545_v24 = vld [vmem:[%s11442_s6 + $0x38] ss:$24 sps:$4 sm:$0xff]   ;;  %v7547_v62 = vld [vmem:[%s11442_s6 + $0x3c] ss:$24 sps:$4 sm:$0xff]  }
 0x692   :  { %v2335_v45 = vmax.f32 %v2320_v18, 0.0  ;;  %v2352_v47 = vmul.f32 %v9220_v41, %v2333_v56  ;;  %v7553_v18 = vld [vmem:[%s11442_s6 + $0x6c] ss:$24 sps:$4 sm:$0xff]  }
 0x693   :  { %v2353_v46 = vmul.f32 %v9216_v39, %v2334_v44 }
 0x694   :  { %v2354_v10 = vmul.f32 %v9220_v41, %v2335_v45  ;;  %v2323_v53 = vpop.f32.mrb[16].mxu1 }
 0x695   :  { %v9226_v54 = vpack.c.bf16 %v2353_v46, %v2351_v12  ;;  %v2324_v55 = vadd.f32 %v2323_v53, %v2248_v52  ;;  %v2325_v59 = vpop.f32.mrb[17].mxu1  ;;  %v7551_v12 = vld [vmem:[%s11442_s6 + $0x68] ss:$24 sps:$4 sm:$0xff]   ;;  %v7559_v46 = vld [vmem:[%s11442_s6 + $0x9c] ss:$24 sps:$4 sm:$0xff]  }
 0x696   :  { %v9228_v13 = vpack.c.bf16 %v2354_v10, %v2352_v47  ;;  %v2326_v61 = vadd.f32 %v2325_v59, %v2248_v52  ;;  %v2327_v36 = vpop.f32.mrb[18].mxu1  ;;  %v7565_v59 = vld [vmem:[%s11442_s6 + $0xcc] ss:$24 sps:$4 sm:$0xff]  }
 0x697   :  { %2455 = vst [vmem:[#allocation2 + $0x208] sm:$0xff] %v9226_v54  ;;  %v2336_v63 = vmax.f32 %v2324_v55, 0.0  ;;  %v2328_v38 = vadd.f32 %v2327_v36, %v2253_v60  ;;  %v2329_v2 = vpop.f32.mrb[19].mxu1  ;;  %2367 = vrot.lane.b32.xlu0 %v9226_v54, %s7991_s5  ;;  %v7557_v55 = vld [vmem:[%s11442_s6 + $0x98] ss:$24 sps:$4 sm:$0xff]  }
 0x698   :  { %v2337_v5 = vmax.f32 %v2326_v61, 0.0  ;;  %v2330_v22 = vadd.f32 %v2329_v2, %v2253_v60  ;;  %2369 = vrot.lane.b32.xlu1 %v9228_v13, %s7991_s5  ;;  %v7571_v2 = vld [vmem:[%s11442_s6 + $0xfc] ss:$24 sps:$4 sm:$0xff]  }
 0x699   :  { %v2338_v7 = vmax.f32 %v2328_v38, 0.0  ;;  %v2355_v40 = vmul.f32 %v9216_v39, %v2336_v63  ;;  %v7563_v38 = vld [vmem:[%s11442_s6 + $0xc8] ss:$24 sps:$4 sm:$0xff]  }
 0x69a   :  { %v2339_v8 = vmax.f32 %v2330_v22, 0.0  ;;  %v2356_v4 = vmul.f32 %v9220_v41, %v2337_v5 }
 0x69b   :  { %v2357_v11 = vmul.f32 %v9216_v39, %v2338_v7 }
 0x69c   :  { %v2358_v14 = vmul.f32 %v9220_v41, %v2339_v8 }
 0x69d   :  { %v9239_v21 = vpack.c.bf16 %v2357_v11, %v2355_v40  ;;  %v7569_v40 = vld [vmem:[%s11442_s6 + $0xf8] ss:$24 sps:$4 sm:$0xff]   ;;  %v7577_v11 = vld [vmem:[%s11442_s6 + $0x12c] ss:$24 sps:$4 sm:$0xff]  }
 0x69e   :  { %v9241_v51 = vpack.c.bf16 %v2358_v14, %v2356_v4 }
 0x69f   :  { %2457 = vst [vmem:[#allocation2 + $0x248] sm:$0xff] %v9239_v21  ;;  %2371 = vrot.lane.b32.xlu0 %v9239_v21, %s7991_s5 }
 0x6a0   :  { %2373 = vrot.lane.b32.xlu1 %v9241_v51, %s7991_s5 }
 0x6a3   :  { %2389 = vrot.lane.b32.xlu0 %v9226_v54, %s7992_s20 }
 0x6a4   :  { %2391 = vrot.lane.b32.xlu1 %v9228_v13, %s7992_s20 }
 0x6a7   :  { %2393 = vrot.lane.b32.xlu0 %v9239_v21, %s7992_s20 }
 0x6a8   :  { %2395 = vrot.lane.b32.xlu1 %v9241_v51, %s7992_s20 }
 0x6ab   :  { %2411 = vrot.lane.b32.xlu0 %v9226_v54, %s7993_s21 }
 0x6ac   :  { %2413 = vrot.lane.b32.xlu1 %v9228_v13, %s7993_s21 }
 0x6af   :  { %2415 = vrot.lane.b32.xlu0 %v9239_v21, %s7993_s21 }
 0x6b0   :  { %2417 = vrot.lane.b32.xlu1 %v9241_v51, %s7993_s21 }
 0x6b3   :  { %2433 = vrot.lane.b32.xlu0 %v9226_v54, %s7986_s13 }
 0x6b4   :  { %2435 = vrot.lane.b32.xlu1 %v9228_v13, %s7986_s13 }
 0x6b7   :  { %2437 = vrot.lane.b32.xlu0 %v9239_v21, %s7986_s13 }
 0x6b8   :  { %2439 = vrot.lane.b32.xlu1 %v9241_v51, %s7986_s13 }
 0x6bb   :  { %2459 = vrot.lane.b32.xlu0 %v9226_v54, %s7987_s14 }
 0x6bc   :  { %2461 = vrot.lane.b32.xlu1 %v9228_v13, %s7987_s14 }
 0x6bf   :  { %2463 = vrot.lane.b32.xlu0 %v9239_v21, %s7987_s14 }
 0x6c0   :  { %2465 = vrot.lane.b32.xlu1 %v9241_v51, %s7987_s14 }
 0x6c3   :  { %2481 = vrot.lane.b32.xlu0 %v9226_v54, %s7994_s22 }
 0x6c4   :  { %2483 = vrot.lane.b32.xlu1 %v9228_v13, %s7994_s22 }
 0x6c7   :  { %2485 = vrot.lane.b32.xlu0 %v9239_v21, %s7994_s22 }
 0x6c8   :  { %2487 = vrot.lane.b32.xlu1 %v9241_v51, %s7994_s22 }
 0x6cb   :  { %2503 = vrot.lane.b32.xlu0 %v9226_v54, %s7995_s23 }
 0x6cc   :  { %2505 = vrot.lane.b32.xlu1 %v9228_v13, %s7995_s23 }
 0x6cf   :  { %2507 = vrot.lane.b32.xlu0 %v9239_v21, %s7995_s23 }
 0x6d0   :  { %2509 = vrot.lane.b32.xlu1 %v9241_v51, %s7995_s23 }
 0x6d3   :  { %2525 = vrot.lane.b32.xlu0 %v9226_v54, %s7996_s3 }
 0x6d4   :  { %2527 = vrot.lane.b32.xlu1 %v9228_v13, %s7996_s3 }
 0x6d7   :  { %2529 = vrot.lane.b32.xlu0 %v9239_v21, %s7996_s3 }
 0x6d8   :  { %2531 = vrot.lane.b32.xlu1 %v9241_v51, %s7996_s3 }
 0x6db   :  { %2597 = vperm.xlu0 %7367, %v2591_v20  }
 0x6dc   :  { %2602 = vperm.xlu1 %7368, %v2592_v25   ;;  %v7575_v25 = vld [vmem:[%s11442_s6 + $0x128] ss:$24 sps:$4 sm:$0xff]  }
 0x6df   :  { %2607 = vperm.xlu0 %7367, %v2593_v58  }
 0x6e0   :  { %2612 = vperm.xlu1 %7368, %v2594_v27   ;;  %v7583_v27 = vld [vmem:[%s11442_s6 + $0x15c] ss:$24 sps:$4 sm:$0xff]  }
 0x6e3   :  { %3604 = vrot.lane.b32.xlu0 %v8797_v49, %s7984_s11 }
 0x6e4   :  { %3606 = vrot.lane.b32.xlu1 %v8800_v26, %s7984_s11 }
 0x6e7   :  { %3697 = vrot.lane.b32.xlu0 %v8797_v49, %s7983_s0 }
 0x6e8   :  { %3699 = vrot.lane.b32.xlu1 %v8800_v26, %s7983_s0 }
 0x6eb   :  { %3790 = vrot.lane.b32.xlu0 %v8797_v49, %s7985_s12 }
 0x6ec   :  { %3792 = vrot.lane.b32.xlu1 %v8800_v26, %s7985_s12 }
 0x6ef   :  { %3883 = vrot.lane.b32.xlu0 %v8797_v49, %s7986_s13 }
 0x6f0   :  { %3885 = vrot.lane.b32.xlu1 %v8800_v26, %s7986_s13 }
 0x6f3   :  { %3608 = vrot.lane.b32.xlu0 %v8816_v35, %s7984_s11 }
 0x6f4   :  { %3610 = vrot.lane.b32.xlu1 %v8818_v31, %s7984_s11 }
 0x6f7   :  { %3703 = vrot.lane.b32.xlu0 %v8818_v31, %s7983_s0 }
 0x6f8   :  { %3701 = vrot.lane.b32.xlu1 %v8816_v35, %s7983_s0 }
 0x6fb   :  { %3996 = vrot.lane.b32.xlu0 %v8800_v26, %s7987_s14 }
 0x6fc   :  { %3998 = vrot.lane.b32.xlu1 %v8816_v35, %s7987_s14 }
 0x6ff   :  { %3994 = vrot.lane.b32.xlu0 %v8797_v49, %s7987_s14 }
 0x700   :  { %3796 = vrot.lane.b32.xlu1 %v8818_v31, %s7985_s12 }
 0x703   :  { %3794 = vrot.lane.b32.xlu0 %v8816_v35, %s7985_s12 }
 0x704   :  { %4089 = vrot.lane.b32.xlu1 %v8800_v26, %s7988_s15 }
 0x707   :  { %4091 = vrot.lane.b32.xlu0 %v8816_v35, %s7988_s15 }
 0x708   :  { %4087 = vrot.lane.b32.xlu1 %v8797_v49, %s7988_s15 }
 0x709   :  { %v2368_v57 = vpop.permute.xlu0 %2367 }
 0x70a   :  { %2383 = vst.msk [vmem:[#allocation2 + $0x8] sm:$0xff] %vm2110_vm9, %v2368_v57  ;;  %v2370_v28 = vpop.permute.xlu1 %2369 }
 0x70b   :  { %v2375_v29 = vsel %vm2105_vm14, %v2368_v57, %v2370_v28  ;;  %2385 = vst.msk [vmem:[#allocation2 + $0x18] sm:$0xff] %vm2105_vm14, %v2370_v28  ;;  %3889 = vrot.lane.b32.xlu0 %v8818_v31, %s7986_s13 }
 0x70c   :  { %3887 = vrot.lane.b32.xlu1 %v8816_v35, %s7986_s13  ;;  %2651 = vmatprep.subr.bf16.mxu1 %v2375_v29 }
 0x70f   :  { %4182 = vrot.lane.b32.xlu0 %v8800_v26, %s7989_s16 }
 0x710   :  { %4184 = vrot.lane.b32.xlu1 %v8816_v35, %s7989_s16  ;;  %v7539_v35 = vld [vmem:[%s11442_s6 + $0x8] ss:$24 sps:$4 sm:$0xff]  }
 0x711   :  { %v2372_v30 = vpop.permute.xlu0 %2371  ;;  %v2555_v32 = vld [vmem:[#allocation2 + $0x8] sm:$0xff]  ;;  %3407 = vmatpush1.bf16.msra.mxu0 %v7539_v35 }
 0x712   :  { %2386 = vst.msk [vmem:[#allocation2 + $0x48] sm:$0xff] %vm2110_vm9, %v2372_v30  ;;  %v2374_v33 = vpop.permute.xlu1 %2373  ;;  %2652 = vmatpush1.bf16.msra.mxu1 %v2555_v32  ;;  %3408 = vmatprep.subr.bf16.mxu0 %v7547_v62  ;;  %v7605_v62 = vld [vmem:[%s11442_s6 + $0x218] ss:$24 sps:$4 sm:$0xff]   ;;  %vm11484_vm9 = vcmask 908288  }
 0x713   :  { %v2376_v0 = vsel %vm2105_vm14, %v2372_v30, %v2374_v33  ;;  %2388 = vst.msk [vmem:[#allocation2 + $0x58] sm:$0xff] %vm2105_vm14, %v2374_v33  ;;  %4180 = vrot.lane.b32.xlu0 %v8797_v49, %s7989_s16  ;;  %v7581_v30 = vld [vmem:[%s11442_s6 + $0x158] ss:$24 sps:$4 sm:$0xff]   ;;  %v7589_v33 = vld [vmem:[%s11442_s6 + $0x18c] ss:$24 sps:$4 sm:$0xff]   ;;  %vm11485_vm14 = vmmov %vm11484_vm9 }
 0x714   :  { %2653 = vmatprep.subr.bf16.mxu1 %v2376_v0 }
 0x715   :  { %v2390_v31 = vpop.permute.xlu0 %2389  ;;  %3409 = vmatpush1.bf16.msra.mxu0 %v7545_v24 }
 0x716   :  { %2405 = vst.msk [vmem:[#allocation2 + $0x88] sm:$0xff] %vm2124_vm13, %v2390_v31  ;;  %v2392_v34 = vpop.permute.xlu1 %2391  ;;  %3410 = vmatprep.subr.bf16.mxu0 %v7553_v18 }
 0x717   :  { %2407 = vst.msk [vmem:[#allocation2 + $0x98] sm:$0xff] %vm2119_vm12, %v2392_v34  ;;  %v2397_v49 = vsel %vm2119_vm12, %v2390_v31, %v2392_v34  ;;  %v7587_v34 = vld [vmem:[%s11442_s6 + $0x188] ss:$24 sps:$4 sm:$0xff]  }
 0x719   :  { %v2394_v16 = vpop.permute.xlu0 %2393  ;;  %v2557_v37 = vld [vmem:[#allocation2 + $0x48] sm:$0xff]  ;;  %3411 = vmatpush1.bf16.msra.mxu0 %v7551_v12 }
 0x71a   :  { %2408 = vst.msk [vmem:[#allocation2 + $0xc8] sm:$0xff] %vm2124_vm13, %v2394_v16  ;;  %v2396_v50 = vpop.permute.xlu1 %2395  ;;  %2654 = vmatpush1.bf16.msra.mxu1 %v2557_v37  ;;  %3412 = vmatprep.subr.bf16.mxu0 %v7559_v46  ;;  %v7601_v37 = vld [vmem:[%s11442_s6 + $0x1ec] ss:$24 sps:$4 sm:$0xff]   ;;  %v7611_v12 = vld [vmem:[%s11442_s6 + $0x248] ss:$24 sps:$4 sm:$0xff]  }
 0x71b   :  { %2410 = vst.msk [vmem:[#allocation2 + $0xd8] sm:$0xff] %vm2119_vm12, %v2396_v50  ;;  %2655 = vmatprep.subr.bf16.mxu1 %v2397_v49  ;;  %v2398_v44 = vsel %vm2119_vm12, %v2394_v16, %v2396_v50  ;;  %v7607_v50 = vld [vmem:[%s11442_s6 + $0x21c] ss:$24 sps:$4 sm:$0xff]   ;;  %vm11479_vm12 = vcmask 138240  }
 0x71d   :  { %v2412_v15 = vpop.permute.xlu0 %2411  ;;  %v2559_v56 = vld [vmem:[#allocation2 + $0x88] sm:$0xff]  ;;  %3413 = vmatpush1.bf16.msra.mxu0 %v7557_v55 }
 0x71e   :  { %2427 = vst.msk [vmem:[#allocation2 + $0x108] sm:$0xff] %vm2138_vm11, %v2412_v15  ;;  %v2414_v45 = vpop.permute.xlu1 %2413  ;;  %2656 = vmatpush1.bf16.msra.mxu1 %v2559_v56  ;;  %3414 = vmatprep.subr.bf16.mxu0 %v7565_v59  ;;  %v7613_v56 = vld [vmem:[%s11442_s6 + $0x24c] ss:$24 sps:$4 sm:$0xff]  }
 0x71f   :  { %2429 = vst.msk [vmem:[#allocation2 + $0x118] sm:$0xff] %vm2133_vm6, %v2414_v45  ;;  %2657 = vmatprep.subr.bf16.mxu1 %v2398_v44  ;;  %v2419_v10 = vsel %vm2133_vm6, %v2412_v15, %v2414_v45 }
 0x721   :  { %v2416_v52 = vpop.permute.xlu0 %2415  ;;  %v2561_v47 = vld [vmem:[#allocation2 + $0xc8] sm:$0xff]  ;;  %3415 = vmatpush1.bf16.msra.mxu0 %v7563_v38 }
 0x722   :  { %2430 = vst.msk [vmem:[#allocation2 + $0x148] sm:$0xff] %vm2138_vm11, %v2416_v52  ;;  %v2418_v53 = vpop.permute.xlu1 %2417  ;;  %2658 = vmatpush1.bf16.msra.mxu1 %v2561_v47  ;;  %3416 = vmatprep.subr.bf16.mxu0 %v7571_v2  ;;  %v7531_v2 = vld [vmem:[%s11437_s1 + $0xa4] ss:$16 sps:$4 sm:$0xff]   ;;  %vm11478_vm11 = vcmask 1047688  }
 0x723   :  { %2432 = vst.msk [vmem:[#allocation2 + $0x158] sm:$0xff] %vm2133_vm6, %v2418_v53  ;;  %2659 = vmatprep.subr.bf16.mxu1 %v2419_v10  ;;  %v2420_v36 = vsel %vm2133_vm6, %v2416_v52, %v2418_v53  ;;  %vm11477_vm6 = vcmask 146432  }
 0x725   :  { %v2434_v60 = vpop.permute.xlu0 %2433  ;;  %v2563_v61 = vld [vmem:[#allocation2 + $0x108] sm:$0xff]  ;;  %3417 = vmatpush1.bf16.msra.mxu0 %v7569_v40  ;;  %v7533_v40 = vld [vmem:[%s11437_s1 + $0xa0] ss:$16 sps:$4 sm:$0xff]  }
 0x726   :  { %2449 = vst.msk [vmem:[#allocation2 + $0x188] sm:$0xff] %vm889_vm7, %v2434_v60  ;;  %v2436_v63 = vpop.permute.xlu1 %2435  ;;  %2660 = vmatpush1.bf16.msra.mxu1 %v2563_v61  ;;  %3418 = vmatprep.subr.bf16.mxu0 %v7577_v11 }
 0x727   :  { %2661 = vmatprep.subr.bf16.mxu1 %v2420_v36  ;;  %v2441_v7 = vsel %vm328_vm8, %v2434_v60, %v2436_v63  ;;  %v7528_v63 = vld [vmem:[%s11437_s1 + $0x80] ss:$16 sps:$4 sm:$0xff]  }
 0x729   :  { %v2438_v5 = vpop.permute.xlu0 %2437  ;;  %v2565_v22 = vld [vmem:[#allocation2 + $0x148] sm:$0xff]  ;;  %3419 = vmatpush1.bf16.msra.mxu0 %v7575_v25 }
 0x72a   :  { %2452 = vst.msk [vmem:[#allocation2 + $0x1c8] sm:$0xff] %vm889_vm7, %v2438_v5  ;;  %v2440_v8 = vpop.permute.xlu1 %2439  ;;  %2662 = vmatpush1.bf16.msra.mxu1 %v2565_v22  ;;  %3420 = vmatprep.subr.bf16.mxu0 %v7583_v27 }
 0x72b   :  { %2663 = vmatprep.subr.bf16.mxu1 %v2441_v7  ;;  %v2442_v17 = vsel %vm328_vm8, %v2438_v5, %v2440_v8  ;;  %v7538_v7 = vld [vmem:[%s11442_s6 + $0x4] ss:$24 sps:$4 sm:$0xff]  }
 0x72d   :  { %v2460_v4 = vpop.permute.xlu0 %2459  ;;  %v2567_v14 = vld [vmem:[#allocation2 + $0x188] sm:$0xff]  ;;  %3421 = vmatpush1.bf16.msra.mxu0 %v7581_v30 }
 0x72e   :  { %v2462_v20 = vpop.permute.xlu1 %2461  ;;  %2664 = vmatpush1.bf16.msra.mxu1 %v2567_v14  ;;  %3422 = vmatprep.subr.bf16.mxu0 %v7589_v33  ;;  %v7542_v30 = vld [vmem:[%s11442_s6 + $0x30] ss:$24 sps:$4 sm:$0xff]   ;;  %v7550_v33 = vld [vmem:[%s11442_s6 + $0x64] ss:$24 sps:$4 sm:$0xff]  }
 0x72f   :  { %v2467_v58 = vsel %vm374_vm10, %v2460_v4, %v2462_v20  ;;  %2477 = vst.msk [vmem:[#allocation2 + $0x290] sm:$0xff] %vm374_vm10, %v2462_v20  ;;  %2665 = vmatprep.subr.bf16.mxu1 %v2442_v17  ;;  %v7534_v20 = vld [vmem:[%s11437_s1 + $0x88] ss:$16 sps:$4 sm:$0xff]  }
 0x730   :  { %2476 = vst [vmem:[#allocation2 + $0x288] sm:$0xff] %v2467_v58 }
 0x731   :  { %v2464_v57 = vpop.permute.xlu0 %2463  ;;  %v2569_v28 = vld [vmem:[#allocation2 + $0x1c8] sm:$0xff]  ;;  %3423 = vmatpush1.bf16.msra.mxu0 %v7587_v34 }
 0x732   :  { %v2466_v29 = vpop.permute.xlu1 %2465  ;;  %2666 = vmatpush1.bf16.msra.mxu1 %v2569_v28 }
 0x733   :  { %v2468_v32 = vsel %vm374_vm10, %v2464_v57, %v2466_v29  ;;  %2480 = vst.msk [vmem:[#allocation2 + $0x2d0] sm:$0xff] %vm374_vm10, %v2466_v29  ;;  %2667 = vmatprep.subr.bf16.mxu1 %v9228_v13  ;;  %v7595_v13 = vld [vmem:[%s11442_s6 + $0x1bc] ss:$24 sps:$4 sm:$0xff]  }
 0x734   :  { %2479 = vst [vmem:[#allocation2 + $0x2c8] sm:$0xff] %v2468_v32  ;;  %3424 = vmatprep.subr.bf16.mxu0 %v7595_v13  ;;  %v7544_v57 = vld [vmem:[%s11442_s6 + $0x34] ss:$24 sps:$4 sm:$0xff]   ;;  %v7548_v13 = vld [vmem:[%s11442_s6 + $0x60] ss:$24 sps:$4 sm:$0xff]  }
 0x735   :  { %v2482_v0 = vpop.permute.xlu0 %2481  ;;  %3425 = vmatpush1.bf16.msra.mxu0 %v7593_v42  ;;  %v7556_v42 = vld [vmem:[%s11442_s6 + $0x94] ss:$24 sps:$4 sm:$0xff]  }
 0x736   :  { %v2484_v31 = vpop.permute.xlu1 %2483  ;;  %2668 = vmatpush1.bf16.msra.mxu1 %v9226_v54  ;;  %v2576_v16 = vld [vmem:[#allocation2 + $0x290] sm:$0xff]  ;;  %3426 = vmatprep.subr.bf16.mxu0 %v7601_v37 }
 0x737   :  { %2499 = vst.msk [vmem:[#allocation2 + $0x310] sm:$0xff] %vm2171_vm3, %v2484_v31  ;;  %2669 = vmatprep.subr.bf16.mxu1 %v9241_v51  ;;  %v7599_v51 = vld [vmem:[%s11442_s6 + $0x1e8] ss:$24 sps:$4 sm:$0xff]   ;;  %v2489_v46 = vsel %vm2171_vm3, %v2482_v0, %v2484_v31 }
 0x738   :  { %v7535_v31 = vld [vmem:[%s11437_s1 + $0xa8] ss:$16 sps:$4 sm:$0xff]  }
 0x739   :  { %v2486_v35 = vpop.permute.xlu0 %2485  ;;  %3427 = vmatpush1.bf16.msra.mxu0 %v7599_v51  ;;  %v7554_v37 = vld [vmem:[%s11442_s6 + $0x90] ss:$24 sps:$4 sm:$0xff]  }
 0x73a   :  { %v2488_v54 = vpop.permute.xlu1 %2487  ;;  %2670 = vmatpush1.bf16.msra.mxu1 %v9239_v21  ;;  %v2578_v24 = vld [vmem:[#allocation2 + $0x2d0] sm:$0xff]  ;;  %3428 = vmatprep.subr.bf16.mxu0 %v7607_v50 }
 0x73b   :  { %2502 = vst.msk [vmem:[#allocation2 + $0x350] sm:$0xff] %vm2171_vm3, %v2488_v54  ;;  %2671 = vmatprep.subr.bf16.mxu1 %v2576_v16  ;;  %v2490_v53 = vsel %vm2171_vm3, %v2486_v35, %v2488_v54 }
 0x73d   :  { %v2504_v49 = vpop.permute.xlu0 %2503  ;;  %3429 = vmatpush1.bf16.msra.mxu0 %v7605_v62 }
 0x73e   :  { %v2506_v21 = vpop.permute.xlu1 %2505  ;;  %2672 = vmatpush1.bf16.msra.mxu1 %v2467_v58  ;;  %v2580_v44 = vld [vmem:[#allocation2 + $0x310] sm:$0xff]  ;;  %3430 = vmatprep.subr.bf16.mxu0 %v7613_v56  ;;  %v7536_v58 = vld [vmem:[%s11442_s6] ss:$24 sps:$4 sm:$0xff]  }
 0x73f   :  { %2521 = vst.msk [vmem:[#allocation2 + $0x390] sm:$0xff] %vm2185_vm4, %v2506_v21  ;;  %2673 = vmatprep.subr.bf16.mxu1 %v2578_v24  ;;  %v2511_v60 = vsel %vm2185_vm4, %v2504_v49, %v2506_v21  ;;  %v7562_v49 = vld [vmem:[%s11442_s6 + $0xc4] ss:$24 sps:$4 sm:$0xff]   ;;  %v7560_v24 = vld [vmem:[%s11442_s6 + $0xc0] ss:$24 sps:$4 sm:$0xff]  }
 0x740   :  { %v7568_v56 = vld [vmem:[%s11442_s6 + $0xf4] ss:$24 sps:$4 sm:$0xff]  }
 0x741   :  { %v2508_v15 = vpop.permute.xlu0 %2507  ;;  %3431 = vmatpush1.bf16.msra.mxu0 %v7611_v12 }
 0x742   :  { %v2510_v18 = vpop.permute.xlu1 %2509  ;;  %2674 = vmatpush1.bf16.msra.mxu1 %v2468_v32  ;;  %v2582_v45 = vld [vmem:[#allocation2 + $0x350] sm:$0xff] }
 0x743   :  { %2524 = vst.msk [vmem:[#allocation2 + $0x3d0] sm:$0xff] %vm2185_vm4, %v2510_v18  ;;  %2675 = vmatprep.subr.bf16.mxu1 %v2580_v44  ;;  %v2512_v36 = vsel %vm2185_vm4, %v2508_v15, %v2510_v18  ;;  %vm11476_vm4 = vcmask 1047696  }
 0x745   :  { %v2526_v52 = vpop.permute.xlu0 %2525 }
 0x746   :  { %v2528_v47 = vpop.permute.xlu1 %2527  ;;  %2676 = vmatpush1.bf16.msra.mxu1 %v2489_v46  ;;  %v2584_v10 = vld [vmem:[#allocation2 + $0x390] sm:$0xff]  ;;  %v7574_v46 = vld [vmem:[%s11442_s6 + $0x124] ss:$24 sps:$4 sm:$0xff]  }
 0x747   :  { %2543 = vst.msk [vmem:[#allocation2 + $0x410] sm:$0xff] %vm2199_vm2, %v2528_v47  ;;  %2677 = vmatprep.subr.bf16.mxu1 %v2582_v45  ;;  %3927 = vst [vmem:[#allocation2 + $0x390] sm:$0xff] %v8800_v26  ;;  %v2533_v5 = vsel %vm2199_vm2, %v2526_v52, %v2528_v47  ;;  %v7566_v45 = vld [vmem:[%s11442_s6 + $0xf0] ss:$24 sps:$4 sm:$0xff]  }
 0x749   :  { %v2530_v55 = vpop.permute.xlu0 %2529 }
 0x74a   :  { %v2532_v59 = vpop.permute.xlu1 %2531  ;;  %2678 = vmatpush1.bf16.msra.mxu1 %v2490_v53  ;;  %v2586_v61 = vld [vmem:[#allocation2 + $0x3d0] sm:$0xff]  ;;  %v7572_v53 = vld [vmem:[%s11442_s6 + $0x120] ss:$24 sps:$4 sm:$0xff]  }
 0x74b   :  { %2546 = vst.msk [vmem:[#allocation2 + $0x450] sm:$0xff] %vm2199_vm2, %v2532_v59  ;;  %2679 = vmatprep.subr.bf16.mxu1 %v2584_v10  ;;  %v2534_v8 = vsel %vm2199_vm2, %v2530_v55, %v2532_v59  ;;  %v7580_v59 = vld [vmem:[%s11442_s6 + $0x154] ss:$24 sps:$4 sm:$0xff]   ;;  %vm11482_vm2 = vmmov %vm11479_vm12 }
 0x74c   :  { %vm11483_vm3 = vmmov %vm11482_vm2 }
 0x74e   :  { %2680 = vmatpush1.bf16.msra.mxu1 %v2511_v60  ;;  %v2588_v38 = vld [vmem:[#allocation2 + $0x410] sm:$0xff] }
 0x74f   :  { %2681 = vmatprep.subr.bf16.mxu1 %v2586_v61 }
 0x752   :  { %2682 = vmatpush1.bf16.msra.mxu1 %v2512_v36  ;;  %v2590_v22 = vld [vmem:[#allocation2 + $0x450] sm:$0xff] }
 0x753   :  { %2704 = vmatprep.subr.bf16.mxu1 %v2588_v38  ;;  %v7578_v36 = vld [vmem:[%s11442_s6 + $0x150] ss:$24 sps:$4 sm:$0xff]  }
 0x755   :  { %2684 = vmatmul.mubr.bf16.vlgmr.msra.gmra.mrb[20].mxu1 %v7528_v63 }
 0x756   :  { %2705 = vmatpush1.bf16.msra.mxu1 %v2533_v5  ;;  %2693 = vmatprep.mubr.bf16.mxu1 %v7531_v2  ;;  %v7586_v2 = vld [vmem:[%s11442_s6 + $0x184] ss:$24 sps:$4 sm:$0xff]  }
 0x757   :  { %2706 = vmatprep.subr.bf16.mxu1 %v2590_v22  ;;  %v7584_v22 = vld [vmem:[%s11442_s6 + $0x180] ss:$24 sps:$4 sm:$0xff]  }
 0x75a   :  { %v9502_v11 = vpop.permute.xlu0 %2597  ;;  %2707 = vmatpush1.bf16.msra.mxu1 %v2534_v8 }
 0x75b   :  { %v9504_v4 = vpop.permute.xlu1 %2602  ;;  %3353 = vmatprep.subr.bf16.mxu1 %v7538_v7 }
 0x75d   :  { %2694 = vmatmul.mubr.bf16.gmra.mrb[24].mxu1 %v7533_v40 }
 0x75e   :  { %v9506_v14 = vpop.permute.xlu0 %2607  ;;  %2736 = vmatprep.mubr.bf16.mxu1 %v11452_v3 }
 0x75f   :  { %v9509_v17 = vpop.permute.xlu1 %2612 }
 0x762   :  { %v3605_v25 = vpop.permute.xlu0 %3604 }
 0x763   :  { %3628 = vst.msk [vmem:[#allocation2 + $0x88] sm:$0xff] %vm790_vm1, %v3605_v25  ;;  %v3607_v27 = vpop.permute.xlu1 %3606 }
 0x764   :  { %v3616_v28 = vsel %vm226_vm5, %v3605_v25, %v3607_v27 }
 0x765   :  { %3629 = vst [vmem:[#allocation2 + $0x90] sm:$0xff] %v3616_v28  ;;  %6982 = vmatmul.mubr.msk.bf16.vlgmr.msra.gmra.mrb[20].mxu1 %vm32_vm0, %v7534_v20  ;;  %v7592_v20 = vld [vmem:[%s11442_s6 + $0x1b4] ss:$24 sps:$4 sm:$0xff]   ;;  %v7598_v28 = vld [vmem:[%s11442_s6 + $0x1e4] ss:$24 sps:$4 sm:$0xff]  }
 0x766   :  { %v3698_v29 = vpop.permute.xlu0 %3697  ;;  %2746 = vmatprep.mubr.bf16.mxu1 %v11452_v3  ;;  %3354 = vmatpush1.bf16.msra.mxu1 %v7536_v58  ;;  %v7590_v58 = vld [vmem:[%s11442_s6 + $0x1b0] ss:$24 sps:$4 sm:$0xff]  }
 0x767   :  { %3721 = vst.msk [vmem:[#allocation2 + $0x148] sm:$0xff] %vm11476_vm4, %v3698_v29  ;;  %v3700_v32 = vpop.permute.xlu1 %3699  ;;  %3355 = vmatprep.subr.bf16.mxu1 %v7544_v57  ;;  %vm11487_vm4 = vcmask 900096  }
 0x768   :  { %v3709_v0 = vsel %vm11477_vm6, %v3698_v29, %v3700_v32 }
 0x769   :  { %3722 = vst [vmem:[#allocation2 + $0x150] sm:$0xff] %v3709_v0  ;;  %v7604_v0 = vld [vmem:[%s11442_s6 + $0x214] ss:$24 sps:$4 sm:$0xff]  }
 0x76a   :  { %v3791_v34 = vpop.permute.xlu0 %3790  ;;  %3356 = vmatpush1.bf16.msra.mxu1 %v7542_v30 }
 0x76b   :  { %3814 = vst.msk [vmem:[#allocation2 + $0x208] sm:$0xff] %vm11478_vm11, %v3791_v34  ;;  %v3793_v35 = vpop.permute.xlu1 %3792  ;;  %3357 = vmatprep.subr.bf16.mxu1 %v7550_v33  ;;  %vm11489_vm11 = vcmask 1047696  }
 0x76c   :  { %v3802_v54 = vsel %vm11479_vm12, %v3791_v34, %v3793_v35  ;;  %vm11490_vm12 = vcmask 1047688   ;;  %v4321_v3 = vld [vmem:[#allocation2 + $0x90] sm:$0xff] }
 0x76d   :  { %3815 = vst [vmem:[#allocation2 + $0x210] sm:$0xff] %v3802_v54  ;;  %6983 = vmatmul.mubr.msk.bf16.gmra.mrb[24].mxu1 %vm32_vm0, %v7535_v31  ;;  %vm11480_vm0 = vmmov %vm11477_vm6  ;;  %v7610_v54 = vld [vmem:[%s11442_s6 + $0x244] ss:$24 sps:$4 sm:$0xff]  }
 0x76e   :  { %v3884_v16 = vpop.permute.xlu0 %3883  ;;  %3358 = vmatpush1.bf16.msra.mxu1 %v7548_v13  ;;  %vm11481_vm13 = vmmov %vm11480_vm0 }
 0x76f   :  { %3907 = vst.msk [vmem:[#allocation2 + $0x2c8] sm:$0xff] %vm889_vm7, %v3884_v16  ;;  %v9548_v51 = vpop.permute.xlu1 %3885  ;;  %3359 = vmatprep.subr.bf16.mxu1 %v7556_v42  ;;  %vm11488_vm6 = vmmov %vm11487_vm4 }
 0x770   :  { %v3895_v50 = vsel %vm328_vm8, %v3884_v16, %v9548_v51 }
 0x771   :  { %3908 = vst [vmem:[#allocation2 + $0x2d0] sm:$0xff] %v3895_v50  ;;  %v7616_v50 = vld [vmem:[%s11442_s6 + $0x274] ss:$24 sps:$4 sm:$0xff]  }
 0x772   :  { %v3609_v21 = vpop.permute.xlu0 %3608  ;;  %3360 = vmatpush1.bf16.msra.mxu1 %v7554_v37 }
 0x773   :  { %v3617_v62 = vsel %vm226_vm5, %v3607_v27, %v3609_v21  ;;  %v9559_v15 = vpop.permute.xlu1 %3610  ;;  %3361 = vmatprep.subr.bf16.mxu1 %v7562_v49 }
 0x774   :  { %3630 = vst [vmem:[#allocation2 + $0x98] sm:$0xff] %v3617_v62  ;;  %v3618_v18 = vsel %vm226_vm5, %v3609_v21, %v9559_v15  ;;  %v7614_v21 = vld [vmem:[%s11442_s6 + $0x270] ss:$24 sps:$4 sm:$0xff]  }
 0x775   :  { %3631 = vst [vmem:[#allocation2 + $0xa0] sm:$0xff] %v3618_v18  ;;  %v7617_v62 = vld [vmem:[%s11442_s6 + $0x278] ss:$24 sps:$4 sm:$0xff]  }
 0x776   :  { %v9566_v44 = vpop.permute.xlu0 %3703  ;;  %3362 = vmatpush1.bf16.msra.mxu1 %v7560_v24  ;;  %v7619_v24 = vld [vmem:[%s11442_s6 + $0x27c] ss:$24 sps:$4 sm:$0xff]   ;;  %v7620_v18 = vld [vmem:[%s11442_s6 + $0x2a0] ss:$24 sps:$4 sm:$0xff]  }
 0x777   :  { %v3702_v12 = vpop.permute.xlu1 %3701  ;;  %3363 = vmatprep.subr.bf16.mxu1 %v7568_v56  ;;  %3432 = vmatprep.subr.bf16.mxu0 %v7619_v24  ;;  %v7622_v56 = vld [vmem:[%s11442_s6 + $0x2a4] ss:$24 sps:$4 sm:$0xff]   ;;  %v4357_v43 = vld [vmem:[#allocation2 + $0x210] sm:$0xff] }
 0x778   :  { %v3710_v52 = vsel %vm11480_vm0, %v3700_v32, %v3702_v12  ;;  %v3711_v47 = vsel %vm11481_vm13, %v3702_v12, %v9566_v44  ;;  %v7596_v32 = vld [vmem:[%s11442_s6 + $0x1e0] ss:$24 sps:$4 sm:$0xff]   ;;  %3433 = vmatpush1.bf16.msra.mxu0 %v7617_v62  ;;  %vm11491_vm0 = vmmov %vm11484_vm9 }
 0x779   :  { %3723 = vst [vmem:[#allocation2 + $0x158] sm:$0xff] %v3710_v52  ;;  %3724 = vst [vmem:[#allocation2 + $0x160] sm:$0xff] %v3711_v47  ;;  %v7623_v12 = vld [vmem:[%s11442_s6 + $0x2a8] ss:$24 sps:$4 sm:$0xff]   ;;  %v7631_v47 = vld [vmem:[%s11442_s6 + $0x2dc] ss:$24 sps:$4 sm:$0xff]  }
 0x77a   :  { %v3997_v10 = vpop.permute.xlu0 %3996  ;;  %3364 = vmatpush1.bf16.msra.mxu1 %v7566_v45  ;;  %v7625_v45 = vld [vmem:[%s11442_s6 + $0x2ac] ss:$24 sps:$4 sm:$0xff]   ;;  %v7626_v52 = vld [vmem:[%s11442_s6 + $0x2d0] ss:$24 sps:$4 sm:$0xff]   ;;  %vm11492_vm13 = vmmov %vm11491_vm0 }
 0x77b   :  { %v9580_v55 = vpop.permute.xlu1 %3998  ;;  %3365 = vmatprep.subr.bf16.mxu1 %v7574_v46  ;;  %3434 = vmatprep.subr.bf16.mxu0 %v7625_v45  ;;  %v7628_v46 = vld [vmem:[%s11442_s6 + $0x2d4] ss:$24 sps:$4 sm:$0xff]  }
 0x77c   :  { %v4007_v60 = vsel %vm374_vm10, %v3997_v10, %v9580_v55  ;;  %3435 = vmatpush1.bf16.msra.mxu0 %v7623_v12  ;;  %v7638_v12 = vld [vmem:[%s11442_s6 + $0x70] ss:$24 sps:$4 sm:$0xff]  }
 0x77d   :  { %4020 = vst [vmem:[#allocation2 + $0x450] sm:$0xff] %v4007_v60  ;;  %3436 = vmatprep.subr.bf16.mxu0 %v7631_v47  ;;  %v7649_v47 = vld [vmem:[%s11442_s6 + $0x104] ss:$24 sps:$4 sm:$0xff]  }
 0x77e   :  { %v3995_v61 = vpop.permute.xlu0 %3994  ;;  %3366 = vmatpush1.bf16.msra.mxu1 %v7572_v53  ;;  %v7634_v53 = vld [vmem:[%s11442_s6 + $0x14] ss:$24 sps:$4 sm:$0xff]  }
 0x77f   :  { %v4006_v63 = vsel %vm374_vm10, %v3995_v61, %v3997_v10  ;;  %v9591_v38 = vpop.permute.xlu1 %3796  ;;  %3367 = vmatprep.subr.bf16.mxu1 %v7580_v59  ;;  %v7629_v10 = vld [vmem:[%s11442_s6 + $0x2d8] ss:$24 sps:$4 sm:$0xff]  }
 0x780   :  { %4019 = vst [vmem:[#allocation2 + $0x448] sm:$0xff] %v4006_v63  ;;  %3437 = vmatpush1.bf16.msra.mxu0 %v7629_v10  ;;  %v7647_v10 = vld [vmem:[%s11442_s6 + $0x100] ss:$24 sps:$4 sm:$0xff]  }
 0x782   :  { %v3795_v5 = vpop.permute.xlu0 %3794  ;;  %3368 = vmatpush1.bf16.msra.mxu1 %v7578_v36 }
 0x783   :  { %v3803_v7 = vsel %vm11482_vm2, %v3793_v35, %v3795_v5  ;;  %v3804_v8 = vsel %vm11483_vm3, %v3795_v5, %v9591_v38  ;;  %v4090_v40 = vpop.permute.xlu1 %4089  ;;  %3369 = vmatprep.subr.bf16.mxu1 %v7586_v2  ;;  %v7602_v35 = vld [vmem:[%s11442_s6 + $0x210] ss:$24 sps:$4 sm:$0xff]   ;;  %vm11493_vm2 = vmmov %vm11487_vm4 }
 0x784   :  { %3816 = vst [vmem:[#allocation2 + $0x218] sm:$0xff] %v3803_v7  ;;  %3817 = vst [vmem:[#allocation2 + $0x220] sm:$0xff] %v3804_v8 }
 0x785   :  { %vm11494_vm3 = vmmov %vm11493_vm2 }
 0x786   :  { %v9605_v25 = vpop.permute.xlu0 %4091  ;;  %3370 = vmatpush1.bf16.msra.mxu1 %v7584_v22 }
 0x787   :  { %v4100_v27 = vsel %vm11484_vm9, %v4090_v40, %v9605_v25  ;;  %v4088_v57 = vpop.permute.xlu1 %4087  ;;  %3371 = vmatprep.subr.bf16.mxu1 %v7592_v20  ;;  %vm11495_vm9 = vmmov %vm11489_vm11 }
 0x788   :  { %4113 = vst [vmem:[#allocation2 + $0x510] sm:$0xff] %v4100_v27  ;;  %v4099_v29 = vsel %vm11485_vm14, %v4088_v57, %v4090_v40  ;;  %vm11496_vm14 = vmmov %vm11490_vm12 }
 0x789   :  { %4112 = vst [vmem:[#allocation2 + $0x508] sm:$0xff] %v4099_v29 }
 0x78a   :  { %v9616_v30 = vpop.permute.xlu0 %3889  ;;  %3372 = vmatpush1.bf16.msra.mxu1 %v7590_v58 }
 0x78b   :  { %11486 = vst [vmem:[#allocation10_spill] sm:$0xff] %v9616_v30  ;;  %v3888_v33 = vpop.permute.xlu1 %3887  ;;  %3373 = vmatprep.subr.bf16.mxu1 %v7598_v28 }
 0x78c   :  { %v3896_v31 = vsel %vm328_vm8, %v9548_v51, %v3888_v33  ;;  %v3897_v34 = vsel %vm328_vm8, %v3888_v33, %v9616_v30  ;;  %v7608_v51 = vld [vmem:[%s11442_s6 + $0x240] ss:$24 sps:$4 sm:$0xff]  }
 0x78d   :  { %3909 = vst [vmem:[#allocation2 + $0x2d8] sm:$0xff] %v3896_v31  ;;  %3910 = vst [vmem:[#allocation2 + $0x2e0] sm:$0xff] %v3897_v34  ;;  %v7632_v34 = vld [vmem:[%s11442_s6 + $0x10] ss:$24 sps:$4 sm:$0xff]  }
 0x78e   :  { %v4183_v13 = vpop.permute.xlu0 %4182  ;;  %3374 = vmatpush1.bf16.msra.mxu1 %v7596_v32 }
 0x78f   :  { %v9631_v42 = vpop.permute.xlu1 %4184  ;;  %3375 = vmatprep.subr.bf16.mxu1 %v7604_v0 }
 0x790   :  { %v4193_v16 = vsel %vm11487_vm4, %v4183_v13, %v9631_v42  ;;  %vm11497_vm4 = vcmask 146432  }
 0x791   :  { %4206 = vst [vmem:[#allocation2 + $0x5d0] sm:$0xff] %v4193_v16  ;;  %v7637_v16 = vld [vmem:[%s11442_s6 + $0x44] ss:$24 sps:$4 sm:$0xff]  }
 0x792   :  { %v4181_v37 = vpop.permute.xlu0 %4180  ;;  %3376 = vmatpush1.bf16.msra.mxu1 %v7602_v35 }
 0x793   :  { %v4192_v49 = vsel %vm11488_vm6, %v4181_v37, %v4183_v13  ;;  %3377 = vmatprep.subr.bf16.mxu1 %v7610_v54  ;;  %vm11498_vm6 = vcmask 891904  }
 0x794   :  { %4205 = vst [vmem:[#allocation2 + $0x5c8] sm:$0xff] %v4192_v49 }
 0x796   :  { %3378 = vmatpush1.bf16.msra.mxu1 %v7608_v51 }
 0x797   :  { %3379 = vmatprep.subr.bf16.mxu1 %v7616_v50  ;;  %v7635_v50 = vld [vmem:[%s11442_s6 + $0x40] ss:$24 sps:$4 sm:$0xff]  }
 0x79a   :  { %3380 = vmatpush1.bf16.msra.mxu1 %v7614_v21 }
 0x79b   :  { %3381 = vmatprep.subr.bf16.mxu1 %v7622_v56 }
 0x79e   :  { %3382 = vmatpush1.bf16.msra.mxu1 %v7620_v18 }
 0x79f   :  { %3383 = vmatprep.subr.bf16.mxu1 %v7628_v46  ;;  %v7646_v46 = vld [vmem:[%s11442_s6 + $0xd4] ss:$24 sps:$4 sm:$0xff]  }
 0x7a2   :  { %3384 = vmatpush1.bf16.msra.mxu1 %v7626_v52  ;;  %v7644_v52 = vld [vmem:[%s11442_s6 + $0xd0] ss:$24 sps:$4 sm:$0xff]  }
 0x7a3   :  { %3459 = vmatprep.subr.bf16.mxu1 %v7634_v53  ;;  %v7652_v53 = vld [vmem:[%s11442_s6 + $0x134] ss:$24 sps:$4 sm:$0xff]  }
 0x838   :  { %v2738_v59 = vpop.f32.mrb[20].mxu1 }
 0x839   :  { %v7287_v60 = vadd.f32 %v2738_v59, %v9502_v11  ;;  %v2740_v61 = vpop.f32.mrb[21].mxu1  ;;  %v7650_v59 = vld [vmem:[%s11442_s6 + $0x130] ss:$24 sps:$4 sm:$0xff]  }
 0x83a   :  { %v7288_v36 = vadd.f32 %v2740_v61, %v9502_v11  ;;  %v2742_v63 = vpop.f32.mrb[22].mxu1  ;;  %v7653_v61 = vld [vmem:[%s11442_s6 + $0x160] ss:$24 sps:$4 sm:$0xff]  }
 0x83b   :  { %v2757_v2 = vmax.f32 %v7287_v60, 0.0  ;;  %v7289_v5 = vadd.f32 %v2742_v63, %v9504_v4  ;;  %v2744_v22 = vpop.f32.mrb[23].mxu1  ;;  %v7655_v60 = vld [vmem:[%s11442_s6 + $0x164] ss:$24 sps:$4 sm:$0xff]   ;;  %v7656_v63 = vld [vmem:[%s11442_s6 + $0x190] ss:$24 sps:$4 sm:$0xff]  }
 0x83c   :  { %v2758_v7 = vmax.f32 %v7288_v36, 0.0  ;;  %v7290_v8 = vadd.f32 %v2744_v22, %v9504_v4  ;;  %v7658_v36 = vld [vmem:[%s11442_s6 + $0x194] ss:$24 sps:$4 sm:$0xff]  }
 0x83d   :  { %v2759_v40 = vmax.f32 %v7289_v5, 0.0  ;;  %v2765_v58 = vmul.f32 %v2757_v2, %v9216_v39  ;;  %v7661_v2 = vld [vmem:[%s11442_s6 + $0x1c4] ss:$24 sps:$4 sm:$0xff]   ;;  %v7659_v5 = vld [vmem:[%s11442_s6 + $0x1c0] ss:$24 sps:$4 sm:$0xff]  }
 0x83e   :  { %v2760_v20 = vmax.f32 %v7290_v8, 0.0  ;;  %v2766_v57 = vmul.f32 %v2758_v7, %v9220_v41  ;;  %v7664_v22 = vld [vmem:[%s11442_s6 + $0x1f4] ss:$24 sps:$4 sm:$0xff]   ;;  %v7662_v7 = vld [vmem:[%s11442_s6 + $0x1f0] ss:$24 sps:$4 sm:$0xff]  }
 0x83f   :  { %v2767_v27 = vmul.f32 %v2759_v40, %v9216_v39  ;;  %v7667_v8 = vld [vmem:[%s11442_s6 + $0x224] ss:$24 sps:$4 sm:$0xff]   ;;  %v7665_v40 = vld [vmem:[%s11442_s6 + $0x220] ss:$24 sps:$4 sm:$0xff]  }
 0x840   :  { %v2768_v28 = vmul.f32 %v2760_v20, %v9220_v41  ;;  %v2748_v29 = vpop.f32.mrb[24].mxu1  ;;  %v7670_v20 = vld [vmem:[%s11442_s6 + $0x254] ss:$24 sps:$4 sm:$0xff]  }
 0x841   :  { %v9689_v11 = vpack.c.bf16 %v2767_v27, %v2765_v58  ;;  %v7291_v32 = vadd.f32 %v2748_v29, %v9506_v14  ;;  %v2750_v33 = vpop.f32.mrb[25].mxu1  ;;  %v7668_v58 = vld [vmem:[%s11442_s6 + $0x250] ss:$24 sps:$4 sm:$0xff]   ;;  %v7673_v27 = vld [vmem:[%s11442_s6 + $0x284] ss:$24 sps:$4 sm:$0xff]  }
 0x842   :  { %v7292_v0 = vadd.f32 %v2750_v33, %v9506_v14  ;;  %v2752_v31 = vpop.f32.mrb[26].mxu1  ;;  %v2774_v4 = vpack.c.bf16 %v2768_v28, %v2766_v57  ;;  %v7671_v57 = vld [vmem:[%s11442_s6 + $0x280] ss:$24 sps:$4 sm:$0xff]   ;;  %v7676_v28 = vld [vmem:[%s11442_s6 + $0x2b4] ss:$24 sps:$4 sm:$0xff]  }
 0x843   :  { %v2761_v13 = vmax.f32 %v7291_v32, 0.0  ;;  %v7293_v35 = vadd.f32 %v2752_v31, %v9509_v17  ;;  %v2754_v54 = vpop.f32.mrb[27].mxu1  ;;  %v7674_v29 = vld [vmem:[%s11442_s6 + $0x2b0] ss:$24 sps:$4 sm:$0xff]   ;;  %v7679_v32 = vld [vmem:[%s11442_s6 + $0x2e4] ss:$24 sps:$4 sm:$0xff]  }
 0x844   :  { %v2762_v37 = vmax.f32 %v7292_v0, 0.0  ;;  %v7294_v51 = vadd.f32 %v2754_v54, %v9509_v17  ;;  %3385 = vmatprep.mubr.bf16.mxu1 %v2774_v4  ;;  %3438 = vmatprep.mubr.bf16.mxu0 %v2774_v4  ;;  %v7640_v17 = vld [vmem:[%s11442_s6 + $0x74] ss:$24 sps:$4 sm:$0xff]   ;;  %v7677_v33 = vld [vmem:[%s11442_s6 + $0x2e0] ss:$24 sps:$4 sm:$0xff]  }
 0x845   :  { %v2763_v14 = vmax.f32 %v7293_v35, 0.0  ;;  %3386 = vmatmul.mubr.bf16.vlgmr.msra.gmra.mrb[28].mxu1 %v9689_v11  ;;  %3439 = vmatmul.mubr.bf16.vlgmr.msra.gmra.mrb[16].mxu0 %v9689_v11  ;;  %v2769_v21 = vmul.f32 %v2761_v13, %v9216_v39 }
 0x846   :  { %v2764_v49 = vmax.f32 %v7294_v51, 0.0  ;;  %3460 = vmatpush1.bf16.msra.mxu1 %v7632_v34  ;;  %v2770_v62 = vmul.f32 %v2762_v37, %v9220_v41 }
 0x847   :  { %v2771_v24 = vmul.f32 %v2763_v14, %v9216_v39  ;;  %3461 = vmatprep.subr.bf16.mxu1 %v7637_v16  ;;  %v7643_v39 = vld [vmem:[%s11442_s6 + $0xa4] ss:$24 sps:$4 sm:$0xff]  }
 0x848   :  { %v2772_v56 = vmul.f32 %v2764_v49, %v9220_v41  ;;  %v7641_v41 = vld [vmem:[%s11442_s6 + $0xa0] ss:$24 sps:$4 sm:$0xff]  }
 0x849   :  { %v9713_v18 = vpack.c.bf16 %v2771_v24, %v2769_v21 }
 0x84a   :  { %3462 = vmatpush1.bf16.msra.mxu1 %v7635_v50  ;;  %v2776_v45 = vpack.c.bf16 %v2772_v56, %v2770_v62 }
 0x84b   :  { %3463 = vmatprep.subr.bf16.mxu1 %v7640_v17 }
 0x84c   :  { %3395 = vmatprep.mubr.bf16.mxu1 %v2776_v45  ;;  %3448 = vmatprep.mubr.bf16.mxu0 %v2776_v45 }
 0x84d   :  { %3396 = vmatmul.mubr.bf16.gmra.mrb[32].mxu1 %v9713_v18  ;;  %3449 = vmatmul.mubr.bf16.gmra.mrb[20].mxu0 %v9713_v18 }
 0x84e   :  { %3464 = vmatpush1.bf16.msra.mxu1 %v7638_v12  ;;  %3491 = vmatprep.mubr.bf16.mxu1 %v2774_v4 }
 0x84f   :  { %3465 = vmatprep.subr.bf16.mxu1 %v7643_v39 }
 0x852   :  { %3466 = vmatpush1.bf16.msra.mxu1 %v7641_v41 }
 0x853   :  { %3467 = vmatprep.subr.bf16.mxu1 %v7646_v46 }
 0x856   :  { %3468 = vmatpush1.bf16.msra.mxu1 %v7644_v52 }
 0x857   :  { %3469 = vmatprep.subr.bf16.mxu1 %v7649_v47 }
 0x85a   :  { %3470 = vmatpush1.bf16.msra.mxu1 %v7647_v10 }
 0x85b   :  { %3471 = vmatprep.subr.bf16.mxu1 %v7652_v53 }
 0x85e   :  { %3472 = vmatpush1.bf16.msra.mxu1 %v7650_v59 }
 0x85f   :  { %3473 = vmatprep.subr.bf16.mxu1 %v7655_v60 }
 0x862   :  { %3474 = vmatpush1.bf16.msra.mxu1 %v7653_v61 }
 0x863   :  { %3475 = vmatprep.subr.bf16.mxu1 %v7658_v36 }
 0x866   :  { %3476 = vmatpush1.bf16.msra.mxu1 %v7656_v63 }
 0x867   :  { %3477 = vmatprep.subr.bf16.mxu1 %v7661_v2 }
 0x86a   :  { %3478 = vmatpush1.bf16.msra.mxu1 %v7659_v5 }
 0x86b   :  { %3479 = vmatprep.subr.bf16.mxu1 %v7664_v22  ;;  %v7977_v22 = vld [vmem:[#allocation2 + $0x388] sm:$0xff] }
 0x86e   :  { %3480 = vmatpush1.bf16.msra.mxu1 %v7662_v7  ;;  %v7978_v7 = vld [vmem:[#allocation2 + $0x398] sm:$0xff] }
 0x86f   :  { %3481 = vmatprep.subr.bf16.mxu1 %v7667_v8  ;;  %v9936_v8 = vld [vmem:[#allocation2 + $0x3a0] sm:$0xff] }
 0x872   :  { %3482 = vmatpush1.bf16.msra.mxu1 %v7665_v40  ;;  %v9940_v40 = vld [vmem:[#allocation2 + $0x3a8] sm:$0xff] }
 0x873   :  { %3483 = vmatprep.subr.bf16.mxu1 %v7670_v20  ;;  %v9955_v20 = vld [vmem:[#allocation2 + $0x3b0] sm:$0xff] }
 0x876   :  { %3484 = vmatpush1.bf16.msra.mxu1 %v7668_v58 }
 0x877   :  { %3485 = vmatprep.subr.bf16.mxu1 %v7673_v27 }
 0x87a   :  { %3486 = vmatpush1.bf16.msra.mxu1 %v7671_v57 }
 0x87b   :  { %3487 = vmatprep.subr.bf16.mxu1 %v7676_v28 }
 0x87e   :  { %3488 = vmatpush1.bf16.msra.mxu1 %v7674_v29 }
 0x87f   :  { %3489 = vmatprep.subr.bf16.mxu1 %v7679_v32 }
 0x882   :  { %3490 = vmatpush1.bf16.msra.mxu1 %v7677_v33 }
 0x885   :  { %3492 = vmatmul.mubr.bf16.vlgmr.msra.gmra.mrb[36].mxu1 %v9689_v11 }
 0x886   :  { %3501 = vmatprep.mubr.bf16.mxu1 %v2776_v45 }
 0x88d   :  { %3502 = vmatmul.mubr.bf16.gmra.mrb[40].mxu1 %v9713_v18 }
 0x918   :  { %v3387_v0 = vpop.f32.mrb[28].mxu1  ;;  %v3440_v31 = vpop.f32.mrb[16].mxu0 }
 0x919   :  { %v3389_v4 = vpop.f32.mrb[29].mxu1  ;;  %v3442_v34 = vpop.f32.mrb[17].mxu0 }
 0x91a   :  { %v3391_v13 = vpop.f32.mrb[30].mxu1  ;;  %v3444_v35 = vpop.f32.mrb[18].mxu0 }
 0x91b   :  { %v9800_v54 = vpack.c.bf16 %v3391_v13, %v3387_v0  ;;  %v9802_v16 = vpack.c.bf16 %v3444_v35, %v3440_v31  ;;  %v3393_v37 = vpop.f32.mrb[31].mxu1  ;;  %v3446_v51 = vpop.f32.mrb[19].mxu0 }
 0x91c   :  { %v9804_v14 = vpack.c.bf16 %v3393_v37, %v3389_v4  ;;  %v9806_v49 = vpack.c.bf16 %v3446_v51, %v3442_v34 }
 0x91d   :  { %3916 = vst [vmem:[#allocation2 + $0x318] sm:$0xff] %v9802_v16  ;;  %3936 = vrot.lane.b32.xlu1 %v9802_v16, %s7987_s14  ;;  %3536 = vrot.lane.b32.xlu0 %v9800_v54, %s7984_s11 }
 0x91e   :  { %3915 = vst [vmem:[#allocation2 + $0x310] sm:$0xff] %v9804_v14  ;;  %3917 = vst [vmem:[#allocation2 + $0x320] sm:$0xff] %v9806_v49 }
 0x920   :  { %v3397_v11 = vpop.f32.mrb[32].mxu1  ;;  %v3450_v50 = vpop.f32.mrb[20].mxu0 }
 0x921   :  { %v3452_v21 = vpop.f32.mrb[21].mxu0  ;;  %4025 = vrot.lane.b32.xlu1 %v9800_v54, %s7988_s15  ;;  %3635 = vrot.lane.b32.xlu0 %v9800_v54, %s7983_s0  ;;  %v3399_v24 = vpop.f32.mrb[33].mxu1 }
 0x922   :  { %v3401_v17 = vpop.f32.mrb[34].mxu1  ;;  %v3454_v62 = vpop.f32.mrb[22].mxu0 }
 0x923   :  { %v9819_v56 = vpack.c.bf16 %v3401_v17, %v3397_v11  ;;  %v9821_v18 = vpack.c.bf16 %v3454_v62, %v3450_v50  ;;  %v3403_v45 = vpop.f32.mrb[35].mxu1  ;;  %v3456_v12 = vpop.f32.mrb[23].mxu0 }
 0x924   :  { %v9823_v39 = vpack.c.bf16 %v3403_v45, %v3399_v24  ;;  %v9825_v41 = vpack.c.bf16 %v3456_v12, %v3452_v21 }
 0x925   :  { %3922 = vst [vmem:[#allocation2 + $0x358] sm:$0xff] %v9821_v18  ;;  %3825 = vrot.lane.b32.xlu1 %v9802_v16, %s7986_s13  ;;  %3728 = vrot.lane.b32.xlu0 %v9800_v54, %s7985_s12 }
 0x926   :  { %3921 = vst [vmem:[#allocation2 + $0x350] sm:$0xff] %v9823_v39  ;;  %3923 = vst [vmem:[#allocation2 + $0x360] sm:$0xff] %v9825_v41 }
 0x929   :  { %4122 = vrot.lane.b32.xlu1 %v9802_v16, %s7989_s16  ;;  %3821 = vrot.lane.b32.xlu0 %v9800_v54, %s7986_s13 }
 0x92d   :  { %3540 = vrot.lane.b32.xlu0 %v9802_v16, %s7984_s11  ;;  %3538 = vrot.lane.b32.xlu1 %v9804_v14, %s7984_s11 }
 0x931   :  { %3639 = vrot.lane.b32.xlu0 %v9802_v16, %s7983_s0  ;;  %3637 = vrot.lane.b32.xlu1 %v9804_v14, %s7983_s0 }
 0x935   :  { %3932 = vrot.lane.b32.xlu0 %v9800_v54, %s7987_s14  ;;  %3730 = vrot.lane.b32.xlu1 %v9804_v14, %s7985_s12 }
 0x939   :  { %3732 = vrot.lane.b32.xlu0 %v9802_v16, %s7985_s12  ;;  %3823 = vrot.lane.b32.xlu1 %v9804_v14, %s7986_s13 }
 0x93d   :  { %4029 = vrot.lane.b32.xlu0 %v9802_v16, %s7988_s15  ;;  %3542 = vrot.lane.b32.xlu1 %v9806_v49, %s7984_s11 }
 0x941   :  { %4118 = vrot.lane.b32.xlu0 %v9800_v54, %s7989_s16  ;;  %3641 = vrot.lane.b32.xlu1 %v9806_v49, %s7983_s0 }
 0x945   :  { %3934 = vrot.lane.b32.xlu0 %v9804_v14, %s7987_s14  ;;  %3734 = vrot.lane.b32.xlu1 %v9806_v49, %s7985_s12 }
 0x949   :  { %3827 = vrot.lane.b32.xlu0 %v9806_v49, %s7986_s13  ;;  %4027 = vrot.lane.b32.xlu1 %v9804_v14, %s7988_s15 }
 0x94d   :  { %4120 = vrot.lane.b32.xlu0 %v9804_v14, %s7989_s16  ;;  %3944 = vrot.lane.b32.xlu1 %v9819_v56, %s7987_s14 }
 0x951   :  { %3744 = vrot.lane.b32.xlu1 %v9821_v18, %s7985_s12  ;;  %3548 = vrot.lane.b32.xlu0 %v9819_v56, %s7984_s11 }
 0x955   :  { %4041 = vrot.lane.b32.xlu1 %v9821_v18, %s7988_s15  ;;  %3647 = vrot.lane.b32.xlu0 %v9819_v56, %s7983_s0 }
 0x958   :  { %v3493_v46 = vpop.f32.mrb[36].mxu1 }
 0x959   :  { %v3495_v52 = vpop.f32.mrb[37].mxu1  ;;  %4130 = vrot.lane.b32.xlu1 %v9819_v56, %s7989_s16  ;;  %3740 = vrot.lane.b32.xlu0 %v9819_v56, %s7985_s12 }
 0x95a   :  { %v3497_v47 = vpop.f32.mrb[38].mxu1 }
 0x95b   :  { %v9886_v10 = vpack.c.bf16 %v3497_v47, %v3493_v46  ;;  %v3499_v53 = vpop.f32.mrb[39].mxu1 }
 0x95c   :  { %v9888_v59 = vpack.c.bf16 %v3499_v53, %v3495_v52 }
 0x95d   :  { %3918 = vst [vmem:[#allocation2 + $0x328] sm:$0xff] %v9886_v10  ;;  %3833 = vrot.lane.b32.xlu0 %v9819_v56, %s7986_s13  ;;  %3550 = vrot.lane.b32.xlu1 %v9823_v39, %s7984_s11 }
 0x95e   :  { %3919 = vst [vmem:[#allocation2 + $0x330] sm:$0xff] %v9888_v59 }
 0x960   :  { %v3503_v60 = vpop.f32.mrb[40].mxu1 }
 0x961   :  { %v3505_v61 = vpop.f32.mrb[41].mxu1  ;;  %3552 = vrot.lane.b32.xlu0 %v9821_v18, %s7984_s11  ;;  %4213 = vrot.lane.b32.xlu1 %v9804_v14, %s7990_s17 }
 0x962   :  { %v3507_v36 = vpop.f32.mrb[42].mxu1 }
 0x963   :  { %v9900_v63 = vpack.c.bf16 %v3507_v36, %v3503_v60  ;;  %v3509_v2 = vpop.f32.mrb[43].mxu1 }
 0x964   :  { %v9902_v5 = vpack.c.bf16 %v3509_v2, %v3505_v61 }
 0x965   :  { %3924 = vst [vmem:[#allocation2 + $0x368] sm:$0xff] %v9900_v63  ;;  %3651 = vrot.lane.b32.xlu0 %v9821_v18, %s7983_s0  ;;  %4211 = vrot.lane.b32.xlu1 %v9800_v54, %s7990_s17 }
 0x966   :  { %3925 = vst [vmem:[#allocation2 + $0x370] sm:$0xff] %v9902_v5 }
 0x969   :  { %3948 = vrot.lane.b32.xlu0 %v9821_v18, %s7987_s14  ;;  %3649 = vrot.lane.b32.xlu1 %v9823_v39, %s7983_s0 }
 0x96d   :  { %4037 = vrot.lane.b32.xlu0 %v9819_v56, %s7988_s15  ;;  %4227 = vrot.lane.b32.xlu1 %v9821_v18, %s7990_s17 }
 0x971   :  { %3837 = vrot.lane.b32.xlu0 %v9821_v18, %s7986_s13  ;;  %3938 = vrot.lane.b32.xlu1 %v9806_v49, %s7987_s14 }
 0x975   :  { %4134 = vrot.lane.b32.xlu0 %v9821_v18, %s7989_s16  ;;  %3742 = vrot.lane.b32.xlu1 %v9823_v39, %s7985_s12 }
 0x979   :  { %4215 = vrot.lane.b32.xlu0 %v9802_v16, %s7990_s17  ;;  %4275 = vrot.lane.b32.xlu1 %v8800_v26, %s7990_s17  ;;  %v9951_v26 = vld [vmem:[%s11437_s1 + $0xc4] ss:$16 sps:$4 sm:$0xff]  }
 0x97a   :  { %4537 = vmatprep.mubr.bf16.mxu0 %v9951_v26  ;;  %4623 = vmatprep.mubr.bf16.mxu1 %v9951_v26 }
 0x97d   :  { %4223 = vrot.lane.b32.xlu0 %v9819_v56, %s7990_s17  ;;  %4273 = vrot.lane.b32.xlu1 %v7977_v22, %s7990_s17 }
 0x981   :  { %4277 = vrot.lane.b32.xlu0 %v7978_v7, %s7990_s17  ;;  %3835 = vrot.lane.b32.xlu1 %v9823_v39, %s7986_s13 }
 0x985   :  { %4000 = vrot.lane.b32.xlu0 %v9936_v8, %s7987_s14  ;;  %4002 = vrot.lane.b32.xlu1 %v9940_v40, %s7987_s14 }
 0x989   :  { %3612 = vrot.lane.b32.xlu0 %v9940_v40, %s7984_s11  ;;  %3554 = vrot.lane.b32.xlu1 %v9825_v41, %s7984_s11 }
 0x98d   :  { %4031 = vrot.lane.b32.xlu0 %v9806_v49, %s7988_s15  ;;  %3614 = vrot.lane.b32.xlu1 %v9955_v20, %s7984_s11 }
 0x98f   :  { %v9961_v58 = vpop.permute.xlu1 %3936  ;;  %v3537_v27 = vpop.permute.xlu0 %3536 }
 0x990   :  { %3584 = vst.msk [vmem:[#allocation2 + $0x8] sm:$0xff] %vm790_vm1, %v3537_v27 }
 0x991   :  { %4093 = vrot.lane.b32.xlu0 %v9936_v8, %s7988_s15  ;;  %4095 = vrot.lane.b32.xlu1 %v9940_v40, %s7988_s15 }
 0x993   :  { %v4026_v57 = vpop.permute.xlu1 %4025  ;;  %v9968_v28 = vpop.permute.xlu0 %3635 }
 0x994   :  { %3683 = vst.msk [vmem:[#allocation2 + $0xc8] sm:$0xff] %vm11489_vm11, %v9968_v28  ;;  %vm11499_vm11 = vmmov %vm11497_vm4 }
 0x995   :  { %3705 = vrot.lane.b32.xlu0 %v9940_v40, %s7983_s0  ;;  %3653 = vrot.lane.b32.xlu1 %v9825_v41, %s7983_s0 }
 0x997   :  { %v3826_v29 = vpop.permute.xlu1 %3825  ;;  %v9976_v32 = vpop.permute.xlu0 %3728  ;;  %v4308_v13 = vld [vmem:[#allocation2 + $0x8] sm:$0xff] }
 0x998   :  { %3776 = vst.msk [vmem:[#allocation2 + $0x188] sm:$0xff] %vm11490_vm12, %v9976_v32  ;;  %vm11500_vm12 = vcmask 138240  }
 0x999   :  { %4124 = vrot.lane.b32.xlu0 %v9806_v49, %s7989_s16  ;;  %3946 = vrot.lane.b32.xlu1 %v9823_v39, %s7987_s14 }
 0x99b   :  { %v9984_v33 = vpop.permute.xlu1 %4122  ;;  %v3822_v0 = vpop.permute.xlu0 %3821 }
 0x99c   :  { %3869 = vst.msk [vmem:[#allocation2 + $0x248] sm:$0xff] %vm889_vm7, %v3822_v0 }
 0x99d   :  { %3746 = vrot.lane.b32.xlu0 %v9825_v41, %s7985_s12  ;;  %3707 = vrot.lane.b32.xlu1 %v9955_v20, %s7983_s0 }
 0x99f   :  { %v3541_v31 = vpop.permute.xlu0 %3540  ;;  %v3539_v4 = vpop.permute.xlu1 %3538 }
 0x9a0   :  { %v3560_v34 = vsel %vm226_vm5, %v3537_v27, %v3539_v4  ;;  %v3561_v45 = vsel %vm226_vm5, %v3539_v4, %v3541_v31 }
 0x9a1   :  { %4039 = vrot.lane.b32.xlu0 %v9823_v39, %s7988_s15  ;;  %3839 = vrot.lane.b32.xlu1 %v9825_v41, %s7986_s13 }
 0x9a2   :  { %4505 = vmatprep.subr.bf16.mxu0 %v3560_v34 }
 0x9a3   :  { %v9996_v35 = vpop.permute.xlu0 %3639  ;;  %v9998_v16 = vpop.permute.xlu1 %3637  ;;  %4506 = vmatpush1.bf16.msra.mxu0 %v4308_v13 }
 0x9a4   :  { %v3659_v9 = vsel %vm11497_vm4, %v9968_v28, %v9998_v16 }
 0x9a5   :  { %4225 = vrot.lane.b32.xlu0 %v9823_v39, %s7990_s17  ;;  %4132 = vrot.lane.b32.xlu1 %v9823_v39, %s7989_s16 }
 0x9a7   :  { %v3933_v37 = vpop.permute.xlu0 %3932  ;;  %v10004_v51 = vpop.permute.xlu1 %3730 }
 0x9a9   :  { %3950 = vrot.lane.b32.xlu0 %v9825_v41, %s7987_s14  ;;  %4033 = vrot.lane.b32.xlu1 %v9886_v10, %s7988_s15 }
 0x9ab   :  { %v10010_v11 = vpop.permute.xlu0 %3732  ;;  %v3824_v50 = vpop.permute.xlu1 %3823 }
 0x9ac   :  { %v10013_v21 = vsel %vm328_vm8, %v3822_v0, %v3824_v50  ;;  %v10016_v24 = vsel %vm328_vm8, %v3824_v50, %v3826_v29 }
 0x9ad   :  { %4043 = vrot.lane.b32.xlu0 %v9825_v41, %s7988_s15  ;;  %4126 = vrot.lane.b32.xlu1 %v9886_v10, %s7989_s16 }
 0x9af   :  { %v10022_v17 = vpop.permute.xlu0 %4029  ;;  %v10024_v62 = vpop.permute.xlu1 %3542 }
 0x9b0   :  { %v3562_v18 = vsel %vm226_vm5, %v3541_v31, %v10024_v62 }
 0x9b1   :  { %4136 = vrot.lane.b32.xlu0 %v9825_v41, %s7989_s16  ;;  %3546 = vrot.lane.b32.xlu1 %v9888_v59, %s7984_s11 }
 0x9b2   :  { %4591 = vmatprep.subr.bf16.mxu1 %v3562_v18 }
 0x9b3   :  { %v4119_v12 = vpop.permute.xlu0 %4118  ;;  %v10033_v46 = vpop.permute.xlu1 %3641  ;;  %4592 = vmatpush1.bf16.msra.mxu1 %v3561_v45 }
 0x9b5   :  { %3940 = vrot.lane.b32.xlu0 %v9886_v10, %s7987_s14  ;;  %3645 = vrot.lane.b32.xlu1 %v9888_v59, %s7983_s0 }
 0x9b7   :  { %v3935_v52 = vpop.permute.xlu0 %3934  ;;  %v10039_v47 = vpop.permute.xlu1 %3734 }
 0x9b8   :  { %v10042_v53 = vsel %vm374_vm10, %v3933_v37, %v3935_v52  ;;  %v10046_v60 = vsel %vm374_vm10, %v3935_v52, %v9961_v58 }
 0x9b9   :  { %3982 = vst [vmem:[#allocation2 + $0x3d0] sm:$0xff] %v10046_v60  ;;  %3544 = vrot.lane.b32.xlu0 %v9886_v10, %s7984_s11  ;;  %3738 = vrot.lane.b32.xlu1 %v9888_v59, %s7985_s12 }
 0x9bb   :  { %v10053_v61 = vpop.permute.xlu0 %3827  ;;  %v4028_v36 = vpop.permute.xlu1 %4027 }
 0x9bc   :  { %v10057_v2 = vsel %vm328_vm8, %v3826_v29, %v10053_v61  ;;  %v10060_v22 = vsel %vm11491_vm0, %v4026_v57, %v4028_v36  ;;  %v10064_v7 = vsel %vm11492_vm13, %v4028_v36, %v10022_v17  ;;  %vm11501_vm0 = vmmov %vm11500_vm12 }
 0x9bd   :  { %3643 = vrot.lane.b32.xlu0 %v9886_v10, %s7983_s0  ;;  %3952 = vrot.lane.b32.xlu1 %v9900_v63, %s7987_s14  ;;  %vm11502_vm13 = vmmov %vm11498_vm6 }
 0x9bf   :  { %v4121_v27 = vpop.permute.xlu0 %4120  ;;  %v10070_v0 = vpop.permute.xlu1 %3944 }
 0x9c0   :  { %v10073_v31 = vsel %vm11493_vm2, %v4119_v12, %v4121_v27  ;;  %v10077_v57 = vsel %vm11494_vm3, %v4121_v27, %v9984_v33  ;;  %vm11503_vm2 = vmmov %vm11498_vm6 }
 0x9c1   :  { %3736 = vrot.lane.b32.xlu0 %v9886_v10, %s7985_s12  ;;  %4045 = vrot.lane.b32.xlu1 %v9900_v63, %s7988_s15  ;;  %vm11504_vm3 = vmmov %vm11503_vm2 }
 0x9c3   :  { %v10083_v29 = vpop.permute.xlu1 %3744  ;;  %v3549_v4 = vpop.permute.xlu0 %3548 }
 0x9c4   :  { %3591 = vst.msk [vmem:[#allocation2 + $0x48] sm:$0xff] %vm790_vm1, %v3549_v4 }
 0x9c5   :  { %3556 = vrot.lane.b32.xlu0 %v9900_v63, %s7984_s11  ;;  %4138 = vrot.lane.b32.xlu1 %v9900_v63, %s7989_s16 }
 0x9c7   :  { %v10090_v34 = vpop.permute.xlu1 %4041  ;;  %v3648_v13 = vpop.permute.xlu0 %3647 }
 0x9c8   :  { %3690 = vst.msk [vmem:[#allocation2 + $0x108] sm:$0xff] %vm11495_vm9, %v3648_v13  ;;  %vm11506_vm9 = vcmask 908288  }
 0x9c9   :  { %4186 = vrot.lane.b32.xlu0 %v9936_v8, %s7989_s16  ;;  %3558 = vrot.lane.b32.xlu1 %v9902_v5, %s7984_s11 }
 0x9cb   :  { %v10097_v37 = vpop.permute.xlu1 %4130  ;;  %v3741_v50 = vpop.permute.xlu0 %3740  ;;  %v4314_v52 = vld [vmem:[#allocation2 + $0x48] sm:$0xff] }
 0x9cc   :  { %3783 = vst.msk [vmem:[#allocation2 + $0x1c8] sm:$0xff] %vm11496_vm14, %v3741_v50  ;;  %vm11507_vm14 = vmmov %vm11497_vm4 }
 0x9cd   :  { %3655 = vrot.lane.b32.xlu0 %v9900_v63, %s7983_s0  ;;  %4188 = vrot.lane.b32.xlu1 %v9940_v40, %s7989_s16  ;;  %vm11508_vm4 = vmmov %vm11506_vm9 }
 0x9cf   :  { %v10104_v18 = vpop.permute.xlu0 %3833  ;;  %v10106_v45 = vpop.permute.xlu1 %3550 }
 0x9d0   :  { %3876 = vst.msk [vmem:[#allocation2 + $0x288] sm:$0xff] %vm889_vm7, %v10104_v18  ;;  %v3565_v12 = vsel %vm226_vm5, %v3549_v4, %v10106_v45  ;;  %v4320_v4 = vld [vmem:[#allocation2 + $0x88] sm:$0xff] }
 0x9d1   :  { %3748 = vrot.lane.b32.xlu0 %v9900_v63, %s7985_s12  ;;  %3800 = vrot.lane.b32.xlu1 %v9955_v20, %s7985_s12 }
 0x9d2   :  { %4507 = vmatprep.subr.bf16.mxu0 %v3565_v12 }
 0x9d3   :  { %v10116_v36 = vpop.permute.xlu0 %3552  ;;  %v4214_v27 = vpop.permute.xlu1 %4213  ;;  %4508 = vmatpush1.bf16.msra.mxu0 %v4314_v52 }
 0x9d4   :  { %4509 = vmatprep.subr.bf16.mxu0 %v4321_v3  ;;  %v4326_v3 = vld [vmem:[#allocation2 + $0xc8] sm:$0xff] }
 0x9d5   :  { %3798 = vrot.lane.b32.xlu0 %v9940_v40, %s7985_s12  ;;  %3657 = vrot.lane.b32.xlu1 %v9902_v5, %s7983_s0 }
 0x9d7   :  { %v10125_v6 = vpop.permute.xlu0 %3651  ;;  %v4212_v12 = vpop.permute.xlu1 %4211  ;;  %4510 = vmatpush1.bf16.msra.mxu0 %v4320_v4 }
 0x9d8   :  { %v10128_v1 = vsel %vm11498_vm6, %v4212_v12, %v4214_v27  ;;  %4511 = vmatprep.subr.bf16.mxu0 %v3659_v9  ;;  %v4332_v9 = vld [vmem:[#allocation2 + $0x108] sm:$0xff]  ;;  %v4339_v12 = vld [vmem:[#allocation2 + $0x150] sm:$0xff]  ;;  %vm11509_vm6 = vmmov %vm11508_vm4 }
 0x9d9   :  { %4217 = vrot.lane.b32.xlu0 %v9806_v49, %s7990_s17  ;;  %4219 = vrot.lane.b32.xlu1 %v9886_v10, %s7990_s17 }
 0x9db   :  { %v10134_v52 = vpop.permute.xlu0 %3948  ;;  %v10136_v48 = vpop.permute.xlu1 %3649  ;;  %4512 = vmatpush1.bf16.msra.mxu0 %v4326_v3 }
 0x9dc   :  { %v3664_v28 = vsel %vm11499_vm11, %v3648_v13, %v10136_v48  ;;  %v4338_v13 = vld [vmem:[#allocation2 + $0x148] sm:$0xff] }
 0x9dd   :  { %3829 = vrot.lane.b32.xlu0 %v9886_v10, %s7986_s13  ;;  %3831 = vrot.lane.b32.xlu1 %v9888_v59, %s7986_s13  ;;  %v3752_v10 = vsel %vm11500_vm12, %v9976_v32, %v10004_v51  ;;  %vm11510_vm12 = vmmov %vm11499_vm11 }
 0x9de   :  { %4513 = vmatprep.subr.bf16.mxu0 %v3664_v28 }
 0x9df   :  { %v10144_v49 = vpop.permute.xlu0 %4037  ;;  %v10146_v4 = vpop.permute.xlu1 %4227  ;;  %4514 = vmatpush1.bf16.msra.mxu0 %v4332_v9 }
 0x9e0   :  { %4515 = vmatprep.subr.bf16.mxu0 %v4339_v12 }
 0x9e1   :  { %4229 = vrot.lane.b32.xlu0 %v9825_v41, %s7990_s17  ;;  %3750 = vrot.lane.b32.xlu1 %v9902_v5, %s7985_s12  ;;  %v4344_v41 = vld [vmem:[#allocation2 + $0x188] sm:$0xff] }
 0x9e3   :  { %v10155_v3 = vpop.permute.xlu0 %3837  ;;  %v10157_v28 = vpop.permute.xlu1 %3938  ;;  %4516 = vmatpush1.bf16.msra.mxu0 %v4338_v13 }
 0x9e4   :  { %v10162_v9 = vsel %vm374_vm10, %v9961_v58, %v10157_v28  ;;  %4517 = vmatprep.subr.bf16.mxu0 %v3752_v10  ;;  %v4350_v58 = vld [vmem:[#allocation2 + $0x1c8] sm:$0xff] }
 0x9e5   :  { %3841 = vrot.lane.b32.xlu0 %v9900_v63, %s7986_s13  ;;  %4231 = vrot.lane.b32.xlu1 %v9900_v63, %s7990_s17 }
 0x9e7   :  { %v10168_v12 = vpop.permute.xlu0 %4134  ;;  %v10170_v32 = vpop.permute.xlu1 %3742  ;;  %4518 = vmatpush1.bf16.msra.mxu0 %v4344_v41 }
 0x9e8   :  { %v3757_v13 = vsel %vm11501_vm0, %v3741_v50, %v10170_v32  ;;  %vm11511_vm0 = vmmov %vm11499_vm11 }
 0x9e9   :  { %4279 = vrot.lane.b32.xlu0 %v9936_v8, %s7990_s17  ;;  %4281 = vrot.lane.b32.xlu1 %v9940_v40, %s7990_s17  ;;  %v4356_v8 = vld [vmem:[#allocation2 + $0x208] sm:$0xff] }
 0x9ea   :  { %4519 = vmatprep.subr.bf16.mxu0 %v3757_v13 }
 0x9eb   :  { %v10178_v10 = vpop.permute.xlu0 %4215  ;;  %v4276_v63 = vpop.permute.xlu1 %4275  ;;  %4520 = vmatpush1.bf16.msra.mxu0 %v4350_v58 }
 0x9ec   :  { %v10182_v23 = vsel %vm11502_vm13, %v4214_v27, %v10178_v10  ;;  %4521 = vmatprep.subr.bf16.mxu0 %v4357_v43  ;;  %v4362_v43 = vld [vmem:[#allocation2 + $0x248] sm:$0xff]  ;;  %vm11512_vm13 = vcmask 900096  }
 0x9ed   :  { %3891 = vrot.lane.b32.xlu0 %v9940_v40, %s7986_s13  ;;  %3843 = vrot.lane.b32.xlu1 %v9902_v5, %s7986_s13 }
 0x9ef   :  { %v10188_v50 = vpop.permute.xlu0 %4223  ;;  %v4274_v41 = vpop.permute.xlu1 %4273  ;;  %4522 = vmatpush1.bf16.msra.mxu0 %v4356_v8 }
 0x9f0   :  { %v10191_v13 = vsel %vm11503_vm2, %v4274_v41, %v4276_v63  ;;  %4523 = vmatprep.subr.bf16.mxu0 %v10013_v21  ;;  %v4368_v41 = vld [vmem:[#allocation2 + $0x288] sm:$0xff]  ;;  %vm4501_vm2 = vcmask 392192  }
 0x9f1   :  { %3942 = vrot.lane.b32.xlu0 %v9888_v59, %s7987_s14  ;;  %3893 = vrot.lane.b32.xlu1 %v9955_v20, %s7986_s13 }
 0x9f3   :  { %v10198_v40 = vpop.permute.xlu0 %4277  ;;  %v3836_v27 = vpop.permute.xlu1 %3835  ;;  %4524 = vmatpush1.bf16.msra.mxu0 %v4362_v43 }
 0x9f4   :  { %v10202_v58 = vsel %vm11504_vm3, %v4276_v63, %v10198_v40  ;;  %v3850_v8 = vsel %vm328_vm8, %v10104_v18, %v3836_v27  ;;  %v10208_v21 = vsel %vm328_vm8, %v3836_v27, %v10155_v3  ;;  %v4375_v63 = vld [vmem:[#allocation2 + $0x2d0] sm:$0xff]  ;;  %vm11513_vm3 = vcmask 138240  }
 0x9f5   :  { %3877 = vst [vmem:[#allocation2 + $0x290] sm:$0xff] %v3850_v8  ;;  %4004 = vrot.lane.b32.xlu0 %v9955_v20, %s7987_s14  ;;  %3954 = vrot.lane.b32.xlu1 %v9902_v5, %s7987_s14 }
 0x9f6   :  { %4525 = vmatprep.subr.bf16.mxu0 %v3850_v8  ;;  %v4374_v8 = vld [vmem:[#allocation2 + $0x2c8] sm:$0xff] }
 0x9f7   :  { %v4001_v43 = vpop.permute.xlu0 %4000  ;;  %v10214_v19 = vpop.permute.xlu1 %4002  ;;  %4526 = vmatpush1.bf16.msra.mxu0 %v4368_v41 }
 0x9f8   :  { %11505 = vst [vmem:[#allocation11_spill] sm:$0xff] %v10214_v19  ;;  %v10218_v18 = vsel %vm374_vm10, %v9580_v55, %v4001_v43  ;;  %v10222_v27 = vsel %vm374_vm10, %v4001_v43, %v10214_v19  ;;  %4527 = vmatprep.subr.bf16.mxu0 %v4375_v63  ;;  %v3566_v43 = vsel %vm226_vm5, %v10106_v45, %v10116_v36  ;;  %v4323_v19 = vld [vmem:[#allocation2 + $0xa0] sm:$0xff]  ;;  %v4322_v45 = vld [vmem:[#allocation2 + $0x98] sm:$0xff] }
 0x9f9   :  { %4047 = vrot.lane.b32.xlu0 %v9902_v5, %s7988_s15  ;;  %4035 = vrot.lane.b32.xlu1 %v9888_v59, %s7988_s15 }
 0x9fb   :  { %v10228_v30 = vpop.permute.xlu0 %3612  ;;  %v10230_v41 = vpop.permute.xlu1 %3554  ;;  %4528 = vmatpush1.bf16.msra.mxu0 %v4374_v8 }
 0x9fc   :  { %v3567_v55 = vsel %vm226_vm5, %v10116_v36, %v10230_v41  ;;  %4529 = vmatprep.subr.bf16.mxu0 %v9804_v14 }
 0x9fd   :  { %4128 = vrot.lane.b32.xlu0 %v9888_v59, %s7989_s16  ;;  %4097 = vrot.lane.b32.xlu1 %v9955_v20, %s7988_s15 }
 0x9fe   :  { %4593 = vmatprep.subr.bf16.mxu1 %v3567_v55 }
 0x9ff   :  { %v10243_v63 = vpop.permute.xlu0 %4031  ;;  %v10245_v8 = vpop.permute.xlu1 %3614  ;;  %4530 = vmatpush1.bf16.msra.mxu0 %v9800_v54  ;;  %4594 = vmatpush1.bf16.msra.mxu1 %v3566_v43  ;;  %v3661_v54 = vsel %vm11507_vm14, %v9996_v35, %v10033_v46  ;;  %v4392_v43 = vld [vmem:[#allocation2 + $0x388] sm:$0xff]  ;;  %vm11515_vm14 = vmmov %vm11513_vm3 }
 0xa00   :  { %v10251_v14 = vsel %vm11506_vm9, %v10022_v17, %v10243_v63  ;;  %4595 = vmatprep.subr.bf16.mxu1 %v4323_v19  ;;  %4531 = vmatprep.subr.bf16.mxu0 %v9823_v39  ;;  %v4393_v19 = vld [vmem:[#allocation2 + $0x390] sm:$0xff]  ;;  %vm11514_vm9 = vmmov %vm11511_vm0 }
 0xa01   :  { %4190 = vrot.lane.b32.xlu0 %v9955_v20, %s7989_s16  ;;  %4140 = vrot.lane.b32.xlu1 %v9902_v5, %s7989_s16 }
 0xa03   :  { %v4094_v36 = vpop.permute.xlu0 %4093  ;;  %v10261_v55 = vpop.permute.xlu1 %4095  ;;  %4532 = vmatpush1.bf16.msra.mxu0 %v9819_v56  ;;  %4596 = vmatpush1.bf16.msra.mxu1 %v4322_v45  ;;  %v3660_v56 = vsel %vm11499_vm11, %v9998_v16, %v9996_v35  ;;  %v4471_v35 = vld [vmem:[%s11438_s2 + $0x68] sm:$0xff]  ;;  %v10301_v16 = vld [vmem:[%s11437_s1 + $0xc0] ss:$16 sps:$4 sm:$0xff]   ;;  %vm11517_vm11 = vmmov %vm11509_vm6 }
 0xa04   :  { %v10266_v39 = vsel %vm11508_vm4, %v9605_v25, %v4094_v36  ;;  %v10270_v17 = vsel %vm11509_vm6, %v4094_v36, %v10261_v55  ;;  %4597 = vmatprep.subr.bf16.mxu1 %v3661_v54  ;;  %4533 = vmatprep.subr.bf16.mxu0 %v4393_v19  ;;  %v4470_v25 = vld [vmem:[%s11438_s2 + $0x60] sm:$0xff]  ;;  %vm11516_vm4 = vmmov %vm11513_vm3 }
 0xa05   :  { %4233 = vrot.lane.b32.xlu0 %v9902_v5, %s7990_s17  ;;  %4221 = vrot.lane.b32.xlu1 %v9888_v59, %s7990_s17  ;;  %v3665_v59 = vsel %vm11511_vm0, %v10136_v48, %v10125_v6  ;;  %vm11519_vm0 = vcmask 891904  }
 0xa07   :  { %v10282_v45 = vpop.permute.xlu0 %3705  ;;  %v10284_v36 = vpop.permute.xlu1 %3653  ;;  %4534 = vmatpush1.bf16.msra.mxu0 %v4392_v43  ;;  %4598 = vmatpush1.bf16.msra.mxu1 %v3660_v56  ;;  %v4340_v56 = vld [vmem:[#allocation2 + $0x158] sm:$0xff]  ;;  %v4411_v43 = vld [vmem:[#allocation2 + $0x450] sm:$0xff] }
 0xa08   :  { %v3666_v5 = vsel %vm11510_vm12, %v10125_v6, %v10284_v36  ;;  %4535 = vmatprep.subr.bf16.mxu0 %v10046_v60  ;;  %vm11518_vm12 = vmmov %vm11513_vm3 }
 0xa09   :  { %4474 = vperm.xlu0 %7367, %v4470_v25   ;;  %4283 = vrot.lane.b32.xlu1 %v9955_v20, %s7990_s17  ;;  %v4341_v20 = vld [vmem:[#allocation2 + $0x160] sm:$0xff] }
 0xa0a   :  { %4599 = vmatprep.subr.bf16.mxu1 %v3666_v5 }
 0xa0b   :  { %v10303_v54 = vpop.permute.xlu0 %4124  ;;  %v3947_v60 = vpop.permute.xlu1 %3946  ;;  %4536 = vmatpush1.bf16.msra.mxu0 %v10042_v53  ;;  %4600 = vmatpush1.bf16.msra.mxu1 %v3665_v59  ;;  %v10318_v53 = vld [vmem:[%s11437_s1 + $0xcc] ss:$16 sps:$4 sm:$0xff]   ;;  %v3753_v59 = vsel %vm11515_vm14, %v10004_v51, %v10010_v11  ;;  %vm11523_vm14 = vmmov %vm11509_vm6 }
 0xa0c   :  { %v10309_v48 = vsel %vm11512_vm13, %v9984_v33, %v10303_v54  ;;  %v3961_v6 = vsel %vm374_vm10, %v10070_v0, %v3947_v60  ;;  %v3962_v19 = vsel %vm374_vm10, %v3947_v60, %v10134_v52  ;;  %4601 = vmatprep.subr.bf16.mxu1 %v4341_v20  ;;  %v3754_v33 = vsel %vm11513_vm3, %v10010_v11, %v10039_v47  ;;  %vm11520_vm13 = vmmov %vm11519_vm0 }
 0xa0d   :  { %3989 = vst [vmem:[#allocation2 + $0x410] sm:$0xff] %v3962_v19  ;;  %4479 = vperm.xlu1 %7368, %v4471_v35   ;;  %4548 = vmatprep.subr.bf16.mxu0 %v3962_v19  ;;  %v4410_v35 = vld [vmem:[#allocation2 + $0x448] sm:$0xff]  ;;  %v3758_v11 = vsel %vm11518_vm12, %v10170_v32, %v10083_v29  ;;  %vm11521_vm3 = vcmask 900096   ;;  %v4358_v32 = vld [vmem:[#allocation2 + $0x218] sm:$0xff] }
 0xa0e   :  { %4538 = vmatmul.mubr.bf16.vlgmr.msra.gmra.mrb[24].mxu0 %v10301_v16 }
 0xa0f   :  { %v10324_v0 = vpop.permute.xlu0 %3746  ;;  %v3708_v25 = vpop.permute.xlu1 %3707  ;;  %4549 = vmatpush1.bf16.msra.mxu0 %v3961_v6  ;;  %4602 = vmatpush1.bf16.msra.mxu1 %v4340_v56 }
 0xa10   :  { %v10328_v5 = vsel %vm11514_vm9, %v10282_v45, %v3708_v25  ;;  %4603 = vmatprep.subr.bf16.mxu1 %v3754_v33  ;;  %4550 = vmatprep.subr.bf16.mxu0 %v4411_v43  ;;  %v3759_v60 = vsel %vm11516_vm4, %v10083_v29, %v10324_v0  ;;  %vm11522_vm9 = vmmov %vm11521_vm3  ;;  %v4359_v29 = vld [vmem:[#allocation2 + $0x220] sm:$0xff] }
 0xa11   :  { %3726 = vst [vmem:[#allocation2 + $0x170] sm:$0xff] %v10328_v5  ;;  %7084 = vmatprep.mubr.msk.bf16.mxu0 %vm4501_vm2, %v10318_v53  ;;  %vm11524_vm4 = vmmov %vm11509_vm6 }
 0xa13   :  { %v4040_v20 = vpop.permute.xlu0 %4039  ;;  %v10339_v6 = vpop.permute.xlu1 %3839  ;;  %4551 = vmatpush1.bf16.msra.mxu0 %v4410_v35  ;;  %4604 = vmatpush1.bf16.msra.mxu1 %v3753_v59 }
 0xa14   :  { %v4054_v19 = vsel %vm11509_vm6, %v10144_v49, %v4040_v20  ;;  %v4055_v56 = vsel %vm11517_vm11, %v4040_v20, %v10090_v34  ;;  %v3852_v51 = vsel %vm328_vm8, %v10155_v3, %v10339_v6  ;;  %4552 = vmatprep.subr.bf16.mxu0 %v10064_v7  ;;  %4605 = vmatprep.subr.bf16.mxu1 %v3759_v60  ;;  %v4428_v60 = vld [vmem:[#allocation2 + $0x508] sm:$0xff]  ;;  %vm11525_vm6 = vmmov %vm11521_vm3 }
 0xa15   :  { %vm11526_vm11 = vmmov %vm11521_vm3 }
 0xa17   :  { %v4226_v33 = vpop.permute.xlu0 %4225  ;;  %v4133_v25 = vpop.permute.xlu1 %4132  ;;  %4553 = vmatpush1.bf16.msra.mxu0 %v10060_v22  ;;  %4606 = vmatpush1.bf16.msra.mxu1 %v3758_v11  ;;  %v4377_v11 = vld [vmem:[#allocation2 + $0x2e0] sm:$0xff] }
 0xa18   :  { %v10355_v49 = vsel %vm11519_vm0, %v10188_v50, %v4226_v33  ;;  %v4241_v43 = vsel %vm11520_vm13, %v4226_v33, %v10146_v4  ;;  %v4147_v7 = vsel %vm11521_vm3, %v10097_v37, %v4133_v25  ;;  %v4148_v3 = vsel %vm11522_vm9, %v4133_v25, %v10168_v12  ;;  %4554 = vmatprep.subr.bf16.mxu0 %v4055_v56  ;;  %v4429_v50 = vld [vmem:[#allocation2 + $0x510] sm:$0xff]  ;;  %v4382_v33 = vld [vmem:[#allocation2 + $0x318] sm:$0xff]  ;;  %vm11527_vm0 = vmmov %vm11524_vm4 }
 0xa19   :  { %4607 = vmatprep.subr.bf16.mxu1 %v4359_v29  ;;  %v4389_v29 = vld [vmem:[#allocation2 + $0x360] sm:$0xff]  ;;  %vm11528_vm13 = vmmov %vm11521_vm3 }
 0xa1a   :  { %vm11529_vm9 = vmmov %vm11521_vm3 }
 0xa1b   :  { %v3951_v59 = vpop.permute.xlu0 %3950  ;;  %v10363_v22 = vpop.permute.xlu1 %4033  ;;  %4555 = vmatpush1.bf16.msra.mxu0 %v4054_v19  ;;  %4608 = vmatpush1.bf16.msra.mxu1 %v4358_v32 }
 0xa1c   :  { %v10367_v35 = vsel %vm374_vm10, %v10134_v52, %v3951_v59  ;;  %v10372_v37 = vsel %vm11523_vm14, %v10243_v63, %v10363_v22  ;;  %4556 = vmatprep.subr.bf16.mxu0 %v4429_v50  ;;  %4609 = vmatprep.subr.bf16.mxu1 %v10057_v2  ;;  %vm11530_vm14 = vcmask 146432  }
 0xa1f   :  { %v4044_v20 = vpop.permute.xlu0 %4043  ;;  %v10375_v56 = vpop.permute.xlu1 %4126  ;;  %4557 = vmatpush1.bf16.msra.mxu0 %v4428_v60  ;;  %4610 = vmatpush1.bf16.msra.mxu1 %v10016_v24 }
 0xa20   :  { %v10380_v19 = vsel %vm11524_vm4, %v10090_v34, %v4044_v20  ;;  %v10385_v52 = vsel %vm11525_vm6, %v10303_v54, %v10375_v56  ;;  %4558 = vmatprep.subr.bf16.mxu0 %v10077_v57  ;;  %4611 = vmatprep.subr.bf16.mxu1 %v3852_v51  ;;  %v4376_v34 = vld [vmem:[#allocation2 + $0x2d8] sm:$0xff]  ;;  %v4447_v51 = vld [vmem:[#allocation2 + $0x5d0] sm:$0xff]  ;;  %vm11531_vm4 = vmmov %vm11530_vm14 }
 0xa21   :  { %vm11532_vm6 = vmmov %vm11518_vm12 }
 0xa23   :  { %v4137_v2 = vpop.permute.xlu0 %4136  ;;  %v3547_v63 = vpop.permute.xlu1 %3546  ;;  %4559 = vmatpush1.bf16.msra.mxu0 %v10073_v31  ;;  %4612 = vmatpush1.bf16.msra.mxu1 %v10208_v21  ;;  %v4383_v31 = vld [vmem:[#allocation2 + $0x320] sm:$0xff] }
 0xa24   :  { %v10392_v24 = vsel %vm11526_vm11, %v10168_v12, %v4137_v2  ;;  %3590 = vst.msk [vmem:[#allocation2 + $0x38] sm:$0xff] %vm226_vm5, %v3547_v63  ;;  %4560 = vmatprep.subr.bf16.mxu0 %v4148_v3  ;;  %4613 = vmatprep.subr.bf16.mxu1 %v4377_v11  ;;  %v4446_v12 = vld [vmem:[#allocation2 + $0x5c8] sm:$0xff]  ;;  %v4394_v11 = vld [vmem:[#allocation2 + $0x398] sm:$0xff]  ;;  %vm11533_vm11 = vmmov %vm11531_vm4 }
 0xa27   :  { %v10395_v54 = vpop.permute.xlu0 %3940  ;;  %v10397_v57 = vpop.permute.xlu1 %3645  ;;  %4561 = vmatpush1.bf16.msra.mxu0 %v4147_v7  ;;  %4614 = vmatpush1.bf16.msra.mxu1 %v4376_v34  ;;  %v4388_v7 = vld [vmem:[#allocation2 + $0x358] sm:$0xff] }
 0xa28   :  { %v3959_v21 = vsel %vm374_vm10, %v10157_v28, %v10395_v54  ;;  %4562 = vmatprep.subr.bf16.mxu0 %v4447_v51  ;;  %4615 = vmatprep.subr.bf16.mxu1 %v4383_v31  ;;  %v4395_v28 = vld [vmem:[#allocation2 + $0x3a0] sm:$0xff] }
 0xa2b   :  { %v3545_v25 = vpop.permute.xlu0 %3544  ;;  %v3739_v3 = vpop.permute.xlu1 %3738  ;;  %4563 = vmatpush1.bf16.msra.mxu0 %v4446_v12  ;;  %4616 = vmatpush1.bf16.msra.mxu1 %v4382_v33 }
 0xa2c   :  { %4564 = vmatprep.subr.bf16.mxu0 %v10182_v23  ;;  %4617 = vmatprep.subr.bf16.mxu1 %v4389_v29 }
 0xa2f   :  { %v3644_v32 = vpop.permute.xlu0 %3643  ;;  %v10403_v50 = vpop.permute.xlu1 %3952  ;;  %4565 = vmatpush1.bf16.msra.mxu0 %v10128_v1  ;;  %4618 = vmatpush1.bf16.msra.mxu1 %v4388_v7 }
 0xa30   :  { %v3964_v60 = vsel %vm374_vm10, %v3951_v59, %v10403_v50  ;;  %4566 = vmatprep.subr.bf16.mxu0 %v4241_v43  ;;  %4619 = vmatprep.subr.bf16.mxu1 %v4395_v28  ;;  %v10424_v43 = vld [vmem:[%s11437_s1 + $0xc8] ss:$16 sps:$4 sm:$0xff]  }
 0xa33   :  { %v10408_v34 = vpop.permute.xlu0 %3736  ;;  %v10410_v51 = vpop.permute.xlu1 %4045  ;;  %4567 = vmatpush1.bf16.msra.mxu0 %v10355_v49  ;;  %4620 = vmatpush1.bf16.msra.mxu1 %v4394_v11  ;;  %v3564_v49 = vsel %vm226_vm5, %v3545_v25, %v3547_v63 }
 0xa34   :  { %v10415_v23 = vsel %vm11518_vm12, %v10408_v34, %v3739_v3  ;;  %v4057_v1 = vsel %vm11527_vm0, %v4044_v20, %v10410_v51  ;;  %4568 = vmatprep.subr.bf16.mxu0 %v10202_v58  ;;  %4621 = vmatprep.subr.bf16.mxu1 %v3959_v21  ;;  %v3563_v20 = vsel %vm226_vm5, %v10024_v62, %v3545_v25  ;;  %vm11534_vm12 = vmmov %vm11531_vm4  ;;  %vm11535_vm0 = vcmask 891904  }
 0xa35   :  { %3781 = vst [vmem:[#allocation2 + $0x1b0] sm:$0xff] %v10415_v23 }
 0xa37   :  { %v3557_v59 = vpop.permute.xlu0 %3556  ;;  %v10427_v31 = vpop.permute.xlu1 %4138  ;;  %4569 = vmatpush1.bf16.msra.mxu0 %v10191_v13  ;;  %4622 = vmatpush1.bf16.msra.mxu1 %v10162_v9 }
 0xa38   :  { %v4150_v58 = vsel %vm11528_vm13, %v4137_v2, %v10427_v31  ;;  %4677 = vmatprep.subr.bf16.mxu0 %v3564_v49  ;;  %4634 = vmatprep.subr.bf16.mxu1 %v3964_v60  ;;  %v3568_v62 = vsel %vm226_vm5, %v10230_v41, %v3557_v59  ;;  %v3663_v41 = vsel %vm11530_vm14, %v3644_v32, %v10397_v57  ;;  %vm11536_vm13 = vmmov %vm11535_vm0 }
 0xa39   :  { %vm11539_vm14 = vmmov %vm11535_vm0 }
 0xa3a   :  { %4581 = vmatmul.mubr.bf16.vlgmr.msra.gmra.mrb[24].mxu0 %v10424_v43  ;;  %4624 = vmatmul.mubr.bf16.vlgmr.msra.gmra.mrb[44].mxu1 %v10301_v16 }
 0xa3b   :  { %v4187_v63 = vpop.permute.xlu0 %4186  ;;  %v3559_v21 = vpop.permute.xlu1 %3558  ;;  %4635 = vmatpush1.bf16.msra.mxu1 %v10367_v35  ;;  %4678 = vmatpush1.bf16.msra.mxu0 %v3563_v20  ;;  %v3620_v35 = vsel %vm226_vm5, %v10228_v30, %v10245_v8 }
 0xa3c   :  { %v10440_v9 = vsel %vm11521_vm3, %v9631_v42, %v4187_v63  ;;  %v3569_v13 = vsel %vm226_vm5, %v3557_v59, %v3559_v21  ;;  %4636 = vmatprep.subr.bf16.mxu1 %v10222_v27  ;;  %7085 = vmatprep.mubr.msk.bf16.mxu1 %vm4501_vm2, %v10318_v53  ;;  %vm11537_vm3 = vmmov %vm11531_vm4  ;;  %v11546_v21 = vld [vmem:[#allocation11_spill] sm:$0xff] }
 0xa3d   :  { %4679 = vmatprep.subr.bf16.mxu0 %v3569_v13  ;;  %4709 = vmatprep.mubr.bf16.mxu0 %v9951_v26  ;;  %v3619_v26 = vsel %vm226_vm5, %v9559_v15, %v10228_v30 }
 0xa3f   :  { %v3656_v2 = vpop.permute.xlu0 %3655  ;;  %v10452_v42 = vpop.permute.xlu1 %4188  ;;  %4637 = vmatpush1.bf16.msra.mxu1 %v10218_v18  ;;  %4680 = vmatpush1.bf16.msra.mxu0 %v3568_v62  ;;  %v3662_v18 = vsel %vm11531_vm4, %v10033_v46, %v3644_v32  ;;  %vm11540_vm4 = vmmov %vm11532_vm6 }
 0xa40   :  { %v4195_v27 = vsel %vm11529_vm9, %v4187_v63, %v10452_v42  ;;  %4638 = vmatprep.subr.bf16.mxu1 %v10372_v37  ;;  %4681 = vmatprep.subr.bf16.mxu0 %v3620_v35  ;;  %vm11538_vm9 = vmmov %vm11532_vm6  ;;  %v4385_v63 = vld [vmem:[#allocation2 + $0x330] sm:$0xff] }
 0xa43   :  { %v3749_v8 = vpop.permute.xlu0 %3748  ;;  %v3801_v12 = vpop.permute.xlu1 %3800  ;;  %4639 = vmatpush1.bf16.msra.mxu1 %v10251_v14  ;;  %4682 = vmatpush1.bf16.msra.mxu0 %v3619_v26  ;;  %v3667_v14 = vsel %vm11534_vm12, %v10284_v36, %v3656_v2  ;;  %vm11543_vm12 = vmmov %vm11540_vm4 }
 0xa44   :  { %4640 = vmatprep.subr.bf16.mxu1 %v4057_v1  ;;  %4683 = vmatprep.subr.bf16.mxu0 %v3663_v41 }
 0xa47   :  { %v3799_v33 = vpop.permute.xlu0 %3798  ;;  %v3658_v37 = vpop.permute.xlu1 %3657  ;;  %4641 = vmatpush1.bf16.msra.mxu1 %v10380_v19  ;;  %4684 = vmatpush1.bf16.msra.mxu0 %v3662_v18 }
 0xa48   :  { %v3806_v15 = vsel %vm11532_vm6, %v3799_v33, %v3801_v12  ;;  %v3668_v30 = vsel %vm11533_vm11, %v3656_v2, %v3658_v37  ;;  %4642 = vmatprep.subr.bf16.mxu1 %v10270_v17  ;;  %v3712_v17 = vsel %vm11537_vm3, %v9566_v44, %v10282_v45  ;;  %vm11541_vm6 = vmmov %vm11540_vm4  ;;  %v4391_v2 = vld [vmem:[#allocation2 + $0x370] sm:$0xff]  ;;  %vm11547_vm3 = vcmask 908288  }
 0xa49   :  { %3819 = vst [vmem:[#allocation2 + $0x230] sm:$0xff] %v3806_v15  ;;  %4685 = vmatprep.subr.bf16.mxu0 %v3668_v30  ;;  %vm11542_vm11 = vmmov %vm11535_vm0  ;;  %v4397_v12 = vld [vmem:[#allocation2 + $0x3b0] sm:$0xff] }
 0xa4b   :  { %v4218_v57 = vpop.permute.xlu0 %4217  ;;  %v10472_v25 = vpop.permute.xlu1 %4219  ;;  %4643 = vmatpush1.bf16.msra.mxu1 %v10266_v39  ;;  %4686 = vmatpush1.bf16.msra.mxu0 %v3667_v14 }
 0xa4c   :  { %v4237_v46 = vsel %vm11535_vm0, %v10178_v10, %v4218_v57  ;;  %v4238_v19 = vsel %vm11536_vm13, %v4218_v57, %v10472_v25  ;;  %4644 = vmatprep.subr.bf16.mxu1 %v10385_v52  ;;  %4687 = vmatprep.subr.bf16.mxu0 %v10328_v5  ;;  %v3755_v5 = vsel %vm11538_vm9, %v10039_v47, %v10408_v34  ;;  %vm11544_vm13 = vmmov %vm11535_vm0  ;;  %v11545_v34 = vld [vmem:[#allocation10_spill] sm:$0xff] }
 0xa4d   :  { %vm11548_vm9 = vmmov %vm11547_vm3 }
 0xa4f   :  { %v3830_v36 = vpop.permute.xlu0 %3829  ;;  %v3832_v3 = vpop.permute.xlu1 %3831  ;;  %4645 = vmatpush1.bf16.msra.mxu1 %v10309_v48  ;;  %4688 = vmatpush1.bf16.msra.mxu0 %v3712_v17 }
 0xa50   :  { %v3848_v39 = vsel %vm328_vm8, %v10053_v61, %v3830_v36  ;;  %v3849_v10 = vsel %vm328_vm8, %v3830_v36, %v3832_v3  ;;  %4646 = vmatprep.subr.bf16.mxu1 %v4150_v58  ;;  %4689 = vmatprep.subr.bf16.mxu0 %v10415_v23  ;;  %v3760_v61 = vsel %vm11541_vm6, %v10324_v0, %v3749_v8  ;;  %vm11551_vm6 = vcmask 900096  }
 0xa53   :  { %v4230_v52 = vpop.permute.xlu0 %4229  ;;  %v3751_v29 = vpop.permute.xlu1 %3750  ;;  %4647 = vmatpush1.bf16.msra.mxu1 %v10392_v24  ;;  %4690 = vmatpush1.bf16.msra.mxu0 %v3755_v5  ;;  %v3805_v24 = vsel %vm11543_vm12, %v9591_v38, %v3799_v33  ;;  %vm11553_vm12 = vmmov %vm11547_vm3 }
 0xa54   :  { %v4242_v44 = vsel %vm11539_vm14, %v10146_v4, %v4230_v52  ;;  %v3761_v45 = vsel %vm11540_vm4, %v3749_v8, %v3751_v29  ;;  %4648 = vmatprep.subr.bf16.mxu1 %v4195_v27  ;;  %vm11549_vm14 = vmmov %vm11547_vm3  ;;  %v11565_v29 = vmov 0  }
 0xa55   :  { %3788 = vst [vmem:[#allocation2 + $0x1f0] sm:$0xff] %v3761_v45  ;;  %4691 = vmatprep.subr.bf16.mxu0 %v3761_v45  ;;  %vm11550_vm4 = vmmov %vm11547_vm3 }
 0xa57   :  { %v3842_v48 = vpop.permute.xlu0 %3841  ;;  %v10498_v7 = vpop.permute.xlu1 %4231  ;;  %4649 = vmatpush1.bf16.msra.mxu1 %v10440_v9  ;;  %4692 = vmatpush1.bf16.msra.mxu0 %v3760_v61 }
 0xa58   :  { %v3853_v47 = vsel %vm328_vm8, %v10339_v6, %v3842_v48  ;;  %v4243_v4 = vsel %vm11542_vm11, %v4230_v52, %v10498_v7  ;;  %4650 = vmatprep.subr.bf16.mxu1 %v4238_v19  ;;  %4693 = vmatprep.subr.bf16.mxu0 %v3806_v15  ;;  %vm11552_vm11 = vmmov %vm11551_vm6 }
 0xa5b   :  { %v4280_v32 = vpop.permute.xlu0 %4279  ;;  %v10507_v28 = vpop.permute.xlu1 %4281  ;;  %4651 = vmatpush1.bf16.msra.mxu1 %v4237_v46  ;;  %4694 = vmatpush1.bf16.msra.mxu0 %v3805_v24 }
 0xa5c   :  { %v4287_v0 = vsel %vm11535_vm0, %v10198_v40, %v4280_v32  ;;  %v4288_v60 = vsel %vm11544_vm13, %v4280_v32, %v10507_v28  ;;  %4652 = vmatprep.subr.bf16.mxu1 %v4243_v4  ;;  %4695 = vmatprep.subr.bf16.mxu0 %v3849_v10  ;;  %vm11554_vm0 = vmmov %vm11547_vm3 }
 0xa5d   :  { %vm11555_vm13 = vmmov %vm11551_vm6 }
 0xa5f   :  { %v3892_v6 = vpop.permute.xlu0 %3891  ;;  %v3844_v11 = vpop.permute.xlu1 %3843  ;;  %4653 = vmatpush1.bf16.msra.mxu1 %v4242_v44  ;;  %4696 = vmatpush1.bf16.msra.mxu0 %v3848_v39 }
 0xa60   :  { %v3898_v38 = vsel %vm328_vm8, %v11545_v34, %v3892_v6  ;;  %v3854_v23 = vsel %vm328_vm8, %v3842_v48, %v3844_v11  ;;  %4654 = vmatprep.subr.bf16.mxu1 %v4288_v60  ;;  %v11566_v11 = vld [vmem:[#allocation4_spill] sm:$0xff] }
 0xa61   :  { %4697 = vmatprep.subr.bf16.mxu0 %v3854_v23  ;;  %v11567_v23 = vld [vmem:[#allocation5_spill] sm:$0xff] }
 0xa63   :  { %v3943_v1 = vpop.permute.xlu0 %3942  ;;  %v3894_v49 = vpop.permute.xlu1 %3893  ;;  %4655 = vmatpush1.bf16.msra.mxu1 %v4287_v0  ;;  %4698 = vmatpush1.bf16.msra.mxu0 %v3853_v47 }
 0xa64   :  { %v3960_v40 = vsel %vm374_vm10, %v10395_v54, %v3943_v1  ;;  %3986 = vst.msk [vmem:[#allocation2 + $0x3f0] sm:$0xff] %vm374_vm10, %v3943_v1  ;;  %v3899_v59 = vsel %vm328_vm8, %v3892_v6, %v3894_v49  ;;  %v4384_v54 = vld [vmem:[#allocation2 + $0x328] sm:$0xff] }
 0xa65   :  { %4699 = vmatprep.subr.bf16.mxu0 %v3899_v59 }
 0xa66   :  { %4667 = vmatmul.mubr.bf16.vlgmr.msra.gmra.mrb[44].mxu1 %v10424_v43 }
 0xa67   :  { %v4005_v58 = vpop.permute.xlu0 %4004  ;;  %v3955_v20 = vpop.permute.xlu1 %3954  ;;  %4700 = vmatpush1.bf16.msra.mxu0 %v3898_v38 }
 0xa68   :  { %v4010_v9 = vsel %vm374_vm10, %v11546_v21, %v4005_v58  ;;  %4024 = vst.msk [vmem:[#allocation2 + $0x470] sm:$0xff] %vm374_vm10, %v4005_v58  ;;  %v3965_v13 = vsel %vm374_vm10, %v10403_v50, %v3955_v20  ;;  %3993 = vst.msk [vmem:[#allocation2 + $0x430] sm:$0xff] %vm374_vm10, %v3955_v20  ;;  %4701 = vmatprep.subr.bf16.mxu0 %v4385_v63  ;;  %v4390_v50 = vld [vmem:[#allocation2 + $0x368] sm:$0xff] }
 0xa6b   :  { %v4048_v62 = vpop.permute.xlu0 %4047  ;;  %v4036_v35 = vpop.permute.xlu1 %4035  ;;  %4702 = vmatpush1.bf16.msra.mxu0 %v4384_v54  ;;  %v4403_v15 = vld [vmem:[#allocation2 + $0x3f0] sm:$0xff] }
 0xa6c   :  { %v4058_v27 = vsel %vm11547_vm3, %v10410_v51, %v4048_v62  ;;  %4086 = vst.msk [vmem:[#allocation2 + $0x4f0] sm:$0xff] %vm11548_vm9, %v4048_v62  ;;  %v4053_v26 = vsel %vm11549_vm14, %v10363_v22, %v4036_v35  ;;  %4703 = vmatprep.subr.bf16.mxu0 %v4391_v2  ;;  %v4396_v22 = vld [vmem:[#allocation2 + $0x3a8] sm:$0xff]  ;;  %vm11556_vm3 = vmmov %vm11551_vm6 }
 0xa6d   :  { %4079 = vst.msk [vmem:[#allocation2 + $0x4b0] sm:$0xff] %vm11550_vm4, %v4036_v35  ;;  %vm11557_vm9 = vmmov %vm11556_vm3  ;;  %vm11559_vm4 = vcmask 891904  }
 0xa6e   :  { %vm11558_vm14 = vmmov %vm11556_vm3 }
 0xa6f   :  { %v4129_v41 = vpop.permute.xlu0 %4128  ;;  %v4098_v8 = vpop.permute.xlu1 %4097  ;;  %4704 = vmatpush1.bf16.msra.mxu0 %v4390_v50  ;;  %v4409_v57 = vld [vmem:[#allocation2 + $0x430] sm:$0xff]  ;;  %v11568_v50 = vld [vmem:[#allocation6_spill] sm:$0xff] }
 0xa70   :  { %v4146_v18 = vsel %vm11551_vm6, %v10375_v56, %v4129_v41  ;;  %4172 = vst.msk [vmem:[#allocation2 + $0x570] sm:$0xff] %vm11552_vm11, %v4129_v41  ;;  %v4103_v51 = vsel %vm11553_vm12, %v10261_v55, %v4098_v8  ;;  %4705 = vmatprep.subr.bf16.mxu0 %v4397_v12  ;;  %vm11560_vm6 = vmmov %vm11559_vm4  ;;  %v4415_v19 = vld [vmem:[#allocation2 + $0x470] sm:$0xff]  ;;  %v11569_v12 = vld [vmem:[#allocation7_spill] sm:$0xff] }
 0xa71   :  { %4117 = vst.msk [vmem:[#allocation2 + $0x530] sm:$0xff] %vm11554_vm0, %v4098_v8  ;;  %vm11561_vm11 = vmmov %vm11559_vm4 }
 0xa72   :  { %vm11562_vm12 = vmmov %vm11559_vm4 }
 0xa73   :  { %v4191_v33 = vpop.permute.xlu0 %4190  ;;  %v4141_v37 = vpop.permute.xlu1 %4140  ;;  %4706 = vmatpush1.bf16.msra.mxu0 %v4396_v22  ;;  %vm11563_vm0 = vmmov %vm11559_vm4 }
 0xa74   :  { %v4196_v30 = vsel %vm11555_vm13, %v10452_v42, %v4191_v33  ;;  %4210 = vst.msk [vmem:[#allocation2 + $0x5f0] sm:$0xff] %vm11556_vm3, %v4191_v33  ;;  %v4151_v56 = vsel %vm11557_vm9, %v10427_v31, %v4141_v37  ;;  %4707 = vmatprep.subr.bf16.mxu0 %v4403_v15  ;;  %vm11564_vm13 = vmmov %vm11563_vm0  ;;  %v4421_v36 = vld [vmem:[#allocation2 + $0x4b0] sm:$0xff]  ;;  %vm11574_vm3 = vcmask 1047688   ;;  %vm11575_vm9 = vcmask 138240  }
 0xa75   :  { %4179 = vst.msk [vmem:[#allocation2 + $0x5b0] sm:$0xff] %vm11558_vm14, %v4141_v37  ;;  %v10626_v37 = vld [vmem:[%s11437_s1 + $0xe4] ss:$16 sps:$4 sm:$0xff]  }
 0xa76   :  { %7089 = vmatprep.mubr.msk.bf16.mxu1 %vm1113_vm15, %v10626_v37 }
 0xa77   :  { %v4234_v55 = vpop.permute.xlu0 %4233  ;;  %v4222_v14 = vpop.permute.xlu1 %4221  ;;  %4708 = vmatpush1.bf16.msra.mxu0 %v3960_v40  ;;  %v4439_v3 = vld [vmem:[#allocation2 + $0x570] sm:$0xff] }
 0xa78   :  { %v4244_v46 = vsel %vm11559_vm4, %v10498_v7, %v4234_v55  ;;  %4272 = vst.msk [vmem:[#allocation2 + $0x670] sm:$0xff] %vm11560_vm6, %v4234_v55  ;;  %v4239_v42 = vsel %vm11561_vm11, %v10472_v25, %v4222_v14  ;;  %4720 = vmatprep.subr.bf16.mxu0 %v4409_v57  ;;  %v4427_v25 = vld [vmem:[#allocation2 + $0x4f0] sm:$0xff]  ;;  %vm11578_vm4 = vcmask 900096   ;;  %vm11580_vm11 = vmmov %vm11563_vm0 }
 0xa79   :  { %4265 = vst.msk [vmem:[#allocation2 + $0x630] sm:$0xff] %vm11562_vm12, %v4222_v14  ;;  %vm11579_vm6 = vmmov %vm11578_vm4 }
 0xa7a   :  { %4710 = vmatmul.mubr.bf16.vlgmr.msra.gmra.mrb[28].mxu0 %v10301_v16  ;;  %v4433_v16 = vld [vmem:[#allocation2 + $0x530] sm:$0xff]  ;;  %vm11581_vm12 = vmmov %vm11563_vm0 }
 0xa7b   :  { %v4284_v31 = vpop.permute.xlu1 %4283  ;;  %4721 = vmatpush1.bf16.msra.mxu0 %v3965_v13  ;;  %7086 = vmatprep.mubr.msk.bf16.mxu0 %vm4501_vm2, %v10318_v53  ;;  %v4451_v39 = vld [vmem:[#allocation2 + $0x5f0] sm:$0xff]  ;;  %vm11572_vm2 = vcmask 1047696  }
 0xa7c   :  { %v4289_v17 = vsel %vm11563_vm0, %v10507_v28, %v4284_v31  ;;  %4303 = vst.msk [vmem:[#allocation2 + $0x6b0] sm:$0xff] %vm11564_vm13, %v4284_v31  ;;  %4722 = vmatprep.subr.bf16.mxu0 %v4415_v19  ;;  %v4445_v53 = vld [vmem:[#allocation2 + $0x5b0] sm:$0xff]  ;;  %vm11583_vm13 = vmmov %vm11575_vm9 }
 0xa7f   :  { %4723 = vmatpush1.bf16.msra.mxu0 %v4010_v9  ;;  %v4463_v5 = vld [vmem:[#allocation2 + $0x670] sm:$0xff] }
 0xa80   :  { %4724 = vmatprep.subr.bf16.mxu0 %v4421_v36  ;;  %v4457_v10 = vld [vmem:[#allocation2 + $0x630] sm:$0xff] }
 0xa83   :  { %4725 = vmatpush1.bf16.msra.mxu0 %v4053_v26  ;;  %v4469_v52 = vld [vmem:[#allocation2 + $0x6b0] sm:$0xff] }
 0xa84   :  { %4726 = vmatprep.subr.bf16.mxu0 %v4427_v25  ;;  %v11570_v25 = vld [vmem:[#allocation8_spill] sm:$0xff] }
 0xa87   :  { %4727 = vmatpush1.bf16.msra.mxu0 %v4058_v27 }
 0xa88   :  { %4728 = vmatprep.subr.bf16.mxu0 %v4433_v16  ;;  %v10559_v44 = vpop.permute.xlu0 %4474 }
 0xa8b   :  { %4729 = vmatpush1.bf16.msra.mxu0 %v4103_v51 }
 0xa8c   :  { %4730 = vmatprep.subr.bf16.mxu0 %v4439_v3  ;;  %v10562_v7 = vpop.permute.xlu1 %4479 }
 0xa8f   :  { %4731 = vmatpush1.bf16.msra.mxu0 %v4146_v18 }
 0xa90   :  { %4732 = vmatprep.subr.bf16.mxu0 %v4445_v53  ;;  %v11571_v53 = vld [vmem:[#allocation9_spill] sm:$0xff] }
 0xa93   :  { %4733 = vmatpush1.bf16.msra.mxu0 %v4151_v56 }
 0xa94   :  { %4734 = vmatprep.subr.bf16.mxu0 %v4451_v39 }
 0xa97   :  { %4735 = vmatpush1.bf16.msra.mxu0 %v4196_v30 }
 0xa98   :  { %4736 = vmatprep.subr.bf16.mxu0 %v4457_v10 }
 0xa9b   :  { %4737 = vmatpush1.bf16.msra.mxu0 %v4239_v42 }
 0xa9c   :  { %4738 = vmatprep.subr.bf16.mxu0 %v4463_v5 }
 0xa9f   :  { %4739 = vmatpush1.bf16.msra.mxu0 %v4244_v46 }
 0xaa0   :  { %4740 = vmatprep.subr.bf16.mxu0 %v4469_v52 }
 0xaa3   :  { %4741 = vmatpush1.bf16.msra.mxu0 %v4289_v17 }
 0xaa6   :  { %4753 = vmatmul.mubr.bf16.vlgmr.msra.gmra.mrb[28].mxu0 %v10424_v43 }
 0xaa7   :  { %5334 = vmatprep.mubr.bf16.mxu0 %v11565_v29 }
 0xb0d   :  { %v4582_v45 = vpop.f32.mrb[24].mxu0 }
 0xb0e   :  { %v7295_v61 = vadd.f32 %v4582_v45, %v10559_v44  ;;  %v4584_v48 = vpop.f32.mrb[25].mxu0 }
 0xb0f   :  { %v7296_v47 = vadd.f32 %v4584_v48, %v10559_v44  ;;  %v4586_v4 = vpop.f32.mrb[26].mxu0 }
 0xb10   :  { %v4763_v24 = vmax.f32 %v7295_v61, 0.0  ;;  %v7297_v32 = vadd.f32 %v4586_v4, %v10562_v7  ;;  %v4588_v28 = vpop.f32.mrb[27].mxu0 }
 0xb11   :  { %v4764_v0 = vmax.f32 %v7296_v47, 0.0  ;;  %v7298_v43 = vadd.f32 %v4588_v28, %v10562_v7 }
 0xb12   :  { %v4769_v60 = vmax.f32 %v7297_v32, 0.0  ;;  %v4775_v34 = vmul.f32 %v4763_v24, %v11566_v11 }
 0xb13   :  { %v4770_v6 = vmax.f32 %v7298_v43, 0.0  ;;  %v4776_v1 = vmul.f32 %v4764_v0, %v11567_v23 }
 0xb14   :  { %v4781_v38 = vmul.f32 %v4769_v60, %v11566_v11 }
 0xb15   :  { %v4782_v49 = vmul.f32 %v4770_v6, %v11567_v23 }
 0xb16   :  { %v10571_v40 = vpack.c.bf16 %v4781_v38, %v4775_v34  ;;  %v5109_v34 = vld [vmem:[%s11438_s2 + $0x70] sm:$0xff] }
 0xb17   :  { %v10573_v59 = vpack.c.bf16 %v4782_v49, %v4776_v1  ;;  %v5293_v49 = vld [vmem:[%s11438_s2 + $0x80] sm:$0x3] }
 0xb18   :  { %4923 = vst [vmem:[#allocation2 + $0x108] sm:$0xff] %v10571_v40  ;;  %4799 = vrot.lane.b32.xlu0 %v10571_v40, %s7984_s11 }
 0xb19   :  { %4924 = vst [vmem:[#allocation2 + $0x110] sm:$0xff] %v10573_v59  ;;  %4801 = vrot.lane.b32.xlu1 %v10573_v59, %s7984_s11 }
 0xb1c   :  { %4830 = vrot.lane.b32.xlu0 %v10571_v40, %s7983_s0 }
 0xb1d   :  { %4832 = vrot.lane.b32.xlu1 %v10573_v59, %s7983_s0 }
 0xb20   :  { %4861 = vrot.lane.b32.xlu0 %v10571_v40, %s7985_s12 }
 0xb21   :  { %4863 = vrot.lane.b32.xlu1 %v10573_v59, %s7985_s12 }
 0xb24   :  { %4892 = vrot.lane.b32.xlu0 %v10571_v40, %s7986_s13 }
 0xb25   :  { %4894 = vrot.lane.b32.xlu1 %v10573_v59, %s7986_s13 }
 0xb28   :  { %4929 = vrot.lane.b32.xlu0 %v10571_v40, %s7987_s14 }
 0xb29   :  { %4962 = vrot.lane.b32.xlu1 %v10573_v59, %s7988_s15 }
 0xb2c   :  { %4931 = vrot.lane.b32.xlu0 %v10573_v59, %s7987_s14 }
 0xb30   :  { %4993 = vrot.lane.b32.xlu0 %v10573_v59, %s7989_s16 }
 0xb39   :  { %v4668_v58 = vpop.f32.mrb[44].mxu1 }
 0xb3a   :  { %v7299_v20 = vadd.f32 %v4668_v58, %v10559_v44  ;;  %v4670_v63 = vpop.f32.mrb[45].mxu1 }
 0xb3b   :  { %v7300_v21 = vadd.f32 %v4670_v63, %v10559_v44  ;;  %v4672_v9 = vpop.f32.mrb[46].mxu1 }
 0xb3c   :  { %v4765_v13 = vmax.f32 %v7299_v20, 0.0  ;;  %v7301_v54 = vadd.f32 %v4672_v9, %v10562_v7  ;;  %v4674_v62 = vpop.f32.mrb[47].mxu1 }
 0xb3d   :  { %v4766_v35 = vmax.f32 %v7300_v21, 0.0  ;;  %v7302_v2 = vadd.f32 %v4674_v62, %v10562_v7  ;;  %v5110_v21 = vld [vmem:[%s11438_s2 + $0x78] sm:$0xff] }
 0xb3e   :  { %v4771_v27 = vmax.f32 %v7301_v54, 0.0  ;;  %v4777_v41 = vmul.f32 %v4765_v13, %v11568_v50 }
 0xb3f   :  { %v4772_v26 = vmax.f32 %v7302_v2, 0.0  ;;  %v4778_v18 = vmul.f32 %v4766_v35, %v11569_v12 }
 0xb40   :  { %v4783_v8 = vmul.f32 %v4771_v27, %v11568_v50 }
 0xb41   :  { %v4784_v51 = vmul.f32 %v4772_v26, %v11569_v12 }
 0xb42   :  { %v10609_v22 = vpack.c.bf16 %v4783_v8, %v4777_v41 }
 0xb43   :  { %v10611_v33 = vpack.c.bf16 %v4784_v51, %v4778_v18 }
 0xb44   :  { %4925 = vst [vmem:[#allocation2 + $0x118] sm:$0xff] %v10609_v22  ;;  %4933 = vrot.lane.b32.xlu1 %v10609_v22, %s7987_s14  ;;  %4964 = vrot.lane.b32.xlu0 %v10609_v22, %s7988_s15 }
 0xb45   :  { %4926 = vst [vmem:[#allocation2 + $0x120] sm:$0xff] %v10611_v33 }
 0xb48   :  { %4960 = vrot.lane.b32.xlu1 %v10571_v40, %s7988_s15  ;;  %4991 = vrot.lane.b32.xlu0 %v10571_v40, %s7989_s16 }
 0xb4c   :  { %4995 = vrot.lane.b32.xlu1 %v10609_v22, %s7989_s16  ;;  %5026 = vrot.lane.b32.xlu0 %v10609_v22, %s7990_s17 }
 0xb50   :  { %5024 = vrot.lane.b32.xlu1 %v10573_v59, %s7990_s17  ;;  %4803 = vrot.lane.b32.xlu0 %v10609_v22, %s7984_s11 }
 0xb54   :  { %5022 = vrot.lane.b32.xlu1 %v10571_v40, %s7990_s17  ;;  %4834 = vrot.lane.b32.xlu0 %v10609_v22, %s7983_s0 }
 0xb58   :  { %4805 = vrot.lane.b32.xlu1 %v10611_v33, %s7984_s11  ;;  %4865 = vrot.lane.b32.xlu0 %v10609_v22, %s7985_s12 }
 0xb5c   :  { %4836 = vrot.lane.b32.xlu1 %v10611_v33, %s7983_s0  ;;  %4896 = vrot.lane.b32.xlu0 %v10609_v22, %s7986_s13 }
 0xb60   :  { %4867 = vrot.lane.b32.xlu1 %v10611_v33, %s7985_s12  ;;  %4935 = vrot.lane.b32.xlu0 %v10611_v33, %s7987_s14 }
 0xb64   :  { %4898 = vrot.lane.b32.xlu1 %v10611_v33, %s7986_s13  ;;  %4966 = vrot.lane.b32.xlu0 %v10611_v33, %s7988_s15 }
 0xb68   :  { %4997 = vrot.lane.b32.xlu0 %v10611_v33, %s7989_s16 }
 0xb6c   :  { %5028 = vrot.lane.b32.xlu0 %v10611_v33, %s7990_s17 }
 0xb79   :  { %v4754_v15 = vpop.f32.mrb[28].mxu0 }
 0xb7a   :  { %v7303_v30 = vadd.f32 %v4754_v15, %v10559_v44  ;;  %v4756_v56 = vpop.f32.mrb[29].mxu0 }
 0xb7b   :  { %v7304_v55 = vadd.f32 %v4756_v56, %v10559_v44  ;;  %v4758_v14 = vpop.f32.mrb[30].mxu0 }
 0xb7c   :  { %v4767_v57 = vmax.f32 %v7303_v30, 0.0  ;;  %v7305_v46 = vadd.f32 %v4758_v14, %v10562_v7  ;;  %v4760_v42 = vpop.f32.mrb[31].mxu0 }
 0xb7d   :  { %v4768_v31 = vmax.f32 %v7304_v55, 0.0  ;;  %v7306_v19 = vadd.f32 %v4760_v42, %v10562_v7  ;;  %v10757_v42 = vld [vmem:[%s11437_s1 + $0xe0] ss:$16 sps:$4 sm:$0xff]  }
 0xb7e   :  { %v4773_v17 = vmax.f32 %v7305_v46, 0.0  ;;  %v4779_v16 = vmul.f32 %v4767_v57, %v11570_v25 }
 0xb7f   :  { %v4774_v36 = vmax.f32 %v7306_v19, 0.0  ;;  %v4780_v39 = vmul.f32 %v4768_v31, %v11571_v53 }
 0xb80   :  { %v4785_v3 = vmul.f32 %v4773_v17, %v11570_v25 }
 0xb81   :  { %v4786_v10 = vmul.f32 %v4774_v36, %v11571_v53 }
 0xb82   :  { %v10670_v5 = vpack.c.bf16 %v4785_v3, %v4779_v16 }
 0xb83   :  { %v10672_v52 = vpack.c.bf16 %v4786_v10, %v4780_v39 }
 0xb84   :  { %4927 = vst [vmem:[#allocation2 + $0x128] sm:$0xff] %v10670_v5  ;;  %4807 = vrot.lane.b32.xlu0 %v10670_v5, %s7984_s11  ;;  %4937 = vrot.lane.b32.xlu1 %v10670_v5, %s7987_s14 }
 0xb85   :  { %4928 = vst [vmem:[#allocation2 + $0x130] sm:$0xff] %v10672_v52 }
 0xb88   :  { %4838 = vrot.lane.b32.xlu0 %v10670_v5, %s7983_s0  ;;  %4968 = vrot.lane.b32.xlu1 %v10670_v5, %s7988_s15 }
 0xb8a   :  { %v4800_v44 = vpop.permute.xlu0 %4799 }
 0xb8b   :  { %4823 = vst.msk [vmem:[#allocation2 + $0x8] sm:$0xff] %vm790_vm1, %v4800_v44  ;;  %v10685_v45 = vpop.permute.xlu1 %4801  ;;  %vm11573_vm1 = vcmask 146432  }
 0xb8c   :  { %v4811_v61 = vsel %vm226_vm5, %v4800_v44, %v10685_v45  ;;  %4869 = vrot.lane.b32.xlu0 %v10670_v5, %s7985_s12  ;;  %4999 = vrot.lane.b32.xlu1 %v10670_v5, %s7989_s16  ;;  %vm11582_vm0 = vmmov %vm11573_vm1 }
 0xb8d   :  { %4824 = vst [vmem:[#allocation2 + $0x10] sm:$0xff] %v4811_v61  ;;  %5133 = vmatprep.subr.bf16.mxu1 %v4811_v61 }
 0xb8e   :  { %v4831_v48 = vpop.permute.xlu0 %4830 }
 0xb8f   :  { %4854 = vst.msk [vmem:[#allocation2 + $0x48] sm:$0xff] %vm11572_vm2, %v4831_v48  ;;  %v10694_v7 = vpop.permute.xlu1 %4832  ;;  %vm11584_vm2 = vmmov %vm11582_vm0 }
 0xb90   :  { %v4842_v47 = vsel %vm11573_vm1, %v4831_v48, %v10694_v7  ;;  %4900 = vrot.lane.b32.xlu0 %v10670_v5, %s7986_s13  ;;  %5030 = vrot.lane.b32.xlu1 %v10670_v5, %s7990_s17  ;;  %vm11585_vm1 = vmmov %vm11575_vm9 }
 0xb91   :  { %4855 = vst [vmem:[#allocation2 + $0x50] sm:$0xff] %v4842_v47 }
 0xb92   :  { %v4862_v4 = vpop.permute.xlu0 %4861  ;;  %v5055_v24 = vld [vmem:[#allocation2 + $0x8] sm:$0xff] }
 0xb93   :  { %4885 = vst.msk [vmem:[#allocation2 + $0x88] sm:$0xff] %vm11574_vm3, %v4862_v4  ;;  %v10703_v32 = vpop.permute.xlu1 %4863  ;;  %5134 = vmatpush1.bf16.msra.mxu1 %v5055_v24 }
 0xb94   :  { %v4873_v28 = vsel %vm11575_vm9, %v4862_v4, %v10703_v32  ;;  %4939 = vrot.lane.b32.xlu0 %v10672_v52, %s7987_s14  ;;  %4809 = vrot.lane.b32.xlu1 %v10672_v52, %s7984_s11  ;;  %vm11587_vm9 = vmmov %vm11578_vm4 }
 0xb95   :  { %4886 = vst [vmem:[#allocation2 + $0x90] sm:$0xff] %v4873_v28  ;;  %5135 = vmatprep.subr.bf16.mxu1 %v4842_v47 }
 0xb96   :  { %v4893_v0 = vpop.permute.xlu0 %4892  ;;  %v5061_v43 = vld [vmem:[#allocation2 + $0x48] sm:$0xff] }
 0xb97   :  { %4916 = vst.msk [vmem:[#allocation2 + $0xc8] sm:$0xff] %vm889_vm7, %v4893_v0  ;;  %v10712_v60 = vpop.permute.xlu1 %4894  ;;  %5136 = vmatpush1.bf16.msra.mxu1 %v5061_v43  ;;  %vm11576_vm7 = vcmask 908288  }
 0xb98   :  { %v4904_v6 = vsel %vm328_vm8, %v4893_v0, %v10712_v60  ;;  %5001 = vrot.lane.b32.xlu0 %v10672_v52, %s7989_s16  ;;  %4840 = vrot.lane.b32.xlu1 %v10672_v52, %s7983_s0  ;;  %vm11577_vm14 = vmmov %vm11576_vm7 }
 0xb99   :  { %4917 = vst [vmem:[#allocation2 + $0xd0] sm:$0xff] %v4904_v6  ;;  %5137 = vmatprep.subr.bf16.mxu1 %v4873_v28  ;;  %vm11586_vm3 = vmmov %vm11576_vm7 }
 0xb9a   :  { %v4930_v38 = vpop.permute.xlu0 %4929  ;;  %v5067_v1 = vld [vmem:[#allocation2 + $0x88] sm:$0xff] }
 0xb9b   :  { %5138 = vmatpush1.bf16.msra.mxu1 %v5067_v1  ;;  %v4963_v9 = vpop.permute.xlu1 %4962 }
 0xb9c   :  { %5113 = vperm.xlu0 %7367, %v5109_v34   ;;  %4871 = vrot.lane.b32.xlu1 %v10672_v52, %s7985_s12 }
 0xb9d   :  { %5139 = vmatprep.subr.bf16.mxu1 %v4904_v6 }
 0xb9e   :  { %v4932_v58 = vpop.permute.xlu0 %4931  ;;  %v5073_v20 = vld [vmem:[#allocation2 + $0xc8] sm:$0xff] }
 0xb9f   :  { %v4941_v63 = vsel %vm374_vm10, %v4930_v38, %v4932_v58  ;;  %5140 = vmatpush1.bf16.msra.mxu1 %v5073_v20 }
 0xba0   :  { %4954 = vst [vmem:[#allocation2 + $0x148] sm:$0xff] %v4941_v63  ;;  %5296 = vperm.xlu0 %7367, %v5293_v49   ;;  %4902 = vrot.lane.b32.xlu1 %v10672_v52, %s7986_s13 }
 0xba1   :  { %5141 = vmatprep.subr.bf16.mxu1 %v10573_v59 }
 0xba2   :  { %v4994_v13 = vpop.permute.xlu0 %4993 }
 0xba3   :  { %5142 = vmatpush1.bf16.msra.mxu1 %v10571_v40 }
 0xba4   :  { %4970 = vrot.lane.b32.xlu1 %v10672_v52, %s7988_s15 }
 0xba8   :  { %5032 = vrot.lane.b32.xlu1 %v10672_v52, %s7990_s17 }
 0xbac   :  { %5118 = vperm.xlu1 %7368, %v5110_v21  }
 0xbb6   :  { %v4934_v54 = vpop.permute.xlu1 %4933  ;;  %v10740_v62 = vpop.permute.xlu0 %4964 }
 0xbb7   :  { %v4942_v59 = vsel %vm374_vm10, %v4932_v58, %v4934_v54  ;;  %v4973_v40 = vsel %vm11576_vm7, %v4963_v9, %v10740_v62  ;;  %vm11588_vm7 = vmmov %vm11580_vm11 }
 0xbb8   :  { %4955 = vst [vmem:[#allocation2 + $0x150] sm:$0xff] %v4942_v59  ;;  %4986 = vst [vmem:[#allocation2 + $0x190] sm:$0xff] %v4973_v40  ;;  %5143 = vmatprep.subr.bf16.mxu1 %v4942_v59 }
 0xbb9   :  { %5144 = vmatpush1.bf16.msra.mxu1 %v4941_v63 }
 0xbba   :  { %v4961_v35 = vpop.permute.xlu1 %4960  ;;  %v4992_v2 = vpop.permute.xlu0 %4991  ;;  %5145 = vmatprep.subr.bf16.mxu1 %v4973_v40 }
 0xbbb   :  { %v4972_v27 = vsel %vm11577_vm14, %v4961_v35, %v4963_v9  ;;  %v5003_v26 = vsel %vm11578_vm4, %v4992_v2, %v4994_v13  ;;  %vm11589_vm14 = vmmov %vm11582_vm0 }
 0xbbc   :  { %4985 = vst [vmem:[#allocation2 + $0x188] sm:$0xff] %v4972_v27  ;;  %5016 = vst [vmem:[#allocation2 + $0x1c8] sm:$0xff] %v5003_v26 }
 0xbbd   :  { %5146 = vmatpush1.bf16.msra.mxu1 %v4972_v27  ;;  %vm11590_vm4 = vmmov %vm11586_vm3 }
 0xbbe   :  { %v4996_v41 = vpop.permute.xlu1 %4995  ;;  %v5027_v8 = vpop.permute.xlu0 %5026 }
 0xbbf   :  { %v5004_v18 = vsel %vm11579_vm6, %v4994_v13, %v4996_v41  ;;  %vm11591_vm6 = vmmov %vm11585_vm1 }
 0xbc0   :  { %5017 = vst [vmem:[#allocation2 + $0x1d0] sm:$0xff] %v5004_v18  ;;  %5147 = vmatprep.subr.bf16.mxu1 %v5004_v18 }
 0xbc1   :  { %5148 = vmatpush1.bf16.msra.mxu1 %v5003_v26 }
 0xbc2   :  { %v5025_v51 = vpop.permute.xlu1 %5024  ;;  %v4804_v15 = vpop.permute.xlu0 %4803 }
 0xbc3   :  { %v5035_v30 = vsel %vm11580_vm11, %v5025_v51, %v5027_v8  ;;  %v4812_v56 = vsel %vm226_vm5, %v10685_v45, %v4804_v15  ;;  %vm11592_vm11 = vmmov %vm11587_vm9 }
 0xbc4   :  { %5048 = vst [vmem:[#allocation2 + $0x210] sm:$0xff] %v5035_v30  ;;  %4825 = vst [vmem:[#allocation2 + $0x18] sm:$0xff] %v4812_v56  ;;  %5149 = vmatprep.subr.bf16.mxu1 %v5035_v30 }
 0xbc6   :  { %v5023_v55 = vpop.permute.xlu1 %5022  ;;  %v4835_v14 = vpop.permute.xlu0 %4834 }
 0xbc7   :  { %v5034_v57 = vsel %vm11581_vm12, %v5023_v55, %v5025_v51  ;;  %v4843_v46 = vsel %vm11582_vm0, %v10694_v7, %v4835_v14  ;;  %vm11593_vm12 = vmmov %vm11588_vm7 }
 0xbc8   :  { %5047 = vst [vmem:[#allocation2 + $0x208] sm:$0xff] %v5034_v57  ;;  %4856 = vst [vmem:[#allocation2 + $0x58] sm:$0xff] %v4843_v46  ;;  %5150 = vmatpush1.bf16.msra.mxu1 %v5034_v57 }
 0xbc9   :  { %vm11594_vm0 = vmmov %vm11587_vm9 }
 0xbca   :  { %v4806_v31 = vpop.permute.xlu1 %4805  ;;  %v4866_v19 = vpop.permute.xlu0 %4865 }
 0xbcb   :  { %v4813_v17 = vsel %vm226_vm5, %v4804_v15, %v4806_v31  ;;  %v4874_v36 = vsel %vm11583_vm13, %v10703_v32, %v4866_v19  ;;  %5166 = vmatmul.mubr.bf16.vlgmr.msra.gmra.mrb[48].mxu1 %v10757_v42  ;;  %vm11595_vm13 = vmmov %vm11594_vm0 }
 0xbcc   :  { %4826 = vst [vmem:[#allocation2 + $0x20] sm:$0xff] %v4813_v17  ;;  %4887 = vst [vmem:[#allocation2 + $0x98] sm:$0xff] %v4874_v36  ;;  %5176 = vmatprep.subr.bf16.mxu1 %v4813_v17  ;;  %7090 = vmatprep.mubr.msk.bf16.mxu1 %vm1113_vm15, %v10626_v37 }
 0xbcd   :  { %5177 = vmatpush1.bf16.msra.mxu1 %v4812_v56 }
 0xbce   :  { %v4837_v16 = vpop.permute.xlu1 %4836  ;;  %v4897_v3 = vpop.permute.xlu0 %4896 }
 0xbcf   :  { %v4844_v39 = vsel %vm11584_vm2, %v4835_v14, %v4837_v16  ;;  %v4905_v10 = vsel %vm328_vm8, %v10712_v60, %v4897_v3 }
 0xbd0   :  { %4857 = vst [vmem:[#allocation2 + $0x60] sm:$0xff] %v4844_v39  ;;  %4918 = vst [vmem:[#allocation2 + $0xd8] sm:$0xff] %v4905_v10  ;;  %5178 = vmatprep.subr.bf16.mxu1 %v4844_v39 }
 0xbd1   :  { %5179 = vmatpush1.bf16.msra.mxu1 %v4843_v46 }
 0xbd2   :  { %v4868_v44 = vpop.permute.xlu1 %4867  ;;  %v4936_v45 = vpop.permute.xlu0 %4935 }
 0xbd3   :  { %v4875_v61 = vsel %vm11585_vm1, %v4866_v19, %v4868_v44  ;;  %v4943_v48 = vsel %vm374_vm10, %v4934_v54, %v4936_v45 }
 0xbd4   :  { %4888 = vst [vmem:[#allocation2 + $0xa0] sm:$0xff] %v4875_v61  ;;  %4956 = vst [vmem:[#allocation2 + $0x158] sm:$0xff] %v4943_v48  ;;  %5180 = vmatprep.subr.bf16.mxu1 %v4875_v61 }
 0xbd5   :  { %5181 = vmatpush1.bf16.msra.mxu1 %v4874_v36 }
 0xbd6   :  { %v4899_v7 = vpop.permute.xlu1 %4898  ;;  %v4967_v47 = vpop.permute.xlu0 %4966 }
 0xbd7   :  { %v4906_v4 = vsel %vm328_vm8, %v4897_v3, %v4899_v7  ;;  %v4974_v24 = vsel %vm11586_vm3, %v10740_v62, %v4967_v47 }
 0xbd8   :  { %4919 = vst [vmem:[#allocation2 + $0xe0] sm:$0xff] %v4906_v4  ;;  %5182 = vmatprep.subr.bf16.mxu1 %v4906_v4 }
 0xbd9   :  { %5183 = vmatpush1.bf16.msra.mxu1 %v4905_v10 }
 0xbda   :  { %v4998_v32 = vpop.permute.xlu0 %4997  ;;  %5184 = vmatprep.subr.bf16.mxu1 %v10611_v33 }
 0xbdb   :  { %v5005_v28 = vsel %vm11587_vm9, %v4996_v41, %v4998_v32 }
 0xbdd   :  { %5185 = vmatpush1.bf16.msra.mxu1 %v10609_v22 }
 0xbde   :  { %v5029_v0 = vpop.permute.xlu0 %5028 }
 0xbdf   :  { %v5036_v43 = vsel %vm11588_vm7, %v5027_v8, %v5029_v0 }
 0xbe0   :  { %5049 = vst [vmem:[#allocation2 + $0x218] sm:$0xff] %v5036_v43 }
 0xbf6   :  { %v4808_v60 = vpop.permute.xlu0 %4807  ;;  %v4938_v6 = vpop.permute.xlu1 %4937 }
 0xbf7   :  { %v4814_v34 = vsel %vm226_vm5, %v4806_v31, %v4808_v60  ;;  %v4944_v38 = vsel %vm374_vm10, %v4936_v45, %v4938_v6 }
 0xbf8   :  { %4827 = vst [vmem:[#allocation2 + $0x28] sm:$0xff] %v4814_v34  ;;  %4957 = vst [vmem:[#allocation2 + $0x160] sm:$0xff] %v4944_v38  ;;  %5186 = vmatprep.subr.bf16.mxu1 %v4944_v38 }
 0xbf9   :  { %5187 = vmatpush1.bf16.msra.mxu1 %v4943_v48 }
 0xbfa   :  { %v4839_v1 = vpop.permute.xlu0 %4838  ;;  %v4969_v33 = vpop.permute.xlu1 %4968 }
 0xbfb   :  { %v4845_v49 = vsel %vm11589_vm14, %v4837_v16, %v4839_v1  ;;  %v4975_v22 = vsel %vm11590_vm4, %v4967_v47, %v4969_v33 }
 0xbfc   :  { %4858 = vst [vmem:[#allocation2 + $0x68] sm:$0xff] %v4845_v49  ;;  %5188 = vmatprep.subr.bf16.mxu1 %v4975_v22 }
 0xbfd   :  { %5189 = vmatpush1.bf16.msra.mxu1 %v4974_v24 }
 0xbfe   :  { %v4870_v58 = vpop.permute.xlu0 %4869  ;;  %v5000_v20 = vpop.permute.xlu1 %4999 }
 0xbff   :  { %v4876_v63 = vsel %vm11591_vm6, %v4868_v44, %v4870_v58  ;;  %v5006_v21 = vsel %vm11592_vm11, %v4998_v32, %v5000_v20 }
 0xc00   :  { %4889 = vst [vmem:[#allocation2 + $0xa8] sm:$0xff] %v4876_v63  ;;  %5190 = vmatprep.subr.bf16.mxu1 %v5006_v21 }
 0xc01   :  { %5191 = vmatpush1.bf16.msra.mxu1 %v5005_v28 }
 0xc02   :  { %v4901_v9 = vpop.permute.xlu0 %4900  ;;  %v5031_v13 = vpop.permute.xlu1 %5030 }
 0xc03   :  { %v4907_v54 = vsel %vm328_vm8, %v4899_v7, %v4901_v9  ;;  %v5037_v62 = vsel %vm11593_vm12, %v5029_v0, %v5031_v13 }
 0xc04   :  { %4920 = vst [vmem:[#allocation2 + $0xe8] sm:$0xff] %v4907_v54  ;;  %5050 = vst [vmem:[#allocation2 + $0x220] sm:$0xff] %v5037_v62  ;;  %5192 = vmatprep.subr.bf16.mxu1 %v5037_v62  ;;  %v7691_v62 = vld [vmem:[%s11443_s7 + $0x4] ss:$16 sps:$4 sm:$0xff]  }
 0xc05   :  { %5193 = vmatpush1.bf16.msra.mxu1 %v5036_v43  ;;  %v10820_v43 = vld [vmem:[%s11437_s1 + $0x100] sm:$0x1] }
 0xc06   :  { %v4940_v59 = vpop.permute.xlu0 %4939  ;;  %v4810_v40 = vpop.permute.xlu1 %4809 }
 0xc07   :  { %v4945_v35 = vsel %vm374_vm10, %v4938_v6, %v4940_v59  ;;  %4959 = vst.msk [vmem:[#allocation2 + $0x170] sm:$0xff] %vm374_vm10, %v4940_v59  ;;  %v4815_v2 = vsel %vm226_vm5, %v4808_v60, %v4810_v40  ;;  %vm11597_vm10 = vmmov %vm11586_vm3  ;;  %v7689_v59 = vld [vmem:[%s11443_s7] ss:$16 sps:$4 sm:$0xff]  }
 0xc08   :  { %4829 = vst.msk [vmem:[#allocation2 + $0x38] sm:$0xff] %vm226_vm5, %v4810_v40  ;;  %4828 = vst [vmem:[#allocation2 + $0x30] sm:$0xff] %v4815_v2  ;;  %5209 = vmatmul.mubr.bf16.vlgmr.msra.gmra.mrb[52].mxu1 %v10757_v42  ;;  %5219 = vmatprep.subr.bf16.mxu1 %v4815_v2  ;;  %v7703_v40 = vld [vmem:[%s11443_s7 + $0x44] ss:$16 sps:$4 sm:$0xff]  }
 0xc09   :  { %5220 = vmatpush1.bf16.msra.mxu1 %v4814_v34  ;;  %7091 = vmatprep.mubr.msk.bf16.mxu1 %vm1113_vm15, %v10626_v37  ;;  %vm11596_vm5 = vmmov %vm11585_vm1  ;;  %v7709_v2 = vld [vmem:[%s11443_s7 + $0x64] ss:$16 sps:$4 sm:$0xff]  }
 0xc0a   :  { %v5002_v27 = vpop.permute.xlu0 %5001  ;;  %v4841_v26 = vpop.permute.xlu1 %4840  ;;  %vm11598_vm1 = vmmov %vm11586_vm3 }
 0xc0b   :  { %v5007_v41 = vsel %vm11594_vm0, %v5000_v20, %v5002_v27  ;;  %5021 = vst.msk [vmem:[#allocation2 + $0x1f0] sm:$0xff] %vm11595_vm13, %v5002_v27  ;;  %v4846_v8 = vsel %vm11584_vm2, %v4839_v1, %v4841_v26  ;;  %vm11599_vm3 = vmmov %vm11588_vm7  ;;  %v7707_v27 = vld [vmem:[%s11443_s7 + $0x60] ss:$16 sps:$4 sm:$0xff]   ;;  %v7715_v26 = vld [vmem:[%s11443_s7 + $0x84] ss:$16 sps:$4 sm:$0xff]  }
 0xc0c   :  { %4859 = vst [vmem:[#allocation2 + $0x70] sm:$0xff] %v4846_v8  ;;  %5221 = vmatprep.subr.bf16.mxu1 %v4846_v8  ;;  %vm11600_vm9 = vmmov %vm11599_vm3  ;;  %v7721_v8 = vld [vmem:[%s11443_s7 + $0xa4] ss:$16 sps:$4 sm:$0xff]  }
 0xc0d   :  { %5222 = vmatpush1.bf16.msra.mxu1 %v4845_v49 }
 0xc0e   :  { %v4872_v18 = vpop.permute.xlu1 %4871  ;;  %v5090_v55 = vld [vmem:[#allocation2 + $0x170] sm:$0xff] }
 0xc0f   :  { %v4877_v51 = vsel %vm11596_vm5, %v4870_v58, %v4872_v18  ;;  %v7719_v18 = vld [vmem:[%s11443_s7 + $0xa0] ss:$16 sps:$4 sm:$0xff]  }
 0xc10   :  { %4890 = vst [vmem:[#allocation2 + $0xb0] sm:$0xff] %v4877_v51  ;;  %5223 = vmatprep.subr.bf16.mxu1 %v4877_v51  ;;  %v7727_v51 = vld [vmem:[%s11443_s7 + $0xc4] ss:$16 sps:$4 sm:$0xff]  }
 0xc11   :  { %5224 = vmatpush1.bf16.msra.mxu1 %v4876_v63 }
 0xc12   :  { %v4903_v15 = vpop.permute.xlu1 %4902  ;;  %v5102_v31 = vld [vmem:[#allocation2 + $0x1f0] sm:$0xff] }
 0xc13   :  { %v4908_v37 = vsel %vm328_vm8, %v4901_v9, %v4903_v15 }
 0xc14   :  { %4921 = vst [vmem:[#allocation2 + $0xf0] sm:$0xff] %v4908_v37  ;;  %5225 = vmatprep.subr.bf16.mxu1 %v4908_v37 }
 0xc15   :  { %5226 = vmatpush1.bf16.msra.mxu1 %v4907_v54 }
 0xc16   :  { %v4971_v30 = vpop.permute.xlu1 %4970  ;;  %5227 = vmatprep.subr.bf16.mxu1 %v10672_v52 }
 0xc17   :  { %v4976_v56 = vsel %vm11597_vm10, %v4969_v33, %v4971_v30  ;;  %4990 = vst.msk [vmem:[#allocation2 + $0x1b0] sm:$0xff] %vm11598_vm1, %v4971_v30 }
 0xc19   :  { %5228 = vmatpush1.bf16.msra.mxu1 %v10670_v5 }
 0xc1a   :  { %v5033_v14 = vpop.permute.xlu1 %5032  ;;  %5229 = vmatprep.subr.bf16.mxu1 %v5090_v55 }
 0xc1b   :  { %v5038_v57 = vsel %vm11599_vm3, %v5031_v13, %v5033_v14  ;;  %5052 = vst.msk [vmem:[#allocation2 + $0x230] sm:$0xff] %vm11600_vm9, %v5033_v14  ;;  %v10805_v5 = vpop.permute.xlu0 %5113 }
 0xc1d   :  { %5230 = vmatpush1.bf16.msra.mxu1 %v4945_v35  ;;  %v7701_v35 = vld [vmem:[%s11443_s7 + $0x40] ss:$16 sps:$4 sm:$0xff]  }
 0xc1e   :  { %v5096_v46 = vld [vmem:[#allocation2 + $0x1b0] sm:$0xff] }
 0xc1f   :  { %5231 = vmatprep.subr.bf16.mxu1 %v5096_v46 }
 0xc21   :  { %5232 = vmatpush1.bf16.msra.mxu1 %v4976_v56  ;;  %v7725_v56 = vld [vmem:[%s11443_s7 + $0xc0] ss:$16 sps:$4 sm:$0xff]  }
 0xc22   :  { %5233 = vmatprep.subr.bf16.mxu1 %v5102_v31  ;;  %v5108_v52 = vld [vmem:[#allocation2 + $0x230] sm:$0xff] }
 0xc25   :  { %5234 = vmatpush1.bf16.msra.mxu1 %v5007_v41  ;;  %v7713_v41 = vld [vmem:[%s11443_s7 + $0x80] ss:$16 sps:$4 sm:$0xff]  }
 0xc26   :  { %5235 = vmatprep.subr.bf16.mxu1 %v5108_v52 }
 0xc29   :  { %5236 = vmatpush1.bf16.msra.mxu1 %v5038_v57  ;;  %v7733_v57 = vld [vmem:[%s11443_s7 + $0xe4] ss:$16 sps:$4 sm:$0xff]  }
 0xc2b   :  { %v10808_v16 = vpop.permute.xlu1 %5118 }
 0xc2c   :  { %5252 = vmatmul.mubr.bf16.vlgmr.msra.gmra.mrb[56].mxu1 %v10757_v42 }
 0xc2d   :  { %5375 = vmatprep.mubr.bf16.mxu1 %v11565_v29 }
 0xc9e   :  { %v5167_v19 = vpop.f32.mrb[48].mxu1 }
 0xc9f   :  { %v5168_v17 = vadd.f32 %v5167_v19, %v10805_v5  ;;  %v5169_v36 = vpop.f32.mrb[49].mxu1 }
 0xca0   :  { %v5170_v3 = vadd.f32 %v5169_v36, %v10805_v5  ;;  %v5171_v39 = vpop.f32.mrb[50].mxu1 }
 0xca1   :  { %v5262_v10 = vmax.f32 %v5168_v17, 0.0  ;;  %v5172_v44 = vadd.f32 %v5171_v39, %v10808_v16  ;;  %v5173_v45 = vpop.f32.mrb[51].mxu1  ;;  %v7739_v39 = vld [vmem:[%s11443_s7 + $0x104] ss:$16 sps:$4 sm:$0xff]  }
 0xca2   :  { %v5263_v61 = vmax.f32 %v5170_v3, 0.0  ;;  %v5174_v42 = vadd.f32 %v5173_v45, %v10808_v16  ;;  %v7731_v3 = vld [vmem:[%s11443_s7 + $0xe0] ss:$16 sps:$4 sm:$0xff]  }
 0xca3   :  { %v5268_v48 = vmax.f32 %v5172_v44, 0.0  ;;  %v5274_v47 = vmul.f32 %v5262_v10, %v11566_v11 }
 0xca4   :  { %v5269_v7 = vmax.f32 %v5174_v42, 0.0  ;;  %v5275_v24 = vmul.f32 %v5263_v61, %v11567_v23  ;;  %v7737_v42 = vld [vmem:[%s11443_s7 + $0x100] ss:$16 sps:$4 sm:$0xff]  }
 0xca5   :  { %v5280_v4 = vmul.f32 %v5268_v48, %v11566_v11 }
 0xca6   :  { %v5281_v32 = vmul.f32 %v5269_v7, %v11567_v23  ;;  %v7694_v7 = vld [vmem:[%s11443_s7 + $0xc] ss:$16 sps:$4 sm:$0xff]  }
 0xca7   :  { %v5286_v28 = vpack.c.bf16 %v5280_v4, %v5274_v47  ;;  %v7743_v47 = vld [vmem:[%s11443_s7 + $0x120] ss:$16 sps:$4 sm:$0xff]   ;;  %v7700_v4 = vld [vmem:[%s11443_s7 + $0x2c] ss:$16 sps:$4 sm:$0xff]  }
 0xca8   :  { %v5287_v0 = vpack.c.bf16 %v5281_v32, %v5275_v24  ;;  %v7751_v24 = vld [vmem:[%s11443_s7 + $0x144] ss:$16 sps:$4 sm:$0xff]   ;;  %v7698_v32 = vld [vmem:[%s11443_s7 + $0x28] ss:$16 sps:$4 sm:$0xff]  }
 0xcaa   :  { %5302 = vmatprep.subr.bf16.mxu0 %v5287_v0  ;;  %v7706_v0 = vld [vmem:[%s11443_s7 + $0x4c] ss:$16 sps:$4 sm:$0xff]  }
 0xcab   :  { %5303 = vmatpush1.bf16.msra.mxu0 %v5286_v28  ;;  %v7749_v28 = vld [vmem:[%s11443_s7 + $0x140] ss:$16 sps:$4 sm:$0xff]  }
 0xcae   :  { %7092 = vmatmul.mubr.msk.bf16.vlgmr.msra.gmra.mrb[32].mxu0 %vm1113_vm15, %v10820_v43 }
 0xcaf   :  { %5416 = vmatprep.mubr.bf16.mxu0 %v11565_v29 }
 0xcdb   :  { %v5210_v60 = vpop.f32.mrb[52].mxu1 }
 0xcdc   :  { %v5211_v11 = vadd.f32 %v5210_v60, %v10805_v5  ;;  %v5212_v6 = vpop.f32.mrb[53].mxu1  ;;  %v7704_v60 = vld [vmem:[%s11443_s7 + $0x48] ss:$16 sps:$4 sm:$0xff]  }
 0xcdd   :  { %v5213_v23 = vadd.f32 %v5212_v6, %v10805_v5  ;;  %v5214_v34 = vpop.f32.mrb[54].mxu1  ;;  %v7712_v6 = vld [vmem:[%s11443_s7 + $0x6c] ss:$16 sps:$4 sm:$0xff]  }
 0xcde   :  { %v5264_v38 = vmax.f32 %v5211_v11, 0.0  ;;  %v5215_v1 = vadd.f32 %v5214_v34, %v10808_v16  ;;  %v5216_v33 = vpop.f32.mrb[55].mxu1  ;;  %v7755_v11 = vld [vmem:[%s11443_s7 + $0x160] ss:$16 sps:$4 sm:$0xff]   ;;  %v7710_v34 = vld [vmem:[%s11443_s7 + $0x68] ss:$16 sps:$4 sm:$0xff]  }
 0xcdf   :  { %v5265_v49 = vmax.f32 %v5213_v23, 0.0  ;;  %v5217_v22 = vadd.f32 %v5216_v33, %v10808_v16  ;;  %v7763_v23 = vld [vmem:[%s11443_s7 + $0x184] ss:$16 sps:$4 sm:$0xff]  }
 0xce0   :  { %v5270_v58 = vmax.f32 %v5215_v1, 0.0  ;;  %v5276_v63 = vmul.f32 %v5264_v38, %v11568_v50  ;;  %v7761_v38 = vld [vmem:[%s11443_s7 + $0x180] ss:$16 sps:$4 sm:$0xff]   ;;  %v7718_v1 = vld [vmem:[%s11443_s7 + $0x8c] ss:$16 sps:$4 sm:$0xff]  }
 0xce1   :  { %v5271_v20 = vmax.f32 %v5217_v22, 0.0  ;;  %v5277_v21 = vmul.f32 %v5265_v49, %v11569_v12  ;;  %v7769_v33 = vld [vmem:[%s11443_s7 + $0x1a4] ss:$16 sps:$4 sm:$0xff]   ;;  %v7716_v49 = vld [vmem:[%s11443_s7 + $0x88] ss:$16 sps:$4 sm:$0xff]  }
 0xce2   :  { %v5282_v29 = vmul.f32 %v5270_v58, %v11568_v50  ;;  %v7697_v50 = vld [vmem:[%s11443_s7 + $0x24] ss:$16 sps:$4 sm:$0xff]   ;;  %v7767_v22 = vld [vmem:[%s11443_s7 + $0x1a0] ss:$16 sps:$4 sm:$0xff]   ;;  %v7724_v58 = vld [vmem:[%s11443_s7 + $0xac] ss:$16 sps:$4 sm:$0xff]  }
 0xce3   :  { %v5283_v9 = vmul.f32 %v5271_v20, %v11569_v12  ;;  %v7695_v12 = vld [vmem:[%s11443_s7 + $0x20] ss:$16 sps:$4 sm:$0xff]   ;;  %v7775_v20 = vld [vmem:[%s11443_s7 + $0x1c4] ss:$16 sps:$4 sm:$0xff]  }
 0xce4   :  { %v5288_v13 = vpack.c.bf16 %v5282_v29, %v5276_v63  ;;  %v7722_v63 = vld [vmem:[%s11443_s7 + $0xa8] ss:$16 sps:$4 sm:$0xff]   ;;  %v7773_v29 = vld [vmem:[%s11443_s7 + $0x1c0] ss:$16 sps:$4 sm:$0xff]  }
 0xce5   :  { %v5289_v54 = vpack.c.bf16 %v5283_v9, %v5277_v21  ;;  %v7730_v21 = vld [vmem:[%s11443_s7 + $0xcc] ss:$16 sps:$4 sm:$0xff]   ;;  %v7781_v9 = vld [vmem:[%s11443_s7 + $0x1e4] ss:$16 sps:$4 sm:$0xff]  }
 0xce7   :  { %5343 = vmatprep.subr.bf16.mxu1 %v5289_v54  ;;  %v7779_v54 = vld [vmem:[%s11443_s7 + $0x1e0] ss:$16 sps:$4 sm:$0xff]  }
 0xce8   :  { %5344 = vmatpush1.bf16.msra.mxu1 %v5288_v13  ;;  %v7728_v13 = vld [vmem:[%s11443_s7 + $0xc8] ss:$16 sps:$4 sm:$0xff]  }
 0xce9   :  { %6583 = vmatprep.subr.bf16.mxu1 %v7691_v62  ;;  %v7736_v62 = vld [vmem:[%s11443_s7 + $0xec] ss:$16 sps:$4 sm:$0xff]  }
 0xceb   :  { %7093 = vmatmul.mubr.msk.bf16.vlgmr.msra.gmra.mrb[60].mxu1 %vm1113_vm15, %v10820_v43 }
 0xcec   :  { %6584 = vmatpush1.bf16.msra.mxu1 %v7689_v59  ;;  %v7787_v59 = vld [vmem:[%s11443_s7 + $0x204] ss:$16 sps:$4 sm:$0xff]  }
 0xced   :  { %6585 = vmatprep.subr.bf16.mxu1 %v7697_v50  ;;  %v7734_v50 = vld [vmem:[%s11443_s7 + $0xe8] ss:$16 sps:$4 sm:$0xff]  }
 0xcf0   :  { %6586 = vmatpush1.bf16.msra.mxu1 %v7695_v12  ;;  %v7742_v12 = vld [vmem:[%s11443_s7 + $0x10c] ss:$16 sps:$4 sm:$0xff]  }
 0xcf1   :  { %6587 = vmatprep.subr.bf16.mxu1 %v7703_v40  ;;  %v7740_v40 = vld [vmem:[%s11443_s7 + $0x108] ss:$16 sps:$4 sm:$0xff]  }
 0xcf4   :  { %6588 = vmatpush1.bf16.msra.mxu1 %v7701_v35  ;;  %v7748_v35 = vld [vmem:[%s11443_s7 + $0x12c] ss:$16 sps:$4 sm:$0xff]  }
 0xcf5   :  { %6589 = vmatprep.subr.bf16.mxu1 %v7709_v2  ;;  %v7746_v2 = vld [vmem:[%s11443_s7 + $0x128] ss:$16 sps:$4 sm:$0xff]  }
 0xcf8   :  { %6590 = vmatpush1.bf16.msra.mxu1 %v7707_v27  ;;  %v7754_v27 = vld [vmem:[%s11443_s7 + $0x14c] ss:$16 sps:$4 sm:$0xff]  }
 0xcf9   :  { %6591 = vmatprep.subr.bf16.mxu1 %v7715_v26  ;;  %v7752_v26 = vld [vmem:[%s11443_s7 + $0x148] ss:$16 sps:$4 sm:$0xff]  }
 0xcfc   :  { %6592 = vmatpush1.bf16.msra.mxu1 %v7713_v41  ;;  %v7760_v41 = vld [vmem:[%s11443_s7 + $0x16c] ss:$16 sps:$4 sm:$0xff]  }
 0xcfd   :  { %6593 = vmatprep.subr.bf16.mxu1 %v7721_v8  ;;  %v7758_v8 = vld [vmem:[%s11443_s7 + $0x168] ss:$16 sps:$4 sm:$0xff]  }
 0xcff   :  { %v5253_v15 = vpop.f32.mrb[56].mxu1 }
 0xd00   :  { %v5254_v37 = vadd.f32 %v5253_v15, %v10805_v5  ;;  %v5255_v30 = vpop.f32.mrb[57].mxu1  ;;  %6594 = vmatpush1.bf16.msra.mxu1 %v7719_v18  ;;  %v7766_v18 = vld [vmem:[%s11443_s7 + $0x18c] ss:$16 sps:$4 sm:$0xff]  }
 0xd01   :  { %v5256_v55 = vadd.f32 %v5255_v30, %v10805_v5  ;;  %v5257_v14 = vpop.f32.mrb[58].mxu1  ;;  %6595 = vmatprep.subr.bf16.mxu1 %v7727_v51  ;;  %v7764_v51 = vld [vmem:[%s11443_s7 + $0x188] ss:$16 sps:$4 sm:$0xff]   ;;  %v7772_v15 = vld [vmem:[%s11443_s7 + $0x1ac] ss:$16 sps:$4 sm:$0xff]  }
 0xd02   :  { %v5266_v46 = vmax.f32 %v5254_v37, 0.0  ;;  %v5258_v31 = vadd.f32 %v5257_v14, %v10808_v16  ;;  %v5259_v52 = vpop.f32.mrb[59].mxu1  ;;  %v7770_v37 = vld [vmem:[%s11443_s7 + $0x1a8] ss:$16 sps:$4 sm:$0xff]   ;;  %v7778_v30 = vld [vmem:[%s11443_s7 + $0x1cc] ss:$16 sps:$4 sm:$0xff]  }
 0xd03   :  { %v5267_v19 = vmax.f32 %v5256_v55, 0.0  ;;  %v5260_v17 = vadd.f32 %v5259_v52, %v10808_v16  ;;  %v7784_v55 = vld [vmem:[%s11443_s7 + $0x1ec] ss:$16 sps:$4 sm:$0xff]   ;;  %v7782_v14 = vld [vmem:[%s11443_s7 + $0x1e8] ss:$16 sps:$4 sm:$0xff]  }
 0xd04   :  { %v5272_v36 = vmax.f32 %v5258_v31, 0.0  ;;  %6596 = vmatpush1.bf16.msra.mxu1 %v7725_v56  ;;  %v5278_v10 = vmul.f32 %v5266_v46, %v11570_v25  ;;  %v7776_v56 = vld [vmem:[%s11443_s7 + $0x1c8] ss:$16 sps:$4 sm:$0xff]   ;;  %v11043_v46 = vpop.permute.xlu0 %5296 }
 0xd05   :  { %v5273_v5 = vmax.f32 %v5260_v17, 0.0  ;;  %6597 = vmatprep.subr.bf16.mxu1 %v7733_v57  ;;  %v5279_v45 = vmul.f32 %v5267_v19, %v11571_v53  ;;  %v7790_v57 = vld [vmem:[%s11443_s7 + $0x20c] ss:$16 sps:$4 sm:$0xff]  }
 0xd06   :  { %v5284_v44 = vmul.f32 %v5272_v36, %v11570_v25  ;;  %v7745_v25 = vld [vmem:[%s11443_s7 + $0x124] ss:$16 sps:$4 sm:$0xff]  }
 0xd07   :  { %v5285_v16 = vmul.f32 %v5273_v5, %v11571_v53  ;;  %v7692_v53 = vld [vmem:[%s11443_s7 + $0x8] ss:$16 sps:$4 sm:$0xff]  }
 0xd08   :  { %v5290_v61 = vpack.c.bf16 %v5284_v44, %v5278_v10  ;;  %6598 = vmatpush1.bf16.msra.mxu1 %v7731_v3  ;;  %v7788_v10 = vld [vmem:[%s11443_s7 + $0x208] ss:$16 sps:$4 sm:$0xff]  }
 0xd09   :  { %v5291_v48 = vpack.c.bf16 %v5285_v16, %v5279_v45  ;;  %6599 = vmatprep.subr.bf16.mxu1 %v7739_v39  ;;  %v7785_v39 = vld [vmem:[%s11443_s7 + $0x200] ss:$16 sps:$4 sm:$0xff]   ;;  %v7793_v45 = vld [vmem:[%s11443_s7 + $0x224] ss:$16 sps:$4 sm:$0xff]   ;;  %v7796_v16 = vld [vmem:[%s11443_s7 + $0x22c] ss:$16 sps:$4 sm:$0xff]  }
 0xd0b   :  { %5384 = vmatprep.subr.bf16.mxu0 %v5291_v48  ;;  %v7799_v48 = vld [vmem:[%s11443_s7 + $0x244] ss:$16 sps:$4 sm:$0xff]  }
 0xd0c   :  { %5385 = vmatpush1.bf16.msra.mxu0 %v5290_v61  ;;  %6600 = vmatpush1.bf16.msra.mxu1 %v7737_v42  ;;  %v7791_v61 = vld [vmem:[%s11443_s7 + $0x220] ss:$16 sps:$4 sm:$0xff]   ;;  %v7794_v42 = vld [vmem:[%s11443_s7 + $0x228] ss:$16 sps:$4 sm:$0xff]  }
 0xd0d   :  { %6706 = vmatprep.subr.bf16.mxu0 %v7694_v7  ;;  %6601 = vmatprep.subr.bf16.mxu1 %v7745_v25  ;;  %v7802_v7 = vld [vmem:[%s11443_s7 + $0x24c] ss:$16 sps:$4 sm:$0xff]   ;;  %v7797_v25 = vld [vmem:[%s11443_s7 + $0x240] ss:$16 sps:$4 sm:$0xff]  }
 0xd0f   :  { %7094 = vmatmul.mubr.msk.bf16.vlgmr.msra.gmra.mrb[36].mxu0 %vm1113_vm15, %v10820_v43  ;;  %v7757_v43 = vld [vmem:[%s11443_s7 + $0x164] ss:$16 sps:$4 sm:$0xff]  }
 0xd10   :  { %6707 = vmatpush1.bf16.msra.mxu0 %v7692_v53  ;;  %6602 = vmatpush1.bf16.msra.mxu1 %v7743_v47  ;;  %v7800_v53 = vld [vmem:[%s11443_s7 + $0x248] ss:$16 sps:$4 sm:$0xff]   ;;  %v7805_v47 = vld [vmem:[%s11443_s7 + $0x264] ss:$16 sps:$4 sm:$0xff]  }
 0xd11   :  { %6708 = vmatprep.subr.bf16.mxu0 %v7700_v4  ;;  %6603 = vmatprep.subr.bf16.mxu1 %v7751_v24  ;;  %v7808_v4 = vld [vmem:[%s11443_s7 + $0x26c] ss:$16 sps:$4 sm:$0xff]   ;;  %v7803_v24 = vld [vmem:[%s11443_s7 + $0x260] ss:$16 sps:$4 sm:$0xff]  }
 0xd14   :  { %6709 = vmatpush1.bf16.msra.mxu0 %v7698_v32  ;;  %6604 = vmatpush1.bf16.msra.mxu1 %v7749_v28  ;;  %v7806_v32 = vld [vmem:[%s11443_s7 + $0x268] ss:$16 sps:$4 sm:$0xff]   ;;  %v7811_v28 = vld [vmem:[%s11443_s7 + $0x284] ss:$16 sps:$4 sm:$0xff]  }
 0xd15   :  { %6710 = vmatprep.subr.bf16.mxu0 %v7706_v0  ;;  %6605 = vmatprep.subr.bf16.mxu1 %v7757_v43  ;;  %v7814_v0 = vld [vmem:[%s11443_s7 + $0x28c] ss:$16 sps:$4 sm:$0xff]   ;;  %v7809_v43 = vld [vmem:[%s11443_s7 + $0x280] ss:$16 sps:$4 sm:$0xff]  }
 0xd18   :  { %6711 = vmatpush1.bf16.msra.mxu0 %v7704_v60  ;;  %6606 = vmatpush1.bf16.msra.mxu1 %v7755_v11  ;;  %v7812_v60 = vld [vmem:[%s11443_s7 + $0x288] ss:$16 sps:$4 sm:$0xff]   ;;  %v7817_v11 = vld [vmem:[%s11443_s7 + $0x2a4] ss:$16 sps:$4 sm:$0xff]  }
 0xd19   :  { %6712 = vmatprep.subr.bf16.mxu0 %v7712_v6  ;;  %6607 = vmatprep.subr.bf16.mxu1 %v7763_v23  ;;  %v7820_v6 = vld [vmem:[%s11443_s7 + $0x2ac] ss:$16 sps:$4 sm:$0xff]   ;;  %v7815_v23 = vld [vmem:[%s11443_s7 + $0x2a0] ss:$16 sps:$4 sm:$0xff]  }
 0xd1c   :  { %6713 = vmatpush1.bf16.msra.mxu0 %v7710_v34  ;;  %6608 = vmatpush1.bf16.msra.mxu1 %v7761_v38  ;;  %v7818_v34 = vld [vmem:[%s11443_s7 + $0x2a8] ss:$16 sps:$4 sm:$0xff]   ;;  %v7823_v38 = vld [vmem:[%s11443_s7 + $0x2c4] ss:$16 sps:$4 sm:$0xff]  }
 0xd1d   :  { %6714 = vmatprep.subr.bf16.mxu0 %v7718_v1  ;;  %6609 = vmatprep.subr.bf16.mxu1 %v7769_v33  ;;  %v7826_v1 = vld [vmem:[%s11443_s7 + $0x2cc] ss:$16 sps:$4 sm:$0xff]   ;;  %v7821_v33 = vld [vmem:[%s11443_s7 + $0x2c0] ss:$16 sps:$4 sm:$0xff]  }
 0xd20   :  { %6715 = vmatpush1.bf16.msra.mxu0 %v7716_v49  ;;  %6610 = vmatpush1.bf16.msra.mxu1 %v7767_v22  ;;  %v7824_v49 = vld [vmem:[%s11443_s7 + $0x2c8] ss:$16 sps:$4 sm:$0xff]   ;;  %v7829_v22 = vld [vmem:[%s11443_s7 + $0x2e4] ss:$16 sps:$4 sm:$0xff]  }
 0xd21   :  { %6716 = vmatprep.subr.bf16.mxu0 %v7724_v58  ;;  %6611 = vmatprep.subr.bf16.mxu1 %v7775_v20  ;;  %v7832_v58 = vld [vmem:[%s11443_s7 + $0x2ec] ss:$16 sps:$4 sm:$0xff]   ;;  %v7827_v20 = vld [vmem:[%s11443_s7 + $0x2e0] ss:$16 sps:$4 sm:$0xff]  }
 0xd24   :  { %6717 = vmatpush1.bf16.msra.mxu0 %v7722_v63  ;;  %6612 = vmatpush1.bf16.msra.mxu1 %v7773_v29  ;;  %v7830_v63 = vld [vmem:[%s11443_s7 + $0x2e8] ss:$16 sps:$4 sm:$0xff]   ;;  %v7835_v29 = vld [vmem:[%s11443_s7 + $0x304] ss:$16 sps:$4 sm:$0xff]  }
 0xd25   :  { %6718 = vmatprep.subr.bf16.mxu0 %v7730_v21  ;;  %6613 = vmatprep.subr.bf16.mxu1 %v7781_v9  ;;  %v7838_v21 = vld [vmem:[%s11443_s7 + $0x30c] ss:$16 sps:$4 sm:$0xff]   ;;  %v7833_v9 = vld [vmem:[%s11443_s7 + $0x300] ss:$16 sps:$4 sm:$0xff]  }
 0xd28   :  { %6719 = vmatpush1.bf16.msra.mxu0 %v7728_v13  ;;  %6614 = vmatpush1.bf16.msra.mxu1 %v7779_v54  ;;  %v7836_v13 = vld [vmem:[%s11443_s7 + $0x308] ss:$16 sps:$4 sm:$0xff]   ;;  %v7841_v54 = vld [vmem:[%s11443_s7 + $0x324] ss:$16 sps:$4 sm:$0xff]  }
 0xd29   :  { %6720 = vmatprep.subr.bf16.mxu0 %v7736_v62  ;;  %6624 = vmatprep.subr.bf16.mxu1 %v7787_v59  ;;  %v7844_v62 = vld [vmem:[%s11443_s7 + $0x32c] ss:$16 sps:$4 sm:$0xff]   ;;  %v7839_v59 = vld [vmem:[%s11443_s7 + $0x320] ss:$16 sps:$4 sm:$0xff]  }
 0xd2c   :  { %6721 = vmatpush1.bf16.msra.mxu0 %v7734_v50  ;;  %v7842_v50 = vld [vmem:[%s11443_s7 + $0x328] ss:$16 sps:$4 sm:$0xff]  }
 0xd2d   :  { %6722 = vmatprep.subr.bf16.mxu0 %v7742_v12  ;;  %v7847_v12 = vld [vmem:[%s11443_s7 + $0x344] ss:$16 sps:$4 sm:$0xff]  }
 0xd30   :  { %6723 = vmatpush1.bf16.msra.mxu0 %v7740_v40  ;;  %v7850_v40 = vld [vmem:[%s11443_s7 + $0x34c] ss:$16 sps:$4 sm:$0xff]  }
 0xd31   :  { %6724 = vmatprep.subr.bf16.mxu0 %v7748_v35  ;;  %v7845_v35 = vld [vmem:[%s11443_s7 + $0x340] ss:$16 sps:$4 sm:$0xff]  }
 0xd34   :  { %6725 = vmatpush1.bf16.msra.mxu0 %v7746_v2  ;;  %v7848_v2 = vld [vmem:[%s11443_s7 + $0x348] ss:$16 sps:$4 sm:$0xff]  }
 0xd35   :  { %6726 = vmatprep.subr.bf16.mxu0 %v7754_v27  ;;  %v7853_v27 = vld [vmem:[%s11443_s7 + $0x364] ss:$16 sps:$4 sm:$0xff]  }
 0xd38   :  { %6727 = vmatpush1.bf16.msra.mxu0 %v7752_v26  ;;  %v7856_v26 = vld [vmem:[%s11443_s7 + $0x36c] ss:$16 sps:$4 sm:$0xff]  }
 0xd39   :  { %6728 = vmatprep.subr.bf16.mxu0 %v7760_v41  ;;  %v7851_v41 = vld [vmem:[%s11443_s7 + $0x360] ss:$16 sps:$4 sm:$0xff]  }
 0xd3c   :  { %6729 = vmatpush1.bf16.msra.mxu0 %v7758_v8  ;;  %v7854_v8 = vld [vmem:[%s11443_s7 + $0x368] ss:$16 sps:$4 sm:$0xff]  }
 0xd3d   :  { %6730 = vmatprep.subr.bf16.mxu0 %v7766_v18  ;;  %v7859_v18 = vld [vmem:[%s11443_s7 + $0x384] ss:$16 sps:$4 sm:$0xff]  }
 0xd40   :  { %6731 = vmatpush1.bf16.msra.mxu0 %v7764_v51  ;;  %v7862_v51 = vld [vmem:[%s11443_s7 + $0x38c] ss:$16 sps:$4 sm:$0xff]  }
 0xd41   :  { %6732 = vmatprep.subr.bf16.mxu0 %v7772_v15  ;;  %v7857_v15 = vld [vmem:[%s11443_s7 + $0x380] ss:$16 sps:$4 sm:$0xff]  }
 0xd44   :  { %6733 = vmatpush1.bf16.msra.mxu0 %v7770_v37  ;;  %v7860_v37 = vld [vmem:[%s11443_s7 + $0x388] ss:$16 sps:$4 sm:$0xff]  }
 0xd45   :  { %6734 = vmatprep.subr.bf16.mxu0 %v7778_v30  ;;  %v7865_v30 = vld [vmem:[%s11443_s7 + $0x3a4] ss:$16 sps:$4 sm:$0xff]  }
 0xd48   :  { %6735 = vmatpush1.bf16.msra.mxu0 %v7776_v56  ;;  %v7868_v56 = vld [vmem:[%s11443_s7 + $0x3ac] ss:$16 sps:$4 sm:$0xff]  }
 0xd49   :  { %6736 = vmatprep.subr.bf16.mxu0 %v7784_v55  ;;  %v7863_v55 = vld [vmem:[%s11443_s7 + $0x3a0] ss:$16 sps:$4 sm:$0xff]  }
 0xd4c   :  { %6737 = vmatpush1.bf16.msra.mxu0 %v7782_v14  ;;  %v7866_v14 = vld [vmem:[%s11443_s7 + $0x3a8] ss:$16 sps:$4 sm:$0xff]  }
 0xd4d   :  { %6747 = vmatprep.subr.bf16.mxu0 %v7790_v57  ;;  %v7871_v57 = vld [vmem:[%s11443_s7 + $0x3c4] ss:$16 sps:$4 sm:$0xff]  }
 0xd81   :  { %v5336_v31 = vpop.f32.mrb[32].mxu0 }
 0xd82   :  { %v5337_v52 = vadd.f32 %v5336_v31, %v11043_v46  ;;  %v5338_v19 = vpop.f32.mrb[33].mxu0  ;;  %v7874_v31 = vld [vmem:[%s11443_s7 + $0x3cc] ss:$16 sps:$4 sm:$0xff]  }
 0xd83   :  { %v5339_v17 = vadd.f32 %v5338_v19, %v11043_v46  ;;  %v5340_v36 = vpop.f32.mrb[34].mxu0  ;;  %v7872_v19 = vld [vmem:[%s11443_s7 + $0x3c8] ss:$16 sps:$4 sm:$0xff]  }
 0xd84   :  { %v5341_v3 = vpop.f32.mrb[35].mxu0  ;;  %v5425_v44 = vpack.c.bf16 %v5337_v52, %v5337_v52  ;;  %v7869_v52 = vld [vmem:[%s11443_s7 + $0x3c0] ss:$16 sps:$4 sm:$0xff]   ;;  %v7877_v36 = vld [vmem:[%s11443_s7 + $0x3e4] ss:$16 sps:$4 sm:$0xff]  }
 0xd85   :  { %v5426_v5 = vpack.c.bf16 %v5339_v17, %v5339_v17  ;;  %v7880_v3 = vld [vmem:[%s11443_s7 + $0x3ec] ss:$16 sps:$4 sm:$0xff]  }
 0xd87   :  { %6615 = vmatprep.mubr.bf16.mxu1 %v5426_v5  ;;  %6738 = vmatprep.mubr.bf16.mxu0 %v5426_v5 }
 0xd88   :  { %6616 = vmatmul.mubr.bf16.vlgmr.msra.gmra.mrb[64].mxu1 %v5425_v44  ;;  %6739 = vmatmul.mubr.bf16.vlgmr.msra.gmra.mrb[40].mxu0 %v5425_v44  ;;  %v7875_v44 = vld [vmem:[%s11443_s7 + $0x3e0] ss:$16 sps:$4 sm:$0xff]  }
 0xd89   :  { %6625 = vmatpush1.bf16.msra.mxu1 %v7785_v39  ;;  %6748 = vmatpush1.bf16.msra.mxu0 %v7788_v10 }
 0xd8a   :  { %6626 = vmatprep.subr.bf16.mxu1 %v7793_v45  ;;  %6749 = vmatprep.subr.bf16.mxu0 %v7796_v16  ;;  %v7878_v45 = vld [vmem:[%s11443_s7 + $0x3e8] ss:$16 sps:$4 sm:$0xff]  }
 0xd8d   :  { %6627 = vmatpush1.bf16.msra.mxu1 %v7791_v61  ;;  %6750 = vmatpush1.bf16.msra.mxu0 %v7794_v42 }
 0xd8e   :  { %6628 = vmatprep.subr.bf16.mxu1 %v7799_v48  ;;  %6751 = vmatprep.subr.bf16.mxu0 %v7802_v7  ;;  %v7883_v48 = vld [vmem:[%s11443_s7 + $0x404] ss:$16 sps:$4 sm:$0xff]   ;;  %v7886_v7 = vld [vmem:[%s11443_s7 + $0x40c] ss:$16 sps:$4 sm:$0xff]  }
 0xd91   :  { %6629 = vmatpush1.bf16.msra.mxu1 %v7797_v25  ;;  %6752 = vmatpush1.bf16.msra.mxu0 %v7800_v53  ;;  %v7881_v25 = vld [vmem:[%s11443_s7 + $0x400] ss:$16 sps:$4 sm:$0xff]   ;;  %v7884_v53 = vld [vmem:[%s11443_s7 + $0x408] ss:$16 sps:$4 sm:$0xff]  }
 0xd92   :  { %6630 = vmatprep.subr.bf16.mxu1 %v7805_v47  ;;  %6753 = vmatprep.subr.bf16.mxu0 %v7808_v4  ;;  %v7889_v4 = vld [vmem:[%s11443_s7 + $0x424] ss:$16 sps:$4 sm:$0xff]  }
 0xd95   :  { %6631 = vmatpush1.bf16.msra.mxu1 %v7803_v24  ;;  %6754 = vmatpush1.bf16.msra.mxu0 %v7806_v32  ;;  %v7892_v24 = vld [vmem:[%s11443_s7 + $0x42c] ss:$16 sps:$4 sm:$0xff]   ;;  %v7887_v32 = vld [vmem:[%s11443_s7 + $0x420] ss:$16 sps:$4 sm:$0xff]  }
 0xd96   :  { %6632 = vmatprep.subr.bf16.mxu1 %v7811_v28  ;;  %6755 = vmatprep.subr.bf16.mxu0 %v7814_v0  ;;  %v7890_v28 = vld [vmem:[%s11443_s7 + $0x428] ss:$16 sps:$4 sm:$0xff]   ;;  %v7895_v0 = vld [vmem:[%s11443_s7 + $0x444] ss:$16 sps:$4 sm:$0xff]  }
 0xd99   :  { %6633 = vmatpush1.bf16.msra.mxu1 %v7809_v43  ;;  %6756 = vmatpush1.bf16.msra.mxu0 %v7812_v60  ;;  %v7898_v43 = vld [vmem:[%s11443_s7 + $0x44c] ss:$16 sps:$4 sm:$0xff]   ;;  %v7893_v60 = vld [vmem:[%s11443_s7 + $0x440] ss:$16 sps:$4 sm:$0xff]  }
 0xd9a   :  { %6634 = vmatprep.subr.bf16.mxu1 %v7817_v11  ;;  %6757 = vmatprep.subr.bf16.mxu0 %v7820_v6  ;;  %v7896_v11 = vld [vmem:[%s11443_s7 + $0x448] ss:$16 sps:$4 sm:$0xff]   ;;  %v7901_v6 = vld [vmem:[%s11443_s7 + $0x464] ss:$16 sps:$4 sm:$0xff]  }
 0xd9d   :  { %6635 = vmatpush1.bf16.msra.mxu1 %v7815_v23  ;;  %6758 = vmatpush1.bf16.msra.mxu0 %v7818_v34  ;;  %v7904_v23 = vld [vmem:[%s11443_s7 + $0x46c] ss:$16 sps:$4 sm:$0xff]   ;;  %v7899_v34 = vld [vmem:[%s11443_s7 + $0x460] ss:$16 sps:$4 sm:$0xff]  }
 0xd9e   :  { %6636 = vmatprep.subr.bf16.mxu1 %v7823_v38  ;;  %6759 = vmatprep.subr.bf16.mxu0 %v7826_v1  ;;  %v7902_v38 = vld [vmem:[%s11443_s7 + $0x468] ss:$16 sps:$4 sm:$0xff]   ;;  %v7907_v1 = vld [vmem:[%s11443_s7 + $0x484] ss:$16 sps:$4 sm:$0xff]  }
 0xda1   :  { %6637 = vmatpush1.bf16.msra.mxu1 %v7821_v33  ;;  %6760 = vmatpush1.bf16.msra.mxu0 %v7824_v49  ;;  %v7910_v33 = vld [vmem:[%s11443_s7 + $0x48c] ss:$16 sps:$4 sm:$0xff]   ;;  %v7905_v49 = vld [vmem:[%s11443_s7 + $0x480] ss:$16 sps:$4 sm:$0xff]  }
 0xda2   :  { %6638 = vmatprep.subr.bf16.mxu1 %v7829_v22  ;;  %6761 = vmatprep.subr.bf16.mxu0 %v7832_v58  ;;  %v7908_v22 = vld [vmem:[%s11443_s7 + $0x488] ss:$16 sps:$4 sm:$0xff]   ;;  %v7913_v58 = vld [vmem:[%s11443_s7 + $0x4a4] ss:$16 sps:$4 sm:$0xff]  }
 0xda5   :  { %6639 = vmatpush1.bf16.msra.mxu1 %v7827_v20  ;;  %6762 = vmatpush1.bf16.msra.mxu0 %v7830_v63  ;;  %v7916_v20 = vld [vmem:[%s11443_s7 + $0x4ac] ss:$16 sps:$4 sm:$0xff]   ;;  %v7911_v63 = vld [vmem:[%s11443_s7 + $0x4a0] ss:$16 sps:$4 sm:$0xff]  }
 0xda6   :  { %6640 = vmatprep.subr.bf16.mxu1 %v7835_v29  ;;  %6763 = vmatprep.subr.bf16.mxu0 %v7838_v21  ;;  %v7914_v29 = vld [vmem:[%s11443_s7 + $0x4a8] ss:$16 sps:$4 sm:$0xff]   ;;  %v7919_v21 = vld [vmem:[%s11443_s7 + $0x4c4] ss:$16 sps:$4 sm:$0xff]  }
 0xda9   :  { %6641 = vmatpush1.bf16.msra.mxu1 %v7833_v9  ;;  %6764 = vmatpush1.bf16.msra.mxu0 %v7836_v13  ;;  %v7922_v9 = vld [vmem:[%s11443_s7 + $0x4cc] ss:$16 sps:$4 sm:$0xff]   ;;  %v7917_v13 = vld [vmem:[%s11443_s7 + $0x4c0] ss:$16 sps:$4 sm:$0xff]  }
 0xdaa   :  { %6642 = vmatprep.subr.bf16.mxu1 %v7841_v54  ;;  %6765 = vmatprep.subr.bf16.mxu0 %v7844_v62  ;;  %v7920_v54 = vld [vmem:[%s11443_s7 + $0x4c8] ss:$16 sps:$4 sm:$0xff]   ;;  %v7925_v62 = vld [vmem:[%s11443_s7 + $0x4e4] ss:$16 sps:$4 sm:$0xff]  }
 0xdad   :  { %6643 = vmatpush1.bf16.msra.mxu1 %v7839_v59  ;;  %6766 = vmatpush1.bf16.msra.mxu0 %v7842_v50  ;;  %v7928_v59 = vld [vmem:[%s11443_s7 + $0x4ec] ss:$16 sps:$4 sm:$0xff]   ;;  %v7923_v50 = vld [vmem:[%s11443_s7 + $0x4e0] ss:$16 sps:$4 sm:$0xff]  }
 0xdae   :  { %6644 = vmatprep.subr.bf16.mxu1 %v7847_v12  ;;  %6767 = vmatprep.subr.bf16.mxu0 %v7850_v40  ;;  %v7926_v12 = vld [vmem:[%s11443_s7 + $0x4e8] ss:$16 sps:$4 sm:$0xff]  }
 0xdb1   :  { %6645 = vmatpush1.bf16.msra.mxu1 %v7845_v35  ;;  %6768 = vmatpush1.bf16.msra.mxu0 %v7848_v2  ;;  %v7931_v35 = vld [vmem:[%s11443_s7 + $0x504] ss:$16 sps:$4 sm:$0xff]   ;;  %v7934_v2 = vld [vmem:[%s11443_s7 + $0x50c] ss:$16 sps:$4 sm:$0xff]  }
 0xdb2   :  { %6646 = vmatprep.subr.bf16.mxu1 %v7853_v27  ;;  %6769 = vmatprep.subr.bf16.mxu0 %v7856_v26 }
 0xdb5   :  { %6647 = vmatpush1.bf16.msra.mxu1 %v7851_v41  ;;  %6770 = vmatpush1.bf16.msra.mxu0 %v7854_v8  ;;  %v7929_v8 = vld [vmem:[%s11443_s7 + $0x500] ss:$16 sps:$4 sm:$0xff]  }
 0xdb6   :  { %6648 = vmatprep.subr.bf16.mxu1 %v7859_v18  ;;  %6771 = vmatprep.subr.bf16.mxu0 %v7862_v51  ;;  %v7932_v18 = vld [vmem:[%s11443_s7 + $0x508] ss:$16 sps:$4 sm:$0xff]  }
 0xdb9   :  { %6649 = vmatpush1.bf16.msra.mxu1 %v7857_v15  ;;  %6772 = vmatpush1.bf16.msra.mxu0 %v7860_v37  ;;  %v7937_v37 = vld [vmem:[%s11443_s7 + $0x524] ss:$16 sps:$4 sm:$0xff]  }
 0xdba   :  { %6650 = vmatprep.subr.bf16.mxu1 %v7865_v30  ;;  %6773 = vmatprep.subr.bf16.mxu0 %v7868_v56  ;;  %v7940_v30 = vld [vmem:[%s11443_s7 + $0x52c] ss:$16 sps:$4 sm:$0xff]   ;;  %v7935_v56 = vld [vmem:[%s11443_s7 + $0x520] ss:$16 sps:$4 sm:$0xff]  }
 0xdbd   :  { %6651 = vmatpush1.bf16.msra.mxu1 %v7863_v55  ;;  %6774 = vmatpush1.bf16.msra.mxu0 %v7866_v14  ;;  %v7938_v55 = vld [vmem:[%s11443_s7 + $0x528] ss:$16 sps:$4 sm:$0xff]   ;;  %v7943_v14 = vld [vmem:[%s11443_s7 + $0x544] ss:$16 sps:$4 sm:$0xff]  }
 0xdbe   :  { %v5377_v17 = vpop.f32.mrb[60].mxu1  ;;  %6652 = vmatprep.subr.bf16.mxu1 %v7871_v57  ;;  %6775 = vmatprep.subr.bf16.mxu0 %v7874_v31  ;;  %v7946_v57 = vld [vmem:[%s11443_s7 + $0x54c] ss:$16 sps:$4 sm:$0xff]   ;;  %v7941_v31 = vld [vmem:[%s11443_s7 + $0x540] ss:$16 sps:$4 sm:$0xff]  }
 0xdbf   :  { %v5379_v5 = vpop.f32.mrb[61].mxu1  ;;  %v5378_v61 = vadd.f32 %v5377_v17, %v11043_v46  ;;  %v7952_v17 = vld [vmem:[%s11443_s7 + $0x56c] ss:$16 sps:$4 sm:$0xff]  }
 0xdc0   :  { %v5380_v39 = vadd.f32 %v5379_v5, %v11043_v46  ;;  %v5381_v10 = vpop.f32.mrb[62].mxu1  ;;  %v7955_v5 = vld [vmem:[%s11443_s7 + $0x584] ss:$16 sps:$4 sm:$0xff]  }
 0xdc1   :  { %6653 = vmatpush1.bf16.msra.mxu1 %v7869_v52  ;;  %6776 = vmatpush1.bf16.msra.mxu0 %v7872_v19  ;;  %v5382_v16 = vpop.f32.mrb[63].mxu1  ;;  %v5427_v47 = vpack.c.bf16 %v5378_v61, %v5378_v61  ;;  %v7944_v52 = vld [vmem:[%s11443_s7 + $0x548] ss:$16 sps:$4 sm:$0xff]   ;;  %v7949_v19 = vld [vmem:[%s11443_s7 + $0x564] ss:$16 sps:$4 sm:$0xff]  }
 0xdc2   :  { %v5428_v42 = vpack.c.bf16 %v5380_v39, %v5380_v39  ;;  %6654 = vmatprep.subr.bf16.mxu1 %v7877_v36  ;;  %6777 = vmatprep.subr.bf16.mxu0 %v7880_v3  ;;  %v7947_v36 = vld [vmem:[%s11443_s7 + $0x560] ss:$16 sps:$4 sm:$0xff]   ;;  %v7950_v3 = vld [vmem:[%s11443_s7 + $0x568] ss:$16 sps:$4 sm:$0xff]   ;;  %v7958_v39 = vld [vmem:[%s11443_s7 + $0x58c] ss:$16 sps:$4 sm:$0xff]  }
 0xdc3   :  { %v7953_v10 = vld [vmem:[%s11443_s7 + $0x580] ss:$16 sps:$4 sm:$0xff]   ;;  %v7964_v16 = vld [vmem:[%s11443_s7 + $0x5ac] ss:$16 sps:$4 sm:$0xff]  }
 0xdc4   :  { %6656 = vmatprep.mubr.bf16.mxu1 %v5428_v42  ;;  %6779 = vmatprep.mubr.bf16.mxu0 %v5428_v42  ;;  %v7959_v61 = vld [vmem:[%s11443_s7 + $0x5a0] ss:$16 sps:$4 sm:$0xff]   ;;  %v7962_v42 = vld [vmem:[%s11443_s7 + $0x5a8] ss:$16 sps:$4 sm:$0xff]  }
 0xdc5   :  { %6655 = vmatpush1.bf16.msra.mxu1 %v7875_v44  ;;  %6778 = vmatpush1.bf16.msra.mxu0 %v7878_v45  ;;  %v7956_v44 = vld [vmem:[%s11443_s7 + $0x588] ss:$16 sps:$4 sm:$0xff]   ;;  %v7961_v45 = vld [vmem:[%s11443_s7 + $0x5a4] ss:$16 sps:$4 sm:$0xff]  }
 0xdc6   :  { %6665 = vmatprep.subr.bf16.mxu1 %v7883_v48  ;;  %6788 = vmatprep.subr.bf16.mxu0 %v7886_v7  ;;  %v7967_v48 = vld [vmem:[%s11443_s7 + $0x5c4] ss:$16 sps:$4 sm:$0xff]   ;;  %v7970_v7 = vld [vmem:[%s11443_s7 + $0x5cc] ss:$16 sps:$4 sm:$0xff]  }
 0xdc8   :  { %6657 = vmatmul.mubr.bf16.vlgmr.msra.gmra.mrb[64].mxu1 %v5427_v47  ;;  %6780 = vmatmul.mubr.bf16.vlgmr.msra.gmra.mrb[40].mxu0 %v5427_v47  ;;  %v7973_v47 = vld [vmem:[%s11443_s7 + $0x5e4] ss:$16 sps:$4 sm:$0xff]  }
 0xdc9   :  { %6666 = vmatpush1.bf16.msra.mxu1 %v7881_v25  ;;  %6789 = vmatpush1.bf16.msra.mxu0 %v7884_v53  ;;  %v7965_v25 = vld [vmem:[%s11443_s7 + $0x5c0] ss:$16 sps:$4 sm:$0xff]   ;;  %v7968_v53 = vld [vmem:[%s11443_s7 + $0x5c8] ss:$16 sps:$4 sm:$0xff]  }
 0xdca   :  { %6667 = vmatprep.subr.bf16.mxu1 %v7889_v4  ;;  %6790 = vmatprep.subr.bf16.mxu0 %v7892_v24  ;;  %v7976_v4 = vld [vmem:[%s11443_s7 + $0x5ec] ss:$16 sps:$4 sm:$0xff]   ;;  %v7971_v24 = vld [vmem:[%s11443_s7 + $0x5e0] ss:$16 sps:$4 sm:$0xff]  }
 0xdcd   :  { %6668 = vmatpush1.bf16.msra.mxu1 %v7887_v32  ;;  %6791 = vmatpush1.bf16.msra.mxu0 %v7890_v28  ;;  %v7974_v32 = vld [vmem:[%s11443_s7 + $0x5e8] ss:$16 sps:$4 sm:$0xff]  }
 0xdce   :  { %6669 = vmatprep.subr.bf16.mxu1 %v7895_v0  ;;  %6792 = vmatprep.subr.bf16.mxu0 %v7898_v43  ;;  %v7997_v43 = vmov 1983009808  }
 0xdd1   :  { %6670 = vmatpush1.bf16.msra.mxu1 %v7893_v60  ;;  %6793 = vmatpush1.bf16.msra.mxu0 %v7896_v11  ;;  %v6836_v60 = vunpack.c.l.s4 %v7997_v43 }
 0xdd2   :  { %6671 = vmatprep.subr.bf16.mxu1 %v7901_v6  ;;  %6794 = vmatprep.subr.bf16.mxu0 %v7904_v23 }
 0xdd3   :  { %v6837_v11 = vunpack.c.0.s8 %v6836_v60 }
 0xdd5   :  { %6672 = vmatpush1.bf16.msra.mxu1 %v7899_v34  ;;  %6795 = vmatpush1.bf16.msra.mxu0 %v7902_v38  ;;  %v11601_v34 = vld [vmem:[#allocation3_spill] sm:$0xff] }
 0xdd6   :  { %6673 = vmatprep.subr.bf16.mxu1 %v7907_v1  ;;  %6796 = vmatprep.subr.bf16.mxu0 %v7910_v33  ;;  %v6840_v38 = vsub.s32 %v6837_v11, %v11601_v34 }
 0xdd9   :  { %6674 = vmatpush1.bf16.msra.mxu1 %v7905_v49  ;;  %6797 = vmatpush1.bf16.msra.mxu0 %v7908_v22 }
 0xdda   :  { %6675 = vmatprep.subr.bf16.mxu1 %v7913_v58  ;;  %6798 = vmatprep.subr.bf16.mxu0 %v7916_v20 }
 0xddd   :  { %6676 = vmatpush1.bf16.msra.mxu1 %v7911_v63  ;;  %6799 = vmatpush1.bf16.msra.mxu0 %v7914_v29 }
 0xdde   :  { %6677 = vmatprep.subr.bf16.mxu1 %v7919_v21  ;;  %6800 = vmatprep.subr.bf16.mxu0 %v7922_v9 }
 0xde1   :  { %6678 = vmatpush1.bf16.msra.mxu1 %v7917_v13  ;;  %6801 = vmatpush1.bf16.msra.mxu0 %v7920_v54 }
 0xde2   :  { %v11331_v40 = vpop.f32.mrb[36].mxu0  ;;  %6679 = vmatprep.subr.bf16.mxu1 %v7925_v62  ;;  %6802 = vmatprep.subr.bf16.mxu0 %v7928_v59 }
 0xde3   :  { %v5420_v27 = vpop.f32.mrb[37].mxu0  ;;  %v5419_v28 = vadd.f32 %v11331_v40, %v11043_v46 }
 0xde4   :  { %v5421_v26 = vadd.f32 %v5420_v27, %v11043_v46  ;;  %v5422_v41 = vpop.f32.mrb[38].mxu0 }
 0xde5   :  { %6680 = vmatpush1.bf16.msra.mxu1 %v7923_v50  ;;  %6803 = vmatpush1.bf16.msra.mxu0 %v7926_v12  ;;  %v5423_v51 = vpop.f32.mrb[39].mxu0  ;;  %v5429_v0 = vpack.c.bf16 %v5419_v28, %v5419_v28 }
 0xde6   :  { %v5430_v15 = vpack.c.bf16 %v5421_v26, %v5421_v26  ;;  %6681 = vmatprep.subr.bf16.mxu1 %v7931_v35  ;;  %6804 = vmatprep.subr.bf16.mxu0 %v7934_v2 }
 0xde8   :  { %6697 = vmatprep.mubr.bf16.mxu1 %v5430_v15  ;;  %6820 = vmatprep.mubr.bf16.mxu0 %v5430_v15 }
 0xde9   :  { %6682 = vmatpush1.bf16.msra.mxu1 %v7929_v8  ;;  %6805 = vmatpush1.bf16.msra.mxu0 %v7932_v18 }
 0xdea   :  { %6683 = vmatprep.subr.bf16.mxu1 %v7937_v37  ;;  %6806 = vmatprep.subr.bf16.mxu0 %v7940_v30 }
 0xded   :  { %6684 = vmatpush1.bf16.msra.mxu1 %v7935_v56  ;;  %6807 = vmatpush1.bf16.msra.mxu0 %v7938_v55 }
 0xdee   :  { %6685 = vmatprep.subr.bf16.mxu1 %v7943_v14  ;;  %6808 = vmatprep.subr.bf16.mxu0 %v7946_v57 }
 0xdf1   :  { %6686 = vmatpush1.bf16.msra.mxu1 %v7941_v31  ;;  %6809 = vmatpush1.bf16.msra.mxu0 %v7944_v52 }
 0xdf2   :  { %6687 = vmatprep.subr.bf16.mxu1 %v7949_v19  ;;  %6810 = vmatprep.subr.bf16.mxu0 %v7952_v17 }
 0xdf5   :  { %6688 = vmatpush1.bf16.msra.mxu1 %v7947_v36  ;;  %6811 = vmatpush1.bf16.msra.mxu0 %v7950_v3 }
 0xdf6   :  { %6689 = vmatprep.subr.bf16.mxu1 %v7955_v5  ;;  %6812 = vmatprep.subr.bf16.mxu0 %v7958_v39 }
 0xdf9   :  { %6690 = vmatpush1.bf16.msra.mxu1 %v7953_v10  ;;  %6813 = vmatpush1.bf16.msra.mxu0 %v7956_v44 }
 0xdfa   :  { %6691 = vmatprep.subr.bf16.mxu1 %v7961_v45  ;;  %6814 = vmatprep.subr.bf16.mxu0 %v7964_v16 }
 0xdfd   :  { %6692 = vmatpush1.bf16.msra.mxu1 %v7959_v61  ;;  %6815 = vmatpush1.bf16.msra.mxu0 %v7962_v42 }
 0xdfe   :  { %6693 = vmatprep.subr.bf16.mxu1 %v7967_v48  ;;  %6816 = vmatprep.subr.bf16.mxu0 %v7970_v7 }
 0xe01   :  { %6694 = vmatpush1.bf16.msra.mxu1 %v7965_v25  ;;  %6817 = vmatpush1.bf16.msra.mxu0 %v7968_v53 }
 0xe02   :  { %6695 = vmatprep.subr.bf16.mxu1 %v7973_v47  ;;  %6818 = vmatprep.subr.bf16.mxu0 %v7976_v4 }
 0xe05   :  { %6696 = vmatpush1.bf16.msra.mxu1 %v7971_v24  ;;  %6819 = vmatpush1.bf16.msra.mxu0 %v7974_v32 }
 0xe08   :  { %6698 = vmatmul.mubr.bf16.vlgmr.msra.gmra.mrb[64].mxu1 %v5429_v0  ;;  %6821 = vmatmul.mubr.bf16.vlgmr.msra.gmra.mrb[40].mxu0 %v5429_v0 }
 0xedb   :  { %v6699_v6 = vpop.f32.mrb[64].mxu1  ;;  %v6822_v23 = vpop.f32.mrb[40].mxu0 }
 0xedc   :  { %v6701_v1 = vpop.f32.mrb[65].mxu1  ;;  %v6824_v33 = vpop.f32.mrb[41].mxu0 }
 0xedd   :  { %v6833_v49 = vcombine.low %v6699_v6, %v6701_v1  ;;  %v6834_v22 = vcombine.low %v6822_v23, %v6824_v33  ;;  %v6703_v58 = vpop.f32.mrb[66].mxu1  ;;  %v6826_v46 = vpop.f32.mrb[42].mxu0 }
 0xede   :  { %v6704_v20 = vpop.f32.mrb[67].mxu1  ;;  %v6827_v63 = vpop.f32.mrb[43].mxu0 }
 0xedf   :  { %v6841_v29 = vrot.slane %v6833_v49, %v6840_v38  ;;  %v6848_v21 = vrot.slane %v6834_v22, %v6840_v38 }
 0xee1   :  { %v6849_v9 = vcombine.low %v6841_v29, %v6848_v21 }
 0xee3   :  { %6851 = vst [vmem:[%s11444_s8] sm:$0xff] %v6849_v9 }

</bundles_post_ra>
